<compile_context>
chip_gen: v6e
topology: v6e:2x2x1
jax: 0.10.0
libtpu: 0.0.40
codegen_flags: <defaults>
</compile_context>

<pallas_src>
import functools

import jax
import jax.numpy as jnp
from jax.experimental import pallas as pl
from jax.experimental.pallas import tpu as pltpu

_BN_EPS = 1e-5
_HI = jax.lax.Precision.HIGHEST


def _pick_lane_tile(v):
    """Lap column-tile width: multiple of 256 (v6e/v7x MXU) and 128 (v5e)."""
    for tj in (512, 256, 128):
        if v % tj == 0:
            return tj
    return v    # tiny / odd V: single tile (no overlap, still correct)


# --------------------------------- kernel -----------------------------------
def _cheb_bn2_kernel(lap_hbm, x_ref,
                     w1_ref, b1_ref, g1_ref, be1_ref,
                     w2_ref, b2_ref, g2_ref, be2_ref,
                     out_ref,
                     lap_buf, dma_sem, y1_ref, *carries,
                     kernel_size, batch, tile_j, compute_dtype):
    """Fused SphericalChebBN2: (ChebConv + BN + ReLU) x 2, shared Laplacian.

    lap_hbm:  (NJ, V, TJ)  lap^T column tiles, compute_dtype, left in HBM (ANY)
    x_ref:    (B*Cin, V)   features, rows ordered (b, c), f32, VMEM
    wX_ref:   (K, B*CoutX, B*CinX)  block-diag per-order mix weights, compute_dtype
    bX/gX/beX:(CoutX, 1)   conv bias / BN gamma / BN beta, f32
    out_ref:  (B*Cout, V)  f32, lane-dense in V
    lap_buf:  (2, V, TJ)   streamed lap double buffer (VMEM scratch)
    y1_ref:   (B*Cmid, V)  layer-1 output (VMEM scratch)
    carries:  up to 3 x (B*Cmax, V) f32 Chebyshev carries (VMEM scratch)
    """
    K = kernel_size
    B = batch
    TJ = tile_j
    V = out_ref.shape[-1]
    NJ = V // TJ
    cd = compute_dtype
    f32 = jnp.float32

    def stream_lap(tile_body):
        # Manual double-buffered streaming of lap^T column tiles: the DMA for
        # tile j+1 is issued before the matmuls on tile j, hiding the HBM load.
        def _start(j, slot):
            pltpu.make_async_copy(lap_hbm.at[j], lap_buf.at[slot],
                                  dma_sem.at[slot]).start()
        _start(0, 0)
        for j in range(NJ):                       # NJ is static -> unrolled
            slot = j & 1
            pltpu.make_async_copy(lap_hbm.at[j], lap_buf.at[slot],
                                  dma_sem.at[slot]).wait()
            if j + 1 < NJ:
                _start(j + 1, 1 - slot)           # prefetch next tile
            tile_body(j, lap_buf[slot])           # (V, TJ) compute-dtype tile

    def layer(t0_ref, c_in, w_ref, b_ref, g_ref, be_ref, y_ref):
        rows_in = B * c_in
        rows_out = y_ref.shape[0]
        c_out = rows_out // B

        # ---- k = 0 term (no Laplacian): y = W0_bd @ T0 + bias ----
        t0_cd = t0_ref[0:rows_in, :].astype(cd)          # hoisted; reused for T1
        bias_rows = jnp.tile(b_ref[...], (B, 1))         # (rows_out, 1) f32
        y_ref[...] = (jnp.dot(w_ref[0], t0_cd,
                              preferred_element_type=f32) + bias_rows)

        # ---- k = 1: T1 = T0 @ lap^T, streamed over lap column tiles ----
        if K >= 2:
            w1k = w_ref[1]

            def t1_body(j, lap_tile):
                lo, hi = j * TJ, (j + 1) * TJ
                t1_j = jnp.dot(t0_cd, lap_tile, preferred_element_type=f32)
                if K >= 3:                               # carry only if reused
                    carries[0][0:rows_in, lo:hi] = t1_j
                y_ref[:, lo:hi] += jnp.dot(w1k, t1_j.astype(cd),
                                           preferred_element_type=f32)
            stream_lap(t1_body)

        # ---- k >= 2: T_k = 2*T_{k-1}@lap^T - T_{k-2}, incremental mix ----
        if K >= 3:
            tprev2_ref, tprev1_ref = t0_ref, carries[0]
            for k in range(2, K):
                tnew_ref = carries[(k - 1) % 3]
                wk = w_ref[k]
                lhs_cd = tprev1_ref[0:rows_in, :].astype(cd)   # hoisted per pass

                def tk_body(j, lap_tile, lhs_cd=lhs_cd, wk=wk,
                            tprev2_ref=tprev2_ref, tnew_ref=tnew_ref):
                    lo, hi = j * TJ, (j + 1) * TJ
                    tk_j = (2.0 * jnp.dot(lhs_cd, lap_tile,
                                          preferred_element_type=f32)
                            - tprev2_ref[0:rows_in, lo:hi])
                    tnew_ref[0:rows_in, lo:hi] = tk_j
                    y_ref[:, lo:hi] += jnp.dot(wk, tk_j.astype(cd),
                                               preferred_element_type=f32)
                stream_lap(tk_body)
                tprev2_ref, tprev1_ref = tprev1_ref, tnew_ref

        # ---- BatchNorm (training batch stats, two-pass) + ReLU, in place ----
        y = y_ref[...]                                   # (rows_out, V) f32
        row_sum = jnp.sum(y, axis=1, keepdims=True)      # lane (XLU) reduce
        s = row_sum[0:c_out]
        for b in range(1, B):                            # tiny cross-b combine
            s = s + row_sum[b * c_out:(b + 1) * c_out]
        inv_n = 1.0 / float(B * V)
        mean_c = s * inv_n                               # (c_out, 1)
        d = y - jnp.tile(mean_c, (B, 1))                 # centered
        row_ssq = jnp.sum(d * d, axis=1, keepdims=True)
        ss = row_ssq[0:c_out]
        for b in range(1, B):
            ss = ss + row_ssq[b * c_out:(b + 1) * c_out]
        var_c = ss * inv_n                               # biased var (BatchNorm1d)
        scale_c = g_ref[...] * jax.lax.rsqrt(var_c + _BN_EPS)   # EUP rsqrt
        scale_rows = jnp.tile(scale_c, (B, 1))           # hoisted broadcasts
        shift_rows = jnp.tile(be_ref[...], (B, 1))
        y_ref[...] = jnp.maximum(d * scale_rows + shift_rows, 0.0)

    c_in = x_ref.shape[0] // B
    c_mid = y1_ref.shape[0] // B
    layer(x_ref, c_in, w1_ref, b1_ref, g1_ref, be1_ref, y1_ref)
    layer(y1_ref, c_mid, w2_ref, b2_ref, g2_ref, be2_ref, out_ref)


# --------------------------------- wrapper -----------------------------------
def _mix_weights(weight, batch, compute_dtype):
    """(K, Fin, Fout) ChebConv weight -> (K, B*Fout, B*Fin) block-diag mixes.

    PyTorch's cheb_conv flattens activations as (B*V, Fin*K) but the weight as
    weight.view(K*Fin, Fout); the effective weight multiplying Chebyshev order
    k / input feature i is therefore weight.view(K*Fin, Fout)[i*K + k].
    kron(I_B, W_k) lets the per-order channel mix run as ONE MXU matmul over
    all batch elements (rows of T_k are laid out (b, i); rows of y are (b, o)).
    """
    K, Fin, Fout = weight.shape
    w_flat = weight.reshape(K * Fin, Fout)
    w_k = jnp.transpose(w_flat.reshape(Fin, K, Fout), (1, 2, 0))   # (K, Fout, Fin)
    eye_b = jnp.eye(batch, dtype=w_k.dtype)
    w_bd = jnp.einsum('koi,ab->kaobi', w_k, eye_b)
    return w_bd.reshape(K, batch * Fout, batch * Fin).astype(compute_dtype)


def _vmem_budget_bytes():
    """Generation-aware VMEM cap (~80% of physical; 128 MiB v5e/v6e, 64 MiB v7x)."""
    try:
        cap = int(pltpu.get_tpu_info().vmem_capacity_bytes)
    except Exception:
        cap = 64 << 20           # conservative fallback (v7x per-core VMEM)
    return (cap * 4) // 5


def spherical_cheb_bn2(x, lap, params, *, compute_dtype=jnp.bfloat16):
    """SphericalChebBN2.forward.  x: (B, V, C_in) -> (B, V, C_out)."""
    B, V, Cin = x.shape
    K, _, Cmid = params["w1"].shape
    Cout = params["w2"].shape[2]
    cd = jnp.dtype(compute_dtype)
    cmax = max(Cin, Cmid)
    TJ = _pick_lane_tile(V)
    NJ = V // TJ
    n_carry = 0 if K <= 2 else min(K - 1, 3)

    # Layout plumbing in the wrapper (kept out of the kernel):
    #   * lap^T packed as contiguous column tiles (NJ, V, TJ), compute dtype
    #   * features as (B*Cin, V): V lane-dense, rows ordered (b, c)
    lapT = jnp.transpose(jnp.asarray(lap, jnp.float32)).astype(cd)
    lap_tiles = jnp.transpose(lapT.reshape(V, NJ, TJ), (1, 0, 2))
    xT = jnp.transpose(jnp.asarray(x, jnp.float32), (0, 2, 1)).reshape(B * Cin, V)
    w1 = _mix_weights(jnp.asarray(params["w1"], jnp.float32), B, cd)
    w2 = _mix_weights(jnp.asarray(params["w2"], jnp.float32), B, cd)
    col = lambda a: jnp.asarray(a, jnp.float32).reshape(-1, 1)

    flops = (2 * V * V * B * (Cin + Cmid) * (K - 1)
             + 2 * B * V * K * (Cin * Cmid + Cmid * Cout))
    bytes_accessed = (2 * max(K - 1, 1) * V * V * cd.itemsize   # lap per order
                      + B * Cin * V * 4 + B * Cout * V * 4
                      + (w1.size + w2.size) * cd.itemsize)

    est = (2 * V * TJ * cd.itemsize                 # lap double buffer
           + B * (Cin + Cmid + Cout) * V * 4        # x block, y1, out block
           + n_carry * B * cmax * V * 4             # Chebyshev carries
           + 4 * B * cmax * V * 4                   # hoisted casts / epilogue temps
           + (2 << 20))
    vmem_limit = int(min(max(2 * est, 32 << 20), _vmem_budget_bytes()))

    kernel = functools.partial(_cheb_bn2_kernel, kernel_size=K, batch=B,
                               tile_j=TJ, compute_dtype=cd)
    vmem = pl.BlockSpec(memory_space=pltpu.MemorySpace.VMEM)
    hbm = pl.BlockSpec(memory_space=pl.ANY)
    scratch = [pltpu.VMEM((2, V, TJ), cd),               # lap tile double buffer
               pltpu.SemaphoreType.DMA((2,)),
               pltpu.VMEM((B * Cmid, V), jnp.float32)]   # layer-1 output
    scratch += [pltpu.VMEM((B * cmax, V), jnp.float32) for _ in range(n_carry)]

    out = pl.pallas_call(
        kernel,
        out_shape=jax.ShapeDtypeStruct((B * Cout, V), jnp.float32),
        in_specs=[hbm] + [vmem] * 9,
        out_specs=vmem,
        scratch_shapes=scratch,
        compiler_params=pltpu.CompilerParams(vmem_limit_bytes=vmem_limit),
        cost_estimate=pl.CostEstimate(flops=int(flops),
                                      transcendentals=int(Cmid + Cout),
                                      bytes_accessed=int(bytes_accessed)),
    )(lap_tiles, xT,
      w1, col(params["b1"]), col(params["g1"]), col(params["be1"]),
      w2, col(params["b2"]), col(params["g2"]), col(params["be2"]))

    return jnp.transpose(out.reshape(B, Cout, V), (0, 2, 1))   # (B, V, Cout)


# ----------------------- pure-JAX reference (mirrors PyTorch) -----------------
def _cheb_conv_ref(lap, x, weight):
    B, V, Fin = x.shape
    K, _, Fout = weight.shape
    x0 = jnp.transpose(x, (1, 2, 0)).reshape(V, Fin * B)
    xs = [x0]
    if K > 1:
        x1 = jnp.matmul(lap, x0, precision=_HI)
        xs.append(x1)
        for _ in range(2, K):
            x2 = 2.0 * jnp.matmul(lap, x1, precision=_HI) - x0
            xs.append(x2)
            x0, x1 = x1, x2
    xk = jnp.stack(xs, 0).reshape(K, V, Fin, B)
    xk = jnp.transpose(xk, (3, 1, 2, 0)).reshape(B * V, Fin * K)
    w = weight.reshape(K * Fin, Fout)
    return jnp.matmul(xk, w, precision=_HI).reshape(B, V, Fout)


def _cheb_bn_ref(x, lap, weight, bias, gamma, beta):
    y = _cheb_conv_ref(lap, x, weight) + bias
    m = jnp.mean(y, axis=(0, 1), keepdims=True)
    v = jnp.mean((y - m) ** 2, axis=(0, 1), keepdims=True)
    y = (y - m) / jnp.sqrt(v + _BN_EPS) * gamma + beta
    return jnp.maximum(y, 0.0)


def _ref_forward(x, lap, p):
    x = _cheb_bn_ref(x, lap, p["w1"], p["b1"], p["g1"], p["be1"])
    x = _cheb_bn_ref(x, lap, p["w2"], p["b2"], p["g2"], p["be2"])
    return x


# ------------------------------------ main -----------------------------------
if __name__ == "__main__":
    key = jax.random.PRNGKey(0)
    B, V = 2, 768                    # HEALPix nside=8 -> 768 vertices (multiple of 256)
    Cin, Cmid, Cout = 4, 8, 16       # in / middle / out channels
    K = 3                            # Chebyshev polynomial degree (kernel_size)

    ks = jax.random.split(key, 10)
    x = jax.random.normal(ks[0], (B, V, Cin), jnp.float32)

    # deterministic dense symmetric "Laplacian" with bounded-ish spectrum
    A = jax.random.normal(ks[1], (V, V), jnp.float32)
    lap = (A + A.T) / (2.0 * jnp.sqrt(jnp.float32(V)))

    params = {
        "w1": 0.1 * jax.random.normal(ks[2], (K, Cin, Cmid), jnp.float32),
        "b1": 0.1 * jax.random.normal(ks[3], (Cmid,), jnp.float32),
        "g1": 1.0 + 0.1 * jax.random.normal(ks[4], (Cmid,), jnp.float32),
        "be1": 0.1 * jax.random.normal(ks[5], (Cmid,), jnp.float32),
        "w2": 0.1 * jax.random.normal(ks[6], (K, Cmid, Cout), jnp.float32),
        "b2": 0.1 * jax.random.normal(ks[7], (Cout,), jnp.float32),
        "g2": 1.0 + 0.1 * jax.random.normal(ks[8], (Cout,), jnp.float32),
        "be2": 0.1 * jax.random.normal(ks[9], (Cout,), jnp.float32),
    }

    ref = jax.block_until_ready(_ref_forward(x, lap, params))

    # f32 MXU operands: tight check against the f32 reference.
    out_f32 = jax.block_until_ready(
        spherical_cheb_bn2(x, lap, params, compute_dtype=jnp.float32))
    assert out_f32.shape == (B, V, Cout), out_f32.shape
    assert jnp.allclose(out_f32, ref, atol=2e-3, rtol=2e-3), (
        float(jnp.max(jnp.abs(out_f32 - ref))))

    # Default path: bf16 Laplacian / MXU operands (half the streamed bytes,
    # 2x MXU throughput).  Operand rounding compounds through the Chebyshev
    # recursion, so the check is loose; accumulation/BN/ReLU stay f32.
    out_bf16 = jax.block_until_ready(spherical_cheb_bn2(x, lap, params))
    assert out_bf16.shape == (B, V, Cout), out_bf16.shape
    assert bool(jnp.all(jnp.isfinite(out_bf16)))
    assert jnp.allclose(out_bf16, ref, atol=2.5e-1, rtol=2.5e-1), (
        float(jnp.max(jnp.abs(out_bf16 - ref))))

    print("KERNEL_OK")
</pallas_src>

<mosaic_0001>
module attributes {stable_mosaic.version = 11 : i64} {
  func.func @_cheb_bn2_kernel(%arg0: memref<3x768x256xf32, #tpu.memory_space<any>>, %arg1: memref<8x768xf32, #tpu.memory_space<vmem>>, %arg2: memref<3x16x8xf32, #tpu.memory_space<vmem>>, %arg3: memref<8x1xf32, #tpu.memory_space<vmem>>, %arg4: memref<8x1xf32, #tpu.memory_space<vmem>>, %arg5: memref<8x1xf32, #tpu.memory_space<vmem>>, %arg6: memref<3x32x16xf32, #tpu.memory_space<vmem>>, %arg7: memref<16x1xf32, #tpu.memory_space<vmem>>, %arg8: memref<16x1xf32, #tpu.memory_space<vmem>>, %arg9: memref<16x1xf32, #tpu.memory_space<vmem>>, %arg10: memref<32x768xf32, #tpu.memory_space<vmem>>, %arg11: memref<2x768x256xf32, #tpu.memory_space<vmem>>, %arg12: memref<2x!tpu.dma_semaphore, #tpu.memory_space<semaphore_mem>>, %arg13: memref<16x768xf32, #tpu.memory_space<vmem>>, %arg14: memref<16x768xf32, #tpu.memory_space<vmem>>, %arg15: memref<16x768xf32, #tpu.memory_space<vmem>>) attributes {dimension_semantics = [], scalar_prefetch = 0 : i64, scratch_operands = 5 : i64, tpu.core_type = #tpu.core_type<tc>} {
    %c0 = arith.constant 0 : index
    %c0_0 = arith.constant 0 : index
    %0 = vector.load %arg1[%c0, %c0_0] : memref<8x768xf32, #tpu.memory_space<vmem>>, vector<8x768xf32>
    %c0_1 = arith.constant 0 : index
    %c0_2 = arith.constant 0 : index
    %1 = vector.load %arg3[%c0_1, %c0_2] : memref<8x1xf32, #tpu.memory_space<vmem>>, vector<8x1xf32>
    %2 = tpu.concatenate %1, %1 in 0 : vector<8x1xf32>, vector<8x1xf32> -> vector<16x1xf32>
    %c0_3 = arith.constant 0 : index
    %c0_4 = arith.constant 0 : index
    %c0_5 = arith.constant 0 : index
    %3 = vector.load %arg2[%c0_3, %c0_4, %c0_5] : memref<3x16x8xf32, #tpu.memory_space<vmem>>, vector<1x16x8xf32>
    %4 = vector.shape_cast %3 : vector<1x16x8xf32> to vector<16x8xf32>
    %cst = arith.constant dense<0.000000e+00> : vector<16x768xf32>
    %5 = tpu.matmul %4, %0, %cst {dimension_numbers = #tpu.dot_dimension_numbers<[1], [0], [0], [1], [0, 0, 1, 1], [], []>} : vector<16x8xf32>, vector<8x768xf32>, vector<16x768xf32> -> vector<16x768xf32>
    %6 = vector.broadcast %2 : vector<16x1xf32> to vector<16x768xf32>
    %7 = arith.addf %5, %6 : vector<16x768xf32>
    %c0_6 = arith.constant 0 : index
    %c0_7 = arith.constant 0 : index
    %8 = vector.load %arg13[%c0_6, %c0_7] : memref<16x768xf32, #tpu.memory_space<vmem>>, vector<16x768xf32>
    tpu.vector_store %arg13[%c0_6, %c0_7], %7 {strides = array<i32>} : memref<16x768xf32, #tpu.memory_space<vmem>>, vector<16x768xf32>,
    %c1 = arith.constant 1 : index
    %c0_8 = arith.constant 0 : index
    %c0_9 = arith.constant 0 : index
    %9 = vector.load %arg2[%c1, %c0_8, %c0_9] : memref<3x16x8xf32, #tpu.memory_space<vmem>>, vector<1x16x8xf32>
    %10 = vector.shape_cast %9 : vector<1x16x8xf32> to vector<16x8xf32>
    %c0_i32 = arith.constant 0 : i32
    %c0_i32_10 = arith.constant 0 : i32
    %c0_i32_11 = arith.constant 0 : i32
    %c0_i32_12 = arith.constant 0 : i32
    %c0_i32_13 = arith.constant 0 : i32
    %11 = tpu.memref_slice %arg0[%c0_i32, %c0_i32_12, %c0_i32_13] : memref<3x768x256xf32, #tpu.memory_space<any>> -> memref<1x768x256xf32, #tpu.memory_space<any>>
    %12 = tpu.memref_squeeze %11 : memref<1x768x256xf32, #tpu.memory_space<any>> -> memref<768x256xf32, #tpu.memory_space<any>>
    %c0_i32_14 = arith.constant 0 : i32
    %c0_i32_15 = arith.constant 0 : i32
    %13 = tpu.memref_slice %arg11[%c0_i32_10, %c0_i32_14, %c0_i32_15] : memref<2x768x256xf32, #tpu.memory_space<vmem>> -> memref<1x768x256xf32, #tpu.memory_space<vmem>>
    %14 = tpu.memref_squeeze %13 : memref<1x768x256xf32, #tpu.memory_space<vmem>> -> memref<768x256xf32, #tpu.memory_space<vmem>>
    %15 = tpu.memref_slice %arg12[%c0_i32_11] : memref<2x!tpu.dma_semaphore, #tpu.memory_space<semaphore_mem>> -> memref<1x!tpu.dma_semaphore, #tpu.memory_space<semaphore_mem>>
    %16 = tpu.memref_squeeze %15 : memref<1x!tpu.dma_semaphore, #tpu.memory_space<semaphore_mem>> -> memref<!tpu.dma_semaphore, #tpu.memory_space<semaphore_mem>>
    tpu.enqueue_dma source(%12 : memref<768x256xf32, #tpu.memory_space<any>>) target(%14 : memref<768x256xf32, #tpu.memory_space<vmem>>) target_semaphore(%16 : memref<!tpu.dma_semaphore, #tpu.memory_space<semaphore_mem>>)
    %c0_i32_16 = arith.constant 0 : i32
    %c0_i32_17 = arith.constant 0 : i32
    %c0_i32_18 = arith.constant 0 : i32
    %c0_i32_19 = arith.constant 0 : i32
    %c0_i32_20 = arith.constant 0 : i32
    %17 = tpu.memref_slice %arg0[%c0_i32_16, %c0_i32_19, %c0_i32_20] : memref<3x768x256xf32, #tpu.memory_space<any>> -> memref<1x768x256xf32, #tpu.memory_space<any>>
    %18 = tpu.memref_squeeze %17 : memref<1x768x256xf32, #tpu.memory_space<any>> -> memref<768x256xf32, #tpu.memory_space<any>>
    %c0_i32_21 = arith.constant 0 : i32
    %c0_i32_22 = arith.constant 0 : i32
    %19 = tpu.memref_slice %arg11[%c0_i32_17, %c0_i32_21, %c0_i32_22] : memref<2x768x256xf32, #tpu.memory_space<vmem>> -> memref<1x768x256xf32, #tpu.memory_space<vmem>>
    %20 = tpu.memref_squeeze %19 : memref<1x768x256xf32, #tpu.memory_space<vmem>> -> memref<768x256xf32, #tpu.memory_space<vmem>>
    %21 = tpu.memref_slice %arg12[%c0_i32_18] : memref<2x!tpu.dma_semaphore, #tpu.memory_space<semaphore_mem>> -> memref<1x!tpu.dma_semaphore, #tpu.memory_space<semaphore_mem>>
    %22 = tpu.memref_squeeze %21 : memref<1x!tpu.dma_semaphore, #tpu.memory_space<semaphore_mem>> -> memref<!tpu.dma_semaphore, #tpu.memory_space<semaphore_mem>>
    tpu.wait_dma2 semaphore(%22 : memref<!tpu.dma_semaphore, #tpu.memory_space<semaphore_mem>>) src(%18 : memref<768x256xf32, #tpu.memory_space<any>>) dst(%20 : memref<768x256xf32, #tpu.memory_space<vmem>>)
    %c1_i32 = arith.constant 1 : i32
    %c1_i32_23 = arith.constant 1 : i32
    %c1_i32_24 = arith.constant 1 : i32
    %c0_i32_25 = arith.constant 0 : i32
    %c0_i32_26 = arith.constant 0 : i32
    %23 = tpu.memref_slice %arg0[%c1_i32, %c0_i32_25, %c0_i32_26] : memref<3x768x256xf32, #tpu.memory_space<any>> -> memref<1x768x256xf32, #tpu.memory_space<any>>
    %24 = tpu.memref_squeeze %23 : memref<1x768x256xf32, #tpu.memory_space<any>> -> memref<768x256xf32, #tpu.memory_space<any>>
    %c0_i32_27 = arith.constant 0 : i32
    %c0_i32_28 = arith.constant 0 : i32
    %25 = tpu.memref_slice %arg11[%c1_i32_23, %c0_i32_27, %c0_i32_28] : memref<2x768x256xf32, #tpu.memory_space<vmem>> -> memref<1x768x256xf32, #tpu.memory_space<vmem>>
    %26 = tpu.memref_squeeze %25 : memref<1x768x256xf32, #tpu.memory_space<vmem>> -> memref<768x256xf32, #tpu.memory_space<vmem>>
    %27 = tpu.memref_slice %arg12[%c1_i32_24] : memref<2x!tpu.dma_semaphore, #tpu.memory_space<semaphore_mem>> -> memref<1x!tpu.dma_semaphore, #tpu.memory_space<semaphore_mem>>
    %28 = tpu.memref_squeeze %27 : memref<1x!tpu.dma_semaphore, #tpu.memory_space<semaphore_mem>> -> memref<!tpu.dma_semaphore, #tpu.memory_space<semaphore_mem>>
    tpu.enqueue_dma source(%24 : memref<768x256xf32, #tpu.memory_space<any>>) target(%26 : memref<768x256xf32, #tpu.memory_space<vmem>>) target_semaphore(%28 : memref<!tpu.dma_semaphore, #tpu.memory_space<semaphore_mem>>)
    %c0_29 = arith.constant 0 : index
    %c0_30 = arith.constant 0 : index
    %c0_31 = arith.constant 0 : index
    %29 = vector.load %arg11[%c0_29, %c0_30, %c0_31] : memref<2x768x256xf32, #tpu.memory_space<vmem>>, vector<1x768x256xf32>
    %30 = vector.shape_cast %29 : vector<1x768x256xf32> to vector<768x256xf32>
    %cst_32 = arith.constant dense<0.000000e+00> : vector<8x256xf32>
    %31 = tpu.matmul %0, %30, %cst_32 {dimension_numbers = #tpu.dot_dimension_numbers<[1], [0], [0], [1], [0, 0, 1, 1], [], []>} : vector<8x768xf32>, vector<768x256xf32>, vector<8x256xf32> -> vector<8x256xf32>
    %c0_33 = arith.constant 0 : index
    %c0_34 = arith.constant 0 : index
    %32 = vector.load %arg14[%c0_33, %c0_34] : memref<16x768xf32, #tpu.memory_space<vmem>>, vector<8x256xf32>
    tpu.vector_store %arg14[%c0_33, %c0_34], %31 {strides = array<i32>} : memref<16x768xf32, #tpu.memory_space<vmem>>, vector<8x256xf32>,
    %c0_35 = arith.constant 0 : index
    %c0_36 = arith.constant 0 : index
    %33 = vector.load %arg13[%c0_35, %c0_36] : memref<16x768xf32, #tpu.memory_space<vmem>>, vector<16x256xf32>
    %cst_37 = arith.constant dense<0.000000e+00> : vector<16x256xf32>
    %34 = tpu.matmul %10, %31, %cst_37 {dimension_numbers = #tpu.dot_dimension_numbers<[1], [0], [0], [1], [0, 0, 1, 1], [], []>} : vector<16x8xf32>, vector<8x256xf32>, vector<16x256xf32> -> vector<16x256xf32>
    %35 = arith.addf %33, %34 : vector<16x256xf32>
    %c0_38 = arith.constant 0 : index
    %c0_39 = arith.constant 0 : index
    %36 = vector.load %arg13[%c0_38, %c0_39] : memref<16x768xf32, #tpu.memory_space<vmem>>, vector<16x256xf32>
    tpu.vector_store %arg13[%c0_38, %c0_39], %35 {strides = array<i32>} : memref<16x768xf32, #tpu.memory_space<vmem>>, vector<16x256xf32>,
    %c1_i32_40 = arith.constant 1 : i32
    %c1_i32_41 = arith.constant 1 : i32
    %c1_i32_42 = arith.constant 1 : i32
    %c0_i32_43 = arith.constant 0 : i32
    %c0_i32_44 = arith.constant 0 : i32
    %37 = tpu.memref_slice %arg0[%c1_i32_40, %c0_i32_43, %c0_i32_44] : memref<3x768x256xf32, #tpu.memory_space<any>> -> memref<1x768x256xf32, #tpu.memory_space<any>>
    %38 = tpu.memref_squeeze %37 : memref<1x768x256xf32, #tpu.memory_space<any>> -> memref<768x256xf32, #tpu.memory_space<any>>
    %c0_i32_45 = arith.constant 0 : i32
    %c0_i32_46 = arith.constant 0 : i32
    %39 = tpu.memref_slice %arg11[%c1_i32_41, %c0_i32_45, %c0_i32_46] : memref<2x768x256xf32, #tpu.memory_space<vmem>> -> memref<1x768x256xf32, #tpu.memory_space<vmem>>
    %40 = tpu.memref_squeeze %39 : memref<1x768x256xf32, #tpu.memory_space<vmem>> -> memref<768x256xf32, #tpu.memory_space<vmem>>
    %41 = tpu.memref_slice %arg12[%c1_i32_42] : memref<2x!tpu.dma_semaphore, #tpu.memory_space<semaphore_mem>> -> memref<1x!tpu.dma_semaphore, #tpu.memory_space<semaphore_mem>>
    %42 = tpu.memref_squeeze %41 : memref<1x!tpu.dma_semaphore, #tpu.memory_space<semaphore_mem>> -> memref<!tpu.dma_semaphore, #tpu.memory_space<semaphore_mem>>
    tpu.wait_dma2 semaphore(%42 : memref<!tpu.dma_semaphore, #tpu.memory_space<semaphore_mem>>) src(%38 : memref<768x256xf32, #tpu.memory_space<any>>) dst(%40 : memref<768x256xf32, #tpu.memory_space<vmem>>)
    %c2_i32 = arith.constant 2 : i32
    %c0_i32_47 = arith.constant 0 : i32
    %c0_i32_48 = arith.constant 0 : i32
    %c0_i32_49 = arith.constant 0 : i32
    %c0_i32_50 = arith.constant 0 : i32
    %43 = tpu.memref_slice %arg0[%c2_i32, %c0_i32_49, %c0_i32_50] : memref<3x768x256xf32, #tpu.memory_space<any>> -> memref<1x768x256xf32, #tpu.memory_space<any>>
    %44 = tpu.memref_squeeze %43 : memref<1x768x256xf32, #tpu.memory_space<any>> -> memref<768x256xf32, #tpu.memory_space<any>>
    %c0_i32_51 = arith.constant 0 : i32
    %c0_i32_52 = arith.constant 0 : i32
    %45 = tpu.memref_slice %arg11[%c0_i32_47, %c0_i32_51, %c0_i32_52] : memref<2x768x256xf32, #tpu.memory_space<vmem>> -> memref<1x768x256xf32, #tpu.memory_space<vmem>>
    %46 = tpu.memref_squeeze %45 : memref<1x768x256xf32, #tpu.memory_space<vmem>> -> memref<768x256xf32, #tpu.memory_space<vmem>>
    %47 = tpu.memref_slice %arg12[%c0_i32_48] : memref<2x!tpu.dma_semaphore, #tpu.memory_space<semaphore_mem>> -> memref<1x!tpu.dma_semaphore, #tpu.memory_space<semaphore_mem>>
    %48 = tpu.memref_squeeze %47 : memref<1x!tpu.dma_semaphore, #tpu.memory_space<semaphore_mem>> -> memref<!tpu.dma_semaphore, #tpu.memory_space<semaphore_mem>>
    tpu.enqueue_dma source(%44 : memref<768x256xf32, #tpu.memory_space<any>>) target(%46 : memref<768x256xf32, #tpu.memory_space<vmem>>) target_semaphore(%48 : memref<!tpu.dma_semaphore, #tpu.memory_space<semaphore_mem>>)
    %c1_53 = arith.constant 1 : index
    %c0_54 = arith.constant 0 : index
    %c0_55 = arith.constant 0 : index
    %49 = vector.load %arg11[%c1_53, %c0_54, %c0_55] : memref<2x768x256xf32, #tpu.memory_space<vmem>>, vector<1x768x256xf32>
    %50 = vector.shape_cast %49 : vector<1x768x256xf32> to vector<768x256xf32>
    %cst_56 = arith.constant dense<0.000000e+00> : vector<8x256xf32>
    %51 = tpu.matmul %0, %50, %cst_56 {dimension_numbers = #tpu.dot_dimension_numbers<[1], [0], [0], [1], [0, 0, 1, 1], [], []>} : vector<8x768xf32>, vector<768x256xf32>, vector<8x256xf32> -> vector<8x256xf32>
    %c0_57 = arith.constant 0 : index
    %c256 = arith.constant 256 : index
    %52 = vector.load %arg14[%c0_57, %c256] : memref<16x768xf32, #tpu.memory_space<vmem>>, vector<8x256xf32>
    tpu.vector_store %arg14[%c0_57, %c256], %51 {strides = array<i32>} : memref<16x768xf32, #tpu.memory_space<vmem>>, vector<8x256xf32>,
    %c0_58 = arith.constant 0 : index
    %c256_59 = arith.constant 256 : index
    %53 = vector.load %arg13[%c0_58, %c256_59] : memref<16x768xf32, #tpu.memory_space<vmem>>, vector<16x256xf32>
    %cst_60 = arith.constant dense<0.000000e+00> : vector<16x256xf32>
    %54 = tpu.matmul %10, %51, %cst_60 {dimension_numbers = #tpu.dot_dimension_numbers<[1], [0], [0], [1], [0, 0, 1, 1], [], []>} : vector<16x8xf32>, vector<8x256xf32>, vector<16x256xf32> -> vector<16x256xf32>
    %55 = arith.addf %53, %54 : vector<16x256xf32>
    %c0_61 = arith.constant 0 : index
    %c256_62 = arith.constant 256 : index
    %56 = vector.load %arg13[%c0_61, %c256_62] : memref<16x768xf32, #tpu.memory_space<vmem>>, vector<16x256xf32>
    tpu.vector_store %arg13[%c0_61, %c256_62], %55 {strides = array<i32>} : memref<16x768xf32, #tpu.memory_space<vmem>>, vector<16x256xf32>,
    %c2_i32_63 = arith.constant 2 : i32
    %c0_i32_64 = arith.constant 0 : i32
    %c0_i32_65 = arith.constant 0 : i32
    %c0_i32_66 = arith.constant 0 : i32
    %c0_i32_67 = arith.constant 0 : i32
    %57 = tpu.memref_slice %arg0[%c2_i32_63, %c0_i32_66, %c0_i32_67] : memref<3x768x256xf32, #tpu.memory_space<any>> -> memref<1x768x256xf32, #tpu.memory_space<any>>
    %58 = tpu.memref_squeeze %57 : memref<1x768x256xf32, #tpu.memory_space<any>> -> memref<768x256xf32, #tpu.memory_space<any>>
    %c0_i32_68 = arith.constant 0 : i32
    %c0_i32_69 = arith.constant 0 : i32
    %59 = tpu.memref_slice %arg11[%c0_i32_64, %c0_i32_68, %c0_i32_69] : memref<2x768x256xf32, #tpu.memory_space<vmem>> -> memref<1x768x256xf32, #tpu.memory_space<vmem>>
    %60 = tpu.memref_squeeze %59 : memref<1x768x256xf32, #tpu.memory_space<vmem>> -> memref<768x256xf32, #tpu.memory_space<vmem>>
    %61 = tpu.memref_slice %arg12[%c0_i32_65] : memref<2x!tpu.dma_semaphore, #tpu.memory_space<semaphore_mem>> -> memref<1x!tpu.dma_semaphore, #tpu.memory_space<semaphore_mem>>
    %62 = tpu.memref_squeeze %61 : memref<1x!tpu.dma_semaphore, #tpu.memory_space<semaphore_mem>> -> memref<!tpu.dma_semaphore, #tpu.memory_space<semaphore_mem>>
    tpu.wait_dma2 semaphore(%62 : memref<!tpu.dma_semaphore, #tpu.memory_space<semaphore_mem>>) src(%58 : memref<768x256xf32, #tpu.memory_space<any>>) dst(%60 : memref<768x256xf32, #tpu.memory_space<vmem>>)
    %c0_70 = arith.constant 0 : index
    %c0_71 = arith.constant 0 : index
    %c0_72 = arith.constant 0 : index
    %63 = vector.load %arg11[%c0_70, %c0_71, %c0_72] : memref<2x768x256xf32, #tpu.memory_space<vmem>>, vector<1x768x256xf32>
    %64 = vector.shape_cast %63 : vector<1x768x256xf32> to vector<768x256xf32>
    %cst_73 = arith.constant dense<0.000000e+00> : vector<8x256xf32>
    %65 = tpu.matmul %0, %64, %cst_73 {dimension_numbers = #tpu.dot_dimension_numbers<[1], [0], [0], [1], [0, 0, 1, 1], [], []>} : vector<8x768xf32>, vector<768x256xf32>, vector<8x256xf32> -> vector<8x256xf32>
    %c0_74 = arith.constant 0 : index
    %c512 = arith.constant 512 : index
    %66 = vector.load %arg14[%c0_74, %c512] : memref<16x768xf32, #tpu.memory_space<vmem>>, vector<8x256xf32>
    tpu.vector_store %arg14[%c0_74, %c512], %65 {strides = array<i32>} : memref<16x768xf32, #tpu.memory_space<vmem>>, vector<8x256xf32>,
    %c0_75 = arith.constant 0 : index
    %c512_76 = arith.constant 512 : index
    %67 = vector.load %arg13[%c0_75, %c512_76] : memref<16x768xf32, #tpu.memory_space<vmem>>, vector<16x256xf32>
    %cst_77 = arith.constant dense<0.000000e+00> : vector<16x256xf32>
    %68 = tpu.matmul %10, %65, %cst_77 {dimension_numbers = #tpu.dot_dimension_numbers<[1], [0], [0], [1], [0, 0, 1, 1], [], []>} : vector<16x8xf32>, vector<8x256xf32>, vector<16x256xf32> -> vector<16x256xf32>
    %69 = arith.addf %67, %68 : vector<16x256xf32>
    %c0_78 = arith.constant 0 : index
    %c512_79 = arith.constant 512 : index
    %70 = vector.load %arg13[%c0_78, %c512_79] : memref<16x768xf32, #tpu.memory_space<vmem>>, vector<16x256xf32>
    tpu.vector_store %arg13[%c0_78, %c512_79], %69 {strides = array<i32>} : memref<16x768xf32, #tpu.memory_space<vmem>>, vector<16x256xf32>,
    %c2 = arith.constant 2 : index
    %c0_80 = arith.constant 0 : index
    %c0_81 = arith.constant 0 : index
    %71 = vector.load %arg2[%c2, %c0_80, %c0_81] : memref<3x16x8xf32, #tpu.memory_space<vmem>>, vector<1x16x8xf32>
    %72 = vector.shape_cast %71 : vector<1x16x8xf32> to vector<16x8xf32>
    %c0_82 = arith.constant 0 : index
    %c0_83 = arith.constant 0 : index
    %73 = vector.load %arg14[%c0_82, %c0_83] : memref<16x768xf32, #tpu.memory_space<vmem>>, vector<8x768xf32>
    %c0_i32_84 = arith.constant 0 : i32
    %c0_i32_85 = arith.constant 0 : i32
    %c0_i32_86 = arith.constant 0 : i32
    %c0_i32_87 = arith.constant 0 : i32
    %c0_i32_88 = arith.constant 0 : i32
    %74 = tpu.memref_slice %arg0[%c0_i32_84, %c0_i32_87, %c0_i32_88] : memref<3x768x256xf32, #tpu.memory_space<any>> -> memref<1x768x256xf32, #tpu.memory_space<any>>
    %75 = tpu.memref_squeeze %74 : memref<1x768x256xf32, #tpu.memory_space<any>> -> memref<768x256xf32, #tpu.memory_space<any>>
    %c0_i32_89 = arith.constant 0 : i32
    %c0_i32_90 = arith.constant 0 : i32
    %76 = tpu.memref_slice %arg11[%c0_i32_85, %c0_i32_89, %c0_i32_90] : memref<2x768x256xf32, #tpu.memory_space<vmem>> -> memref<1x768x256xf32, #tpu.memory_space<vmem>>
    %77 = tpu.memref_squeeze %76 : memref<1x768x256xf32, #tpu.memory_space<vmem>> -> memref<768x256xf32, #tpu.memory_space<vmem>>
    %78 = tpu.memref_slice %arg12[%c0_i32_86] : memref<2x!tpu.dma_semaphore, #tpu.memory_space<semaphore_mem>> -> memref<1x!tpu.dma_semaphore, #tpu.memory_space<semaphore_mem>>
    %79 = tpu.memref_squeeze %78 : memref<1x!tpu.dma_semaphore, #tpu.memory_space<semaphore_mem>> -> memref<!tpu.dma_semaphore, #tpu.memory_space<semaphore_mem>>
    tpu.enqueue_dma source(%75 : memref<768x256xf32, #tpu.memory_space<any>>) target(%77 : memref<768x256xf32, #tpu.memory_space<vmem>>) target_semaphore(%79 : memref<!tpu.dma_semaphore, #tpu.memory_space<semaphore_mem>>)
    %c0_i32_91 = arith.constant 0 : i32
    %c0_i32_92 = arith.constant 0 : i32
    %c0_i32_93 = arith.constant 0 : i32
    %c0_i32_94 = arith.constant 0 : i32
    %c0_i32_95 = arith.constant 0 : i32
    %80 = tpu.memref_slice %arg0[%c0_i32_91, %c0_i32_94, %c0_i32_95] : memref<3x768x256xf32, #tpu.memory_space<any>> -> memref<1x768x256xf32, #tpu.memory_space<any>>
    %81 = tpu.memref_squeeze %80 : memref<1x768x256xf32, #tpu.memory_space<any>> -> memref<768x256xf32, #tpu.memory_space<any>>
    %c0_i32_96 = arith.constant 0 : i32
    %c0_i32_97 = arith.constant 0 : i32
    %82 = tpu.memref_slice %arg11[%c0_i32_92, %c0_i32_96, %c0_i32_97] : memref<2x768x256xf32, #tpu.memory_space<vmem>> -> memref<1x768x256xf32, #tpu.memory_space<vmem>>
    %83 = tpu.memref_squeeze %82 : memref<1x768x256xf32, #tpu.memory_space<vmem>> -> memref<768x256xf32, #tpu.memory_space<vmem>>
    %84 = tpu.memref_slice %arg12[%c0_i32_93] : memref<2x!tpu.dma_semaphore, #tpu.memory_space<semaphore_mem>> -> memref<1x!tpu.dma_semaphore, #tpu.memory_space<semaphore_mem>>
    %85 = tpu.memref_squeeze %84 : memref<1x!tpu.dma_semaphore, #tpu.memory_space<semaphore_mem>> -> memref<!tpu.dma_semaphore, #tpu.memory_space<semaphore_mem>>
    tpu.wait_dma2 semaphore(%85 : memref<!tpu.dma_semaphore, #tpu.memory_space<semaphore_mem>>) src(%81 : memref<768x256xf32, #tpu.memory_space<any>>) dst(%83 : memref<768x256xf32, #tpu.memory_space<vmem>>)
    %c1_i32_98 = arith.constant 1 : i32
    %c1_i32_99 = arith.constant 1 : i32
    %c1_i32_100 = arith.constant 1 : i32
    %c0_i32_101 = arith.constant 0 : i32
    %c0_i32_102 = arith.constant 0 : i32
    %86 = tpu.memref_slice %arg0[%c1_i32_98, %c0_i32_101, %c0_i32_102] : memref<3x768x256xf32, #tpu.memory_space<any>> -> memref<1x768x256xf32, #tpu.memory_space<any>>
    %87 = tpu.memref_squeeze %86 : memref<1x768x256xf32, #tpu.memory_space<any>> -> memref<768x256xf32, #tpu.memory_space<any>>
    %c0_i32_103 = arith.constant 0 : i32
    %c0_i32_104 = arith.constant 0 : i32
    %88 = tpu.memref_slice %arg11[%c1_i32_99, %c0_i32_103, %c0_i32_104] : memref<2x768x256xf32, #tpu.memory_space<vmem>> -> memref<1x768x256xf32, #tpu.memory_space<vmem>>
    %89 = tpu.memref_squeeze %88 : memref<1x768x256xf32, #tpu.memory_space<vmem>> -> memref<768x256xf32, #tpu.memory_space<vmem>>
    %90 = tpu.memref_slice %arg12[%c1_i32_100] : memref<2x!tpu.dma_semaphore, #tpu.memory_space<semaphore_mem>> -> memref<1x!tpu.dma_semaphore, #tpu.memory_space<semaphore_mem>>
    %91 = tpu.memref_squeeze %90 : memref<1x!tpu.dma_semaphore, #tpu.memory_space<semaphore_mem>> -> memref<!tpu.dma_semaphore, #tpu.memory_space<semaphore_mem>>
    tpu.enqueue_dma source(%87 : memref<768x256xf32, #tpu.memory_space<any>>) target(%89 : memref<768x256xf32, #tpu.memory_space<vmem>>) target_semaphore(%91 : memref<!tpu.dma_semaphore, #tpu.memory_space<semaphore_mem>>)
    %c0_105 = arith.constant 0 : index
    %c0_106 = arith.constant 0 : index
    %c0_107 = arith.constant 0 : index
    %92 = vector.load %arg11[%c0_105, %c0_106, %c0_107] : memref<2x768x256xf32, #tpu.memory_space<vmem>>, vector<1x768x256xf32>
    %93 = vector.shape_cast %92 : vector<1x768x256xf32> to vector<768x256xf32>
    %cst_108 = arith.constant dense<0.000000e+00> : vector<8x256xf32>
    %94 = tpu.matmul %73, %93, %cst_108 {dimension_numbers = #tpu.dot_dimension_numbers<[1], [0], [0], [1], [0, 0, 1, 1], [], []>} : vector<8x768xf32>, vector<768x256xf32>, vector<8x256xf32> -> vector<8x256xf32>
    %cst_109 = arith.constant 2.000000e+00 : f32
    %95 = vector.broadcast %cst_109 : f32 to vector<8x256xf32>
    %96 = arith.mulf %95, %94 : vector<8x256xf32>
    %c0_110 = arith.constant 0 : index
    %c0_111 = arith.constant 0 : index
    %97 = vector.load %arg1[%c0_110, %c0_111] : memref<8x768xf32, #tpu.memory_space<vmem>>, vector<8x256xf32>
    %98 = arith.subf %96, %97 : vector<8x256xf32>
    %c0_112 = arith.constant 0 : index
    %c0_113 = arith.constant 0 : index
    %99 = vector.load %arg15[%c0_112, %c0_113] : memref<16x768xf32, #tpu.memory_space<vmem>>, vector<8x256xf32>
    tpu.vector_store %arg15[%c0_112, %c0_113], %98 {strides = array<i32>} : memref<16x768xf32, #tpu.memory_space<vmem>>, vector<8x256xf32>,
    %c0_114 = arith.constant 0 : index
    %c0_115 = arith.constant 0 : index
    %100 = vector.load %arg13[%c0_114, %c0_115] : memref<16x768xf32, #tpu.memory_space<vmem>>, vector<16x256xf32>
    %cst_116 = arith.constant dense<0.000000e+00> : vector<16x256xf32>
    %101 = tpu.matmul %72, %98, %cst_116 {dimension_numbers = #tpu.dot_dimension_numbers<[1], [0], [0], [1], [0, 0, 1, 1], [], []>} : vector<16x8xf32>, vector<8x256xf32>, vector<16x256xf32> -> vector<16x256xf32>
    %102 = arith.addf %100, %101 : vector<16x256xf32>
    %c0_117 = arith.constant 0 : index
    %c0_118 = arith.constant 0 : index
    %103 = vector.load %arg13[%c0_117, %c0_118] : memref<16x768xf32, #tpu.memory_space<vmem>>, vector<16x256xf32>
    tpu.vector_store %arg13[%c0_117, %c0_118], %102 {strides = array<i32>} : memref<16x768xf32, #tpu.memory_space<vmem>>, vector<16x256xf32>,
    %c1_i32_119 = arith.constant 1 : i32
    %c1_i32_120 = arith.constant 1 : i32
    %c1_i32_121 = arith.constant 1 : i32
    %c0_i32_122 = arith.constant 0 : i32
    %c0_i32_123 = arith.constant 0 : i32
    %104 = tpu.memref_slice %arg0[%c1_i32_119, %c0_i32_122, %c0_i32_123] : memref<3x768x256xf32, #tpu.memory_space<any>> -> memref<1x768x256xf32, #tpu.memory_space<any>>
    %105 = tpu.memref_squeeze %104 : memref<1x768x256xf32, #tpu.memory_space<any>> -> memref<768x256xf32, #tpu.memory_space<any>>
    %c0_i32_124 = arith.constant 0 : i32
    %c0_i32_125 = arith.constant 0 : i32
    %106 = tpu.memref_slice %arg11[%c1_i32_120, %c0_i32_124, %c0_i32_125] : memref<2x768x256xf32, #tpu.memory_space<vmem>> -> memref<1x768x256xf32, #tpu.memory_space<vmem>>
    %107 = tpu.memref_squeeze %106 : memref<1x768x256xf32, #tpu.memory_space<vmem>> -> memref<768x256xf32, #tpu.memory_space<vmem>>
    %108 = tpu.memref_slice %arg12[%c1_i32_121] : memref<2x!tpu.dma_semaphore, #tpu.memory_space<semaphore_mem>> -> memref<1x!tpu.dma_semaphore, #tpu.memory_space<semaphore_mem>>
    %109 = tpu.memref_squeeze %108 : memref<1x!tpu.dma_semaphore, #tpu.memory_space<semaphore_mem>> -> memref<!tpu.dma_semaphore, #tpu.memory_space<semaphore_mem>>
    tpu.wait_dma2 semaphore(%109 : memref<!tpu.dma_semaphore, #tpu.memory_space<semaphore_mem>>) src(%105 : memref<768x256xf32, #tpu.memory_space<any>>) dst(%107 : memref<768x256xf32, #tpu.memory_space<vmem>>)
    %c2_i32_126 = arith.constant 2 : i32
    %c0_i32_127 = arith.constant 0 : i32
    %c0_i32_128 = arith.constant 0 : i32
    %c0_i32_129 = arith.constant 0 : i32
    %c0_i32_130 = arith.constant 0 : i32
    %110 = tpu.memref_slice %arg0[%c2_i32_126, %c0_i32_129, %c0_i32_130] : memref<3x768x256xf32, #tpu.memory_space<any>> -> memref<1x768x256xf32, #tpu.memory_space<any>>
    %111 = tpu.memref_squeeze %110 : memref<1x768x256xf32, #tpu.memory_space<any>> -> memref<768x256xf32, #tpu.memory_space<any>>
    %c0_i32_131 = arith.constant 0 : i32
    %c0_i32_132 = arith.constant 0 : i32
    %112 = tpu.memref_slice %arg11[%c0_i32_127, %c0_i32_131, %c0_i32_132] : memref<2x768x256xf32, #tpu.memory_space<vmem>> -> memref<1x768x256xf32, #tpu.memory_space<vmem>>
    %113 = tpu.memref_squeeze %112 : memref<1x768x256xf32, #tpu.memory_space<vmem>> -> memref<768x256xf32, #tpu.memory_space<vmem>>
    %114 = tpu.memref_slice %arg12[%c0_i32_128] : memref<2x!tpu.dma_semaphore, #tpu.memory_space<semaphore_mem>> -> memref<1x!tpu.dma_semaphore, #tpu.memory_space<semaphore_mem>>
    %115 = tpu.memref_squeeze %114 : memref<1x!tpu.dma_semaphore, #tpu.memory_space<semaphore_mem>> -> memref<!tpu.dma_semaphore, #tpu.memory_space<semaphore_mem>>
    tpu.enqueue_dma source(%111 : memref<768x256xf32, #tpu.memory_space<any>>) target(%113 : memref<768x256xf32, #tpu.memory_space<vmem>>) target_semaphore(%115 : memref<!tpu.dma_semaphore, #tpu.memory_space<semaphore_mem>>)
    %c1_133 = arith.constant 1 : index
    %c0_134 = arith.constant 0 : index
    %c0_135 = arith.constant 0 : index
    %116 = vector.load %arg11[%c1_133, %c0_134, %c0_135] : memref<2x768x256xf32, #tpu.memory_space<vmem>>, vector<1x768x256xf32>
    %117 = vector.shape_cast %116 : vector<1x768x256xf32> to vector<768x256xf32>
    %cst_136 = arith.constant dense<0.000000e+00> : vector<8x256xf32>
    %118 = tpu.matmul %73, %117, %cst_136 {dimension_numbers = #tpu.dot_dimension_numbers<[1], [0], [0], [1], [0, 0, 1, 1], [], []>} : vector<8x768xf32>, vector<768x256xf32>, vector<8x256xf32> -> vector<8x256xf32>
    %cst_137 = arith.constant 2.000000e+00 : f32
    %119 = vector.broadcast %cst_137 : f32 to vector<8x256xf32>
    %120 = arith.mulf %119, %118 : vector<8x256xf32>
    %c0_138 = arith.constant 0 : index
    %c256_139 = arith.constant 256 : index
    %121 = vector.load %arg1[%c0_138, %c256_139] : memref<8x768xf32, #tpu.memory_space<vmem>>, vector<8x256xf32>
    %122 = arith.subf %120, %121 : vector<8x256xf32>
    %c0_140 = arith.constant 0 : index
    %c256_141 = arith.constant 256 : index
    %123 = vector.load %arg15[%c0_140, %c256_141] : memref<16x768xf32, #tpu.memory_space<vmem>>, vector<8x256xf32>
    tpu.vector_store %arg15[%c0_140, %c256_141], %122 {strides = array<i32>} : memref<16x768xf32, #tpu.memory_space<vmem>>, vector<8x256xf32>,
    %c0_142 = arith.constant 0 : index
    %c256_143 = arith.constant 256 : index
    %124 = vector.load %arg13[%c0_142, %c256_143] : memref<16x768xf32, #tpu.memory_space<vmem>>, vector<16x256xf32>
    %cst_144 = arith.constant dense<0.000000e+00> : vector<16x256xf32>
    %125 = tpu.matmul %72, %122, %cst_144 {dimension_numbers = #tpu.dot_dimension_numbers<[1], [0], [0], [1], [0, 0, 1, 1], [], []>} : vector<16x8xf32>, vector<8x256xf32>, vector<16x256xf32> -> vector<16x256xf32>
    %126 = arith.addf %124, %125 : vector<16x256xf32>
    %c0_145 = arith.constant 0 : index
    %c256_146 = arith.constant 256 : index
    %127 = vector.load %arg13[%c0_145, %c256_146] : memref<16x768xf32, #tpu.memory_space<vmem>>, vector<16x256xf32>
    tpu.vector_store %arg13[%c0_145, %c256_146], %126 {strides = array<i32>} : memref<16x768xf32, #tpu.memory_space<vmem>>, vector<16x256xf32>,
    %c2_i32_147 = arith.constant 2 : i32
    %c0_i32_148 = arith.constant 0 : i32
    %c0_i32_149 = arith.constant 0 : i32
    %c0_i32_150 = arith.constant 0 : i32
    %c0_i32_151 = arith.constant 0 : i32
    %128 = tpu.memref_slice %arg0[%c2_i32_147, %c0_i32_150, %c0_i32_151] : memref<3x768x256xf32, #tpu.memory_space<any>> -> memref<1x768x256xf32, #tpu.memory_space<any>>
    %129 = tpu.memref_squeeze %128 : memref<1x768x256xf32, #tpu.memory_space<any>> -> memref<768x256xf32, #tpu.memory_space<any>>
    %c0_i32_152 = arith.constant 0 : i32
    %c0_i32_153 = arith.constant 0 : i32
    %130 = tpu.memref_slice %arg11[%c0_i32_148, %c0_i32_152, %c0_i32_153] : memref<2x768x256xf32, #tpu.memory_space<vmem>> -> memref<1x768x256xf32, #tpu.memory_space<vmem>>
    %131 = tpu.memref_squeeze %130 : memref<1x768x256xf32, #tpu.memory_space<vmem>> -> memref<768x256xf32, #tpu.memory_space<vmem>>
    %132 = tpu.memref_slice %arg12[%c0_i32_149] : memref<2x!tpu.dma_semaphore, #tpu.memory_space<semaphore_mem>> -> memref<1x!tpu.dma_semaphore, #tpu.memory_space<semaphore_mem>>
    %133 = tpu.memref_squeeze %132 : memref<1x!tpu.dma_semaphore, #tpu.memory_space<semaphore_mem>> -> memref<!tpu.dma_semaphore, #tpu.memory_space<semaphore_mem>>
    tpu.wait_dma2 semaphore(%133 : memref<!tpu.dma_semaphore, #tpu.memory_space<semaphore_mem>>) src(%129 : memref<768x256xf32, #tpu.memory_space<any>>) dst(%131 : memref<768x256xf32, #tpu.memory_space<vmem>>)
    %c0_154 = arith.constant 0 : index
    %c0_155 = arith.constant 0 : index
    %c0_156 = arith.constant 0 : index
    %134 = vector.load %arg11[%c0_154, %c0_155, %c0_156] : memref<2x768x256xf32, #tpu.memory_space<vmem>>, vector<1x768x256xf32>
    %135 = vector.shape_cast %134 : vector<1x768x256xf32> to vector<768x256xf32>
    %cst_157 = arith.constant dense<0.000000e+00> : vector<8x256xf32>
    %136 = tpu.matmul %73, %135, %cst_157 {dimension_numbers = #tpu.dot_dimension_numbers<[1], [0], [0], [1], [0, 0, 1, 1], [], []>} : vector<8x768xf32>, vector<768x256xf32>, vector<8x256xf32> -> vector<8x256xf32>
    %cst_158 = arith.constant 2.000000e+00 : f32
    %137 = vector.broadcast %cst_158 : f32 to vector<8x256xf32>
    %138 = arith.mulf %137, %136 : vector<8x256xf32>
    %c0_159 = arith.constant 0 : index
    %c512_160 = arith.constant 512 : index
    %139 = vector.load %arg1[%c0_159, %c512_160] : memref<8x768xf32, #tpu.memory_space<vmem>>, vector<8x256xf32>
    %140 = arith.subf %138, %139 : vector<8x256xf32>
    %c0_161 = arith.constant 0 : index
    %c512_162 = arith.constant 512 : index
    %141 = vector.load %arg15[%c0_161, %c512_162] : memref<16x768xf32, #tpu.memory_space<vmem>>, vector<8x256xf32>
    tpu.vector_store %arg15[%c0_161, %c512_162], %140 {strides = array<i32>} : memref<16x768xf32, #tpu.memory_space<vmem>>, vector<8x256xf32>,
    %c0_163 = arith.constant 0 : index
    %c512_164 = arith.constant 512 : index
    %142 = vector.load %arg13[%c0_163, %c512_164] : memref<16x768xf32, #tpu.memory_space<vmem>>, vector<16x256xf32>
    %cst_165 = arith.constant dense<0.000000e+00> : vector<16x256xf32>
    %143 = tpu.matmul %72, %140, %cst_165 {dimension_numbers = #tpu.dot_dimension_numbers<[1], [0], [0], [1], [0, 0, 1, 1], [], []>} : vector<16x8xf32>, vector<8x256xf32>, vector<16x256xf32> -> vector<16x256xf32>
    %144 = arith.addf %142, %143 : vector<16x256xf32>
    %c0_166 = arith.constant 0 : index
    %c512_167 = arith.constant 512 : index
    %145 = vector.load %arg13[%c0_166, %c512_167] : memref<16x768xf32, #tpu.memory_space<vmem>>, vector<16x256xf32>
    tpu.vector_store %arg13[%c0_166, %c512_167], %144 {strides = array<i32>} : memref<16x768xf32, #tpu.memory_space<vmem>>, vector<16x256xf32>,
    %c0_168 = arith.constant 0 : index
    %c0_169 = arith.constant 0 : index
    %146 = vector.load %arg13[%c0_168, %c0_169] : memref<16x768xf32, #tpu.memory_space<vmem>>, vector<16x768xf32>
    %cst_170 = arith.constant dense<0.000000e+00> : vector<16xf32>
    %147 = vector.multi_reduction <add>, %146, %cst_170 [1] : vector<16x768xf32> to vector<16xf32>
    %148 = vector.shape_cast %147 : vector<16xf32> to vector<16x1xf32>
    %149 = vector.extract_strided_slice %148 {offsets = [0, 0], sizes = [8, 1], strides = [1, 1]} : vector<16x1xf32> to vector<8x1xf32>
    %150 = vector.extract_strided_slice %148 {offsets = [8, 0], sizes = [8, 1], strides = [1, 1]} : vector<16x1xf32> to vector<8x1xf32>
    %151 = arith.addf %149, %150 : vector<8x1xf32>
    %cst_171 = arith.constant 6.51041686E-4 : f32
    %152 = vector.broadcast %cst_171 : f32 to vector<8x1xf32>
    %153 = arith.mulf %151, %152 : vector<8x1xf32>
    %154 = tpu.concatenate %153, %153 in 0 : vector<8x1xf32>, vector<8x1xf32> -> vector<16x1xf32>
    %155 = vector.broadcast %154 : vector<16x1xf32> to vector<16x768xf32>
    %156 = arith.subf %146, %155 : vector<16x768xf32>
    %157 = arith.mulf %156, %156 : vector<16x768xf32>
    %cst_172 = arith.constant dense<0.000000e+00> : vector<16xf32>
    %158 = vector.multi_reduction <add>, %157, %cst_172 [1] : vector<16x768xf32> to vector<16xf32>
    %159 = vector.shape_cast %158 : vector<16xf32> to vector<16x1xf32>
    %160 = vector.extract_strided_slice %159 {offsets = [0, 0], sizes = [8, 1], strides = [1, 1]} : vector<16x1xf32> to vector<8x1xf32>
    %161 = vector.extract_strided_slice %159 {offsets = [8, 0], sizes = [8, 1], strides = [1, 1]} : vector<16x1xf32> to vector<8x1xf32>
    %162 = arith.addf %160, %161 : vector<8x1xf32>
    %cst_173 = arith.constant 6.51041686E-4 : f32
    %163 = vector.broadcast %cst_173 : f32 to vector<8x1xf32>
    %164 = arith.mulf %162, %163 : vector<8x1xf32>
    %c0_174 = arith.constant 0 : index
    %c0_175 = arith.constant 0 : index
    %165 = vector.load %arg4[%c0_174, %c0_175] : memref<8x1xf32, #tpu.memory_space<vmem>>, vector<8x1xf32>
    %cst_176 = arith.constant 9.99999974E-6 : f32
    %166 = vector.broadcast %cst_176 : f32 to vector<8x1xf32>
    %167 = arith.addf %164, %166 : vector<8x1xf32>
    %168 = math.rsqrt %167 : vector<8x1xf32>
    %169 = arith.mulf %165, %168 : vector<8x1xf32>
    %170 = tpu.concatenate %169, %169 in 0 : vector<8x1xf32>, vector<8x1xf32> -> vector<16x1xf32>
    %c0_177 = arith.constant 0 : index
    %c0_178 = arith.constant 0 : index
    %171 = vector.load %arg5[%c0_177, %c0_178] : memref<8x1xf32, #tpu.memory_space<vmem>>, vector<8x1xf32>
    %172 = tpu.concatenate %171, %171 in 0 : vector<8x1xf32>, vector<8x1xf32> -> vector<16x1xf32>
    %173 = vector.broadcast %170 : vector<16x1xf32> to vector<16x768xf32>
    %174 = arith.mulf %156, %173 : vector<16x768xf32>
    %175 = vector.broadcast %172 : vector<16x1xf32> to vector<16x768xf32>
    %176 = arith.addf %174, %175 : vector<16x768xf32>
    %cst_179 = arith.constant 0.000000e+00 : f32
    %177 = vector.broadcast %cst_179 : f32 to vector<16x768xf32>
    %178 = arith.maximumf %176, %177 : vector<16x768xf32>
    %c0_180 = arith.constant 0 : index
    %c0_181 = arith.constant 0 : index
    %179 = vector.load %arg13[%c0_180, %c0_181] : memref<16x768xf32, #tpu.memory_space<vmem>>, vector<16x768xf32>
    tpu.vector_store %arg13[%c0_180, %c0_181], %178 {strides = array<i32>} : memref<16x768xf32, #tpu.memory_space<vmem>>, vector<16x768xf32>,
    %c0_182 = arith.constant 0 : index
    %c0_183 = arith.constant 0 : index
    %180 = vector.load %arg13[%c0_182, %c0_183] : memref<16x768xf32, #tpu.memory_space<vmem>>, vector<16x768xf32>
    %c0_184 = arith.constant 0 : index
    %c0_185 = arith.constant 0 : index
    %181 = vector.load %arg7[%c0_184, %c0_185] : memref<16x1xf32, #tpu.memory_space<vmem>>, vector<16x1xf32>
    %182 = tpu.concatenate %181, %181 in 0 : vector<16x1xf32>, vector<16x1xf32> -> vector<32x1xf32>
    %c0_186 = arith.constant 0 : index
    %c0_187 = arith.constant 0 : index
    %c0_188 = arith.constant 0 : index
    %183 = vector.load %arg6[%c0_186, %c0_187, %c0_188] : memref<3x32x16xf32, #tpu.memory_space<vmem>>, vector<1x32x16xf32>
    %184 = vector.shape_cast %183 : vector<1x32x16xf32> to vector<32x16xf32>
    %cst_189 = arith.constant dense<0.000000e+00> : vector<32x768xf32>
    %185 = tpu.matmul %184, %180, %cst_189 {dimension_numbers = #tpu.dot_dimension_numbers<[1], [0], [0], [1], [0, 0, 1, 1], [], []>} : vector<32x16xf32>, vector<16x768xf32>, vector<32x768xf32> -> vector<32x768xf32>
    %186 = vector.broadcast %182 : vector<32x1xf32> to vector<32x768xf32>
    %187 = arith.addf %185, %186 : vector<32x768xf32>
    %c0_190 = arith.constant 0 : index
    %c0_191 = arith.constant 0 : index
    %188 = vector.load %arg10[%c0_190, %c0_191] : memref<32x768xf32, #tpu.memory_space<vmem>>, vector<32x768xf32>
    tpu.vector_store %arg10[%c0_190, %c0_191], %187 {strides = array<i32>} : memref<32x768xf32, #tpu.memory_space<vmem>>, vector<32x768xf32>,
    %c1_192 = arith.constant 1 : index
    %c0_193 = arith.constant 0 : index
    %c0_194 = arith.constant 0 : index
    %189 = vector.load %arg6[%c1_192, %c0_193, %c0_194] : memref<3x32x16xf32, #tpu.memory_space<vmem>>, vector<1x32x16xf32>
    %190 = vector.shape_cast %189 : vector<1x32x16xf32> to vector<32x16xf32>
    %c0_i32_195 = arith.constant 0 : i32
    %c0_i32_196 = arith.constant 0 : i32
    %c0_i32_197 = arith.constant 0 : i32
    %c0_i32_198 = arith.constant 0 : i32
    %c0_i32_199 = arith.constant 0 : i32
    %191 = tpu.memref_slice %arg0[%c0_i32_195, %c0_i32_198, %c0_i32_199] : memref<3x768x256xf32, #tpu.memory_space<any>> -> memref<1x768x256xf32, #tpu.memory_space<any>>
    %192 = tpu.memref_squeeze %191 : memref<1x768x256xf32, #tpu.memory_space<any>> -> memref<768x256xf32, #tpu.memory_space<any>>
    %c0_i32_200 = arith.constant 0 : i32
    %c0_i32_201 = arith.constant 0 : i32
    %193 = tpu.memref_slice %arg11[%c0_i32_196, %c0_i32_200, %c0_i32_201] : memref<2x768x256xf32, #tpu.memory_space<vmem>> -> memref<1x768x256xf32, #tpu.memory_space<vmem>>
    %194 = tpu.memref_squeeze %193 : memref<1x768x256xf32, #tpu.memory_space<vmem>> -> memref<768x256xf32, #tpu.memory_space<vmem>>
    %195 = tpu.memref_slice %arg12[%c0_i32_197] : memref<2x!tpu.dma_semaphore, #tpu.memory_space<semaphore_mem>> -> memref<1x!tpu.dma_semaphore, #tpu.memory_space<semaphore_mem>>
    %196 = tpu.memref_squeeze %195 : memref<1x!tpu.dma_semaphore, #tpu.memory_space<semaphore_mem>> -> memref<!tpu.dma_semaphore, #tpu.memory_space<semaphore_mem>>
    tpu.enqueue_dma source(%192 : memref<768x256xf32, #tpu.memory_space<any>>) target(%194 : memref<768x256xf32, #tpu.memory_space<vmem>>) target_semaphore(%196 : memref<!tpu.dma_semaphore, #tpu.memory_space<semaphore_mem>>)
    %c0_i32_202 = arith.constant 0 : i32
    %c0_i32_203 = arith.constant 0 : i32
    %c0_i32_204 = arith.constant 0 : i32
    %c0_i32_205 = arith.constant 0 : i32
    %c0_i32_206 = arith.constant 0 : i32
    %197 = tpu.memref_slice %arg0[%c0_i32_202, %c0_i32_205, %c0_i32_206] : memref<3x768x256xf32, #tpu.memory_space<any>> -> memref<1x768x256xf32, #tpu.memory_space<any>>
    %198 = tpu.memref_squeeze %197 : memref<1x768x256xf32, #tpu.memory_space<any>> -> memref<768x256xf32, #tpu.memory_space<any>>
    %c0_i32_207 = arith.constant 0 : i32
    %c0_i32_208 = arith.constant 0 : i32
    %199 = tpu.memref_slice %arg11[%c0_i32_203, %c0_i32_207, %c0_i32_208] : memref<2x768x256xf32, #tpu.memory_space<vmem>> -> memref<1x768x256xf32, #tpu.memory_space<vmem>>
    %200 = tpu.memref_squeeze %199 : memref<1x768x256xf32, #tpu.memory_space<vmem>> -> memref<768x256xf32, #tpu.memory_space<vmem>>
    %201 = tpu.memref_slice %arg12[%c0_i32_204] : memref<2x!tpu.dma_semaphore, #tpu.memory_space<semaphore_mem>> -> memref<1x!tpu.dma_semaphore, #tpu.memory_space<semaphore_mem>>
    %202 = tpu.memref_squeeze %201 : memref<1x!tpu.dma_semaphore, #tpu.memory_space<semaphore_mem>> -> memref<!tpu.dma_semaphore, #tpu.memory_space<semaphore_mem>>
    tpu.wait_dma2 semaphore(%202 : memref<!tpu.dma_semaphore, #tpu.memory_space<semaphore_mem>>) src(%198 : memref<768x256xf32, #tpu.memory_space<any>>) dst(%200 : memref<768x256xf32, #tpu.memory_space<vmem>>)
    %c1_i32_209 = arith.constant 1 : i32
    %c1_i32_210 = arith.constant 1 : i32
    %c1_i32_211 = arith.constant 1 : i32
    %c0_i32_212 = arith.constant 0 : i32
    %c0_i32_213 = arith.constant 0 : i32
    %203 = tpu.memref_slice %arg0[%c1_i32_209, %c0_i32_212, %c0_i32_213] : memref<3x768x256xf32, #tpu.memory_space<any>> -> memref<1x768x256xf32, #tpu.memory_space<any>>
    %204 = tpu.memref_squeeze %203 : memref<1x768x256xf32, #tpu.memory_space<any>> -> memref<768x256xf32, #tpu.memory_space<any>>
    %c0_i32_214 = arith.constant 0 : i32
    %c0_i32_215 = arith.constant 0 : i32
    %205 = tpu.memref_slice %arg11[%c1_i32_210, %c0_i32_214, %c0_i32_215] : memref<2x768x256xf32, #tpu.memory_space<vmem>> -> memref<1x768x256xf32, #tpu.memory_space<vmem>>
    %206 = tpu.memref_squeeze %205 : memref<1x768x256xf32, #tpu.memory_space<vmem>> -> memref<768x256xf32, #tpu.memory_space<vmem>>
    %207 = tpu.memref_slice %arg12[%c1_i32_211] : memref<2x!tpu.dma_semaphore, #tpu.memory_space<semaphore_mem>> -> memref<1x!tpu.dma_semaphore, #tpu.memory_space<semaphore_mem>>
    %208 = tpu.memref_squeeze %207 : memref<1x!tpu.dma_semaphore, #tpu.memory_space<semaphore_mem>> -> memref<!tpu.dma_semaphore, #tpu.memory_space<semaphore_mem>>
    tpu.enqueue_dma source(%204 : memref<768x256xf32, #tpu.memory_space<any>>) target(%206 : memref<768x256xf32, #tpu.memory_space<vmem>>) target_semaphore(%208 : memref<!tpu.dma_semaphore, #tpu.memory_space<semaphore_mem>>)
    %c0_216 = arith.constant 0 : index
    %c0_217 = arith.constant 0 : index
    %c0_218 = arith.constant 0 : index
    %209 = vector.load %arg11[%c0_216, %c0_217, %c0_218] : memref<2x768x256xf32, #tpu.memory_space<vmem>>, vector<1x768x256xf32>
    %210 = vector.shape_cast %209 : vector<1x768x256xf32> to vector<768x256xf32>
    %cst_219 = arith.constant dense<0.000000e+00> : vector<16x256xf32>
    %211 = tpu.matmul %180, %210, %cst_219 {dimension_numbers = #tpu.dot_dimension_numbers<[1], [0], [0], [1], [0, 0, 1, 1], [], []>} : vector<16x768xf32>, vector<768x256xf32>, vector<16x256xf32> -> vector<16x256xf32>
    %c0_220 = arith.constant 0 : index
    %c0_221 = arith.constant 0 : index
    %212 = vector.load %arg14[%c0_220, %c0_221] : memref<16x768xf32, #tpu.memory_space<vmem>>, vector<16x256xf32>
    tpu.vector_store %arg14[%c0_220, %c0_221], %211 {strides = array<i32>} : memref<16x768xf32, #tpu.memory_space<vmem>>, vector<16x256xf32>,
    %c0_222 = arith.constant 0 : index
    %c0_223 = arith.constant 0 : index
    %213 = vector.load %arg10[%c0_222, %c0_223] : memref<32x768xf32, #tpu.memory_space<vmem>>, vector<32x256xf32>
    %cst_224 = arith.constant dense<0.000000e+00> : vector<32x256xf32>
    %214 = tpu.matmul %190, %211, %cst_224 {dimension_numbers = #tpu.dot_dimension_numbers<[1], [0], [0], [1], [0, 0, 1, 1], [], []>} : vector<32x16xf32>, vector<16x256xf32>, vector<32x256xf32> -> vector<32x256xf32>
    %215 = arith.addf %213, %214 : vector<32x256xf32>
    %c0_225 = arith.constant 0 : index
    %c0_226 = arith.constant 0 : index
    %216 = vector.load %arg10[%c0_225, %c0_226] : memref<32x768xf32, #tpu.memory_space<vmem>>, vector<32x256xf32>
    tpu.vector_store %arg10[%c0_225, %c0_226], %215 {strides = array<i32>} : memref<32x768xf32, #tpu.memory_space<vmem>>, vector<32x256xf32>,
    %c1_i32_227 = arith.constant 1 : i32
    %c1_i32_228 = arith.constant 1 : i32
    %c1_i32_229 = arith.constant 1 : i32
    %c0_i32_230 = arith.constant 0 : i32
    %c0_i32_231 = arith.constant 0 : i32
    %217 = tpu.memref_slice %arg0[%c1_i32_227, %c0_i32_230, %c0_i32_231] : memref<3x768x256xf32, #tpu.memory_space<any>> -> memref<1x768x256xf32, #tpu.memory_space<any>>
    %218 = tpu.memref_squeeze %217 : memref<1x768x256xf32, #tpu.memory_space<any>> -> memref<768x256xf32, #tpu.memory_space<any>>
    %c0_i32_232 = arith.constant 0 : i32
    %c0_i32_233 = arith.constant 0 : i32
    %219 = tpu.memref_slice %arg11[%c1_i32_228, %c0_i32_232, %c0_i32_233] : memref<2x768x256xf32, #tpu.memory_space<vmem>> -> memref<1x768x256xf32, #tpu.memory_space<vmem>>
    %220 = tpu.memref_squeeze %219 : memref<1x768x256xf32, #tpu.memory_space<vmem>> -> memref<768x256xf32, #tpu.memory_space<vmem>>
    %221 = tpu.memref_slice %arg12[%c1_i32_229] : memref<2x!tpu.dma_semaphore, #tpu.memory_space<semaphore_mem>> -> memref<1x!tpu.dma_semaphore, #tpu.memory_space<semaphore_mem>>
    %222 = tpu.memref_squeeze %221 : memref<1x!tpu.dma_semaphore, #tpu.memory_space<semaphore_mem>> -> memref<!tpu.dma_semaphore, #tpu.memory_space<semaphore_mem>>
    tpu.wait_dma2 semaphore(%222 : memref<!tpu.dma_semaphore, #tpu.memory_space<semaphore_mem>>) src(%218 : memref<768x256xf32, #tpu.memory_space<any>>) dst(%220 : memref<768x256xf32, #tpu.memory_space<vmem>>)
    %c2_i32_234 = arith.constant 2 : i32
    %c0_i32_235 = arith.constant 0 : i32
    %c0_i32_236 = arith.constant 0 : i32
    %c0_i32_237 = arith.constant 0 : i32
    %c0_i32_238 = arith.constant 0 : i32
    %223 = tpu.memref_slice %arg0[%c2_i32_234, %c0_i32_237, %c0_i32_238] : memref<3x768x256xf32, #tpu.memory_space<any>> -> memref<1x768x256xf32, #tpu.memory_space<any>>
    %224 = tpu.memref_squeeze %223 : memref<1x768x256xf32, #tpu.memory_space<any>> -> memref<768x256xf32, #tpu.memory_space<any>>
    %c0_i32_239 = arith.constant 0 : i32
    %c0_i32_240 = arith.constant 0 : i32
    %225 = tpu.memref_slice %arg11[%c0_i32_235, %c0_i32_239, %c0_i32_240] : memref<2x768x256xf32, #tpu.memory_space<vmem>> -> memref<1x768x256xf32, #tpu.memory_space<vmem>>
    %226 = tpu.memref_squeeze %225 : memref<1x768x256xf32, #tpu.memory_space<vmem>> -> memref<768x256xf32, #tpu.memory_space<vmem>>
    %227 = tpu.memref_slice %arg12[%c0_i32_236] : memref<2x!tpu.dma_semaphore, #tpu.memory_space<semaphore_mem>> -> memref<1x!tpu.dma_semaphore, #tpu.memory_space<semaphore_mem>>
    %228 = tpu.memref_squeeze %227 : memref<1x!tpu.dma_semaphore, #tpu.memory_space<semaphore_mem>> -> memref<!tpu.dma_semaphore, #tpu.memory_space<semaphore_mem>>
    tpu.enqueue_dma source(%224 : memref<768x256xf32, #tpu.memory_space<any>>) target(%226 : memref<768x256xf32, #tpu.memory_space<vmem>>) target_semaphore(%228 : memref<!tpu.dma_semaphore, #tpu.memory_space<semaphore_mem>>)
    %c1_241 = arith.constant 1 : index
    %c0_242 = arith.constant 0 : index
    %c0_243 = arith.constant 0 : index
    %229 = vector.load %arg11[%c1_241, %c0_242, %c0_243] : memref<2x768x256xf32, #tpu.memory_space<vmem>>, vector<1x768x256xf32>
    %230 = vector.shape_cast %229 : vector<1x768x256xf32> to vector<768x256xf32>
    %cst_244 = arith.constant dense<0.000000e+00> : vector<16x256xf32>
    %231 = tpu.matmul %180, %230, %cst_244 {dimension_numbers = #tpu.dot_dimension_numbers<[1], [0], [0], [1], [0, 0, 1, 1], [], []>} : vector<16x768xf32>, vector<768x256xf32>, vector<16x256xf32> -> vector<16x256xf32>
    %c0_245 = arith.constant 0 : index
    %c256_246 = arith.constant 256 : index
    %232 = vector.load %arg14[%c0_245, %c256_246] : memref<16x768xf32, #tpu.memory_space<vmem>>, vector<16x256xf32>
    tpu.vector_store %arg14[%c0_245, %c256_246], %231 {strides = array<i32>} : memref<16x768xf32, #tpu.memory_space<vmem>>, vector<16x256xf32>,
    %c0_247 = arith.constant 0 : index
    %c256_248 = arith.constant 256 : index
    %233 = vector.load %arg10[%c0_247, %c256_248] : memref<32x768xf32, #tpu.memory_space<vmem>>, vector<32x256xf32>
    %cst_249 = arith.constant dense<0.000000e+00> : vector<32x256xf32>
    %234 = tpu.matmul %190, %231, %cst_249 {dimension_numbers = #tpu.dot_dimension_numbers<[1], [0], [0], [1], [0, 0, 1, 1], [], []>} : vector<32x16xf32>, vector<16x256xf32>, vector<32x256xf32> -> vector<32x256xf32>
    %235 = arith.addf %233, %234 : vector<32x256xf32>
    %c0_250 = arith.constant 0 : index
    %c256_251 = arith.constant 256 : index
    %236 = vector.load %arg10[%c0_250, %c256_251] : memref<32x768xf32, #tpu.memory_space<vmem>>, vector<32x256xf32>
    tpu.vector_store %arg10[%c0_250, %c256_251], %235 {strides = array<i32>} : memref<32x768xf32, #tpu.memory_space<vmem>>, vector<32x256xf32>,
    %c2_i32_252 = arith.constant 2 : i32
    %c0_i32_253 = arith.constant 0 : i32
    %c0_i32_254 = arith.constant 0 : i32
    %c0_i32_255 = arith.constant 0 : i32
    %c0_i32_256 = arith.constant 0 : i32
    %237 = tpu.memref_slice %arg0[%c2_i32_252, %c0_i32_255, %c0_i32_256] : memref<3x768x256xf32, #tpu.memory_space<any>> -> memref<1x768x256xf32, #tpu.memory_space<any>>
    %238 = tpu.memref_squeeze %237 : memref<1x768x256xf32, #tpu.memory_space<any>> -> memref<768x256xf32, #tpu.memory_space<any>>
    %c0_i32_257 = arith.constant 0 : i32
    %c0_i32_258 = arith.constant 0 : i32
    %239 = tpu.memref_slice %arg11[%c0_i32_253, %c0_i32_257, %c0_i32_258] : memref<2x768x256xf32, #tpu.memory_space<vmem>> -> memref<1x768x256xf32, #tpu.memory_space<vmem>>
    %240 = tpu.memref_squeeze %239 : memref<1x768x256xf32, #tpu.memory_space<vmem>> -> memref<768x256xf32, #tpu.memory_space<vmem>>
    %241 = tpu.memref_slice %arg12[%c0_i32_254] : memref<2x!tpu.dma_semaphore, #tpu.memory_space<semaphore_mem>> -> memref<1x!tpu.dma_semaphore, #tpu.memory_space<semaphore_mem>>
    %242 = tpu.memref_squeeze %241 : memref<1x!tpu.dma_semaphore, #tpu.memory_space<semaphore_mem>> -> memref<!tpu.dma_semaphore, #tpu.memory_space<semaphore_mem>>
    tpu.wait_dma2 semaphore(%242 : memref<!tpu.dma_semaphore, #tpu.memory_space<semaphore_mem>>) src(%238 : memref<768x256xf32, #tpu.memory_space<any>>) dst(%240 : memref<768x256xf32, #tpu.memory_space<vmem>>)
    %c0_259 = arith.constant 0 : index
    %c0_260 = arith.constant 0 : index
    %c0_261 = arith.constant 0 : index
    %243 = vector.load %arg11[%c0_259, %c0_260, %c0_261] : memref<2x768x256xf32, #tpu.memory_space<vmem>>, vector<1x768x256xf32>
    %244 = vector.shape_cast %243 : vector<1x768x256xf32> to vector<768x256xf32>
    %cst_262 = arith.constant dense<0.000000e+00> : vector<16x256xf32>
    %245 = tpu.matmul %180, %244, %cst_262 {dimension_numbers = #tpu.dot_dimension_numbers<[1], [0], [0], [1], [0, 0, 1, 1], [], []>} : vector<16x768xf32>, vector<768x256xf32>, vector<16x256xf32> -> vector<16x256xf32>
    %c0_263 = arith.constant 0 : index
    %c512_264 = arith.constant 512 : index
    %246 = vector.load %arg14[%c0_263, %c512_264] : memref<16x768xf32, #tpu.memory_space<vmem>>, vector<16x256xf32>
    tpu.vector_store %arg14[%c0_263, %c512_264], %245 {strides = array<i32>} : memref<16x768xf32, #tpu.memory_space<vmem>>, vector<16x256xf32>,
    %c0_265 = arith.constant 0 : index
    %c512_266 = arith.constant 512 : index
    %247 = vector.load %arg10[%c0_265, %c512_266] : memref<32x768xf32, #tpu.memory_space<vmem>>, vector<32x256xf32>
    %cst_267 = arith.constant dense<0.000000e+00> : vector<32x256xf32>
    %248 = tpu.matmul %190, %245, %cst_267 {dimension_numbers = #tpu.dot_dimension_numbers<[1], [0], [0], [1], [0, 0, 1, 1], [], []>} : vector<32x16xf32>, vector<16x256xf32>, vector<32x256xf32> -> vector<32x256xf32>
    %249 = arith.addf %247, %248 : vector<32x256xf32>
    %c0_268 = arith.constant 0 : index
    %c512_269 = arith.constant 512 : index
    %250 = vector.load %arg10[%c0_268, %c512_269] : memref<32x768xf32, #tpu.memory_space<vmem>>, vector<32x256xf32>
    tpu.vector_store %arg10[%c0_268, %c512_269], %249 {strides = array<i32>} : memref<32x768xf32, #tpu.memory_space<vmem>>, vector<32x256xf32>,
    %c2_270 = arith.constant 2 : index
    %c0_271 = arith.constant 0 : index
    %c0_272 = arith.constant 0 : index
    %251 = vector.load %arg6[%c2_270, %c0_271, %c0_272] : memref<3x32x16xf32, #tpu.memory_space<vmem>>, vector<1x32x16xf32>
    %252 = vector.shape_cast %251 : vector<1x32x16xf32> to vector<32x16xf32>
    %c0_273 = arith.constant 0 : index
    %c0_274 = arith.constant 0 : index
    %253 = vector.load %arg14[%c0_273, %c0_274] : memref<16x768xf32, #tpu.memory_space<vmem>>, vector<16x768xf32>
    %c0_i32_275 = arith.constant 0 : i32
    %c0_i32_276 = arith.constant 0 : i32
    %c0_i32_277 = arith.constant 0 : i32
    %c0_i32_278 = arith.constant 0 : i32
    %c0_i32_279 = arith.constant 0 : i32
    %254 = tpu.memref_slice %arg0[%c0_i32_275, %c0_i32_278, %c0_i32_279] : memref<3x768x256xf32, #tpu.memory_space<any>> -> memref<1x768x256xf32, #tpu.memory_space<any>>
    %255 = tpu.memref_squeeze %254 : memref<1x768x256xf32, #tpu.memory_space<any>> -> memref<768x256xf32, #tpu.memory_space<any>>
    %c0_i32_280 = arith.constant 0 : i32
    %c0_i32_281 = arith.constant 0 : i32
    %256 = tpu.memref_slice %arg11[%c0_i32_276, %c0_i32_280, %c0_i32_281] : memref<2x768x256xf32, #tpu.memory_space<vmem>> -> memref<1x768x256xf32, #tpu.memory_space<vmem>>
    %257 = tpu.memref_squeeze %256 : memref<1x768x256xf32, #tpu.memory_space<vmem>> -> memref<768x256xf32, #tpu.memory_space<vmem>>
    %258 = tpu.memref_slice %arg12[%c0_i32_277] : memref<2x!tpu.dma_semaphore, #tpu.memory_space<semaphore_mem>> -> memref<1x!tpu.dma_semaphore, #tpu.memory_space<semaphore_mem>>
    %259 = tpu.memref_squeeze %258 : memref<1x!tpu.dma_semaphore, #tpu.memory_space<semaphore_mem>> -> memref<!tpu.dma_semaphore, #tpu.memory_space<semaphore_mem>>
    tpu.enqueue_dma source(%255 : memref<768x256xf32, #tpu.memory_space<any>>) target(%257 : memref<768x256xf32, #tpu.memory_space<vmem>>) target_semaphore(%259 : memref<!tpu.dma_semaphore, #tpu.memory_space<semaphore_mem>>)
    %c0_i32_282 = arith.constant 0 : i32
    %c0_i32_283 = arith.constant 0 : i32
    %c0_i32_284 = arith.constant 0 : i32
    %c0_i32_285 = arith.constant 0 : i32
    %c0_i32_286 = arith.constant 0 : i32
    %260 = tpu.memref_slice %arg0[%c0_i32_282, %c0_i32_285, %c0_i32_286] : memref<3x768x256xf32, #tpu.memory_space<any>> -> memref<1x768x256xf32, #tpu.memory_space<any>>
    %261 = tpu.memref_squeeze %260 : memref<1x768x256xf32, #tpu.memory_space<any>> -> memref<768x256xf32, #tpu.memory_space<any>>
    %c0_i32_287 = arith.constant 0 : i32
    %c0_i32_288 = arith.constant 0 : i32
    %262 = tpu.memref_slice %arg11[%c0_i32_283, %c0_i32_287, %c0_i32_288] : memref<2x768x256xf32, #tpu.memory_space<vmem>> -> memref<1x768x256xf32, #tpu.memory_space<vmem>>
    %263 = tpu.memref_squeeze %262 : memref<1x768x256xf32, #tpu.memory_space<vmem>> -> memref<768x256xf32, #tpu.memory_space<vmem>>
    %264 = tpu.memref_slice %arg12[%c0_i32_284] : memref<2x!tpu.dma_semaphore, #tpu.memory_space<semaphore_mem>> -> memref<1x!tpu.dma_semaphore, #tpu.memory_space<semaphore_mem>>
    %265 = tpu.memref_squeeze %264 : memref<1x!tpu.dma_semaphore, #tpu.memory_space<semaphore_mem>> -> memref<!tpu.dma_semaphore, #tpu.memory_space<semaphore_mem>>
    tpu.wait_dma2 semaphore(%265 : memref<!tpu.dma_semaphore, #tpu.memory_space<semaphore_mem>>) src(%261 : memref<768x256xf32, #tpu.memory_space<any>>) dst(%263 : memref<768x256xf32, #tpu.memory_space<vmem>>)
    %c1_i32_289 = arith.constant 1 : i32
    %c1_i32_290 = arith.constant 1 : i32
    %c1_i32_291 = arith.constant 1 : i32
    %c0_i32_292 = arith.constant 0 : i32
    %c0_i32_293 = arith.constant 0 : i32
    %266 = tpu.memref_slice %arg0[%c1_i32_289, %c0_i32_292, %c0_i32_293] : memref<3x768x256xf32, #tpu.memory_space<any>> -> memref<1x768x256xf32, #tpu.memory_space<any>>
    %267 = tpu.memref_squeeze %266 : memref<1x768x256xf32, #tpu.memory_space<any>> -> memref<768x256xf32, #tpu.memory_space<any>>
    %c0_i32_294 = arith.constant 0 : i32
    %c0_i32_295 = arith.constant 0 : i32
    %268 = tpu.memref_slice %arg11[%c1_i32_290, %c0_i32_294, %c0_i32_295] : memref<2x768x256xf32, #tpu.memory_space<vmem>> -> memref<1x768x256xf32, #tpu.memory_space<vmem>>
    %269 = tpu.memref_squeeze %268 : memref<1x768x256xf32, #tpu.memory_space<vmem>> -> memref<768x256xf32, #tpu.memory_space<vmem>>
    %270 = tpu.memref_slice %arg12[%c1_i32_291] : memref<2x!tpu.dma_semaphore, #tpu.memory_space<semaphore_mem>> -> memref<1x!tpu.dma_semaphore, #tpu.memory_space<semaphore_mem>>
    %271 = tpu.memref_squeeze %270 : memref<1x!tpu.dma_semaphore, #tpu.memory_space<semaphore_mem>> -> memref<!tpu.dma_semaphore, #tpu.memory_space<semaphore_mem>>
    tpu.enqueue_dma source(%267 : memref<768x256xf32, #tpu.memory_space<any>>) target(%269 : memref<768x256xf32, #tpu.memory_space<vmem>>) target_semaphore(%271 : memref<!tpu.dma_semaphore, #tpu.memory_space<semaphore_mem>>)
    %c0_296 = arith.constant 0 : index
    %c0_297 = arith.constant 0 : index
    %c0_298 = arith.constant 0 : index
    %272 = vector.load %arg11[%c0_296, %c0_297, %c0_298] : memref<2x768x256xf32, #tpu.memory_space<vmem>>, vector<1x768x256xf32>
    %273 = vector.shape_cast %272 : vector<1x768x256xf32> to vector<768x256xf32>
    %cst_299 = arith.constant dense<0.000000e+00> : vector<16x256xf32>
    %274 = tpu.matmul %253, %273, %cst_299 {dimension_numbers = #tpu.dot_dimension_numbers<[1], [0], [0], [1], [0, 0, 1, 1], [], []>} : vector<16x768xf32>, vector<768x256xf32>, vector<16x256xf32> -> vector<16x256xf32>
    %cst_300 = arith.constant 2.000000e+00 : f32
    %275 = vector.broadcast %cst_300 : f32 to vector<16x256xf32>
    %276 = arith.mulf %275, %274 : vector<16x256xf32>
    %c0_301 = arith.constant 0 : index
    %c0_302 = arith.constant 0 : index
    %277 = vector.load %arg13[%c0_301, %c0_302] : memref<16x768xf32, #tpu.memory_space<vmem>>, vector<16x256xf32>
    %278 = arith.subf %276, %277 : vector<16x256xf32>
    %c0_303 = arith.constant 0 : index
    %c0_304 = arith.constant 0 : index
    %279 = vector.load %arg15[%c0_303, %c0_304] : memref<16x768xf32, #tpu.memory_space<vmem>>, vector<16x256xf32>
    tpu.vector_store %arg15[%c0_303, %c0_304], %278 {strides = array<i32>} : memref<16x768xf32, #tpu.memory_space<vmem>>, vector<16x256xf32>,
    %c0_305 = arith.constant 0 : index
    %c0_306 = arith.constant 0 : index
    %280 = vector.load %arg10[%c0_305, %c0_306] : memref<32x768xf32, #tpu.memory_space<vmem>>, vector<32x256xf32>
    %cst_307 = arith.constant dense<0.000000e+00> : vector<32x256xf32>
    %281 = tpu.matmul %252, %278, %cst_307 {dimension_numbers = #tpu.dot_dimension_numbers<[1], [0], [0], [1], [0, 0, 1, 1], [], []>} : vector<32x16xf32>, vector<16x256xf32>, vector<32x256xf32> -> vector<32x256xf32>
    %282 = arith.addf %280, %281 : vector<32x256xf32>
    %c0_308 = arith.constant 0 : index
    %c0_309 = arith.constant 0 : index
    %283 = vector.load %arg10[%c0_308, %c0_309] : memref<32x768xf32, #tpu.memory_space<vmem>>, vector<32x256xf32>
    tpu.vector_store %arg10[%c0_308, %c0_309], %282 {strides = array<i32>} : memref<32x768xf32, #tpu.memory_space<vmem>>, vector<32x256xf32>,
    %c1_i32_310 = arith.constant 1 : i32
    %c1_i32_311 = arith.constant 1 : i32
    %c1_i32_312 = arith.constant 1 : i32
    %c0_i32_313 = arith.constant 0 : i32
    %c0_i32_314 = arith.constant 0 : i32
    %284 = tpu.memref_slice %arg0[%c1_i32_310, %c0_i32_313, %c0_i32_314] : memref<3x768x256xf32, #tpu.memory_space<any>> -> memref<1x768x256xf32, #tpu.memory_space<any>>
    %285 = tpu.memref_squeeze %284 : memref<1x768x256xf32, #tpu.memory_space<any>> -> memref<768x256xf32, #tpu.memory_space<any>>
    %c0_i32_315 = arith.constant 0 : i32
    %c0_i32_316 = arith.constant 0 : i32
    %286 = tpu.memref_slice %arg11[%c1_i32_311, %c0_i32_315, %c0_i32_316] : memref<2x768x256xf32, #tpu.memory_space<vmem>> -> memref<1x768x256xf32, #tpu.memory_space<vmem>>
    %287 = tpu.memref_squeeze %286 : memref<1x768x256xf32, #tpu.memory_space<vmem>> -> memref<768x256xf32, #tpu.memory_space<vmem>>
    %288 = tpu.memref_slice %arg12[%c1_i32_312] : memref<2x!tpu.dma_semaphore, #tpu.memory_space<semaphore_mem>> -> memref<1x!tpu.dma_semaphore, #tpu.memory_space<semaphore_mem>>
    %289 = tpu.memref_squeeze %288 : memref<1x!tpu.dma_semaphore, #tpu.memory_space<semaphore_mem>> -> memref<!tpu.dma_semaphore, #tpu.memory_space<semaphore_mem>>
    tpu.wait_dma2 semaphore(%289 : memref<!tpu.dma_semaphore, #tpu.memory_space<semaphore_mem>>) src(%285 : memref<768x256xf32, #tpu.memory_space<any>>) dst(%287 : memref<768x256xf32, #tpu.memory_space<vmem>>)
    %c2_i32_317 = arith.constant 2 : i32
    %c0_i32_318 = arith.constant 0 : i32
    %c0_i32_319 = arith.constant 0 : i32
    %c0_i32_320 = arith.constant 0 : i32
    %c0_i32_321 = arith.constant 0 : i32
    %290 = tpu.memref_slice %arg0[%c2_i32_317, %c0_i32_320, %c0_i32_321] : memref<3x768x256xf32, #tpu.memory_space<any>> -> memref<1x768x256xf32, #tpu.memory_space<any>>
    %291 = tpu.memref_squeeze %290 : memref<1x768x256xf32, #tpu.memory_space<any>> -> memref<768x256xf32, #tpu.memory_space<any>>
    %c0_i32_322 = arith.constant 0 : i32
    %c0_i32_323 = arith.constant 0 : i32
    %292 = tpu.memref_slice %arg11[%c0_i32_318, %c0_i32_322, %c0_i32_323] : memref<2x768x256xf32, #tpu.memory_space<vmem>> -> memref<1x768x256xf32, #tpu.memory_space<vmem>>
    %293 = tpu.memref_squeeze %292 : memref<1x768x256xf32, #tpu.memory_space<vmem>> -> memref<768x256xf32, #tpu.memory_space<vmem>>
    %294 = tpu.memref_slice %arg12[%c0_i32_319] : memref<2x!tpu.dma_semaphore, #tpu.memory_space<semaphore_mem>> -> memref<1x!tpu.dma_semaphore, #tpu.memory_space<semaphore_mem>>
    %295 = tpu.memref_squeeze %294 : memref<1x!tpu.dma_semaphore, #tpu.memory_space<semaphore_mem>> -> memref<!tpu.dma_semaphore, #tpu.memory_space<semaphore_mem>>
    tpu.enqueue_dma source(%291 : memref<768x256xf32, #tpu.memory_space<any>>) target(%293 : memref<768x256xf32, #tpu.memory_space<vmem>>) target_semaphore(%295 : memref<!tpu.dma_semaphore, #tpu.memory_space<semaphore_mem>>)
    %c1_324 = arith.constant 1 : index
    %c0_325 = arith.constant 0 : index
    %c0_326 = arith.constant 0 : index
    %296 = vector.load %arg11[%c1_324, %c0_325, %c0_326] : memref<2x768x256xf32, #tpu.memory_space<vmem>>, vector<1x768x256xf32>
    %297 = vector.shape_cast %296 : vector<1x768x256xf32> to vector<768x256xf32>
    %cst_327 = arith.constant dense<0.000000e+00> : vector<16x256xf32>
    %298 = tpu.matmul %253, %297, %cst_327 {dimension_numbers = #tpu.dot_dimension_numbers<[1], [0], [0], [1], [0, 0, 1, 1], [], []>} : vector<16x768xf32>, vector<768x256xf32>, vector<16x256xf32> -> vector<16x256xf32>
    %cst_328 = arith.constant 2.000000e+00 : f32
    %299 = vector.broadcast %cst_328 : f32 to vector<16x256xf32>
    %300 = arith.mulf %299, %298 : vector<16x256xf32>
    %c0_329 = arith.constant 0 : index
    %c256_330 = arith.constant 256 : index
    %301 = vector.load %arg13[%c0_329, %c256_330] : memref<16x768xf32, #tpu.memory_space<vmem>>, vector<16x256xf32>
    %302 = arith.subf %300, %301 : vector<16x256xf32>
    %c0_331 = arith.constant 0 : index
    %c256_332 = arith.constant 256 : index
    %303 = vector.load %arg15[%c0_331, %c256_332] : memref<16x768xf32, #tpu.memory_space<vmem>>, vector<16x256xf32>
    tpu.vector_store %arg15[%c0_331, %c256_332], %302 {strides = array<i32>} : memref<16x768xf32, #tpu.memory_space<vmem>>, vector<16x256xf32>,
    %c0_333 = arith.constant 0 : index
    %c256_334 = arith.constant 256 : index
    %304 = vector.load %arg10[%c0_333, %c256_334] : memref<32x768xf32, #tpu.memory_space<vmem>>, vector<32x256xf32>
    %cst_335 = arith.constant dense<0.000000e+00> : vector<32x256xf32>
    %305 = tpu.matmul %252, %302, %cst_335 {dimension_numbers = #tpu.dot_dimension_numbers<[1], [0], [0], [1], [0, 0, 1, 1], [], []>} : vector<32x16xf32>, vector<16x256xf32>, vector<32x256xf32> -> vector<32x256xf32>
    %306 = arith.addf %304, %305 : vector<32x256xf32>
    %c0_336 = arith.constant 0 : index
    %c256_337 = arith.constant 256 : index
    %307 = vector.load %arg10[%c0_336, %c256_337] : memref<32x768xf32, #tpu.memory_space<vmem>>, vector<32x256xf32>
    tpu.vector_store %arg10[%c0_336, %c256_337], %306 {strides = array<i32>} : memref<32x768xf32, #tpu.memory_space<vmem>>, vector<32x256xf32>,
    %c2_i32_338 = arith.constant 2 : i32
    %c0_i32_339 = arith.constant 0 : i32
    %c0_i32_340 = arith.constant 0 : i32
    %c0_i32_341 = arith.constant 0 : i32
    %c0_i32_342 = arith.constant 0 : i32
    %308 = tpu.memref_slice %arg0[%c2_i32_338, %c0_i32_341, %c0_i32_342] : memref<3x768x256xf32, #tpu.memory_space<any>> -> memref<1x768x256xf32, #tpu.memory_space<any>>
    %309 = tpu.memref_squeeze %308 : memref<1x768x256xf32, #tpu.memory_space<any>> -> memref<768x256xf32, #tpu.memory_space<any>>
    %c0_i32_343 = arith.constant 0 : i32
    %c0_i32_344 = arith.constant 0 : i32
    %310 = tpu.memref_slice %arg11[%c0_i32_339, %c0_i32_343, %c0_i32_344] : memref<2x768x256xf32, #tpu.memory_space<vmem>> -> memref<1x768x256xf32, #tpu.memory_space<vmem>>
    %311 = tpu.memref_squeeze %310 : memref<1x768x256xf32, #tpu.memory_space<vmem>> -> memref<768x256xf32, #tpu.memory_space<vmem>>
    %312 = tpu.memref_slice %arg12[%c0_i32_340] : memref<2x!tpu.dma_semaphore, #tpu.memory_space<semaphore_mem>> -> memref<1x!tpu.dma_semaphore, #tpu.memory_space<semaphore_mem>>
    %313 = tpu.memref_squeeze %312 : memref<1x!tpu.dma_semaphore, #tpu.memory_space<semaphore_mem>> -> memref<!tpu.dma_semaphore, #tpu.memory_space<semaphore_mem>>
    tpu.wait_dma2 semaphore(%313 : memref<!tpu.dma_semaphore, #tpu.memory_space<semaphore_mem>>) src(%309 : memref<768x256xf32, #tpu.memory_space<any>>) dst(%311 : memref<768x256xf32, #tpu.memory_space<vmem>>)
    %c0_345 = arith.constant 0 : index
    %c0_346 = arith.constant 0 : index
    %c0_347 = arith.constant 0 : index
    %314 = vector.load %arg11[%c0_345, %c0_346, %c0_347] : memref<2x768x256xf32, #tpu.memory_space<vmem>>, vector<1x768x256xf32>
    %315 = vector.shape_cast %314 : vector<1x768x256xf32> to vector<768x256xf32>
    %cst_348 = arith.constant dense<0.000000e+00> : vector<16x256xf32>
    %316 = tpu.matmul %253, %315, %cst_348 {dimension_numbers = #tpu.dot_dimension_numbers<[1], [0], [0], [1], [0, 0, 1, 1], [], []>} : vector<16x768xf32>, vector<768x256xf32>, vector<16x256xf32> -> vector<16x256xf32>
    %cst_349 = arith.constant 2.000000e+00 : f32
    %317 = vector.broadcast %cst_349 : f32 to vector<16x256xf32>
    %318 = arith.mulf %317, %316 : vector<16x256xf32>
    %c0_350 = arith.constant 0 : index
    %c512_351 = arith.constant 512 : index
    %319 = vector.load %arg13[%c0_350, %c512_351] : memref<16x768xf32, #tpu.memory_space<vmem>>, vector<16x256xf32>
    %320 = arith.subf %318, %319 : vector<16x256xf32>
    %c0_352 = arith.constant 0 : index
    %c512_353 = arith.constant 512 : index
    %321 = vector.load %arg15[%c0_352, %c512_353] : memref<16x768xf32, #tpu.memory_space<vmem>>, vector<16x256xf32>
    tpu.vector_store %arg15[%c0_352, %c512_353], %320 {strides = array<i32>} : memref<16x768xf32, #tpu.memory_space<vmem>>, vector<16x256xf32>,
    %c0_354 = arith.constant 0 : index
    %c512_355 = arith.constant 512 : index
    %322 = vector.load %arg10[%c0_354, %c512_355] : memref<32x768xf32, #tpu.memory_space<vmem>>, vector<32x256xf32>
    %cst_356 = arith.constant dense<0.000000e+00> : vector<32x256xf32>
    %323 = tpu.matmul %252, %320, %cst_356 {dimension_numbers = #tpu.dot_dimension_numbers<[1], [0], [0], [1], [0, 0, 1, 1], [], []>} : vector<32x16xf32>, vector<16x256xf32>, vector<32x256xf32> -> vector<32x256xf32>
    %324 = arith.addf %322, %323 : vector<32x256xf32>
    %c0_357 = arith.constant 0 : index
    %c512_358 = arith.constant 512 : index
    %325 = vector.load %arg10[%c0_357, %c512_358] : memref<32x768xf32, #tpu.memory_space<vmem>>, vector<32x256xf32>
    tpu.vector_store %arg10[%c0_357, %c512_358], %324 {strides = array<i32>} : memref<32x768xf32, #tpu.memory_space<vmem>>, vector<32x256xf32>,
    %c0_359 = arith.constant 0 : index
    %c0_360 = arith.constant 0 : index
    %326 = vector.load %arg10[%c0_359, %c0_360] : memref<32x768xf32, #tpu.memory_space<vmem>>, vector<32x768xf32>
    %cst_361 = arith.constant dense<0.000000e+00> : vector<32xf32>
    %327 = vector.multi_reduction <add>, %326, %cst_361 [1] : vector<32x768xf32> to vector<32xf32>
    %328 = vector.shape_cast %327 : vector<32xf32> to vector<32x1xf32>
    %329 = vector.extract_strided_slice %328 {offsets = [0, 0], sizes = [16, 1], strides = [1, 1]} : vector<32x1xf32> to vector<16x1xf32>
    %330 = vector.extract_strided_slice %328 {offsets = [16, 0], sizes = [16, 1], strides = [1, 1]} : vector<32x1xf32> to vector<16x1xf32>
    %331 = arith.addf %329, %330 : vector<16x1xf32>
    %cst_362 = arith.constant 6.51041686E-4 : f32
    %332 = vector.broadcast %cst_362 : f32 to vector<16x1xf32>
    %333 = arith.mulf %331, %332 : vector<16x1xf32>
    %334 = tpu.concatenate %333, %333 in 0 : vector<16x1xf32>, vector<16x1xf32> -> vector<32x1xf32>
    %335 = vector.broadcast %334 : vector<32x1xf32> to vector<32x768xf32>
    %336 = arith.subf %326, %335 : vector<32x768xf32>
    %337 = arith.mulf %336, %336 : vector<32x768xf32>
    %cst_363 = arith.constant dense<0.000000e+00> : vector<32xf32>
    %338 = vector.multi_reduction <add>, %337, %cst_363 [1] : vector<32x768xf32> to vector<32xf32>
    %339 = vector.shape_cast %338 : vector<32xf32> to vector<32x1xf32>
    %340 = vector.extract_strided_slice %339 {offsets = [0, 0], sizes = [16, 1], strides = [1, 1]} : vector<32x1xf32> to vector<16x1xf32>
    %341 = vector.extract_strided_slice %339 {offsets = [16, 0], sizes = [16, 1], strides = [1, 1]} : vector<32x1xf32> to vector<16x1xf32>
    %342 = arith.addf %340, %341 : vector<16x1xf32>
    %cst_364 = arith.constant 6.51041686E-4 : f32
    %343 = vector.broadcast %cst_364 : f32 to vector<16x1xf32>
    %344 = arith.mulf %342, %343 : vector<16x1xf32>
    %c0_365 = arith.constant 0 : index
    %c0_366 = arith.constant 0 : index
    %345 = vector.load %arg8[%c0_365, %c0_366] : memref<16x1xf32, #tpu.memory_space<vmem>>, vector<16x1xf32>
    %cst_367 = arith.constant 9.99999974E-6 : f32
    %346 = vector.broadcast %cst_367 : f32 to vector<16x1xf32>
    %347 = arith.addf %344, %346 : vector<16x1xf32>
    %348 = math.rsqrt %347 : vector<16x1xf32>
    %349 = arith.mulf %345, %348 : vector<16x1xf32>
    %350 = tpu.concatenate %349, %349 in 0 : vector<16x1xf32>, vector<16x1xf32> -> vector<32x1xf32>
    %c0_368 = arith.constant 0 : index
    %c0_369 = arith.constant 0 : index
    %351 = vector.load %arg9[%c0_368, %c0_369] : memref<16x1xf32, #tpu.memory_space<vmem>>, vector<16x1xf32>
    %352 = tpu.concatenate %351, %351 in 0 : vector<16x1xf32>, vector<16x1xf32> -> vector<32x1xf32>
    %353 = vector.broadcast %350 : vector<32x1xf32> to vector<32x768xf32>
    %354 = arith.mulf %336, %353 : vector<32x768xf32>
    %355 = vector.broadcast %352 : vector<32x1xf32> to vector<32x768xf32>
    %356 = arith.addf %354, %355 : vector<32x768xf32>
    %cst_370 = arith.constant 0.000000e+00 : f32
    %357 = vector.broadcast %cst_370 : f32 to vector<32x768xf32>
    %358 = arith.maximumf %356, %357 : vector<32x768xf32>
    %c0_371 = arith.constant 0 : index
    %c0_372 = arith.constant 0 : index
    %359 = vector.load %arg10[%c0_371, %c0_372] : memref<32x768xf32, #tpu.memory_space<vmem>>, vector<32x768xf32>
    tpu.vector_store %arg10[%c0_371, %c0_372], %358 {strides = array<i32>} : memref<32x768xf32, #tpu.memory_space<vmem>>, vector<32x768xf32>,
    return
  }
}

</mosaic_0001>

<bundles_post_ra>
// kernel: tpu_custom_call.1
= control target key start
LH: loop header
LB: loop body
LE: loop exit
PB: predicated region body
PF: predicated region fallthrough
CT: control target
= control target key end

     0   :  { %15 = vsyncpa [#allocation8], 0  ;;  %s9594_s0 = inlined_call_operand.hbm [shape: f32[3,768,256], index: 0, kind: input, shape index: {}]   ;;  %s9595_s1 = inlined_call_operand.hbm [shape: f32[8,768], index: 1, kind: input, shape index: {}]   ;;  %s9596_s2 = inlined_call_operand.vmem [shape: f32[3,16,8], index: 2, kind: input, shape index: {}]   ;;  %s9597_s3 = inlined_call_operand.vmem [shape: f32[8,1], index: 3, kind: input, shape index: {}]   ;;  %s9598_s4 = inlined_call_operand.vmem [shape: f32[8,1], index: 4, kind: input, shape index: {}]   ;;  %s9599_s5 = inlined_call_operand.vmem [shape: f32[8,1], index: 5, kind: input, shape index: {}]   ;;  %s9600_s6 = inlined_call_operand.vmem [shape: f32[3,32,16], index: 6, kind: input, shape index: {}]   ;;  %s9601_s7 = inlined_call_operand.vmem [shape: f32[16,1], index: 7, kind: input, shape index: {}]   ;;  %s9602_s8 = inlined_call_operand.vmem [shape: f32[16,1], index: 8, kind: input, shape index: {}]   ;;  %s9603_s9 = inlined_call_operand.vmem [shape: f32[16,1], index: 9, kind: input, shape index: {}]   ;;  %s9604_s10 = inlined_call_operand.hbm [shape: f32[32,768], index: 10, kind: output, shape index: {}]  }
   0x1   :  { %16 = vsyncpa [#allocation9], 0  ;;  %s8001_s13 = smov [#allocation7]  }
   0x2   :  { %s23_s14 = sshll.u32 %s8001_s13, 4  ;;  %s24_s14 = int_to_ptr.vmem [resolvable:$true] %s23_s14 }
   0x3   :  { %s7677_s15 = scalar_lea.vmem %s24_s14, 768  ;;  %p7682_p1 = scmp.lt.s32.totalorder %s24_s14, %s24_s14 }
   0x4   :  { %p7678_p0 = scmp.ne.s32.totalorder %s24_s14, %s7677_s15  ;;  %p7683_p2 = scmp.lt.s32.totalorder %s7677_s15, %s7677_s15 }
   0x6   :  { %p7684_p3 = por %p7683_p2, %p7682_p1 }
   0x8   :  { %p7685_p4 = pnand %p7684_p3, %p7678_p0 }
   0xa   :  { %7688 = shalt.err (!%p7685_p4)
}
   0xb   :  { %26 = dma.hbm_to_vmem [thread:$0]  %s9595_s1, 768, %s24_s14, [#allocation8]  }
   0xc   :  { %7973 = dma.done.wait [#allocation8], 768  }
   0xd   :  { %7974 = vsyncadd [#allocation8], 4294966528  ;;  %v9607_v0 = vmov 0.0   ;;  %v9605_v1 = vmov 0   ;;  %v8073_v2 = vld [vmem:[%s9596_s2 + $0x10] sm:$0xff]  ;;  %v8078_v3 = vld [vmem:[%s9596_s2 + $0x18] sm:$0xff] }
   0xe   :  { %131 = vmatprep.mubr.f32.mxu0 %v9607_v0  ;;  %208 = vmatprep.mubr.f32.mxu1 %v9607_v0  ;;  %9670 = vst [vmem:[#allocation51_spill] sm:$0xff] %v8073_v2  ;;  %9671 = vst [vmem:[#allocation52_spill] sm:$0xff] %v8078_v3  ;;  %v8080_v4 = vld [vmem:[#allocation7 + $0x8] sm:$0xff]  ;;  %vm60_vm0 = vcmask 64512   ;;  %v8083_v5 = vld [vmem:[#allocation7] sm:$0xff] }
   0xf   :  { %7658 = vset.pattern.permute.xlu0 %v9605_v1  ;;  %97 = vmatprep.subr.mxu0 %v8080_v4  ;;  %v53_v6 = vld [vmem:[%s9596_s2] sm:$0xff]  ;;  %v8088_v7 = vld [vmem:[#allocation7 + $0x28] sm:$0xff]  ;;  %v8093_v9 = vld [vmem:[#allocation7 + $0x18] sm:$0xff] }
  0x10   :  { %98 = vmatpush1.msra.mxu0 %v8083_v5  ;;  %v8091_v8 = vld [vmem:[#allocation7 + $0x20] sm:$0xff]  ;;  %v8097_v10 = vld [vmem:[#allocation7 + $0x10] sm:$0xff]  ;;  %v54_v12 = vld [vmem:[%s9596_s2 + $0x8] sm:$0xff]  ;;  %174 = vmatprep.subr.mxu1 %v8093_v9 }
  0x11   :  { %9672 = vst [vmem:[#allocation53_spill] sm:$0xff] %v8091_v8  ;;  %7582 = vmatmul.mubr.msk.f32.vlgmr.msra.gmra.mxu0 %vm60_vm0, %v53_v6  ;;  %251 = vmatprep.subr.mxu0 %v8088_v7  ;;  %v52_v11 = vld [vmem:[%s9597_s3] sm:$0xff]  ;;  %s8004_s3 = smov [#allocation2]  }
  0x12   :  { %252 = vmatpush1.msra.mxu0 %v8091_v8  ;;  %137 = vmatprep.mubr.f32.mxu0 %v9607_v0  ;;  %s320_s27 = sshll.u32 %s8004_s3, 4  ;;  %s8117_s27 = int_to_ptr.vmem [resolvable:$true] %s320_s27 }
  0x13   :  { %57 = vperm.xlu0 %7658, %v52_v11   ;;  %175 = vmatpush1.msra.mxu1 %v8097_v10  ;;  %s7697_s28 = scalar_lea.vmem %s8117_s27, 24576  ;;  %s7701_s29 = scalar_lea.vmem %s8117_s27, 49152 }
  0x14   :  { %7584 = vmatmul.mubr.msk.f32.vlgmr.msra.gmra.mxu1 %vm60_vm0, %v53_v6  ;;  %p7698_p5 = scmp.ne.s32.totalorder %s8117_s27, %s7697_s28  ;;  %p7702_p6 = scmp.lt.s32.totalorder %s8117_s27, %s8117_s27 }
  0x15   :  { %7583 = vmatmul.mubr.msk.f32.gmra.mxu0 %vm60_vm0, %v54_v12  ;;  %214 = vmatprep.mubr.f32.mxu1 %v9607_v0  ;;  %p7703_p7 = scmp.lt.s32.totalorder %s7701_s29, %s7697_s28 }
  0x16   :  { %285 = vmatprep.mubr.f32.mxu0 %v9607_v0 }
  0x17   :  { %p7704_p8 = por %p7703_p7, %p7702_p6 }
  0x18   :  { %7585 = vmatmul.mubr.msk.f32.gmra.mxu1 %vm60_vm0, %v54_v12 }
  0x19   :  { %7586 = vmatmul.mubr.msk.f32.vlgmr.msra.gmra.mxu0 %vm60_vm0, %v53_v6  ;;  %p8126_p9 = pnand %p7704_p8, %p7698_p5 }
  0x1a   :  { %291 = vmatprep.mubr.f32.mxu0 %v9607_v0 }
  0x1d   :  { %7587 = vmatmul.mubr.msk.f32.gmra.mxu0 %vm60_vm0, %v54_v12 }
  0x1e   :  { %7708 = shalt.err (!%p8126_p9)  }
  0x1f   :  { %323 = dma.hbm_to_vmem [thread:$0]  %s9594_s0, 24576, %s8117_s27, [#allocation3] }
  0x8e   :  { %v58_v13 = vpop.permute.xlu0 %57 }
  0xd1   :  { %v133_v14 = vpop.f32.mrf.mxu0 }
  0xd2   :  { %v8136_v15 = vadd.f32 %v133_v14, %v58_v13 }
  0xd3   :  { %v135_v16 = vpop.f32.mrf.mxu0 }
  0xd4   :  { %v8138_v17 = vadd.f32 %v135_v16, %v58_v13  ;;  %v210_v19 = vpop.f32.mrf.mxu1 }
  0xd5   :  { %v139_v18 = vpop.f32.mrf.mxu0  ;;  %v8142_v21 = vadd.f32 %v210_v19, %v58_v13 }
  0xd6   :  { %v8140_v20 = vadd.f32 %v139_v18, %v58_v13  ;;  %v212_v23 = vpop.f32.mrf.mxu1 }
  0xd7   :  { %v141_v22 = vpop.f32.mrf.mxu0  ;;  %v8146_v25 = vadd.f32 %v212_v23, %v58_v13 }
  0xd8   :  { %v8144_v24 = vadd.f32 %v141_v22, %v58_v13  ;;  %v216_v27 = vpop.f32.mrf.mxu1 }
  0xd9   :  { %v287_v26 = vpop.f32.mrf.mxu0  ;;  %v8150_v29 = vadd.f32 %v216_v27, %v58_v13 }
  0xda   :  { %v8148_v28 = vadd.f32 %v287_v26, %v58_v13  ;;  %v218_v31 = vpop.f32.mrf.mxu1 }
  0xdb   :  { %v289_v30 = vpop.f32.mrf.mxu0  ;;  %v8154_v33 = vadd.f32 %v218_v31, %v58_v13 }
  0xdc   :  { %9674 = vst [vmem:[#allocation54_spill] sm:$0xff] %v8148_v28  ;;  %v8152_v32 = vadd.f32 %v289_v30, %v58_v13 }
  0xdd   :  { %v293_v34 = vpop.f32.mrf.mxu0 }
  0xde   :  { %9675 = vst [vmem:[#allocation55_spill] sm:$0xff] %v8152_v32  ;;  %v8156_v35 = vadd.f32 %v293_v34, %v58_v13 }
  0xdf   :  { %v295_v36 = vpop.f32.mrf.mxu0 }
  0xe0   :  { %9676 = vst [vmem:[#allocation56_spill] sm:$0xff] %v8156_v35  ;;  %v8158_v37 = vadd.f32 %v295_v36, %v58_v13 }
  0xe2   :  { %9677 = vst [vmem:[#allocation57_spill] sm:$0xff] %v8158_v37 }
  0xe3   :  { %7975 = dma.done.wait [#allocation3], 24576 }
  0xe4   :  { %7976 = vsyncadd [#allocation3], 4294942720  ;;  %s8163_s15 = scalar_lea.hbm %s9594_s0, 24576  ;;  %598 = vmatprep.mubr.f32.mxu1 %v8080_v4  ;;  %669 = vmatprep.mubr.f32.mxu0 %v8093_v9  ;;  %s8005_s16 = smov [#allocation2 + $0x600]  }
  0xe5   :  { %s338_s17 = sshll.u32 %s8005_s16, 4  ;;  %s8167_s17 = int_to_ptr.vmem [resolvable:$true] %s338_s17 }
  0xe6   :  { %s7719_s18 = scalar_lea.vmem %s8167_s17, 24576  ;;  %p7724_p11 = scmp.lt.s32.totalorder %s8167_s17, %s8117_s27 }
  0xe7   :  { %p7720_p10 = scmp.ne.s32.totalorder %s8167_s17, %s7719_s18  ;;  %p7725_p12 = scmp.lt.s32.totalorder %s7701_s29, %s7719_s18 }
  0xe9   :  { %p7726_p13 = por %p7725_p12, %p7724_p11 }
  0xeb   :  { %p8175_p0 = pnand %p7726_p13, %p7720_p10 }
  0xed   :  { %7730 = shalt.err (!%p8175_p0)  }
  0xee   :  { %341 = dma.hbm_to_vmem [thread:$0]  %s8163_s15, 24576, %s8167_s17, [#allocation3 + $0x1] }
  0xef   :  { %v373_v38 = vld [vmem:[#allocation2 + $0xf8] sm:$0xff]  ;;  %v372_v40 = vld [vmem:[#allocation2 + $0xf0] sm:$0xff]  ;;  %v371_v42 = vld [vmem:[#allocation2 + $0xe8] sm:$0xff] }
  0xf0   :  { %v437_v39 = vld [vmem:[#allocation2 + $0x2f8] sm:$0xff]  ;;  %534 = vmatprep.subr.mxu1 %v373_v38  ;;  %v436_v41 = vld [vmem:[#allocation2 + $0x2f0] sm:$0xff]  ;;  %v435_v43 = vld [vmem:[#allocation2 + $0x2e8] sm:$0xff] }
  0xf1   :  { %605 = vmatprep.subr.mxu0 %v437_v39  ;;  %535 = vmatpush1.msra.mxu1 %v372_v40  ;;  %v370_v44 = vld [vmem:[#allocation2 + $0xe0] sm:$0xff]  ;;  %v369_v46 = vld [vmem:[#allocation2 + $0xd8] sm:$0xff]  ;;  %v368_v48 = vld [vmem:[#allocation2 + $0xd0] sm:$0xff] }
  0xf2   :  { %606 = vmatpush1.msra.mxu0 %v436_v41  ;;  %v434_v45 = vld [vmem:[#allocation2 + $0x2e0] sm:$0xff]  ;;  %536 = vmatprep.subr.mxu1 %v371_v42  ;;  %v433_v47 = vld [vmem:[#allocation2 + $0x2d8] sm:$0xff]  ;;  %v432_v49 = vld [vmem:[#allocation2 + $0x2d0] sm:$0xff] }
  0xf3   :  { %607 = vmatprep.subr.mxu0 %v435_v43  ;;  %537 = vmatpush1.msra.mxu1 %v370_v44  ;;  %v367_v50 = vld [vmem:[#allocation2 + $0xc8] sm:$0xff]  ;;  %v366_v52 = vld [vmem:[#allocation2 + $0xc0] sm:$0xff]  ;;  %v365_v54 = vld [vmem:[#allocation2 + $0xb8] sm:$0xff] }
  0xf4   :  { %608 = vmatpush1.msra.mxu0 %v434_v45  ;;  %v431_v51 = vld [vmem:[#allocation2 + $0x2c8] sm:$0xff]  ;;  %538 = vmatprep.subr.mxu1 %v369_v46  ;;  %v430_v53 = vld [vmem:[#allocation2 + $0x2c0] sm:$0xff]  ;;  %v429_v55 = vld [vmem:[#allocation2 + $0x2b8] sm:$0xff] }
  0xf5   :  { %609 = vmatprep.subr.mxu0 %v433_v47  ;;  %539 = vmatpush1.msra.mxu1 %v368_v48  ;;  %v364_v56 = vld [vmem:[#allocation2 + $0xb0] sm:$0xff]  ;;  %v363_v58 = vld [vmem:[#allocation2 + $0xa8] sm:$0xff]  ;;  %v362_v60 = vld [vmem:[#allocation2 + $0xa0] sm:$0xff] }
  0xf6   :  { %610 = vmatpush1.msra.mxu0 %v432_v49  ;;  %540 = vmatprep.subr.mxu1 %v367_v50  ;;  %v428_v57 = vld [vmem:[#allocation2 + $0x2b0] sm:$0xff]  ;;  %v427_v59 = vld [vmem:[#allocation2 + $0x2a8] sm:$0xff]  ;;  %v426_v61 = vld [vmem:[#allocation2 + $0x2a0] sm:$0xff] }
  0xf7   :  { %611 = vmatprep.subr.mxu0 %v431_v51  ;;  %541 = vmatpush1.msra.mxu1 %v366_v52  ;;  %v361_v62 = vld [vmem:[#allocation2 + $0x98] sm:$0xff]  ;;  %v360_v6 = vld [vmem:[#allocation2 + $0x90] sm:$0xff]  ;;  %v359_v12 = vld [vmem:[#allocation2 + $0x88] sm:$0xff] }
  0xf8   :  { %612 = vmatpush1.msra.mxu0 %v430_v53  ;;  %542 = vmatprep.subr.mxu1 %v365_v54  ;;  %v425_v63 = vld [vmem:[#allocation2 + $0x298] sm:$0xff]  ;;  %v424_v11 = vld [vmem:[#allocation2 + $0x290] sm:$0xff]  ;;  %v423_v13 = vld [vmem:[#allocation2 + $0x288] sm:$0xff] }
  0xf9   :  { %613 = vmatprep.subr.mxu0 %v429_v55  ;;  %543 = vmatpush1.msra.mxu1 %v364_v56  ;;  %v358_v14 = vld [vmem:[#allocation2 + $0x80] sm:$0xff]  ;;  %v357_v18 = vld [vmem:[#allocation2 + $0x78] sm:$0xff]  ;;  %v356_v22 = vld [vmem:[#allocation2 + $0x70] sm:$0xff] }
  0xfa   :  { %614 = vmatpush1.msra.mxu0 %v428_v57  ;;  %544 = vmatprep.subr.mxu1 %v363_v58  ;;  %v422_v16 = vld [vmem:[#allocation2 + $0x280] sm:$0xff]  ;;  %v421_v19 = vld [vmem:[#allocation2 + $0x278] sm:$0xff]  ;;  %v420_v23 = vld [vmem:[#allocation2 + $0x270] sm:$0xff] }
  0xfb   :  { %615 = vmatprep.subr.mxu0 %v427_v59  ;;  %545 = vmatpush1.msra.mxu1 %v362_v60  ;;  %v355_v26 = vld [vmem:[#allocation2 + $0x68] sm:$0xff]  ;;  %v354_v30 = vld [vmem:[#allocation2 + $0x60] sm:$0xff]  ;;  %v353_v34 = vld [vmem:[#allocation2 + $0x58] sm:$0xff] }
  0xfc   :  { %616 = vmatpush1.msra.mxu0 %v426_v61  ;;  %546 = vmatprep.subr.mxu1 %v361_v62  ;;  %v419_v27 = vld [vmem:[#allocation2 + $0x268] sm:$0xff]  ;;  %v418_v31 = vld [vmem:[#allocation2 + $0x260] sm:$0xff]  ;;  %v417_v36 = vld [vmem:[#allocation2 + $0x258] sm:$0xff] }
  0xfd   :  { %617 = vmatprep.subr.mxu0 %v425_v63  ;;  %547 = vmatpush1.msra.mxu1 %v360_v6  ;;  %v352_v38 = vld [vmem:[#allocation2 + $0x50] sm:$0xff]  ;;  %v351_v40 = vld [vmem:[#allocation2 + $0x48] sm:$0xff]  ;;  %v350_v42 = vld [vmem:[#allocation2 + $0x40] sm:$0xff] }
  0xfe   :  { %618 = vmatpush1.msra.mxu0 %v424_v11  ;;  %548 = vmatprep.subr.mxu1 %v359_v12  ;;  %v416_v39 = vld [vmem:[#allocation2 + $0x250] sm:$0xff]  ;;  %v415_v41 = vld [vmem:[#allocation2 + $0x248] sm:$0xff]  ;;  %v414_v43 = vld [vmem:[#allocation2 + $0x240] sm:$0xff] }
  0xff   :  { %619 = vmatprep.subr.mxu0 %v423_v13  ;;  %549 = vmatpush1.msra.mxu1 %v358_v14  ;;  %v349_v44 = vld [vmem:[#allocation2 + $0x38] sm:$0xff]  ;;  %v348_v46 = vld [vmem:[#allocation2 + $0x30] sm:$0xff]  ;;  %v347_v48 = vld [vmem:[#allocation2 + $0x28] sm:$0xff] }
 0x100   :  { %620 = vmatpush1.msra.mxu0 %v422_v16  ;;  %550 = vmatprep.subr.mxu1 %v357_v18  ;;  %v413_v45 = vld [vmem:[#allocation2 + $0x238] sm:$0xff]  ;;  %v412_v47 = vld [vmem:[#allocation2 + $0x230] sm:$0xff]  ;;  %v411_v49 = vld [vmem:[#allocation2 + $0x228] sm:$0xff] }
 0x101   :  { %621 = vmatprep.subr.mxu0 %v421_v19  ;;  %551 = vmatpush1.msra.mxu1 %v356_v22  ;;  %v346_v50 = vld [vmem:[#allocation2 + $0x20] sm:$0xff]  ;;  %v345_v52 = vld [vmem:[#allocation2 + $0x18] sm:$0xff]  ;;  %v344_v54 = vld [vmem:[#allocation2 + $0x10] sm:$0xff] }
 0x102   :  { %622 = vmatpush1.msra.mxu0 %v420_v23  ;;  %552 = vmatprep.subr.mxu1 %v355_v26  ;;  %v410_v51 = vld [vmem:[#allocation2 + $0x220] sm:$0xff]  ;;  %v409_v53 = vld [vmem:[#allocation2 + $0x218] sm:$0xff]  ;;  %v408_v55 = vld [vmem:[#allocation2 + $0x210] sm:$0xff] }
 0x103   :  { %623 = vmatprep.subr.mxu0 %v419_v27  ;;  %553 = vmatpush1.msra.mxu1 %v354_v30  ;;  %v343_v56 = vld [vmem:[#allocation2 + $0x8] sm:$0xff]  ;;  %v342_v58 = vld [vmem:[#allocation2] sm:$0xff]  ;;  %v405_v60 = vld [vmem:[#allocation2 + $0x1f8] sm:$0xff] }
 0x104   :  { %624 = vmatpush1.msra.mxu0 %v418_v31  ;;  %554 = vmatprep.subr.mxu1 %v353_v34  ;;  %v407_v57 = vld [vmem:[#allocation2 + $0x208] sm:$0xff]  ;;  %v406_v59 = vld [vmem:[#allocation2 + $0x200] sm:$0xff]  ;;  %v469_v61 = vld [vmem:[#allocation2 + $0x3f8] sm:$0xff] }
 0x105   :  { %625 = vmatprep.subr.mxu0 %v417_v36  ;;  %555 = vmatpush1.msra.mxu1 %v352_v38  ;;  %v404_v62 = vld [vmem:[#allocation2 + $0x1f0] sm:$0xff]  ;;  %v403_v6 = vld [vmem:[#allocation2 + $0x1e8] sm:$0xff]  ;;  %v402_v12 = vld [vmem:[#allocation2 + $0x1e0] sm:$0xff] }
 0x106   :  { %626 = vmatpush1.msra.mxu0 %v416_v39  ;;  %556 = vmatprep.subr.mxu1 %v351_v40  ;;  %v468_v63 = vld [vmem:[#allocation2 + $0x3f0] sm:$0xff]  ;;  %v467_v11 = vld [vmem:[#allocation2 + $0x3e8] sm:$0xff]  ;;  %v466_v13 = vld [vmem:[#allocation2 + $0x3e0] sm:$0xff] }
 0x107   :  { %627 = vmatprep.subr.mxu0 %v415_v41  ;;  %557 = vmatpush1.msra.mxu1 %v350_v42  ;;  %v401_v14 = vld [vmem:[#allocation2 + $0x1d8] sm:$0xff]  ;;  %v400_v18 = vld [vmem:[#allocation2 + $0x1d0] sm:$0xff]  ;;  %v399_v22 = vld [vmem:[#allocation2 + $0x1c8] sm:$0xff] }
 0x108   :  { %628 = vmatpush1.msra.mxu0 %v414_v43  ;;  %558 = vmatprep.subr.mxu1 %v349_v44  ;;  %v465_v16 = vld [vmem:[#allocation2 + $0x3d8] sm:$0xff]  ;;  %v464_v19 = vld [vmem:[#allocation2 + $0x3d0] sm:$0xff]  ;;  %v463_v23 = vld [vmem:[#allocation2 + $0x3c8] sm:$0xff] }
 0x109   :  { %629 = vmatprep.subr.mxu0 %v413_v45  ;;  %559 = vmatpush1.msra.mxu1 %v348_v46  ;;  %v398_v26 = vld [vmem:[#allocation2 + $0x1c0] sm:$0xff]  ;;  %v397_v30 = vld [vmem:[#allocation2 + $0x1b8] sm:$0xff]  ;;  %v396_v34 = vld [vmem:[#allocation2 + $0x1b0] sm:$0xff] }
 0x10a   :  { %630 = vmatpush1.msra.mxu0 %v412_v47  ;;  %560 = vmatprep.subr.mxu1 %v347_v48  ;;  %v462_v27 = vld [vmem:[#allocation2 + $0x3c0] sm:$0xff]  ;;  %v461_v31 = vld [vmem:[#allocation2 + $0x3b8] sm:$0xff]  ;;  %v460_v36 = vld [vmem:[#allocation2 + $0x3b0] sm:$0xff] }
 0x10b   :  { %631 = vmatprep.subr.mxu0 %v411_v49  ;;  %561 = vmatpush1.msra.mxu1 %v346_v50  ;;  %v395_v38 = vld [vmem:[#allocation2 + $0x1a8] sm:$0xff]  ;;  %v394_v40 = vld [vmem:[#allocation2 + $0x1a0] sm:$0xff]  ;;  %v393_v42 = vld [vmem:[#allocation2 + $0x198] sm:$0xff] }
 0x10c   :  { %632 = vmatpush1.msra.mxu0 %v410_v51  ;;  %562 = vmatprep.subr.mxu1 %v345_v52  ;;  %v459_v39 = vld [vmem:[#allocation2 + $0x3a8] sm:$0xff]  ;;  %v458_v41 = vld [vmem:[#allocation2 + $0x3a0] sm:$0xff]  ;;  %v457_v43 = vld [vmem:[#allocation2 + $0x398] sm:$0xff] }
 0x10d   :  { %633 = vmatprep.subr.mxu0 %v409_v53  ;;  %563 = vmatpush1.msra.mxu1 %v344_v54  ;;  %v392_v44 = vld [vmem:[#allocation2 + $0x190] sm:$0xff]  ;;  %v391_v46 = vld [vmem:[#allocation2 + $0x188] sm:$0xff]  ;;  %v390_v48 = vld [vmem:[#allocation2 + $0x180] sm:$0xff] }
 0x10e   :  { %634 = vmatpush1.msra.mxu0 %v408_v55  ;;  %564 = vmatprep.subr.mxu1 %v343_v56  ;;  %v456_v45 = vld [vmem:[#allocation2 + $0x390] sm:$0xff]  ;;  %v455_v47 = vld [vmem:[#allocation2 + $0x388] sm:$0xff]  ;;  %v454_v49 = vld [vmem:[#allocation2 + $0x380] sm:$0xff] }
 0x10f   :  { %635 = vmatprep.subr.mxu0 %v407_v57  ;;  %565 = vmatpush1.msra.mxu1 %v342_v58  ;;  %v389_v50 = vld [vmem:[#allocation2 + $0x178] sm:$0xff]  ;;  %v388_v52 = vld [vmem:[#allocation2 + $0x170] sm:$0xff]  ;;  %v387_v54 = vld [vmem:[#allocation2 + $0x168] sm:$0xff] }
 0x110   :  { %636 = vmatpush1.msra.mxu0 %v406_v59  ;;  %566 = vmatprep.subr.mxu1 %v405_v60  ;;  %v453_v51 = vld [vmem:[#allocation2 + $0x378] sm:$0xff]  ;;  %v452_v53 = vld [vmem:[#allocation2 + $0x370] sm:$0xff]  ;;  %v451_v55 = vld [vmem:[#allocation2 + $0x368] sm:$0xff] }
 0x111   :  { %637 = vmatprep.subr.mxu0 %v469_v61  ;;  %567 = vmatpush2.msra.mxu1 %v404_v62  ;;  %v386_v56 = vld [vmem:[#allocation2 + $0x160] sm:$0xff]  ;;  %v385_v58 = vld [vmem:[#allocation2 + $0x158] sm:$0xff]  ;;  %v384_v60 = vld [vmem:[#allocation2 + $0x150] sm:$0xff] }
 0x112   :  { %638 = vmatpush2.msra.mxu0 %v468_v63  ;;  %568 = vmatprep.subr.mxu1 %v403_v6  ;;  %v450_v57 = vld [vmem:[#allocation2 + $0x360] sm:$0xff]  ;;  %v449_v59 = vld [vmem:[#allocation2 + $0x358] sm:$0xff]  ;;  %v448_v61 = vld [vmem:[#allocation2 + $0x350] sm:$0xff] }
 0x113   :  { %639 = vmatprep.subr.mxu0 %v467_v11  ;;  %569 = vmatpush2.msra.mxu1 %v402_v12  ;;  %v383_v62 = vld [vmem:[#allocation2 + $0x148] sm:$0xff]  ;;  %v382_v6 = vld [vmem:[#allocation2 + $0x140] sm:$0xff]  ;;  %v381_v12 = vld [vmem:[#allocation2 + $0x138] sm:$0xff] }
 0x114   :  { %640 = vmatpush2.msra.mxu0 %v466_v13  ;;  %570 = vmatprep.subr.mxu1 %v401_v14  ;;  %v447_v63 = vld [vmem:[#allocation2 + $0x348] sm:$0xff]  ;;  %v446_v11 = vld [vmem:[#allocation2 + $0x340] sm:$0xff]  ;;  %v445_v13 = vld [vmem:[#allocation2 + $0x338] sm:$0xff] }
 0x115   :  { %641 = vmatprep.subr.mxu0 %v465_v16  ;;  %571 = vmatpush2.msra.mxu1 %v400_v18  ;;  %v380_v14 = vld [vmem:[#allocation2 + $0x130] sm:$0xff]  ;;  %v379_v18 = vld [vmem:[#allocation2 + $0x128] sm:$0xff] }
 0x116   :  { %642 = vmatpush2.msra.mxu0 %v464_v19  ;;  %572 = vmatprep.subr.mxu1 %v399_v22  ;;  %v444_v16 = vld [vmem:[#allocation2 + $0x330] sm:$0xff]  ;;  %v443_v19 = vld [vmem:[#allocation2 + $0x328] sm:$0xff]  ;;  %v378_v22 = vld [vmem:[#allocation2 + $0x120] sm:$0xff] }
 0x117   :  { %643 = vmatprep.subr.mxu0 %v463_v23  ;;  %573 = vmatpush2.msra.mxu1 %v398_v26  ;;  %v442_v23 = vld [vmem:[#allocation2 + $0x320] sm:$0xff]  ;;  %v377_v26 = vld [vmem:[#allocation2 + $0x118] sm:$0xff] }
 0x118   :  { %644 = vmatpush2.msra.mxu0 %v462_v27  ;;  %574 = vmatprep.subr.mxu1 %v397_v30  ;;  %v441_v27 = vld [vmem:[#allocation2 + $0x318] sm:$0xff]  ;;  %v376_v30 = vld [vmem:[#allocation2 + $0x110] sm:$0xff] }
 0x119   :  { %645 = vmatprep.subr.mxu0 %v461_v31  ;;  %575 = vmatpush2.msra.mxu1 %v396_v34  ;;  %v440_v31 = vld [vmem:[#allocation2 + $0x310] sm:$0xff]  ;;  %v375_v34 = vld [vmem:[#allocation2 + $0x108] sm:$0xff] }
 0x11a   :  { %646 = vmatpush2.msra.mxu0 %v460_v36  ;;  %576 = vmatprep.subr.mxu1 %v395_v38  ;;  %v439_v36 = vld [vmem:[#allocation2 + $0x308] sm:$0xff]  ;;  %v374_v38 = vld [vmem:[#allocation2 + $0x100] sm:$0xff] }
 0x11b   :  { %647 = vmatprep.subr.mxu0 %v459_v39  ;;  %577 = vmatpush2.msra.mxu1 %v394_v40  ;;  %v438_v39 = vld [vmem:[#allocation2 + $0x300] sm:$0xff]  ;;  %v501_v40 = vld [vmem:[#allocation2 + $0x4f8] sm:$0xff] }
 0x11c   :  { %648 = vmatpush2.msra.mxu0 %v458_v41  ;;  %578 = vmatprep.subr.mxu1 %v393_v42  ;;  %v500_v41 = vld [vmem:[#allocation2 + $0x4f0] sm:$0xff]  ;;  %v499_v42 = vld [vmem:[#allocation2 + $0x4e8] sm:$0xff] }
 0x11d   :  { %649 = vmatprep.subr.mxu0 %v457_v43  ;;  %579 = vmatpush2.msra.mxu1 %v392_v44  ;;  %v498_v43 = vld [vmem:[#allocation2 + $0x4e0] sm:$0xff]  ;;  %v497_v44 = vld [vmem:[#allocation2 + $0x4d8] sm:$0xff] }
 0x11e   :  { %650 = vmatpush2.msra.mxu0 %v456_v45  ;;  %580 = vmatprep.subr.mxu1 %v391_v46  ;;  %v496_v45 = vld [vmem:[#allocation2 + $0x4d0] sm:$0xff]  ;;  %v495_v46 = vld [vmem:[#allocation2 + $0x4c8] sm:$0xff] }
 0x11f   :  { %651 = vmatprep.subr.mxu0 %v455_v47  ;;  %581 = vmatpush2.msra.mxu1 %v390_v48  ;;  %v494_v47 = vld [vmem:[#allocation2 + $0x4c0] sm:$0xff]  ;;  %v493_v48 = vld [vmem:[#allocation2 + $0x4b8] sm:$0xff] }
 0x120   :  { %652 = vmatpush2.msra.mxu0 %v454_v49  ;;  %582 = vmatprep.subr.mxu1 %v389_v50  ;;  %v492_v49 = vld [vmem:[#allocation2 + $0x4b0] sm:$0xff]  ;;  %v491_v50 = vld [vmem:[#allocation2 + $0x4a8] sm:$0xff] }
 0x121   :  { %653 = vmatprep.subr.mxu0 %v453_v51  ;;  %583 = vmatpush2.msra.mxu1 %v388_v52  ;;  %v490_v51 = vld [vmem:[#allocation2 + $0x4a0] sm:$0xff]  ;;  %v489_v52 = vld [vmem:[#allocation2 + $0x498] sm:$0xff] }
 0x122   :  { %654 = vmatpush2.msra.mxu0 %v452_v53  ;;  %584 = vmatprep.subr.mxu1 %v387_v54  ;;  %v488_v53 = vld [vmem:[#allocation2 + $0x490] sm:$0xff]  ;;  %v487_v54 = vld [vmem:[#allocation2 + $0x488] sm:$0xff] }
 0x123   :  { %655 = vmatprep.subr.mxu0 %v451_v55  ;;  %585 = vmatpush2.msra.mxu1 %v386_v56  ;;  %v486_v55 = vld [vmem:[#allocation2 + $0x480] sm:$0xff]  ;;  %v485_v56 = vld [vmem:[#allocation2 + $0x478] sm:$0xff] }
 0x124   :  { %656 = vmatpush2.msra.mxu0 %v450_v57  ;;  %586 = vmatprep.subr.mxu1 %v385_v58  ;;  %v484_v57 = vld [vmem:[#allocation2 + $0x470] sm:$0xff]  ;;  %v483_v58 = vld [vmem:[#allocation2 + $0x468] sm:$0xff] }
 0x125   :  { %657 = vmatprep.subr.mxu0 %v449_v59  ;;  %587 = vmatpush2.msra.mxu1 %v384_v60  ;;  %v482_v59 = vld [vmem:[#allocation2 + $0x460] sm:$0xff]  ;;  %v481_v60 = vld [vmem:[#allocation2 + $0x458] sm:$0xff] }
 0x126   :  { %658 = vmatpush2.msra.mxu0 %v448_v61  ;;  %588 = vmatprep.subr.mxu1 %v383_v62  ;;  %v480_v61 = vld [vmem:[#allocation2 + $0x450] sm:$0xff]  ;;  %v479_v62 = vld [vmem:[#allocation2 + $0x448] sm:$0xff] }
 0x127   :  { %659 = vmatprep.subr.mxu0 %v447_v63  ;;  %589 = vmatpush2.msra.mxu1 %v382_v6  ;;  %v478_v63 = vld [vmem:[#allocation2 + $0x440] sm:$0xff]  ;;  %v477_v6 = vld [vmem:[#allocation2 + $0x438] sm:$0xff] }
 0x128   :  { %660 = vmatpush2.msra.mxu0 %v446_v11  ;;  %590 = vmatprep.subr.mxu1 %v381_v12  ;;  %v476_v11 = vld [vmem:[#allocation2 + $0x430] sm:$0xff]  ;;  %v475_v12 = vld [vmem:[#allocation2 + $0x428] sm:$0xff] }
 0x129   :  { %661 = vmatprep.subr.mxu0 %v445_v13  ;;  %591 = vmatpush2.msra.mxu1 %v380_v14  ;;  %v474_v13 = vld [vmem:[#allocation2 + $0x420] sm:$0xff]  ;;  %v473_v14 = vld [vmem:[#allocation2 + $0x418] sm:$0xff] }
 0x12a   :  { %662 = vmatpush2.msra.mxu0 %v444_v16  ;;  %592 = vmatprep.subr.mxu1 %v379_v18  ;;  %v472_v16 = vld [vmem:[#allocation2 + $0x410] sm:$0xff]  ;;  %v471_v18 = vld [vmem:[#allocation2 + $0x408] sm:$0xff] }
 0x12b   :  { %663 = vmatprep.subr.mxu0 %v443_v19  ;;  %593 = vmatpush2.msra.mxu1 %v378_v22  ;;  %v470_v19 = vld [vmem:[#allocation2 + $0x400] sm:$0xff]  ;;  %v533_v22 = vld [vmem:[#allocation2 + $0x5f8] sm:$0xff] }
 0x12c   :  { %664 = vmatpush2.msra.mxu0 %v442_v23  ;;  %594 = vmatprep.subr.mxu1 %v377_v26  ;;  %v532_v23 = vld [vmem:[#allocation2 + $0x5f0] sm:$0xff]  ;;  %v531_v26 = vld [vmem:[#allocation2 + $0x5e8] sm:$0xff] }
 0x12d   :  { %665 = vmatprep.subr.mxu0 %v441_v27  ;;  %595 = vmatpush2.msra.mxu1 %v376_v30  ;;  %v530_v27 = vld [vmem:[#allocation2 + $0x5e0] sm:$0xff]  ;;  %v529_v30 = vld [vmem:[#allocation2 + $0x5d8] sm:$0xff] }
 0x12e   :  { %666 = vmatpush2.msra.mxu0 %v440_v31  ;;  %596 = vmatprep.subr.mxu1 %v375_v34  ;;  %v528_v31 = vld [vmem:[#allocation2 + $0x5d0] sm:$0xff]  ;;  %v527_v34 = vld [vmem:[#allocation2 + $0x5c8] sm:$0xff] }
 0x12f   :  { %667 = vmatprep.subr.mxu0 %v439_v36  ;;  %597 = vmatpush2.msra.mxu1 %v374_v38  ;;  %v526_v36 = vld [vmem:[#allocation2 + $0x5c0] sm:$0xff]  ;;  %v525_v38 = vld [vmem:[#allocation2 + $0x5b8] sm:$0xff] }
 0x130   :  { %668 = vmatpush2.msra.mxu0 %v438_v39  ;;  %599 = vmatmul.mubr.f32.vlgmr.msra.gmra.mxu1 %v8083_v5  ;;  %v524_v39 = vld [vmem:[#allocation2 + $0x5b0] sm:$0xff] }
 0x131   :  { %670 = vmatmul.mubr.f32.vlgmr.msra.gmra.mxu0 %v8097_v10  ;;  %676 = vmatprep.subr.mxu1 %v501_v40  ;;  %v523_v40 = vld [vmem:[#allocation2 + $0x5a8] sm:$0xff] }
 0x132   :  { %740 = vmatprep.mubr.f32.mxu1 %v8088_v7  ;;  %677 = vmatpush1.msra.mxu1 %v500_v41  ;;  %v522_v41 = vld [vmem:[#allocation2 + $0x5a0] sm:$0xff] }
 0x133   :  { %823 = vmatprep.mubr.f32.mxu0 %v9607_v0  ;;  %678 = vmatprep.subr.mxu1 %v499_v42  ;;  %v521_v42 = vld [vmem:[#allocation2 + $0x598] sm:$0xff] }
 0x134   :  { %679 = vmatpush1.msra.mxu1 %v498_v43  ;;  %v520_v43 = vld [vmem:[#allocation2 + $0x590] sm:$0xff] }
 0x135   :  { %680 = vmatprep.subr.mxu1 %v497_v44  ;;  %v519_v44 = vld [vmem:[#allocation2 + $0x588] sm:$0xff] }
 0x136   :  { %681 = vmatpush1.msra.mxu1 %v496_v45  ;;  %v518_v45 = vld [vmem:[#allocation2 + $0x580] sm:$0xff] }
 0x137   :  { %682 = vmatprep.subr.mxu1 %v495_v46  ;;  %v517_v46 = vld [vmem:[#allocation2 + $0x578] sm:$0xff] }
 0x138   :  { %683 = vmatpush1.msra.mxu1 %v494_v47  ;;  %v516_v47 = vld [vmem:[#allocation2 + $0x570] sm:$0xff] }
 0x139   :  { %684 = vmatprep.subr.mxu1 %v493_v48  ;;  %v515_v48 = vld [vmem:[#allocation2 + $0x568] sm:$0xff] }
 0x13a   :  { %685 = vmatpush1.msra.mxu1 %v492_v49  ;;  %v514_v49 = vld [vmem:[#allocation2 + $0x560] sm:$0xff] }
 0x13b   :  { %686 = vmatprep.subr.mxu1 %v491_v50  ;;  %v513_v50 = vld [vmem:[#allocation2 + $0x558] sm:$0xff] }
 0x13c   :  { %687 = vmatpush1.msra.mxu1 %v490_v51  ;;  %v512_v51 = vld [vmem:[#allocation2 + $0x550] sm:$0xff] }
 0x13d   :  { %688 = vmatprep.subr.mxu1 %v489_v52  ;;  %v511_v52 = vld [vmem:[#allocation2 + $0x548] sm:$0xff] }
 0x13e   :  { %689 = vmatpush1.msra.mxu1 %v488_v53  ;;  %v510_v53 = vld [vmem:[#allocation2 + $0x540] sm:$0xff] }
 0x13f   :  { %690 = vmatprep.subr.mxu1 %v487_v54  ;;  %v509_v54 = vld [vmem:[#allocation2 + $0x538] sm:$0xff] }
 0x140   :  { %691 = vmatpush1.msra.mxu1 %v486_v55  ;;  %v508_v55 = vld [vmem:[#allocation2 + $0x530] sm:$0xff] }
 0x141   :  { %692 = vmatprep.subr.mxu1 %v485_v56  ;;  %v507_v56 = vld [vmem:[#allocation2 + $0x528] sm:$0xff] }
 0x142   :  { %693 = vmatpush1.msra.mxu1 %v484_v57  ;;  %v506_v57 = vld [vmem:[#allocation2 + $0x520] sm:$0xff] }
 0x143   :  { %694 = vmatprep.subr.mxu1 %v483_v58  ;;  %v505_v58 = vld [vmem:[#allocation2 + $0x518] sm:$0xff] }
 0x144   :  { %695 = vmatpush1.msra.mxu1 %v482_v59  ;;  %v504_v59 = vld [vmem:[#allocation2 + $0x510] sm:$0xff] }
 0x145   :  { %696 = vmatprep.subr.mxu1 %v481_v60  ;;  %v503_v60 = vld [vmem:[#allocation2 + $0x508] sm:$0xff] }
 0x146   :  { %697 = vmatpush1.msra.mxu1 %v480_v61  ;;  %v502_v61 = vld [vmem:[#allocation2 + $0x500] sm:$0xff] }
 0x147   :  { %698 = vmatprep.subr.mxu1 %v479_v62 }
 0x148   :  { %699 = vmatpush1.msra.mxu1 %v478_v63 }
 0x149   :  { %700 = vmatprep.subr.mxu1 %v477_v6 }
 0x14a   :  { %701 = vmatpush1.msra.mxu1 %v476_v11 }
 0x14b   :  { %702 = vmatprep.subr.mxu1 %v475_v12 }
 0x14c   :  { %703 = vmatpush1.msra.mxu1 %v474_v13 }
 0x14d   :  { %704 = vmatprep.subr.mxu1 %v473_v14 }
 0x14e   :  { %705 = vmatpush1.msra.mxu1 %v472_v16 }
 0x14f   :  { %706 = vmatprep.subr.mxu1 %v471_v18 }
 0x150   :  { %707 = vmatpush1.msra.mxu1 %v470_v19 }
 0x151   :  { %708 = vmatprep.subr.mxu1 %v533_v22 }
 0x152   :  { %709 = vmatpush2.msra.mxu1 %v532_v23 }
 0x153   :  { %710 = vmatprep.subr.mxu1 %v531_v26 }
 0x154   :  { %711 = vmatpush2.msra.mxu1 %v530_v27 }
 0x155   :  { %712 = vmatprep.subr.mxu1 %v529_v30 }
 0x156   :  { %713 = vmatpush2.msra.mxu1 %v528_v31 }
 0x157   :  { %714 = vmatprep.subr.mxu1 %v527_v34 }
 0x158   :  { %715 = vmatpush2.msra.mxu1 %v526_v36 }
 0x159   :  { %716 = vmatprep.subr.mxu1 %v525_v38 }
 0x15a   :  { %717 = vmatpush2.msra.mxu1 %v524_v39 }
 0x15b   :  { %718 = vmatprep.subr.mxu1 %v523_v40 }
 0x15c   :  { %719 = vmatpush2.msra.mxu1 %v522_v41 }
 0x15d   :  { %720 = vmatprep.subr.mxu1 %v521_v42 }
 0x15e   :  { %721 = vmatpush2.msra.mxu1 %v520_v43 }
 0x15f   :  { %722 = vmatprep.subr.mxu1 %v519_v44 }
 0x160   :  { %723 = vmatpush2.msra.mxu1 %v518_v45 }
 0x161   :  { %724 = vmatprep.subr.mxu1 %v517_v46 }
 0x162   :  { %725 = vmatpush2.msra.mxu1 %v516_v47 }
 0x163   :  { %726 = vmatprep.subr.mxu1 %v515_v48 }
 0x164   :  { %727 = vmatpush2.msra.mxu1 %v514_v49 }
 0x165   :  { %728 = vmatprep.subr.mxu1 %v513_v50 }
 0x166   :  { %729 = vmatpush2.msra.mxu1 %v512_v51 }
 0x167   :  { %730 = vmatprep.subr.mxu1 %v511_v52 }
 0x168   :  { %731 = vmatpush2.msra.mxu1 %v510_v53 }
 0x169   :  { %732 = vmatprep.subr.mxu1 %v509_v54 }
 0x16a   :  { %733 = vmatpush2.msra.mxu1 %v508_v55 }
 0x16b   :  { %734 = vmatprep.subr.mxu1 %v507_v56 }
 0x16c   :  { %735 = vmatpush2.msra.mxu1 %v506_v57 }
 0x16d   :  { %736 = vmatprep.subr.mxu1 %v505_v58 }
 0x16e   :  { %737 = vmatpush2.msra.mxu1 %v504_v59 }
 0x16f   :  { %738 = vmatprep.subr.mxu1 %v503_v60 }
 0x170   :  { %739 = vmatpush2.msra.mxu1 %v502_v61 }
 0x171   :  { %741 = vmatmul.mubr.f32.vlgmr.msra.gmra.mxu1 %v8091_v8 }
 0x1f0   :  { %v600_v62 = vpop.f32.mrf.mxu1 }
 0x1f1   :  { %v671_v63 = vpop.f32.mrf.mxu0 }
 0x1f2   :  { %v602_v6 = vpop.f32.mrf.mxu1  ;;  %v672_v14 = vadd.f32 %v671_v63, %v600_v62 }
 0x1f3   :  { %v673_v11 = vpop.f32.mrf.mxu0 }
 0x1f4   :  { %v674_v13 = vadd.f32 %v673_v11, %v602_v6 }
 0x231   :  { %v742_v12 = vpop.f32.mrf.mxu1 }
 0x232   :  { %v8190_v19 = vadd.f32 %v742_v12, %v672_v14 }
 0x233   :  { %v744_v16 = vpop.f32.mrf.mxu1 }
 0x234   :  { %v8188_v18 = vadd.f32 %v744_v16, %v674_v13  ;;  %9680 = vst [vmem:[#allocation59_spill] sm:$0xff] %v8190_v19 }
 0x236   :  { %9679 = vst [vmem:[#allocation58_spill] sm:$0xff] %v8188_v18  ;;  %789 = vmatprep.subr.mxu0 %v8188_v18 }
 0x237   :  { %790 = vmatpush1.msra.mxu0 %v8190_v19 }
 0x238   :  { %7590 = vmatmul.mubr.msk.f32.vlgmr.msra.gmra.mxu0 %vm60_vm0, %v8073_v2 }
 0x239   :  { %829 = vmatprep.mubr.f32.mxu0 %v9607_v0 }
 0x23c   :  { %7591 = vmatmul.mubr.msk.f32.gmra.mxu0 %vm60_vm0, %v8078_v3 }
 0x2f8   :  { %v825_v22 = vpop.f32.mrf.mxu0 }
 0x2f9   :  { %v8200_v23 = vadd.f32 %v825_v22, %v8136_v15 }
 0x2fa   :  { %v827_v26 = vpop.f32.mrf.mxu0 }
 0x2fb   :  { %9681 = vst [vmem:[#allocation60_spill] sm:$0xff] %v8200_v23  ;;  %v8203_v27 = vadd.f32 %v827_v26, %v8138_v17 }
 0x2fc   :  { %v831_v30 = vpop.f32.mrf.mxu0 }
 0x2fd   :  { %9682 = vst [vmem:[#allocation61_spill] sm:$0xff] %v8203_v27  ;;  %v8206_v31 = vadd.f32 %v831_v30, %v8140_v20 }
 0x2fe   :  { %v833_v34 = vpop.f32.mrf.mxu0 }
 0x2ff   :  { %9683 = vst [vmem:[#allocation62_spill] sm:$0xff] %v8206_v31  ;;  %v8209_v36 = vadd.f32 %v833_v34, %v8144_v24 }
 0x301   :  { %9684 = vst [vmem:[#allocation63_spill] sm:$0xff] %v8209_v36 }
 0x302   :  { %7977 = dma.done.wait [#allocation3 + $0x1], 24576 }
 0x303   :  { %7978 = vsyncadd [#allocation3 + $0x1], 4294942720  ;;  %s8214_s1 = scalar_lea.hbm %s9594_s0, 49152  ;;  %1114 = vmatprep.mubr.f32.mxu0 %v8080_v4  ;;  %1185 = vmatprep.mubr.f32.mxu1 %v8093_v9 }
 0x304   :  { %7753 = shalt.err (!%p8126_p9)  }
 0x305   :  { %857 = dma.hbm_to_vmem [thread:$0]  %s8214_s1, 24576, %s8117_s27, [#allocation3] }
 0x306   :  { %v889_v15 = vld [vmem:[#allocation2 + $0x6f8] sm:$0xff]  ;;  %v888_v20 = vld [vmem:[#allocation2 + $0x6f0] sm:$0xff]  ;;  %v887_v38 = vld [vmem:[#allocation2 + $0x6e8] sm:$0xff] }
 0x307   :  { %v953_v17 = vld [vmem:[#allocation2 + $0x8f8] sm:$0xff]  ;;  %1050 = vmatprep.subr.mxu0 %v889_v15  ;;  %v952_v24 = vld [vmem:[#allocation2 + $0x8f0] sm:$0xff]  ;;  %v951_v39 = vld [vmem:[#allocation2 + $0x8e8] sm:$0xff] }
 0x308   :  { %1121 = vmatprep.subr.mxu1 %v953_v17  ;;  %1051 = vmatpush1.msra.mxu0 %v888_v20  ;;  %v886_v40 = vld [vmem:[#allocation2 + $0x6e0] sm:$0xff]  ;;  %v885_v42 = vld [vmem:[#allocation2 + $0x6d8] sm:$0xff]  ;;  %v884_v44 = vld [vmem:[#allocation2 + $0x6d0] sm:$0xff] }
 0x309   :  { %1122 = vmatpush1.msra.mxu1 %v952_v24  ;;  %v950_v41 = vld [vmem:[#allocation2 + $0x8e0] sm:$0xff]  ;;  %1052 = vmatprep.subr.mxu0 %v887_v38  ;;  %v949_v43 = vld [vmem:[#allocation2 + $0x8d8] sm:$0xff]  ;;  %v948_v45 = vld [vmem:[#allocation2 + $0x8d0] sm:$0xff] }
 0x30a   :  { %1123 = vmatprep.subr.mxu1 %v951_v39  ;;  %1053 = vmatpush1.msra.mxu0 %v886_v40  ;;  %v883_v46 = vld [vmem:[#allocation2 + $0x6c8] sm:$0xff]  ;;  %v882_v48 = vld [vmem:[#allocation2 + $0x6c0] sm:$0xff]  ;;  %v881_v50 = vld [vmem:[#allocation2 + $0x6b8] sm:$0xff] }
 0x30b   :  { %1124 = vmatpush1.msra.mxu1 %v950_v41  ;;  %v947_v47 = vld [vmem:[#allocation2 + $0x8c8] sm:$0xff]  ;;  %1054 = vmatprep.subr.mxu0 %v885_v42  ;;  %v946_v49 = vld [vmem:[#allocation2 + $0x8c0] sm:$0xff]  ;;  %v945_v51 = vld [vmem:[#allocation2 + $0x8b8] sm:$0xff] }
 0x30c   :  { %1125 = vmatprep.subr.mxu1 %v949_v43  ;;  %1055 = vmatpush1.msra.mxu0 %v884_v44  ;;  %v880_v52 = vld [vmem:[#allocation2 + $0x6b0] sm:$0xff]  ;;  %v879_v54 = vld [vmem:[#allocation2 + $0x6a8] sm:$0xff]  ;;  %v878_v56 = vld [vmem:[#allocation2 + $0x6a0] sm:$0xff] }
 0x30d   :  { %1126 = vmatpush1.msra.mxu1 %v948_v45  ;;  %1056 = vmatprep.subr.mxu0 %v883_v46  ;;  %v944_v53 = vld [vmem:[#allocation2 + $0x8b0] sm:$0xff]  ;;  %v943_v55 = vld [vmem:[#allocation2 + $0x8a8] sm:$0xff]  ;;  %v942_v57 = vld [vmem:[#allocation2 + $0x8a0] sm:$0xff] }
 0x30e   :  { %1127 = vmatprep.subr.mxu1 %v947_v47  ;;  %1057 = vmatpush1.msra.mxu0 %v882_v48  ;;  %v877_v58 = vld [vmem:[#allocation2 + $0x698] sm:$0xff]  ;;  %v876_v60 = vld [vmem:[#allocation2 + $0x690] sm:$0xff]  ;;  %v875_v62 = vld [vmem:[#allocation2 + $0x688] sm:$0xff] }
 0x30f   :  { %1128 = vmatpush1.msra.mxu1 %v946_v49  ;;  %1058 = vmatprep.subr.mxu0 %v881_v50  ;;  %v941_v59 = vld [vmem:[#allocation2 + $0x898] sm:$0xff]  ;;  %v940_v61 = vld [vmem:[#allocation2 + $0x890] sm:$0xff]  ;;  %v939_v63 = vld [vmem:[#allocation2 + $0x888] sm:$0xff] }
 0x310   :  { %1129 = vmatprep.subr.mxu1 %v945_v51  ;;  %1059 = vmatpush1.msra.mxu0 %v880_v52  ;;  %v874_v6 = vld [vmem:[#allocation2 + $0x680] sm:$0xff]  ;;  %v873_v12 = vld [vmem:[#allocation2 + $0x678] sm:$0xff]  ;;  %v872_v14 = vld [vmem:[#allocation2 + $0x670] sm:$0xff] }
 0x311   :  { %1130 = vmatpush1.msra.mxu1 %v944_v53  ;;  %1060 = vmatprep.subr.mxu0 %v879_v54  ;;  %v938_v11 = vld [vmem:[#allocation2 + $0x880] sm:$0xff]  ;;  %v937_v13 = vld [vmem:[#allocation2 + $0x878] sm:$0xff]  ;;  %v936_v16 = vld [vmem:[#allocation2 + $0x870] sm:$0xff] }
 0x312   :  { %1131 = vmatprep.subr.mxu1 %v943_v55  ;;  %1061 = vmatpush1.msra.mxu0 %v878_v56  ;;  %v871_v22 = vld [vmem:[#allocation2 + $0x668] sm:$0xff]  ;;  %v870_v30 = vld [vmem:[#allocation2 + $0x660] sm:$0xff]  ;;  %v869_v15 = vld [vmem:[#allocation2 + $0x658] sm:$0xff] }
 0x313   :  { %1132 = vmatpush1.msra.mxu1 %v942_v57  ;;  %1062 = vmatprep.subr.mxu0 %v877_v58  ;;  %v935_v26 = vld [vmem:[#allocation2 + $0x868] sm:$0xff]  ;;  %v934_v34 = vld [vmem:[#allocation2 + $0x860] sm:$0xff]  ;;  %v933_v17 = vld [vmem:[#allocation2 + $0x858] sm:$0xff] }
 0x314   :  { %1133 = vmatprep.subr.mxu1 %v941_v59  ;;  %1063 = vmatpush1.msra.mxu0 %v876_v60  ;;  %v868_v20 = vld [vmem:[#allocation2 + $0x650] sm:$0xff]  ;;  %v867_v38 = vld [vmem:[#allocation2 + $0x648] sm:$0xff]  ;;  %v866_v40 = vld [vmem:[#allocation2 + $0x640] sm:$0xff] }
 0x315   :  { %1134 = vmatpush1.msra.mxu1 %v940_v61  ;;  %1064 = vmatprep.subr.mxu0 %v875_v62  ;;  %v932_v24 = vld [vmem:[#allocation2 + $0x850] sm:$0xff]  ;;  %v931_v39 = vld [vmem:[#allocation2 + $0x848] sm:$0xff]  ;;  %v930_v41 = vld [vmem:[#allocation2 + $0x840] sm:$0xff] }
 0x316   :  { %1135 = vmatprep.subr.mxu1 %v939_v63  ;;  %1065 = vmatpush1.msra.mxu0 %v874_v6  ;;  %v865_v42 = vld [vmem:[#allocation2 + $0x638] sm:$0xff]  ;;  %v864_v44 = vld [vmem:[#allocation2 + $0x630] sm:$0xff]  ;;  %v863_v46 = vld [vmem:[#allocation2 + $0x628] sm:$0xff] }
 0x317   :  { %1136 = vmatpush1.msra.mxu1 %v938_v11  ;;  %1066 = vmatprep.subr.mxu0 %v873_v12  ;;  %v929_v43 = vld [vmem:[#allocation2 + $0x838] sm:$0xff]  ;;  %v928_v45 = vld [vmem:[#allocation2 + $0x830] sm:$0xff]  ;;  %v927_v47 = vld [vmem:[#allocation2 + $0x828] sm:$0xff] }
 0x318   :  { %1137 = vmatprep.subr.mxu1 %v937_v13  ;;  %1067 = vmatpush1.msra.mxu0 %v872_v14  ;;  %v862_v48 = vld [vmem:[#allocation2 + $0x620] sm:$0xff]  ;;  %v861_v50 = vld [vmem:[#allocation2 + $0x618] sm:$0xff]  ;;  %v860_v52 = vld [vmem:[#allocation2 + $0x610] sm:$0xff] }
 0x319   :  { %1138 = vmatpush1.msra.mxu1 %v936_v16  ;;  %1068 = vmatprep.subr.mxu0 %v871_v22  ;;  %v926_v49 = vld [vmem:[#allocation2 + $0x820] sm:$0xff]  ;;  %v925_v51 = vld [vmem:[#allocation2 + $0x818] sm:$0xff]  ;;  %v924_v53 = vld [vmem:[#allocation2 + $0x810] sm:$0xff] }
 0x31a   :  { %1139 = vmatprep.subr.mxu1 %v935_v26  ;;  %1069 = vmatpush1.msra.mxu0 %v870_v30  ;;  %v859_v54 = vld [vmem:[#allocation2 + $0x608] sm:$0xff]  ;;  %v858_v56 = vld [vmem:[#allocation2 + $0x600] sm:$0xff]  ;;  %v921_v58 = vld [vmem:[#allocation2 + $0x7f8] sm:$0xff] }
 0x31b   :  { %1140 = vmatpush1.msra.mxu1 %v934_v34  ;;  %1070 = vmatprep.subr.mxu0 %v869_v15  ;;  %v923_v55 = vld [vmem:[#allocation2 + $0x808] sm:$0xff]  ;;  %v922_v57 = vld [vmem:[#allocation2 + $0x800] sm:$0xff]  ;;  %v985_v59 = vld [vmem:[#allocation2 + $0x9f8] sm:$0xff] }
 0x31c   :  { %1141 = vmatprep.subr.mxu1 %v933_v17  ;;  %1071 = vmatpush1.msra.mxu0 %v868_v20  ;;  %v920_v60 = vld [vmem:[#allocation2 + $0x7f0] sm:$0xff]  ;;  %v919_v62 = vld [vmem:[#allocation2 + $0x7e8] sm:$0xff]  ;;  %v918_v6 = vld [vmem:[#allocation2 + $0x7e0] sm:$0xff] }
 0x31d   :  { %1142 = vmatpush1.msra.mxu1 %v932_v24  ;;  %1072 = vmatprep.subr.mxu0 %v867_v38  ;;  %v984_v61 = vld [vmem:[#allocation2 + $0x9f0] sm:$0xff]  ;;  %v983_v63 = vld [vmem:[#allocation2 + $0x9e8] sm:$0xff]  ;;  %v982_v11 = vld [vmem:[#allocation2 + $0x9e0] sm:$0xff] }
 0x31e   :  { %1143 = vmatprep.subr.mxu1 %v931_v39  ;;  %1073 = vmatpush1.msra.mxu0 %v866_v40  ;;  %v917_v12 = vld [vmem:[#allocation2 + $0x7d8] sm:$0xff]  ;;  %v916_v14 = vld [vmem:[#allocation2 + $0x7d0] sm:$0xff]  ;;  %v915_v22 = vld [vmem:[#allocation2 + $0x7c8] sm:$0xff] }
 0x31f   :  { %1144 = vmatpush1.msra.mxu1 %v930_v41  ;;  %1074 = vmatprep.subr.mxu0 %v865_v42  ;;  %v981_v13 = vld [vmem:[#allocation2 + $0x9d8] sm:$0xff]  ;;  %v980_v16 = vld [vmem:[#allocation2 + $0x9d0] sm:$0xff]  ;;  %v979_v26 = vld [vmem:[#allocation2 + $0x9c8] sm:$0xff] }
 0x320   :  { %1145 = vmatprep.subr.mxu1 %v929_v43  ;;  %1075 = vmatpush1.msra.mxu0 %v864_v44  ;;  %v914_v30 = vld [vmem:[#allocation2 + $0x7c0] sm:$0xff]  ;;  %v913_v15 = vld [vmem:[#allocation2 + $0x7b8] sm:$0xff]  ;;  %v912_v20 = vld [vmem:[#allocation2 + $0x7b0] sm:$0xff] }
 0x321   :  { %1146 = vmatpush1.msra.mxu1 %v928_v45  ;;  %1076 = vmatprep.subr.mxu0 %v863_v46  ;;  %v978_v34 = vld [vmem:[#allocation2 + $0x9c0] sm:$0xff]  ;;  %v977_v17 = vld [vmem:[#allocation2 + $0x9b8] sm:$0xff]  ;;  %v976_v24 = vld [vmem:[#allocation2 + $0x9b0] sm:$0xff] }
 0x322   :  { %1147 = vmatprep.subr.mxu1 %v927_v47  ;;  %1077 = vmatpush1.msra.mxu0 %v862_v48  ;;  %v911_v38 = vld [vmem:[#allocation2 + $0x7a8] sm:$0xff]  ;;  %v910_v40 = vld [vmem:[#allocation2 + $0x7a0] sm:$0xff]  ;;  %v909_v42 = vld [vmem:[#allocation2 + $0x798] sm:$0xff] }
 0x323   :  { %1148 = vmatpush1.msra.mxu1 %v926_v49  ;;  %1078 = vmatprep.subr.mxu0 %v861_v50  ;;  %v975_v39 = vld [vmem:[#allocation2 + $0x9a8] sm:$0xff]  ;;  %v974_v41 = vld [vmem:[#allocation2 + $0x9a0] sm:$0xff]  ;;  %v973_v43 = vld [vmem:[#allocation2 + $0x998] sm:$0xff] }
 0x324   :  { %1149 = vmatprep.subr.mxu1 %v925_v51  ;;  %1079 = vmatpush1.msra.mxu0 %v860_v52  ;;  %v908_v44 = vld [vmem:[#allocation2 + $0x790] sm:$0xff]  ;;  %v907_v46 = vld [vmem:[#allocation2 + $0x788] sm:$0xff]  ;;  %v906_v48 = vld [vmem:[#allocation2 + $0x780] sm:$0xff] }
 0x325   :  { %1150 = vmatpush1.msra.mxu1 %v924_v53  ;;  %1080 = vmatprep.subr.mxu0 %v859_v54  ;;  %v972_v45 = vld [vmem:[#allocation2 + $0x990] sm:$0xff]  ;;  %v971_v47 = vld [vmem:[#allocation2 + $0x988] sm:$0xff]  ;;  %v970_v49 = vld [vmem:[#allocation2 + $0x980] sm:$0xff] }
 0x326   :  { %1151 = vmatprep.subr.mxu1 %v923_v55  ;;  %1081 = vmatpush1.msra.mxu0 %v858_v56  ;;  %v905_v50 = vld [vmem:[#allocation2 + $0x778] sm:$0xff]  ;;  %v904_v52 = vld [vmem:[#allocation2 + $0x770] sm:$0xff]  ;;  %v903_v54 = vld [vmem:[#allocation2 + $0x768] sm:$0xff] }
 0x327   :  { %1152 = vmatpush1.msra.mxu1 %v922_v57  ;;  %1082 = vmatprep.subr.mxu0 %v921_v58  ;;  %v969_v51 = vld [vmem:[#allocation2 + $0x978] sm:$0xff]  ;;  %v968_v53 = vld [vmem:[#allocation2 + $0x970] sm:$0xff]  ;;  %v967_v55 = vld [vmem:[#allocation2 + $0x968] sm:$0xff] }
 0x328   :  { %1153 = vmatprep.subr.mxu1 %v985_v59  ;;  %1083 = vmatpush2.msra.mxu0 %v920_v60  ;;  %v902_v56 = vld [vmem:[#allocation2 + $0x760] sm:$0xff]  ;;  %v901_v58 = vld [vmem:[#allocation2 + $0x758] sm:$0xff]  ;;  %v900_v60 = vld [vmem:[#allocation2 + $0x750] sm:$0xff] }
 0x329   :  { %1154 = vmatpush2.msra.mxu1 %v984_v61  ;;  %1084 = vmatprep.subr.mxu0 %v919_v62  ;;  %v966_v57 = vld [vmem:[#allocation2 + $0x960] sm:$0xff]  ;;  %v965_v59 = vld [vmem:[#allocation2 + $0x958] sm:$0xff]  ;;  %v964_v61 = vld [vmem:[#allocation2 + $0x950] sm:$0xff] }
 0x32a   :  { %1155 = vmatprep.subr.mxu1 %v983_v63  ;;  %1085 = vmatpush2.msra.mxu0 %v918_v6  ;;  %v899_v62 = vld [vmem:[#allocation2 + $0x748] sm:$0xff]  ;;  %v898_v6 = vld [vmem:[#allocation2 + $0x740] sm:$0xff] }
 0x32b   :  { %1156 = vmatpush2.msra.mxu1 %v982_v11  ;;  %1086 = vmatprep.subr.mxu0 %v917_v12  ;;  %v963_v63 = vld [vmem:[#allocation2 + $0x948] sm:$0xff]  ;;  %v962_v11 = vld [vmem:[#allocation2 + $0x940] sm:$0xff]  ;;  %v897_v12 = vld [vmem:[#allocation2 + $0x738] sm:$0xff] }
 0x32c   :  { %1157 = vmatprep.subr.mxu1 %v981_v13  ;;  %1087 = vmatpush2.msra.mxu0 %v916_v14  ;;  %v961_v13 = vld [vmem:[#allocation2 + $0x938] sm:$0xff]  ;;  %v896_v14 = vld [vmem:[#allocation2 + $0x730] sm:$0xff] }
 0x32d   :  { %1158 = vmatpush2.msra.mxu1 %v980_v16  ;;  %1088 = vmatprep.subr.mxu0 %v915_v22  ;;  %v960_v16 = vld [vmem:[#allocation2 + $0x930] sm:$0xff]  ;;  %v895_v22 = vld [vmem:[#allocation2 + $0x728] sm:$0xff] }
 0x32e   :  { %1159 = vmatprep.subr.mxu1 %v979_v26  ;;  %1089 = vmatpush2.msra.mxu0 %v914_v30  ;;  %v959_v26 = vld [vmem:[#allocation2 + $0x928] sm:$0xff]  ;;  %v894_v30 = vld [vmem:[#allocation2 + $0x720] sm:$0xff] }
 0x32f   :  { %1160 = vmatpush2.msra.mxu1 %v978_v34  ;;  %1090 = vmatprep.subr.mxu0 %v913_v15  ;;  %v958_v34 = vld [vmem:[#allocation2 + $0x920] sm:$0xff]  ;;  %v893_v15 = vld [vmem:[#allocation2 + $0x718] sm:$0xff] }
 0x330   :  { %1161 = vmatprep.subr.mxu1 %v977_v17  ;;  %1091 = vmatpush2.msra.mxu0 %v912_v20  ;;  %v957_v17 = vld [vmem:[#allocation2 + $0x918] sm:$0xff]  ;;  %v892_v20 = vld [vmem:[#allocation2 + $0x710] sm:$0xff] }
 0x331   :  { %1162 = vmatpush2.msra.mxu1 %v976_v24  ;;  %1092 = vmatprep.subr.mxu0 %v911_v38  ;;  %v956_v24 = vld [vmem:[#allocation2 + $0x910] sm:$0xff]  ;;  %v891_v38 = vld [vmem:[#allocation2 + $0x708] sm:$0xff] }
 0x332   :  { %1163 = vmatprep.subr.mxu1 %v975_v39  ;;  %1093 = vmatpush2.msra.mxu0 %v910_v40  ;;  %v955_v39 = vld [vmem:[#allocation2 + $0x908] sm:$0xff]  ;;  %v890_v40 = vld [vmem:[#allocation2 + $0x700] sm:$0xff] }
 0x333   :  { %1164 = vmatpush2.msra.mxu1 %v974_v41  ;;  %1094 = vmatprep.subr.mxu0 %v909_v42  ;;  %v954_v41 = vld [vmem:[#allocation2 + $0x900] sm:$0xff]  ;;  %v1017_v42 = vld [vmem:[#allocation2 + $0xaf8] sm:$0xff] }
 0x334   :  { %1165 = vmatprep.subr.mxu1 %v973_v43  ;;  %1095 = vmatpush2.msra.mxu0 %v908_v44  ;;  %v1016_v43 = vld [vmem:[#allocation2 + $0xaf0] sm:$0xff]  ;;  %v1015_v44 = vld [vmem:[#allocation2 + $0xae8] sm:$0xff] }
 0x335   :  { %1166 = vmatpush2.msra.mxu1 %v972_v45  ;;  %1096 = vmatprep.subr.mxu0 %v907_v46  ;;  %v1014_v45 = vld [vmem:[#allocation2 + $0xae0] sm:$0xff]  ;;  %v1013_v46 = vld [vmem:[#allocation2 + $0xad8] sm:$0xff] }
 0x336   :  { %1167 = vmatprep.subr.mxu1 %v971_v47  ;;  %1097 = vmatpush2.msra.mxu0 %v906_v48  ;;  %v1012_v47 = vld [vmem:[#allocation2 + $0xad0] sm:$0xff]  ;;  %v1011_v48 = vld [vmem:[#allocation2 + $0xac8] sm:$0xff] }
 0x337   :  { %1168 = vmatpush2.msra.mxu1 %v970_v49  ;;  %1098 = vmatprep.subr.mxu0 %v905_v50  ;;  %v1010_v49 = vld [vmem:[#allocation2 + $0xac0] sm:$0xff]  ;;  %v1009_v50 = vld [vmem:[#allocation2 + $0xab8] sm:$0xff] }
 0x338   :  { %1169 = vmatprep.subr.mxu1 %v969_v51  ;;  %1099 = vmatpush2.msra.mxu0 %v904_v52  ;;  %v1008_v51 = vld [vmem:[#allocation2 + $0xab0] sm:$0xff]  ;;  %v1007_v52 = vld [vmem:[#allocation2 + $0xaa8] sm:$0xff] }
 0x339   :  { %1170 = vmatpush2.msra.mxu1 %v968_v53  ;;  %1100 = vmatprep.subr.mxu0 %v903_v54  ;;  %v1006_v53 = vld [vmem:[#allocation2 + $0xaa0] sm:$0xff]  ;;  %v1005_v54 = vld [vmem:[#allocation2 + $0xa98] sm:$0xff] }
 0x33a   :  { %1171 = vmatprep.subr.mxu1 %v967_v55  ;;  %1101 = vmatpush2.msra.mxu0 %v902_v56  ;;  %v1004_v55 = vld [vmem:[#allocation2 + $0xa90] sm:$0xff]  ;;  %v1003_v56 = vld [vmem:[#allocation2 + $0xa88] sm:$0xff] }
 0x33b   :  { %1172 = vmatpush2.msra.mxu1 %v966_v57  ;;  %1102 = vmatprep.subr.mxu0 %v901_v58  ;;  %v1002_v57 = vld [vmem:[#allocation2 + $0xa80] sm:$0xff]  ;;  %v1001_v58 = vld [vmem:[#allocation2 + $0xa78] sm:$0xff] }
 0x33c   :  { %1173 = vmatprep.subr.mxu1 %v965_v59  ;;  %1103 = vmatpush2.msra.mxu0 %v900_v60  ;;  %v1000_v59 = vld [vmem:[#allocation2 + $0xa70] sm:$0xff]  ;;  %v999_v60 = vld [vmem:[#allocation2 + $0xa68] sm:$0xff] }
 0x33d   :  { %1174 = vmatpush2.msra.mxu1 %v964_v61  ;;  %1104 = vmatprep.subr.mxu0 %v899_v62  ;;  %v998_v61 = vld [vmem:[#allocation2 + $0xa60] sm:$0xff]  ;;  %v997_v62 = vld [vmem:[#allocation2 + $0xa58] sm:$0xff] }
 0x33e   :  { %1175 = vmatprep.subr.mxu1 %v963_v63  ;;  %1105 = vmatpush2.msra.mxu0 %v898_v6  ;;  %v996_v63 = vld [vmem:[#allocation2 + $0xa50] sm:$0xff]  ;;  %v995_v6 = vld [vmem:[#allocation2 + $0xa48] sm:$0xff] }
 0x33f   :  { %1176 = vmatpush2.msra.mxu1 %v962_v11  ;;  %1106 = vmatprep.subr.mxu0 %v897_v12  ;;  %v994_v11 = vld [vmem:[#allocation2 + $0xa40] sm:$0xff]  ;;  %v993_v12 = vld [vmem:[#allocation2 + $0xa38] sm:$0xff] }
 0x340   :  { %1177 = vmatprep.subr.mxu1 %v961_v13  ;;  %1107 = vmatpush2.msra.mxu0 %v896_v14  ;;  %v992_v13 = vld [vmem:[#allocation2 + $0xa30] sm:$0xff]  ;;  %v991_v14 = vld [vmem:[#allocation2 + $0xa28] sm:$0xff] }
 0x341   :  { %1178 = vmatpush2.msra.mxu1 %v960_v16  ;;  %1108 = vmatprep.subr.mxu0 %v895_v22  ;;  %v990_v16 = vld [vmem:[#allocation2 + $0xa20] sm:$0xff]  ;;  %v989_v22 = vld [vmem:[#allocation2 + $0xa18] sm:$0xff] }
 0x342   :  { %1179 = vmatprep.subr.mxu1 %v959_v26  ;;  %1109 = vmatpush2.msra.mxu0 %v894_v30  ;;  %v988_v26 = vld [vmem:[#allocation2 + $0xa10] sm:$0xff]  ;;  %v987_v30 = vld [vmem:[#allocation2 + $0xa08] sm:$0xff] }
 0x343   :  { %1180 = vmatpush2.msra.mxu1 %v958_v34  ;;  %1110 = vmatprep.subr.mxu0 %v893_v15  ;;  %v986_v34 = vld [vmem:[#allocation2 + $0xa00] sm:$0xff]  ;;  %v1049_v15 = vld [vmem:[#allocation2 + $0xbf8] sm:$0xff] }
 0x344   :  { %1181 = vmatprep.subr.mxu1 %v957_v17  ;;  %1111 = vmatpush2.msra.mxu0 %v892_v20  ;;  %v1048_v17 = vld [vmem:[#allocation2 + $0xbf0] sm:$0xff]  ;;  %v1047_v20 = vld [vmem:[#allocation2 + $0xbe8] sm:$0xff] }
 0x345   :  { %1182 = vmatpush2.msra.mxu1 %v956_v24  ;;  %1112 = vmatprep.subr.mxu0 %v891_v38  ;;  %v1046_v24 = vld [vmem:[#allocation2 + $0xbe0] sm:$0xff]  ;;  %v1045_v38 = vld [vmem:[#allocation2 + $0xbd8] sm:$0xff] }
 0x346   :  { %1183 = vmatprep.subr.mxu1 %v955_v39  ;;  %1113 = vmatpush2.msra.mxu0 %v890_v40  ;;  %v1044_v39 = vld [vmem:[#allocation2 + $0xbd0] sm:$0xff]  ;;  %v1043_v40 = vld [vmem:[#allocation2 + $0xbc8] sm:$0xff] }
 0x347   :  { %1184 = vmatpush2.msra.mxu1 %v954_v41  ;;  %1115 = vmatmul.mubr.f32.vlgmr.msra.gmra.mxu0 %v8083_v5  ;;  %v1042_v41 = vld [vmem:[#allocation2 + $0xbc0] sm:$0xff] }
 0x348   :  { %1186 = vmatmul.mubr.f32.vlgmr.msra.gmra.mxu1 %v8097_v10  ;;  %1192 = vmatprep.subr.mxu0 %v1017_v42  ;;  %v1041_v42 = vld [vmem:[#allocation2 + $0xbb8] sm:$0xff] }
 0x349   :  { %1256 = vmatprep.mubr.f32.mxu0 %v8088_v7  ;;  %1193 = vmatpush1.msra.mxu0 %v1016_v43  ;;  %v1040_v43 = vld [vmem:[#allocation2 + $0xbb0] sm:$0xff] }
 0x34a   :  { %1333 = vmatprep.mubr.f32.mxu1 %v9607_v0  ;;  %1194 = vmatprep.subr.mxu0 %v1015_v44  ;;  %v1039_v44 = vld [vmem:[#allocation2 + $0xba8] sm:$0xff] }
 0x34b   :  { %1195 = vmatpush1.msra.mxu0 %v1014_v45  ;;  %v1038_v45 = vld [vmem:[#allocation2 + $0xba0] sm:$0xff] }
 0x34c   :  { %1196 = vmatprep.subr.mxu0 %v1013_v46  ;;  %v1037_v46 = vld [vmem:[#allocation2 + $0xb98] sm:$0xff] }
 0x34d   :  { %1197 = vmatpush1.msra.mxu0 %v1012_v47  ;;  %v1036_v47 = vld [vmem:[#allocation2 + $0xb90] sm:$0xff] }
 0x34e   :  { %1198 = vmatprep.subr.mxu0 %v1011_v48  ;;  %v1035_v48 = vld [vmem:[#allocation2 + $0xb88] sm:$0xff] }
 0x34f   :  { %1199 = vmatpush1.msra.mxu0 %v1010_v49  ;;  %v1034_v49 = vld [vmem:[#allocation2 + $0xb80] sm:$0xff] }
 0x350   :  { %1200 = vmatprep.subr.mxu0 %v1009_v50  ;;  %v1033_v50 = vld [vmem:[#allocation2 + $0xb78] sm:$0xff] }
 0x351   :  { %1201 = vmatpush1.msra.mxu0 %v1008_v51  ;;  %v1032_v51 = vld [vmem:[#allocation2 + $0xb70] sm:$0xff] }
 0x352   :  { %1202 = vmatprep.subr.mxu0 %v1007_v52  ;;  %v1031_v52 = vld [vmem:[#allocation2 + $0xb68] sm:$0xff] }
 0x353   :  { %1203 = vmatpush1.msra.mxu0 %v1006_v53  ;;  %v1030_v53 = vld [vmem:[#allocation2 + $0xb60] sm:$0xff] }
 0x354   :  { %1204 = vmatprep.subr.mxu0 %v1005_v54  ;;  %v1029_v54 = vld [vmem:[#allocation2 + $0xb58] sm:$0xff] }
 0x355   :  { %1205 = vmatpush1.msra.mxu0 %v1004_v55  ;;  %v1028_v55 = vld [vmem:[#allocation2 + $0xb50] sm:$0xff] }
 0x356   :  { %1206 = vmatprep.subr.mxu0 %v1003_v56  ;;  %v1027_v56 = vld [vmem:[#allocation2 + $0xb48] sm:$0xff] }
 0x357   :  { %1207 = vmatpush1.msra.mxu0 %v1002_v57  ;;  %v1026_v57 = vld [vmem:[#allocation2 + $0xb40] sm:$0xff] }
 0x358   :  { %1208 = vmatprep.subr.mxu0 %v1001_v58  ;;  %v1025_v58 = vld [vmem:[#allocation2 + $0xb38] sm:$0xff] }
 0x359   :  { %1209 = vmatpush1.msra.mxu0 %v1000_v59  ;;  %v1024_v59 = vld [vmem:[#allocation2 + $0xb30] sm:$0xff] }
 0x35a   :  { %1210 = vmatprep.subr.mxu0 %v999_v60  ;;  %v1023_v60 = vld [vmem:[#allocation2 + $0xb28] sm:$0xff] }
 0x35b   :  { %1211 = vmatpush1.msra.mxu0 %v998_v61  ;;  %v1022_v61 = vld [vmem:[#allocation2 + $0xb20] sm:$0xff] }
 0x35c   :  { %1212 = vmatprep.subr.mxu0 %v997_v62  ;;  %v1021_v62 = vld [vmem:[#allocation2 + $0xb18] sm:$0xff] }
 0x35d   :  { %1213 = vmatpush1.msra.mxu0 %v996_v63  ;;  %v1020_v63 = vld [vmem:[#allocation2 + $0xb10] sm:$0xff] }
 0x35e   :  { %1214 = vmatprep.subr.mxu0 %v995_v6  ;;  %v1019_v6 = vld [vmem:[#allocation2 + $0xb08] sm:$0xff] }
 0x35f   :  { %1215 = vmatpush1.msra.mxu0 %v994_v11  ;;  %v1018_v11 = vld [vmem:[#allocation2 + $0xb00] sm:$0xff] }
 0x360   :  { %1216 = vmatprep.subr.mxu0 %v993_v12 }
 0x361   :  { %1217 = vmatpush1.msra.mxu0 %v992_v13 }
 0x362   :  { %1218 = vmatprep.subr.mxu0 %v991_v14 }
 0x363   :  { %1219 = vmatpush1.msra.mxu0 %v990_v16 }
 0x364   :  { %1220 = vmatprep.subr.mxu0 %v989_v22 }
 0x365   :  { %1221 = vmatpush1.msra.mxu0 %v988_v26 }
 0x366   :  { %1222 = vmatprep.subr.mxu0 %v987_v30 }
 0x367   :  { %1223 = vmatpush1.msra.mxu0 %v986_v34 }
 0x368   :  { %1224 = vmatprep.subr.mxu0 %v1049_v15 }
 0x369   :  { %1225 = vmatpush2.msra.mxu0 %v1048_v17 }
 0x36a   :  { %1226 = vmatprep.subr.mxu0 %v1047_v20 }
 0x36b   :  { %1227 = vmatpush2.msra.mxu0 %v1046_v24 }
 0x36c   :  { %1228 = vmatprep.subr.mxu0 %v1045_v38 }
 0x36d   :  { %1229 = vmatpush2.msra.mxu0 %v1044_v39 }
 0x36e   :  { %1230 = vmatprep.subr.mxu0 %v1043_v40 }
 0x36f   :  { %1231 = vmatpush2.msra.mxu0 %v1042_v41 }
 0x370   :  { %1232 = vmatprep.subr.mxu0 %v1041_v42 }
 0x371   :  { %1233 = vmatpush2.msra.mxu0 %v1040_v43 }
 0x372   :  { %1234 = vmatprep.subr.mxu0 %v1039_v44 }
 0x373   :  { %1235 = vmatpush2.msra.mxu0 %v1038_v45 }
 0x374   :  { %1236 = vmatprep.subr.mxu0 %v1037_v46 }
 0x375   :  { %1237 = vmatpush2.msra.mxu0 %v1036_v47 }
 0x376   :  { %1238 = vmatprep.subr.mxu0 %v1035_v48 }
 0x377   :  { %1239 = vmatpush2.msra.mxu0 %v1034_v49 }
 0x378   :  { %1240 = vmatprep.subr.mxu0 %v1033_v50 }
 0x379   :  { %1241 = vmatpush2.msra.mxu0 %v1032_v51 }
 0x37a   :  { %1242 = vmatprep.subr.mxu0 %v1031_v52 }
 0x37b   :  { %1243 = vmatpush2.msra.mxu0 %v1030_v53 }
 0x37c   :  { %1244 = vmatprep.subr.mxu0 %v1029_v54 }
 0x37d   :  { %1245 = vmatpush2.msra.mxu0 %v1028_v55 }
 0x37e   :  { %1246 = vmatprep.subr.mxu0 %v1027_v56 }
 0x37f   :  { %1247 = vmatpush2.msra.mxu0 %v1026_v57 }
 0x380   :  { %1248 = vmatprep.subr.mxu0 %v1025_v58 }
 0x381   :  { %1249 = vmatpush2.msra.mxu0 %v1024_v59 }
 0x382   :  { %1250 = vmatprep.subr.mxu0 %v1023_v60 }
 0x383   :  { %1251 = vmatpush2.msra.mxu0 %v1022_v61 }
 0x384   :  { %1252 = vmatprep.subr.mxu0 %v1021_v62 }
 0x385   :  { %1253 = vmatpush2.msra.mxu0 %v1020_v63 }
 0x386   :  { %1254 = vmatprep.subr.mxu0 %v1019_v6 }
 0x387   :  { %1255 = vmatpush2.msra.mxu0 %v1018_v11 }
 0x388   :  { %1257 = vmatmul.mubr.f32.vlgmr.msra.gmra.mxu0 %v8091_v8 }
 0x407   :  { %v1116_v12 = vpop.f32.mrf.mxu0 }
 0x408   :  { %v1187_v13 = vpop.f32.mrf.mxu1 }
 0x409   :  { %v1118_v14 = vpop.f32.mrf.mxu0  ;;  %v1188_v30 = vadd.f32 %v1187_v13, %v1116_v12 }
 0x40a   :  { %v1189_v16 = vpop.f32.mrf.mxu1 }
 0x40b   :  { %v1190_v26 = vadd.f32 %v1189_v16, %v1118_v14 }
 0x448   :  { %v1258_v22 = vpop.f32.mrf.mxu0 }
 0x449   :  { %v8229_v17 = vadd.f32 %v1258_v22, %v1188_v30 }
 0x44a   :  { %v1260_v34 = vpop.f32.mrf.mxu0 }
 0x44b   :  { %v8227_v15 = vadd.f32 %v1260_v34, %v1190_v26  ;;  %9686 = vst [vmem:[#allocation65_spill] sm:$0xff] %v8229_v17 }
 0x44d   :  { %9685 = vst [vmem:[#allocation64_spill] sm:$0xff] %v8227_v15  ;;  %1299 = vmatprep.subr.mxu1 %v8227_v15 }
 0x44e   :  { %1300 = vmatpush1.msra.mxu1 %v8229_v17 }
 0x44f   :  { %7592 = vmatmul.mubr.msk.f32.vlgmr.msra.gmra.mxu1 %vm60_vm0, %v8073_v2 }
 0x450   :  { %1339 = vmatprep.mubr.f32.mxu1 %v9607_v0 }
 0x453   :  { %7593 = vmatmul.mubr.msk.f32.gmra.mxu1 %vm60_vm0, %v8078_v3 }
 0x50f   :  { %v1335_v20 = vpop.f32.mrf.mxu1 }
 0x510   :  { %v8239_v24 = vadd.f32 %v1335_v20, %v8142_v21 }
 0x511   :  { %v1337_v38 = vpop.f32.mrf.mxu1 }
 0x512   :  { %9687 = vst [vmem:[#allocation66_spill] sm:$0xff] %v8239_v24  ;;  %v8242_v39 = vadd.f32 %v1337_v38, %v8146_v25 }
 0x513   :  { %v1341_v40 = vpop.f32.mrf.mxu1 }
 0x514   :  { %9688 = vst [vmem:[#allocation67_spill] sm:$0xff] %v8242_v39  ;;  %v8245_v41 = vadd.f32 %v1341_v40, %v8150_v29 }
 0x515   :  { %v1343_v42 = vpop.f32.mrf.mxu1 }
 0x516   :  { %9689 = vst [vmem:[#allocation68_spill] sm:$0xff] %v8245_v41  ;;  %v8248_v43 = vadd.f32 %v1343_v42, %v8154_v33 }
 0x518   :  { %9690 = vst [vmem:[#allocation69_spill] sm:$0xff] %v8248_v43 }
 0x519   :  { %7979 = dma.done.wait [#allocation3], 24576 }
 0x51a   :  { %7980 = vsyncadd [#allocation3], 4294942720  ;;  %1612 = vmatprep.mubr.f32.mxu1 %v8080_v4  ;;  %1683 = vmatprep.mubr.f32.mxu0 %v8093_v9  ;;  %v8255_v21 = vld [vmem:[%s9596_s2 + $0x20] sm:$0xff]  ;;  %v8260_v25 = vld [vmem:[%s9596_s2 + $0x28] sm:$0xff] }
 0x51b   :  { %9691 = vst [vmem:[#allocation70_spill] sm:$0xff] %v8255_v21  ;;  %9692 = vst [vmem:[#allocation71_spill] sm:$0xff] %v8260_v25  ;;  %v1387_v29 = vld [vmem:[#allocation2 + $0xf8] sm:$0xff]  ;;  %v1386_v44 = vld [vmem:[#allocation2 + $0xf0] sm:$0xff] }
 0x51c   :  { %1548 = vmatprep.subr.mxu1 %v1387_v29  ;;  %v1451_v33 = vld [vmem:[#allocation2 + $0x2f8] sm:$0xff]  ;;  %v1450_v45 = vld [vmem:[#allocation2 + $0x2f0] sm:$0xff]  ;;  %v1385_v4 = vld [vmem:[#allocation2 + $0xe8] sm:$0xff] }
 0x51d   :  { %1619 = vmatprep.subr.mxu0 %v1451_v33  ;;  %1549 = vmatpush1.msra.mxu1 %v1386_v44  ;;  %v1449_v46 = vld [vmem:[#allocation2 + $0x2e8] sm:$0xff]  ;;  %v1384_v9 = vld [vmem:[#allocation2 + $0xe0] sm:$0xff]  ;;  %v1383_v48 = vld [vmem:[#allocation2 + $0xd8] sm:$0xff] }
 0x51e   :  { %1620 = vmatpush1.msra.mxu0 %v1450_v45  ;;  %1550 = vmatprep.subr.mxu1 %v1385_v4  ;;  %v1448_v47 = vld [vmem:[#allocation2 + $0x2e0] sm:$0xff]  ;;  %v1447_v49 = vld [vmem:[#allocation2 + $0x2d8] sm:$0xff]  ;;  %v1382_v50 = vld [vmem:[#allocation2 + $0xd0] sm:$0xff] }
 0x51f   :  { %1621 = vmatprep.subr.mxu0 %v1449_v46  ;;  %1551 = vmatpush1.msra.mxu1 %v1384_v9  ;;  %v1446_v51 = vld [vmem:[#allocation2 + $0x2d0] sm:$0xff]  ;;  %v1381_v52 = vld [vmem:[#allocation2 + $0xc8] sm:$0xff]  ;;  %v1380_v54 = vld [vmem:[#allocation2 + $0xc0] sm:$0xff] }
 0x520   :  { %1622 = vmatpush1.msra.mxu0 %v1448_v47  ;;  %1552 = vmatprep.subr.mxu1 %v1383_v48  ;;  %v1445_v53 = vld [vmem:[#allocation2 + $0x2c8] sm:$0xff]  ;;  %v1444_v55 = vld [vmem:[#allocation2 + $0x2c0] sm:$0xff]  ;;  %v1379_v56 = vld [vmem:[#allocation2 + $0xb8] sm:$0xff] }
 0x521   :  { %1623 = vmatprep.subr.mxu0 %v1447_v49  ;;  %1553 = vmatpush1.msra.mxu1 %v1382_v50  ;;  %v1443_v57 = vld [vmem:[#allocation2 + $0x2b8] sm:$0xff]  ;;  %v1378_v58 = vld [vmem:[#allocation2 + $0xb0] sm:$0xff]  ;;  %v1377_v60 = vld [vmem:[#allocation2 + $0xa8] sm:$0xff] }
 0x522   :  { %1624 = vmatpush1.msra.mxu0 %v1446_v51  ;;  %1554 = vmatprep.subr.mxu1 %v1381_v52  ;;  %v1442_v59 = vld [vmem:[#allocation2 + $0x2b0] sm:$0xff]  ;;  %v1441_v61 = vld [vmem:[#allocation2 + $0x2a8] sm:$0xff]  ;;  %v1376_v62 = vld [vmem:[#allocation2 + $0xa0] sm:$0xff] }
 0x523   :  { %1625 = vmatprep.subr.mxu0 %v1445_v53  ;;  %1555 = vmatpush1.msra.mxu1 %v1380_v54  ;;  %v1440_v63 = vld [vmem:[#allocation2 + $0x2a0] sm:$0xff]  ;;  %v1375_v6 = vld [vmem:[#allocation2 + $0x98] sm:$0xff]  ;;  %v1374_v12 = vld [vmem:[#allocation2 + $0x90] sm:$0xff] }
 0x524   :  { %1626 = vmatpush1.msra.mxu0 %v1444_v55  ;;  %1556 = vmatprep.subr.mxu1 %v1379_v56  ;;  %v1439_v11 = vld [vmem:[#allocation2 + $0x298] sm:$0xff]  ;;  %v1438_v13 = vld [vmem:[#allocation2 + $0x290] sm:$0xff]  ;;  %v1373_v14 = vld [vmem:[#allocation2 + $0x88] sm:$0xff] }
 0x525   :  { %1627 = vmatprep.subr.mxu0 %v1443_v57  ;;  %1557 = vmatpush1.msra.mxu1 %v1378_v58  ;;  %v1437_v16 = vld [vmem:[#allocation2 + $0x288] sm:$0xff]  ;;  %v1372_v22 = vld [vmem:[#allocation2 + $0x80] sm:$0xff]  ;;  %v1371_v30 = vld [vmem:[#allocation2 + $0x78] sm:$0xff] }
 0x526   :  { %1628 = vmatpush1.msra.mxu0 %v1442_v59  ;;  %1558 = vmatprep.subr.mxu1 %v1377_v60  ;;  %v1436_v26 = vld [vmem:[#allocation2 + $0x280] sm:$0xff]  ;;  %v1435_v34 = vld [vmem:[#allocation2 + $0x278] sm:$0xff]  ;;  %v1370_v20 = vld [vmem:[#allocation2 + $0x70] sm:$0xff] }
 0x527   :  { %1629 = vmatprep.subr.mxu0 %v1441_v61  ;;  %1559 = vmatpush1.msra.mxu1 %v1376_v62  ;;  %v1434_v38 = vld [vmem:[#allocation2 + $0x270] sm:$0xff]  ;;  %v1369_v40 = vld [vmem:[#allocation2 + $0x68] sm:$0xff]  ;;  %v1368_v29 = vld [vmem:[#allocation2 + $0x60] sm:$0xff] }
 0x528   :  { %1630 = vmatpush1.msra.mxu0 %v1440_v63  ;;  %1560 = vmatprep.subr.mxu1 %v1375_v6  ;;  %v1433_v42 = vld [vmem:[#allocation2 + $0x268] sm:$0xff]  ;;  %v1432_v33 = vld [vmem:[#allocation2 + $0x260] sm:$0xff]  ;;  %v1367_v44 = vld [vmem:[#allocation2 + $0x58] sm:$0xff] }
 0x529   :  { %1631 = vmatprep.subr.mxu0 %v1439_v11  ;;  %1561 = vmatpush1.msra.mxu1 %v1374_v12  ;;  %v1431_v45 = vld [vmem:[#allocation2 + $0x258] sm:$0xff]  ;;  %v1366_v4 = vld [vmem:[#allocation2 + $0x50] sm:$0xff]  ;;  %v1365_v9 = vld [vmem:[#allocation2 + $0x48] sm:$0xff] }
 0x52a   :  { %1632 = vmatpush1.msra.mxu0 %v1438_v13  ;;  %1562 = vmatprep.subr.mxu1 %v1373_v14  ;;  %v1430_v46 = vld [vmem:[#allocation2 + $0x250] sm:$0xff]  ;;  %v1429_v47 = vld [vmem:[#allocation2 + $0x248] sm:$0xff]  ;;  %v1364_v48 = vld [vmem:[#allocation2 + $0x40] sm:$0xff] }
 0x52b   :  { %1633 = vmatprep.subr.mxu0 %v1437_v16  ;;  %1563 = vmatpush1.msra.mxu1 %v1372_v22  ;;  %v1428_v49 = vld [vmem:[#allocation2 + $0x240] sm:$0xff]  ;;  %v1363_v50 = vld [vmem:[#allocation2 + $0x38] sm:$0xff]  ;;  %v1362_v52 = vld [vmem:[#allocation2 + $0x30] sm:$0xff] }
 0x52c   :  { %1634 = vmatpush1.msra.mxu0 %v1436_v26  ;;  %1564 = vmatprep.subr.mxu1 %v1371_v30  ;;  %v1427_v51 = vld [vmem:[#allocation2 + $0x238] sm:$0xff]  ;;  %v1426_v53 = vld [vmem:[#allocation2 + $0x230] sm:$0xff]  ;;  %v1361_v54 = vld [vmem:[#allocation2 + $0x28] sm:$0xff] }
 0x52d   :  { %1635 = vmatprep.subr.mxu0 %v1435_v34  ;;  %1565 = vmatpush1.msra.mxu1 %v1370_v20  ;;  %v1425_v55 = vld [vmem:[#allocation2 + $0x228] sm:$0xff]  ;;  %v1360_v56 = vld [vmem:[#allocation2 + $0x20] sm:$0xff]  ;;  %v1359_v58 = vld [vmem:[#allocation2 + $0x18] sm:$0xff] }
 0x52e   :  { %1636 = vmatpush1.msra.mxu0 %v1434_v38  ;;  %1566 = vmatprep.subr.mxu1 %v1369_v40  ;;  %v1424_v57 = vld [vmem:[#allocation2 + $0x220] sm:$0xff]  ;;  %v1423_v59 = vld [vmem:[#allocation2 + $0x218] sm:$0xff]  ;;  %v1358_v60 = vld [vmem:[#allocation2 + $0x10] sm:$0xff] }
 0x52f   :  { %1637 = vmatprep.subr.mxu0 %v1433_v42  ;;  %1567 = vmatpush1.msra.mxu1 %v1368_v29  ;;  %v1422_v61 = vld [vmem:[#allocation2 + $0x210] sm:$0xff]  ;;  %v1357_v62 = vld [vmem:[#allocation2 + $0x8] sm:$0xff]  ;;  %v1356_v6 = vld [vmem:[#allocation2] sm:$0xff] }
 0x530   :  { %1638 = vmatpush1.msra.mxu0 %v1432_v33  ;;  %1568 = vmatprep.subr.mxu1 %v1367_v44  ;;  %v1421_v63 = vld [vmem:[#allocation2 + $0x208] sm:$0xff]  ;;  %v1420_v11 = vld [vmem:[#allocation2 + $0x200] sm:$0xff]  ;;  %v1419_v12 = vld [vmem:[#allocation2 + $0x1f8] sm:$0xff] }
 0x531   :  { %1639 = vmatprep.subr.mxu0 %v1431_v45  ;;  %1569 = vmatpush1.msra.mxu1 %v1366_v4  ;;  %v1483_v13 = vld [vmem:[#allocation2 + $0x3f8] sm:$0xff]  ;;  %v1418_v14 = vld [vmem:[#allocation2 + $0x1f0] sm:$0xff]  ;;  %v1417_v22 = vld [vmem:[#allocation2 + $0x1e8] sm:$0xff] }
 0x532   :  { %1640 = vmatpush1.msra.mxu0 %v1430_v46  ;;  %1570 = vmatprep.subr.mxu1 %v1365_v9  ;;  %v1482_v16 = vld [vmem:[#allocation2 + $0x3f0] sm:$0xff]  ;;  %v1481_v26 = vld [vmem:[#allocation2 + $0x3e8] sm:$0xff]  ;;  %v1416_v30 = vld [vmem:[#allocation2 + $0x1e0] sm:$0xff] }
 0x533   :  { %1641 = vmatprep.subr.mxu0 %v1429_v47  ;;  %1571 = vmatpush1.msra.mxu1 %v1364_v48  ;;  %v1480_v34 = vld [vmem:[#allocation2 + $0x3e0] sm:$0xff]  ;;  %v1415_v20 = vld [vmem:[#allocation2 + $0x1d8] sm:$0xff]  ;;  %v1414_v40 = vld [vmem:[#allocation2 + $0x1d0] sm:$0xff] }
 0x534   :  { %1642 = vmatpush1.msra.mxu0 %v1428_v49  ;;  %1572 = vmatprep.subr.mxu1 %v1363_v50  ;;  %v1479_v38 = vld [vmem:[#allocation2 + $0x3d8] sm:$0xff]  ;;  %v1478_v42 = vld [vmem:[#allocation2 + $0x3d0] sm:$0xff]  ;;  %v1413_v29 = vld [vmem:[#allocation2 + $0x1c8] sm:$0xff] }
 0x535   :  { %1643 = vmatprep.subr.mxu0 %v1427_v51  ;;  %1573 = vmatpush1.msra.mxu1 %v1362_v52  ;;  %v1477_v33 = vld [vmem:[#allocation2 + $0x3c8] sm:$0xff]  ;;  %v1412_v44 = vld [vmem:[#allocation2 + $0x1c0] sm:$0xff]  ;;  %v1411_v4 = vld [vmem:[#allocation2 + $0x1b8] sm:$0xff] }
 0x536   :  { %1644 = vmatpush1.msra.mxu0 %v1426_v53  ;;  %1574 = vmatprep.subr.mxu1 %v1361_v54  ;;  %v1476_v45 = vld [vmem:[#allocation2 + $0x3c0] sm:$0xff]  ;;  %v1475_v46 = vld [vmem:[#allocation2 + $0x3b8] sm:$0xff]  ;;  %v1410_v9 = vld [vmem:[#allocation2 + $0x1b0] sm:$0xff] }
 0x537   :  { %1645 = vmatprep.subr.mxu0 %v1425_v55  ;;  %1575 = vmatpush1.msra.mxu1 %v1360_v56  ;;  %v1474_v47 = vld [vmem:[#allocation2 + $0x3b0] sm:$0xff]  ;;  %v1409_v48 = vld [vmem:[#allocation2 + $0x1a8] sm:$0xff]  ;;  %v1408_v50 = vld [vmem:[#allocation2 + $0x1a0] sm:$0xff] }
 0x538   :  { %1646 = vmatpush1.msra.mxu0 %v1424_v57  ;;  %1576 = vmatprep.subr.mxu1 %v1359_v58  ;;  %v1473_v49 = vld [vmem:[#allocation2 + $0x3a8] sm:$0xff]  ;;  %v1472_v51 = vld [vmem:[#allocation2 + $0x3a0] sm:$0xff]  ;;  %v1407_v52 = vld [vmem:[#allocation2 + $0x198] sm:$0xff] }
 0x539   :  { %1647 = vmatprep.subr.mxu0 %v1423_v59  ;;  %1577 = vmatpush1.msra.mxu1 %v1358_v60  ;;  %v1471_v53 = vld [vmem:[#allocation2 + $0x398] sm:$0xff]  ;;  %v1406_v54 = vld [vmem:[#allocation2 + $0x190] sm:$0xff]  ;;  %v1405_v56 = vld [vmem:[#allocation2 + $0x188] sm:$0xff] }
 0x53a   :  { %1648 = vmatpush1.msra.mxu0 %v1422_v61  ;;  %1578 = vmatprep.subr.mxu1 %v1357_v62  ;;  %v1470_v55 = vld [vmem:[#allocation2 + $0x390] sm:$0xff]  ;;  %v1469_v57 = vld [vmem:[#allocation2 + $0x388] sm:$0xff]  ;;  %v1404_v58 = vld [vmem:[#allocation2 + $0x180] sm:$0xff] }
 0x53b   :  { %1649 = vmatprep.subr.mxu0 %v1421_v63  ;;  %1579 = vmatpush1.msra.mxu1 %v1356_v6  ;;  %v1468_v59 = vld [vmem:[#allocation2 + $0x380] sm:$0xff]  ;;  %v1403_v60 = vld [vmem:[#allocation2 + $0x178] sm:$0xff]  ;;  %v1402_v62 = vld [vmem:[#allocation2 + $0x170] sm:$0xff] }
 0x53c   :  { %1650 = vmatpush1.msra.mxu0 %v1420_v11  ;;  %1580 = vmatprep.subr.mxu1 %v1419_v12  ;;  %v1467_v61 = vld [vmem:[#allocation2 + $0x378] sm:$0xff]  ;;  %v1466_v63 = vld [vmem:[#allocation2 + $0x370] sm:$0xff]  ;;  %v1401_v6 = vld [vmem:[#allocation2 + $0x168] sm:$0xff] }
 0x53d   :  { %1651 = vmatprep.subr.mxu0 %v1483_v13  ;;  %1581 = vmatpush2.msra.mxu1 %v1418_v14  ;;  %v1465_v11 = vld [vmem:[#allocation2 + $0x368] sm:$0xff]  ;;  %v1400_v12 = vld [vmem:[#allocation2 + $0x160] sm:$0xff]  ;;  %v1399_v14 = vld [vmem:[#allocation2 + $0x158] sm:$0xff] }
 0x53e   :  { %1652 = vmatpush2.msra.mxu0 %v1482_v16  ;;  %1582 = vmatprep.subr.mxu1 %v1417_v22  ;;  %v1464_v13 = vld [vmem:[#allocation2 + $0x360] sm:$0xff]  ;;  %v1463_v16 = vld [vmem:[#allocation2 + $0x358] sm:$0xff]  ;;  %v1398_v22 = vld [vmem:[#allocation2 + $0x150] sm:$0xff] }
 0x53f   :  { %1653 = vmatprep.subr.mxu0 %v1481_v26  ;;  %1583 = vmatpush2.msra.mxu1 %v1416_v30  ;;  %v1462_v26 = vld [vmem:[#allocation2 + $0x350] sm:$0xff]  ;;  %v1397_v30 = vld [vmem:[#allocation2 + $0x148] sm:$0xff]  ;;  %v8342_v43 = vld [vmem:[#allocation2 + $0x5e0] sm:$0xff] }
 0x540   :  { %1654 = vmatpush2.msra.mxu0 %v1480_v34  ;;  %1584 = vmatprep.subr.mxu1 %v1415_v20  ;;  %v1461_v34 = vld [vmem:[#allocation2 + $0x348] sm:$0xff]  ;;  %v1396_v20 = vld [vmem:[#allocation2 + $0x140] sm:$0xff]  ;;  %v8338_v1 = vld [vmem:[#allocation2 + $0x5f0] sm:$0xff] }
 0x541   :  { %1655 = vmatprep.subr.mxu0 %v1479_v38  ;;  %1585 = vmatpush2.msra.mxu1 %v1414_v40  ;;  %v1460_v38 = vld [vmem:[#allocation2 + $0x340] sm:$0xff]  ;;  %v1395_v40 = vld [vmem:[#allocation2 + $0x138] sm:$0xff]  ;;  %v8340_v0 = vld [vmem:[#allocation2 + $0x5e8] sm:$0xff] }
 0x542   :  { %1656 = vmatpush2.msra.mxu0 %v1478_v42  ;;  %1586 = vmatprep.subr.mxu1 %v1413_v29  ;;  %v1459_v42 = vld [vmem:[#allocation2 + $0x338] sm:$0xff]  ;;  %v1394_v29 = vld [vmem:[#allocation2 + $0x130] sm:$0xff]  ;;  %v8348_v24 = vld [vmem:[#allocation2 + $0x5c8] sm:$0xff] }
 0x543   :  { %1657 = vmatprep.subr.mxu0 %v1477_v33  ;;  %1587 = vmatpush2.msra.mxu1 %v1412_v44  ;;  %v1458_v33 = vld [vmem:[#allocation2 + $0x330] sm:$0xff]  ;;  %v1393_v44 = vld [vmem:[#allocation2 + $0x128] sm:$0xff]  ;;  %v8344_v41 = vld [vmem:[#allocation2 + $0x5d8] sm:$0xff] }
 0x544   :  { %1658 = vmatpush2.msra.mxu0 %v1476_v45  ;;  %1588 = vmatprep.subr.mxu1 %v1411_v4  ;;  %v1457_v45 = vld [vmem:[#allocation2 + $0x328] sm:$0xff]  ;;  %v1392_v4 = vld [vmem:[#allocation2 + $0x120] sm:$0xff]  ;;  %v8346_v39 = vld [vmem:[#allocation2 + $0x5d0] sm:$0xff] }
 0x545   :  { %1659 = vmatprep.subr.mxu0 %v1475_v46  ;;  %1589 = vmatpush2.msra.mxu1 %v1410_v9  ;;  %v1456_v46 = vld [vmem:[#allocation2 + $0x320] sm:$0xff]  ;;  %v1391_v9 = vld [vmem:[#allocation2 + $0x118] sm:$0xff]  ;;  %v8354_v27 = vld [vmem:[#allocation2 + $0x5b0] sm:$0xff] }
 0x546   :  { %1660 = vmatpush2.msra.mxu0 %v1474_v47  ;;  %1590 = vmatprep.subr.mxu1 %v1409_v48  ;;  %v1455_v47 = vld [vmem:[#allocation2 + $0x318] sm:$0xff]  ;;  %v1390_v48 = vld [vmem:[#allocation2 + $0x110] sm:$0xff]  ;;  %v8350_v36 = vld [vmem:[#allocation2 + $0x5c0] sm:$0xff] }
 0x547   :  { %1661 = vmatprep.subr.mxu0 %v1473_v49  ;;  %1591 = vmatpush2.msra.mxu1 %v1408_v50  ;;  %v8262_v49 = vld [vmem:[#allocation2 + $0x310] sm:$0xff]  ;;  %v8264_v50 = vld [vmem:[#allocation2 + $0x108] sm:$0xff]  ;;  %v8352_v31 = vld [vmem:[#allocation2 + $0x5b8] sm:$0xff] }
 0x548   :  { %1662 = vmatpush2.msra.mxu0 %v1472_v51  ;;  %1592 = vmatprep.subr.mxu1 %v1407_v52  ;;  %v8266_v51 = vld [vmem:[#allocation2 + $0x308] sm:$0xff]  ;;  %v8268_v52 = vld [vmem:[#allocation2 + $0x100] sm:$0xff]  ;;  %v8360_v21 = vld [vmem:[#allocation2 + $0x598] sm:$0xff] }
 0x549   :  { %1663 = vmatprep.subr.mxu0 %v1471_v53  ;;  %1593 = vmatpush2.msra.mxu1 %v1406_v54  ;;  %v8270_v53 = vld [vmem:[#allocation2 + $0x300] sm:$0xff]  ;;  %v8272_v54 = vld [vmem:[#allocation2 + $0x4f8] sm:$0xff]  ;;  %v8356_v23 = vld [vmem:[#allocation2 + $0x5a8] sm:$0xff] }
 0x54a   :  { %1664 = vmatpush2.msra.mxu0 %v1470_v55  ;;  %1594 = vmatprep.subr.mxu1 %v1405_v56  ;;  %v8274_v55 = vld [vmem:[#allocation2 + $0x4f0] sm:$0xff]  ;;  %v8276_v56 = vld [vmem:[#allocation2 + $0x4e8] sm:$0xff]  ;;  %v8358_v25 = vld [vmem:[#allocation2 + $0x5a0] sm:$0xff] }
 0x54b   :  { %1665 = vmatprep.subr.mxu0 %v1469_v57  ;;  %1595 = vmatpush2.msra.mxu1 %v1404_v58  ;;  %v8278_v57 = vld [vmem:[#allocation2 + $0x4e0] sm:$0xff]  ;;  %v8280_v58 = vld [vmem:[#allocation2 + $0x4d8] sm:$0xff]  ;;  %v8362_v17 = vld [vmem:[#allocation2 + $0x590] sm:$0xff] }
 0x54c   :  { %1666 = vmatpush2.msra.mxu0 %v1468_v59  ;;  %1596 = vmatprep.subr.mxu1 %v1403_v60  ;;  %v8282_v59 = vld [vmem:[#allocation2 + $0x4d0] sm:$0xff]  ;;  %v8284_v60 = vld [vmem:[#allocation2 + $0x4c8] sm:$0xff]  ;;  %v8366_v15 = vld [vmem:[#allocation2 + $0x580] sm:$0xff] }
 0x54d   :  { %1667 = vmatprep.subr.mxu0 %v1467_v61  ;;  %1597 = vmatpush2.msra.mxu1 %v1402_v62  ;;  %v8286_v61 = vld [vmem:[#allocation2 + $0x4c0] sm:$0xff]  ;;  %v8288_v62 = vld [vmem:[#allocation2 + $0x4b8] sm:$0xff]  ;;  %v8364_v19 = vld [vmem:[#allocation2 + $0x588] sm:$0xff]  ;;  %9694 = vst [vmem:[#allocation73_spill] sm:$0xff] %v8366_v15 }
 0x54e   :  { %1668 = vmatpush2.msra.mxu0 %v1466_v63  ;;  %1598 = vmatprep.subr.mxu1 %v1401_v6  ;;  %v8290_v63 = vld [vmem:[#allocation2 + $0x4b0] sm:$0xff]  ;;  %v8292_v6 = vld [vmem:[#allocation2 + $0x4a8] sm:$0xff]  ;;  %9693 = vst [vmem:[#allocation72_spill] sm:$0xff] %v8364_v19  ;;  %v8368_v18 = vld [vmem:[#allocation2 + $0x578] sm:$0xff] }
 0x54f   :  { %1669 = vmatprep.subr.mxu0 %v1465_v11  ;;  %1599 = vmatpush2.msra.mxu1 %v1400_v12  ;;  %v8294_v11 = vld [vmem:[#allocation2 + $0x4a0] sm:$0xff]  ;;  %v8296_v12 = vld [vmem:[#allocation2 + $0x498] sm:$0xff]  ;;  %v8370_v37 = vld [vmem:[#allocation2 + $0x570] sm:$0xff] }
 0x550   :  { %1670 = vmatpush2.msra.mxu0 %v1464_v13  ;;  %1600 = vmatprep.subr.mxu1 %v1399_v14  ;;  %v8298_v13 = vld [vmem:[#allocation2 + $0x490] sm:$0xff]  ;;  %v8300_v14 = vld [vmem:[#allocation2 + $0x488] sm:$0xff]  ;;  %v8374_v32 = vld [vmem:[#allocation2 + $0x560] sm:$0xff] }
 0x551   :  { %1671 = vmatprep.subr.mxu0 %v1463_v16  ;;  %1601 = vmatpush2.msra.mxu1 %v1398_v22  ;;  %v8302_v16 = vld [vmem:[#allocation2 + $0x480] sm:$0xff]  ;;  %v8304_v22 = vld [vmem:[#allocation2 + $0x478] sm:$0xff]  ;;  %v8372_v35 = vld [vmem:[#allocation2 + $0x568] sm:$0xff]  ;;  %9696 = vst [vmem:[#allocation75_spill] sm:$0xff] %v8374_v32 }
 0x552   :  { %1672 = vmatpush2.msra.mxu0 %v1462_v26  ;;  %1602 = vmatprep.subr.mxu1 %v1397_v30  ;;  %v8306_v26 = vld [vmem:[#allocation2 + $0x470] sm:$0xff]  ;;  %v8308_v30 = vld [vmem:[#allocation2 + $0x468] sm:$0xff]  ;;  %9695 = vst [vmem:[#allocation74_spill] sm:$0xff] %v8372_v35  ;;  %v8376_v28 = vld [vmem:[#allocation2 + $0x558] sm:$0xff] }
 0x553   :  { %1673 = vmatprep.subr.mxu0 %v1461_v34  ;;  %1603 = vmatpush2.msra.mxu1 %v1396_v20  ;;  %v8310_v34 = vld [vmem:[#allocation2 + $0x460] sm:$0xff]  ;;  %v8312_v20 = vld [vmem:[#allocation2 + $0x458] sm:$0xff]  ;;  %9697 = vst [vmem:[#allocation76_spill] sm:$0xff] %v8376_v28  ;;  %v8378_v3 = vld [vmem:[#allocation2 + $0x550] sm:$0xff] }
 0x554   :  { %1674 = vmatpush2.msra.mxu0 %v1460_v38  ;;  %1604 = vmatprep.subr.mxu1 %v1395_v40  ;;  %v8314_v38 = vld [vmem:[#allocation2 + $0x450] sm:$0xff]  ;;  %v8316_v40 = vld [vmem:[#allocation2 + $0x448] sm:$0xff]  ;;  %v8382_v8 = vld [vmem:[#allocation2 + $0x540] sm:$0xff] }
 0x555   :  { %1675 = vmatprep.subr.mxu0 %v1459_v42  ;;  %1605 = vmatpush2.msra.mxu1 %v1394_v29  ;;  %v8318_v42 = vld [vmem:[#allocation2 + $0x440] sm:$0xff]  ;;  %v8320_v29 = vld [vmem:[#allocation2 + $0x438] sm:$0xff]  ;;  %v8380_v2 = vld [vmem:[#allocation2 + $0x548] sm:$0xff]  ;;  %9699 = vst [vmem:[#allocation78_spill] sm:$0xff] %v8382_v8 }
 0x556   :  { %1676 = vmatpush2.msra.mxu0 %v1458_v33  ;;  %1606 = vmatprep.subr.mxu1 %v1393_v44  ;;  %v8322_v33 = vld [vmem:[#allocation2 + $0x430] sm:$0xff]  ;;  %v8324_v44 = vld [vmem:[#allocation2 + $0x428] sm:$0xff]  ;;  %9698 = vst [vmem:[#allocation77_spill] sm:$0xff] %v8380_v2  ;;  %v8384_v19 = vld [vmem:[#allocation2 + $0x538] sm:$0xff] }
 0x557   :  { %1677 = vmatprep.subr.mxu0 %v1457_v45  ;;  %1607 = vmatpush2.msra.mxu1 %v1392_v4  ;;  %v8326_v45 = vld [vmem:[#allocation2 + $0x420] sm:$0xff]  ;;  %v8328_v4 = vld [vmem:[#allocation2 + $0x418] sm:$0xff]  ;;  %9700 = vst [vmem:[#allocation79_spill] sm:$0xff] %v8384_v19  ;;  %v8386_v15 = vld [vmem:[#allocation2 + $0x530] sm:$0xff] }
 0x558   :  { %1678 = vmatpush2.msra.mxu0 %v1456_v46  ;;  %1608 = vmatprep.subr.mxu1 %v1391_v9  ;;  %v8330_v46 = vld [vmem:[#allocation2 + $0x410] sm:$0xff]  ;;  %v8332_v9 = vld [vmem:[#allocation2 + $0x408] sm:$0xff]  ;;  %v8392_v32 = vld [vmem:[#allocation2 + $0x520] sm:$0xff] }
 0x559   :  { %1679 = vmatprep.subr.mxu0 %v1455_v47  ;;  %1609 = vmatpush2.msra.mxu1 %v1390_v48  ;;  %v8334_v47 = vld [vmem:[#allocation2 + $0x400] sm:$0xff]  ;;  %v8336_v48 = vld [vmem:[#allocation2 + $0x5f8] sm:$0xff]  ;;  %v8390_v35 = vld [vmem:[#allocation2 + $0x528] sm:$0xff] }
 0x55a   :  { %1680 = vmatpush2.msra.mxu0 %v8262_v49  ;;  %1610 = vmatprep.subr.mxu1 %v8264_v50  ;;  %v8394_v28 = vld [vmem:[#allocation2 + $0x518] sm:$0xff]  ;;  %v8398_v2 = vld [vmem:[#allocation2 + $0x510] sm:$0xff]  ;;  %v8400_v8 = vld [vmem:[#allocation2 + $0x508] sm:$0xff] }
 0x55b   :  { %1681 = vmatprep.subr.mxu0 %v8266_v51  ;;  %1611 = vmatpush2.msra.mxu1 %v8268_v52  ;;  %v8402_v19 = vld [vmem:[#allocation2 + $0x500] sm:$0xff] }
 0x55c   :  { %1682 = vmatpush2.msra.mxu0 %v8270_v53  ;;  %1613 = vmatmul.mubr.f32.vlgmr.msra.gmra.mxu1 %v8083_v5 }
 0x55d   :  { %7774 = shalt.err (!%p8126_p9)  }
 0x55e   :  { %1871 = dma.hbm_to_vmem [thread:$0]  %s9594_s0, 24576, %s8117_s27, [#allocation3]  ;;  %1684 = vmatmul.mubr.f32.vlgmr.msra.gmra.mxu0 %v8097_v10  ;;  %1690 = vmatprep.subr.mxu1 %v8272_v54  ;;  %v9701_v49 = vmov 0.0   ;;  %v9704_v5 = vld [vmem:[#allocation74_spill] sm:$0xff]  ;;  %v9706_v10 = vld [vmem:[#allocation76_spill] sm:$0xff] }
 0x55f   :  { %1691 = vmatpush1.msra.mxu1 %v8274_v55  ;;  %1754 = vmatprep.mubr.f32.mxu1 %v8088_v7  ;;  %v9705_v7 = vld [vmem:[#allocation75_spill] sm:$0xff]  ;;  %v9718_v52 = vld [vmem:[#allocation56_spill] sm:$0xff]  ;;  %v9720_v55 = vld [vmem:[#allocation57_spill] sm:$0xff] }
 0x560   :  { %1692 = vmatprep.subr.mxu1 %v8276_v56  ;;  %1831 = vmatprep.mubr.f32.mxu0 %v9701_v49 }
 0x561   :  { %1693 = vmatpush1.msra.mxu1 %v8278_v57 }
 0x562   :  { %1694 = vmatprep.subr.mxu1 %v8280_v58 }
 0x563   :  { %1695 = vmatpush1.msra.mxu1 %v8282_v59 }
 0x564   :  { %1696 = vmatprep.subr.mxu1 %v8284_v60 }
 0x565   :  { %1697 = vmatpush1.msra.mxu1 %v8286_v61 }
 0x566   :  { %1698 = vmatprep.subr.mxu1 %v8288_v62 }
 0x567   :  { %1699 = vmatpush1.msra.mxu1 %v8290_v63 }
 0x568   :  { %1700 = vmatprep.subr.mxu1 %v8292_v6 }
 0x569   :  { %1701 = vmatpush1.msra.mxu1 %v8294_v11 }
 0x56a   :  { %1702 = vmatprep.subr.mxu1 %v8296_v12 }
 0x56b   :  { %1703 = vmatpush1.msra.mxu1 %v8298_v13 }
 0x56c   :  { %1704 = vmatprep.subr.mxu1 %v8300_v14 }
 0x56d   :  { %1705 = vmatpush1.msra.mxu1 %v8302_v16 }
 0x56e   :  { %1706 = vmatprep.subr.mxu1 %v8304_v22 }
 0x56f   :  { %1707 = vmatpush1.msra.mxu1 %v8306_v26 }
 0x570   :  { %1708 = vmatprep.subr.mxu1 %v8308_v30 }
 0x571   :  { %1709 = vmatpush1.msra.mxu1 %v8310_v34 }
 0x572   :  { %1710 = vmatprep.subr.mxu1 %v8312_v20 }
 0x573   :  { %1711 = vmatpush1.msra.mxu1 %v8314_v38 }
 0x574   :  { %1712 = vmatprep.subr.mxu1 %v8316_v40 }
 0x575   :  { %1713 = vmatpush1.msra.mxu1 %v8318_v42 }
 0x576   :  { %1714 = vmatprep.subr.mxu1 %v8320_v29 }
 0x577   :  { %1715 = vmatpush1.msra.mxu1 %v8322_v33 }
 0x578   :  { %1716 = vmatprep.subr.mxu1 %v8324_v44 }
 0x579   :  { %1717 = vmatpush1.msra.mxu1 %v8326_v45 }
 0x57a   :  { %1718 = vmatprep.subr.mxu1 %v8328_v4 }
 0x57b   :  { %1719 = vmatpush1.msra.mxu1 %v8330_v46 }
 0x57c   :  { %1720 = vmatprep.subr.mxu1 %v8332_v9 }
 0x57d   :  { %1721 = vmatpush1.msra.mxu1 %v8334_v47 }
 0x57e   :  { %1722 = vmatprep.subr.mxu1 %v8336_v48 }
 0x57f   :  { %1723 = vmatpush2.msra.mxu1 %v8338_v1  ;;  %v9703_v1 = vld [vmem:[#allocation73_spill] sm:$0xff] }
 0x580   :  { %1724 = vmatprep.subr.mxu1 %v8340_v0  ;;  %v9702_v0 = vld [vmem:[#allocation72_spill] sm:$0xff] }
 0x581   :  { %1725 = vmatpush2.msra.mxu1 %v8342_v43 }
 0x582   :  { %1726 = vmatprep.subr.mxu1 %v8344_v41 }
 0x583   :  { %1727 = vmatpush2.msra.mxu1 %v8346_v39 }
 0x584   :  { %1728 = vmatprep.subr.mxu1 %v8348_v24 }
 0x585   :  { %1729 = vmatpush2.msra.mxu1 %v8350_v36 }
 0x586   :  { %1730 = vmatprep.subr.mxu1 %v8352_v31  ;;  %v9709_v31 = vld [vmem:[#allocation79_spill] sm:$0xff] }
 0x587   :  { %1731 = vmatpush2.msra.mxu1 %v8354_v27  ;;  %v9708_v27 = vld [vmem:[#allocation78_spill] sm:$0xff] }
 0x588   :  { %1732 = vmatprep.subr.mxu1 %v8356_v23  ;;  %v9707_v23 = vld [vmem:[#allocation77_spill] sm:$0xff] }
 0x589   :  { %1733 = vmatpush2.msra.mxu1 %v8358_v25  ;;  %v9716_v25 = vld [vmem:[#allocation55_spill] sm:$0xff] }
 0x58a   :  { %1734 = vmatprep.subr.mxu1 %v8360_v21 }
 0x58b   :  { %1735 = vmatpush2.msra.mxu1 %v8362_v17 }
 0x58c   :  { %1736 = vmatprep.subr.mxu1 %v9702_v0 }
 0x58d   :  { %1737 = vmatpush2.msra.mxu1 %v9703_v1 }
 0x58e   :  { %1738 = vmatprep.subr.mxu1 %v8368_v18 }
 0x58f   :  { %1739 = vmatpush2.msra.mxu1 %v8370_v37 }
 0x590   :  { %1740 = vmatprep.subr.mxu1 %v9704_v5 }
 0x591   :  { %1741 = vmatpush2.msra.mxu1 %v9705_v7 }
 0x592   :  { %1742 = vmatprep.subr.mxu1 %v9706_v10 }
 0x593   :  { %1743 = vmatpush2.msra.mxu1 %v8378_v3  ;;  %v9710_v3 = vld [vmem:[#allocation53_spill] sm:$0xff] }
 0x594   :  { %1744 = vmatprep.subr.mxu1 %v9707_v23 }
 0x595   :  { %1745 = vmatpush2.msra.mxu1 %v9708_v27 }
 0x596   :  { %1746 = vmatprep.subr.mxu1 %v9709_v31 }
 0x597   :  { %1747 = vmatpush2.msra.mxu1 %v8386_v15 }
 0x598   :  { %1748 = vmatprep.subr.mxu1 %v8390_v35 }
 0x599   :  { %1749 = vmatpush2.msra.mxu1 %v8392_v32 }
 0x59a   :  { %1750 = vmatprep.subr.mxu1 %v8394_v28 }
 0x59b   :  { %1751 = vmatpush2.msra.mxu1 %v8398_v2  ;;  %v9712_v2 = vld [vmem:[#allocation51_spill] sm:$0xff] }
 0x59c   :  { %1752 = vmatprep.subr.mxu1 %v8400_v8  ;;  %v9713_v8 = vld [vmem:[#allocation52_spill] sm:$0xff] }
 0x59d   :  { %1753 = vmatpush2.msra.mxu1 %v8402_v19  ;;  %v9714_v19 = vld [vmem:[#allocation54_spill] sm:$0xff] }
 0x59e   :  { %1755 = vmatmul.mubr.f32.vlgmr.msra.gmra.mxu1 %v9710_v3 }
 0x61c   :  { %v1614_v37 = vpop.f32.mrf.mxu1 }
 0x61e   :  { %v1685_v18 = vpop.f32.mrf.mxu0  ;;  %v1616_v36 = vpop.f32.mrf.mxu1 }
 0x61f   :  { %v1686_v39 = vadd.f32 %v1685_v18, %v1614_v37 }
 0x620   :  { %v1687_v17 = vpop.f32.mrf.mxu0 }
 0x621   :  { %v1688_v15 = vadd.f32 %v1687_v17, %v1616_v36 }
 0x65e   :  { %v1756_v24 = vpop.f32.mrf.mxu1 }
 0x65f   :  { %v8482_v32 = vadd.f32 %v1756_v24, %v1686_v39 }
 0x660   :  { %v1758_v35 = vpop.f32.mrf.mxu1 }
 0x661   :  { %v8480_v41 = vadd.f32 %v1758_v35, %v1688_v15  ;;  %9711 = vst [vmem:[#allocation72_spill] sm:$0xff] %v8482_v32 }
 0x663   :  { %1797 = vmatprep.subr.mxu0 %v8480_v41 }
 0x664   :  { %1798 = vmatpush1.msra.mxu0 %v8482_v32 }
 0x665   :  { %7594 = vmatmul.mubr.msk.f32.vlgmr.msra.gmra.mxu0 %vm60_vm0, %v9712_v2 }
 0x666   :  { %1837 = vmatprep.mubr.f32.mxu0 %v9701_v49 }
 0x669   :  { %7595 = vmatmul.mubr.msk.f32.gmra.mxu0 %vm60_vm0, %v9713_v8 }
 0x725   :  { %v1833_v28 = vpop.f32.mrf.mxu0 }
 0x726   :  { %v8492_v43 = vadd.f32 %v1833_v28, %v9714_v19 }
 0x727   :  { %v1835_v21 = vpop.f32.mrf.mxu0 }
 0x728   :  { %9715 = vst [vmem:[#allocation73_spill] sm:$0xff] %v8492_v43  ;;  %v8495_v50 = vadd.f32 %v1835_v21, %v9716_v25 }
 0x729   :  { %v1839_v51 = vpop.f32.mrf.mxu0 }
 0x72a   :  { %9717 = vst [vmem:[#allocation74_spill] sm:$0xff] %v8495_v50  ;;  %v8498_v53 = vadd.f32 %v1839_v51, %v9718_v52 }
 0x72b   :  { %v1841_v54 = vpop.f32.mrf.mxu0 }
 0x72c   :  { %9719 = vst [vmem:[#allocation75_spill] sm:$0xff] %v8498_v53  ;;  %v8501_v56 = vadd.f32 %v1841_v54, %v9720_v55 }
 0x72e   :  { %9721 = vst [vmem:[#allocation76_spill] sm:$0xff] %v8501_v56 }
 0x72f   :  { %7981 = dma.done.wait [#allocation3], 24576 }
 0x730   :  { %7982 = vsyncadd [#allocation3], 4294942720  ;;  %v9722_v57 = vld [vmem:[#allocation58_spill] sm:$0xff]  ;;  %v9723_v58 = vld [vmem:[#allocation64_spill] sm:$0xff] }
 0x731   :  { %2141 = vmatprep.mubr.f32.mxu0 %v9722_v57  ;;  %2212 = vmatprep.mubr.f32.mxu1 %v9723_v58 }
 0x732   :  { %7796 = shalt.err (!%p8175_p0)  }
 0x733   :  { %1884 = dma.hbm_to_vmem [thread:$0]  %s8163_s15, 24576, %s8167_s17, [#allocation3 + $0x1] }
 0x734   :  { %v1916_v59 = vld [vmem:[#allocation2 + $0xf8] sm:$0xff]  ;;  %v1915_v61 = vld [vmem:[#allocation2 + $0xf0] sm:$0xff]  ;;  %v1914_v63 = vld [vmem:[#allocation2 + $0xe8] sm:$0xff] }
 0x735   :  { %v1980_v60 = vld [vmem:[#allocation2 + $0x2f8] sm:$0xff]  ;;  %2077 = vmatprep.subr.mxu0 %v1916_v59  ;;  %v1979_v62 = vld [vmem:[#allocation2 + $0x2f0] sm:$0xff]  ;;  %v1978_v6 = vld [vmem:[#allocation2 + $0x2e8] sm:$0xff] }
 0x736   :  { %2148 = vmatprep.subr.mxu1 %v1980_v60  ;;  %2078 = vmatpush1.msra.mxu0 %v1915_v61  ;;  %v1913_v11 = vld [vmem:[#allocation2 + $0xe0] sm:$0xff]  ;;  %v1912_v13 = vld [vmem:[#allocation2 + $0xd8] sm:$0xff]  ;;  %v1911_v16 = vld [vmem:[#allocation2 + $0xd0] sm:$0xff] }
 0x737   :  { %2149 = vmatpush1.msra.mxu1 %v1979_v62  ;;  %v1977_v12 = vld [vmem:[#allocation2 + $0x2e0] sm:$0xff]  ;;  %2079 = vmatprep.subr.mxu0 %v1914_v63  ;;  %v1976_v14 = vld [vmem:[#allocation2 + $0x2d8] sm:$0xff]  ;;  %v1975_v22 = vld [vmem:[#allocation2 + $0x2d0] sm:$0xff] }
 0x738   :  { %2150 = vmatprep.subr.mxu1 %v1978_v6  ;;  %2080 = vmatpush1.msra.mxu0 %v1913_v11  ;;  %v1910_v26 = vld [vmem:[#allocation2 + $0xc8] sm:$0xff]  ;;  %v1909_v34 = vld [vmem:[#allocation2 + $0xc0] sm:$0xff]  ;;  %v1908_v38 = vld [vmem:[#allocation2 + $0xb8] sm:$0xff] }
 0x739   :  { %2151 = vmatpush1.msra.mxu1 %v1977_v12  ;;  %v1974_v30 = vld [vmem:[#allocation2 + $0x2c8] sm:$0xff]  ;;  %2081 = vmatprep.subr.mxu0 %v1912_v13  ;;  %v1973_v20 = vld [vmem:[#allocation2 + $0x2c0] sm:$0xff]  ;;  %v1972_v40 = vld [vmem:[#allocation2 + $0x2b8] sm:$0xff] }
 0x73a   :  { %2152 = vmatprep.subr.mxu1 %v1976_v14  ;;  %2082 = vmatpush1.msra.mxu0 %v1911_v16  ;;  %v1907_v42 = vld [vmem:[#allocation2 + $0xb0] sm:$0xff]  ;;  %v1906_v33 = vld [vmem:[#allocation2 + $0xa8] sm:$0xff]  ;;  %v1905_v45 = vld [vmem:[#allocation2 + $0xa0] sm:$0xff] }
 0x73b   :  { %2153 = vmatpush1.msra.mxu1 %v1975_v22  ;;  %2083 = vmatprep.subr.mxu0 %v1910_v26  ;;  %v1971_v29 = vld [vmem:[#allocation2 + $0x2b0] sm:$0xff]  ;;  %v1970_v44 = vld [vmem:[#allocation2 + $0x2a8] sm:$0xff]  ;;  %v1969_v4 = vld [vmem:[#allocation2 + $0x2a0] sm:$0xff] }
 0x73c   :  { %2154 = vmatprep.subr.mxu1 %v1974_v30  ;;  %2084 = vmatpush1.msra.mxu0 %v1909_v34  ;;  %v1904_v46 = vld [vmem:[#allocation2 + $0x98] sm:$0xff]  ;;  %v1903_v47 = vld [vmem:[#allocation2 + $0x90] sm:$0xff]  ;;  %v1902_v0 = vld [vmem:[#allocation2 + $0x88] sm:$0xff] }
 0x73d   :  { %2155 = vmatpush1.msra.mxu1 %v1973_v20  ;;  %2085 = vmatprep.subr.mxu0 %v1908_v38  ;;  %v1968_v9 = vld [vmem:[#allocation2 + $0x298] sm:$0xff]  ;;  %v1967_v48 = vld [vmem:[#allocation2 + $0x290] sm:$0xff]  ;;  %v1966_v1 = vld [vmem:[#allocation2 + $0x288] sm:$0xff] }
 0x73e   :  { %2156 = vmatprep.subr.mxu1 %v1972_v40  ;;  %2086 = vmatpush1.msra.mxu0 %v1907_v42  ;;  %v1901_v5 = vld [vmem:[#allocation2 + $0x80] sm:$0xff]  ;;  %v1900_v10 = vld [vmem:[#allocation2 + $0x78] sm:$0xff]  ;;  %v1899_v27 = vld [vmem:[#allocation2 + $0x70] sm:$0xff] }
 0x73f   :  { %2157 = vmatpush1.msra.mxu1 %v1971_v29  ;;  %2087 = vmatprep.subr.mxu0 %v1906_v33  ;;  %v1965_v7 = vld [vmem:[#allocation2 + $0x280] sm:$0xff]  ;;  %v1964_v23 = vld [vmem:[#allocation2 + $0x278] sm:$0xff]  ;;  %v1963_v31 = vld [vmem:[#allocation2 + $0x270] sm:$0xff] }
 0x740   :  { %2158 = vmatprep.subr.mxu1 %v1970_v44  ;;  %2088 = vmatpush1.msra.mxu0 %v1905_v45  ;;  %v1898_v3 = vld [vmem:[#allocation2 + $0x68] sm:$0xff]  ;;  %v1897_v18 = vld [vmem:[#allocation2 + $0x60] sm:$0xff]  ;;  %v1896_v17 = vld [vmem:[#allocation2 + $0x58] sm:$0xff] }
 0x741   :  { %2159 = vmatpush1.msra.mxu1 %v1969_v4  ;;  %2089 = vmatprep.subr.mxu0 %v1904_v46  ;;  %v1962_v37 = vld [vmem:[#allocation2 + $0x268] sm:$0xff]  ;;  %v1961_v36 = vld [vmem:[#allocation2 + $0x260] sm:$0xff]  ;;  %v1960_v24 = vld [vmem:[#allocation2 + $0x258] sm:$0xff] }
 0x742   :  { %2160 = vmatprep.subr.mxu1 %v1968_v9  ;;  %2090 = vmatpush1.msra.mxu0 %v1903_v47  ;;  %v1895_v15 = vld [vmem:[#allocation2 + $0x50] sm:$0xff]  ;;  %v1894_v35 = vld [vmem:[#allocation2 + $0x48] sm:$0xff]  ;;  %v1893_v8 = vld [vmem:[#allocation2 + $0x40] sm:$0xff] }
 0x743   :  { %2161 = vmatpush1.msra.mxu1 %v1967_v48  ;;  %2091 = vmatprep.subr.mxu0 %v1902_v0  ;;  %v1959_v39 = vld [vmem:[#allocation2 + $0x250] sm:$0xff]  ;;  %v1958_v2 = vld [vmem:[#allocation2 + $0x248] sm:$0xff]  ;;  %v1957_v28 = vld [vmem:[#allocation2 + $0x240] sm:$0xff] }
 0x744   :  { %2162 = vmatprep.subr.mxu1 %v1966_v1  ;;  %2092 = vmatpush1.msra.mxu0 %v1901_v5  ;;  %v1892_v19 = vld [vmem:[#allocation2 + $0x38] sm:$0xff]  ;;  %v1891_v25 = vld [vmem:[#allocation2 + $0x30] sm:$0xff]  ;;  %v1890_v52 = vld [vmem:[#allocation2 + $0x28] sm:$0xff] }
 0x745   :  { %2163 = vmatpush1.msra.mxu1 %v1965_v7  ;;  %2093 = vmatprep.subr.mxu0 %v1900_v10  ;;  %v1956_v21 = vld [vmem:[#allocation2 + $0x238] sm:$0xff]  ;;  %v1955_v51 = vld [vmem:[#allocation2 + $0x230] sm:$0xff]  ;;  %v1954_v54 = vld [vmem:[#allocation2 + $0x228] sm:$0xff] }
 0x746   :  { %2164 = vmatprep.subr.mxu1 %v1964_v23  ;;  %2094 = vmatpush1.msra.mxu0 %v1899_v27  ;;  %v1889_v55 = vld [vmem:[#allocation2 + $0x20] sm:$0xff]  ;;  %v1888_v60 = vld [vmem:[#allocation2 + $0x18] sm:$0xff]  ;;  %v1887_v62 = vld [vmem:[#allocation2 + $0x10] sm:$0xff] }
 0x747   :  { %2165 = vmatpush1.msra.mxu1 %v1963_v31  ;;  %2095 = vmatprep.subr.mxu0 %v1898_v3  ;;  %v1953_v59 = vld [vmem:[#allocation2 + $0x220] sm:$0xff]  ;;  %v1952_v61 = vld [vmem:[#allocation2 + $0x218] sm:$0xff]  ;;  %v1951_v63 = vld [vmem:[#allocation2 + $0x210] sm:$0xff] }
 0x748   :  { %2166 = vmatprep.subr.mxu1 %v1962_v37  ;;  %2096 = vmatpush1.msra.mxu0 %v1897_v18  ;;  %v1886_v6 = vld [vmem:[#allocation2 + $0x8] sm:$0xff]  ;;  %v1885_v12 = vld [vmem:[#allocation2] sm:$0xff]  ;;  %v1948_v14 = vld [vmem:[#allocation2 + $0x1f8] sm:$0xff] }
 0x749   :  { %2167 = vmatpush1.msra.mxu1 %v1961_v36  ;;  %2097 = vmatprep.subr.mxu0 %v1896_v17  ;;  %v1950_v11 = vld [vmem:[#allocation2 + $0x208] sm:$0xff]  ;;  %v1949_v13 = vld [vmem:[#allocation2 + $0x200] sm:$0xff]  ;;  %v2012_v16 = vld [vmem:[#allocation2 + $0x3f8] sm:$0xff] }
 0x74a   :  { %2168 = vmatprep.subr.mxu1 %v1960_v24  ;;  %2098 = vmatpush1.msra.mxu0 %v1895_v15  ;;  %v1947_v22 = vld [vmem:[#allocation2 + $0x1f0] sm:$0xff]  ;;  %v1946_v30 = vld [vmem:[#allocation2 + $0x1e8] sm:$0xff]  ;;  %v1945_v20 = vld [vmem:[#allocation2 + $0x1e0] sm:$0xff] }
 0x74b   :  { %2169 = vmatpush1.msra.mxu1 %v1959_v39  ;;  %2099 = vmatprep.subr.mxu0 %v1894_v35  ;;  %v2011_v26 = vld [vmem:[#allocation2 + $0x3f0] sm:$0xff]  ;;  %v2010_v34 = vld [vmem:[#allocation2 + $0x3e8] sm:$0xff]  ;;  %v2009_v38 = vld [vmem:[#allocation2 + $0x3e0] sm:$0xff] }
 0x74c   :  { %2170 = vmatprep.subr.mxu1 %v1958_v2  ;;  %2100 = vmatpush1.msra.mxu0 %v1893_v8  ;;  %v1944_v40 = vld [vmem:[#allocation2 + $0x1d8] sm:$0xff]  ;;  %v1943_v29 = vld [vmem:[#allocation2 + $0x1d0] sm:$0xff]  ;;  %v1942_v44 = vld [vmem:[#allocation2 + $0x1c8] sm:$0xff] }
 0x74d   :  { %2171 = vmatpush1.msra.mxu1 %v1957_v28  ;;  %2101 = vmatprep.subr.mxu0 %v1892_v19  ;;  %v2008_v42 = vld [vmem:[#allocation2 + $0x3d8] sm:$0xff]  ;;  %v2007_v33 = vld [vmem:[#allocation2 + $0x3d0] sm:$0xff]  ;;  %v2006_v45 = vld [vmem:[#allocation2 + $0x3c8] sm:$0xff] }
 0x74e   :  { %2172 = vmatprep.subr.mxu1 %v1956_v21  ;;  %2102 = vmatpush1.msra.mxu0 %v1891_v25  ;;  %v1941_v4 = vld [vmem:[#allocation2 + $0x1c0] sm:$0xff]  ;;  %v1940_v9 = vld [vmem:[#allocation2 + $0x1b8] sm:$0xff]  ;;  %v1939_v48 = vld [vmem:[#allocation2 + $0x1b0] sm:$0xff] }
 0x74f   :  { %2173 = vmatpush1.msra.mxu1 %v1955_v51  ;;  %2103 = vmatprep.subr.mxu0 %v1890_v52  ;;  %v2005_v46 = vld [vmem:[#allocation2 + $0x3c0] sm:$0xff]  ;;  %v2004_v47 = vld [vmem:[#allocation2 + $0x3b8] sm:$0xff]  ;;  %v2003_v0 = vld [vmem:[#allocation2 + $0x3b0] sm:$0xff] }
 0x750   :  { %2174 = vmatprep.subr.mxu1 %v1954_v54  ;;  %2104 = vmatpush1.msra.mxu0 %v1889_v55  ;;  %v1938_v1 = vld [vmem:[#allocation2 + $0x1a8] sm:$0xff]  ;;  %v1937_v7 = vld [vmem:[#allocation2 + $0x1a0] sm:$0xff]  ;;  %v1936_v23 = vld [vmem:[#allocation2 + $0x198] sm:$0xff] }
 0x751   :  { %2175 = vmatpush1.msra.mxu1 %v1953_v59  ;;  %2105 = vmatprep.subr.mxu0 %v1888_v60  ;;  %v2002_v5 = vld [vmem:[#allocation2 + $0x3a8] sm:$0xff]  ;;  %v2001_v10 = vld [vmem:[#allocation2 + $0x3a0] sm:$0xff]  ;;  %v2000_v27 = vld [vmem:[#allocation2 + $0x398] sm:$0xff] }
 0x752   :  { %2176 = vmatprep.subr.mxu1 %v1952_v61  ;;  %2106 = vmatpush1.msra.mxu0 %v1887_v62  ;;  %v1935_v31 = vld [vmem:[#allocation2 + $0x190] sm:$0xff]  ;;  %v1934_v37 = vld [vmem:[#allocation2 + $0x188] sm:$0xff]  ;;  %v1933_v36 = vld [vmem:[#allocation2 + $0x180] sm:$0xff] }
 0x753   :  { %2177 = vmatpush1.msra.mxu1 %v1951_v63  ;;  %2107 = vmatprep.subr.mxu0 %v1886_v6  ;;  %v1999_v3 = vld [vmem:[#allocation2 + $0x390] sm:$0xff]  ;;  %v1998_v18 = vld [vmem:[#allocation2 + $0x388] sm:$0xff]  ;;  %v1997_v17 = vld [vmem:[#allocation2 + $0x380] sm:$0xff] }
 0x754   :  { %2178 = vmatprep.subr.mxu1 %v1950_v11  ;;  %2108 = vmatpush1.msra.mxu0 %v1885_v12  ;;  %v1932_v24 = vld [vmem:[#allocation2 + $0x178] sm:$0xff]  ;;  %v1931_v39 = vld [vmem:[#allocation2 + $0x170] sm:$0xff]  ;;  %v1930_v2 = vld [vmem:[#allocation2 + $0x168] sm:$0xff] }
 0x755   :  { %2179 = vmatpush1.msra.mxu1 %v1949_v13  ;;  %2109 = vmatprep.subr.mxu0 %v1948_v14  ;;  %v1996_v15 = vld [vmem:[#allocation2 + $0x378] sm:$0xff]  ;;  %v1995_v35 = vld [vmem:[#allocation2 + $0x370] sm:$0xff]  ;;  %v1994_v8 = vld [vmem:[#allocation2 + $0x368] sm:$0xff] }
 0x756   :  { %2180 = vmatprep.subr.mxu1 %v2012_v16  ;;  %2110 = vmatpush2.msra.mxu0 %v1947_v22  ;;  %v1929_v28 = vld [vmem:[#allocation2 + $0x160] sm:$0xff]  ;;  %v1928_v21 = vld [vmem:[#allocation2 + $0x158] sm:$0xff]  ;;  %v1927_v51 = vld [vmem:[#allocation2 + $0x150] sm:$0xff] }
 0x757   :  { %2181 = vmatpush2.msra.mxu1 %v2011_v26  ;;  %2111 = vmatprep.subr.mxu0 %v1946_v30  ;;  %v1993_v19 = vld [vmem:[#allocation2 + $0x360] sm:$0xff]  ;;  %v1992_v25 = vld [vmem:[#allocation2 + $0x358] sm:$0xff]  ;;  %v1991_v52 = vld [vmem:[#allocation2 + $0x350] sm:$0xff] }
 0x758   :  { %2182 = vmatprep.subr.mxu1 %v2010_v34  ;;  %2112 = vmatpush2.msra.mxu0 %v1945_v20  ;;  %v1926_v54 = vld [vmem:[#allocation2 + $0x148] sm:$0xff]  ;;  %v1925_v59 = vld [vmem:[#allocation2 + $0x140] sm:$0xff]  ;;  %v1924_v61 = vld [vmem:[#allocation2 + $0x138] sm:$0xff] }
 0x759   :  { %2183 = vmatpush2.msra.mxu1 %v2009_v38  ;;  %2113 = vmatprep.subr.mxu0 %v1944_v40  ;;  %v1990_v55 = vld [vmem:[#allocation2 + $0x348] sm:$0xff]  ;;  %v1989_v60 = vld [vmem:[#allocation2 + $0x340] sm:$0xff]  ;;  %v1988_v62 = vld [vmem:[#allocation2 + $0x338] sm:$0xff] }
 0x75a   :  { %2184 = vmatprep.subr.mxu1 %v2008_v42  ;;  %2114 = vmatpush2.msra.mxu0 %v1943_v29  ;;  %v1923_v63 = vld [vmem:[#allocation2 + $0x130] sm:$0xff]  ;;  %v1922_v11 = vld [vmem:[#allocation2 + $0x128] sm:$0xff]  ;;  %v1921_v13 = vld [vmem:[#allocation2 + $0x120] sm:$0xff] }
 0x75b   :  { %2185 = vmatpush2.msra.mxu1 %v2007_v33  ;;  %2115 = vmatprep.subr.mxu0 %v1942_v44  ;;  %v1987_v6 = vld [vmem:[#allocation2 + $0x330] sm:$0xff]  ;;  %v1986_v12 = vld [vmem:[#allocation2 + $0x328] sm:$0xff]  ;;  %v1985_v14 = vld [vmem:[#allocation2 + $0x320] sm:$0xff] }
 0x75c   :  { %2186 = vmatprep.subr.mxu1 %v2006_v45  ;;  %2116 = vmatpush2.msra.mxu0 %v1941_v4  ;;  %v1920_v16 = vld [vmem:[#allocation2 + $0x118] sm:$0xff]  ;;  %v1919_v26 = vld [vmem:[#allocation2 + $0x110] sm:$0xff]  ;;  %v1918_v34 = vld [vmem:[#allocation2 + $0x108] sm:$0xff] }
 0x75d   :  { %2187 = vmatpush2.msra.mxu1 %v2005_v46  ;;  %2117 = vmatprep.subr.mxu0 %v1940_v9  ;;  %v1984_v22 = vld [vmem:[#allocation2 + $0x318] sm:$0xff]  ;;  %v1983_v30 = vld [vmem:[#allocation2 + $0x310] sm:$0xff]  ;;  %v1982_v20 = vld [vmem:[#allocation2 + $0x308] sm:$0xff] }
 0x75e   :  { %2188 = vmatprep.subr.mxu1 %v2004_v47  ;;  %2118 = vmatpush2.msra.mxu0 %v1939_v48  ;;  %v1917_v38 = vld [vmem:[#allocation2 + $0x100] sm:$0xff]  ;;  %v2044_v42 = vld [vmem:[#allocation2 + $0x4f8] sm:$0xff]  ;;  %v2043_v29 = vld [vmem:[#allocation2 + $0x4f0] sm:$0xff] }
 0x75f   :  { %2189 = vmatpush2.msra.mxu1 %v2003_v0  ;;  %2119 = vmatprep.subr.mxu0 %v1938_v1  ;;  %v1981_v40 = vld [vmem:[#allocation2 + $0x300] sm:$0xff]  ;;  %v9724_v33 = vld [vmem:[#allocation59_spill] sm:$0xff]  ;;  %v2042_v45 = vld [vmem:[#allocation2 + $0x4e8] sm:$0xff] }
 0x760   :  { %2190 = vmatprep.subr.mxu1 %v2002_v5  ;;  %2120 = vmatpush2.msra.mxu0 %v1937_v7  ;;  %v9725_v44 = vld [vmem:[#allocation65_spill] sm:$0xff]  ;;  %v2040_v46 = vld [vmem:[#allocation2 + $0x4d8] sm:$0xff]  ;;  %v2039_v9 = vld [vmem:[#allocation2 + $0x4d0] sm:$0xff] }
 0x761   :  { %2191 = vmatpush2.msra.mxu1 %v2001_v10  ;;  %2121 = vmatprep.subr.mxu0 %v1936_v23  ;;  %v2041_v4 = vld [vmem:[#allocation2 + $0x4e0] sm:$0xff]  ;;  %v2038_v47 = vld [vmem:[#allocation2 + $0x4c8] sm:$0xff]  ;;  %v2036_v0 = vld [vmem:[#allocation2 + $0x4b8] sm:$0xff] }
 0x762   :  { %2192 = vmatprep.subr.mxu1 %v2000_v27  ;;  %2122 = vmatpush2.msra.mxu0 %v1935_v31  ;;  %v2037_v48 = vld [vmem:[#allocation2 + $0x4c0] sm:$0xff]  ;;  %v2035_v1 = vld [vmem:[#allocation2 + $0x4b0] sm:$0xff]  ;;  %v2034_v5 = vld [vmem:[#allocation2 + $0x4a8] sm:$0xff] }
 0x763   :  { %2193 = vmatpush2.msra.mxu1 %v1999_v3  ;;  %2123 = vmatprep.subr.mxu0 %v1934_v37  ;;  %v2033_v7 = vld [vmem:[#allocation2 + $0x4a0] sm:$0xff]  ;;  %v2032_v10 = vld [vmem:[#allocation2 + $0x498] sm:$0xff]  ;;  %v2031_v23 = vld [vmem:[#allocation2 + $0x490] sm:$0xff] }
 0x764   :  { %2194 = vmatprep.subr.mxu1 %v1998_v18  ;;  %2124 = vmatpush2.msra.mxu0 %v1933_v36  ;;  %v2030_v27 = vld [vmem:[#allocation2 + $0x488] sm:$0xff]  ;;  %v2029_v31 = vld [vmem:[#allocation2 + $0x480] sm:$0xff]  ;;  %v2028_v3 = vld [vmem:[#allocation2 + $0x478] sm:$0xff] }
 0x765   :  { %2195 = vmatpush2.msra.mxu1 %v1997_v17  ;;  %2125 = vmatprep.subr.mxu0 %v1932_v24  ;;  %v2027_v37 = vld [vmem:[#allocation2 + $0x470] sm:$0xff]  ;;  %v2026_v18 = vld [vmem:[#allocation2 + $0x468] sm:$0xff]  ;;  %v2025_v36 = vld [vmem:[#allocation2 + $0x460] sm:$0xff] }
 0x766   :  { %2196 = vmatprep.subr.mxu1 %v1996_v15  ;;  %2126 = vmatpush2.msra.mxu0 %v1931_v39  ;;  %v2024_v17 = vld [vmem:[#allocation2 + $0x458] sm:$0xff]  ;;  %v2023_v24 = vld [vmem:[#allocation2 + $0x450] sm:$0xff]  ;;  %v2022_v15 = vld [vmem:[#allocation2 + $0x448] sm:$0xff] }
 0x767   :  { %2197 = vmatpush2.msra.mxu1 %v1995_v35  ;;  %2127 = vmatprep.subr.mxu0 %v1930_v2  ;;  %v2021_v39 = vld [vmem:[#allocation2 + $0x440] sm:$0xff]  ;;  %v2020_v35 = vld [vmem:[#allocation2 + $0x438] sm:$0xff]  ;;  %v2019_v2 = vld [vmem:[#allocation2 + $0x430] sm:$0xff] }
 0x768   :  { %2198 = vmatprep.subr.mxu1 %v1994_v8  ;;  %2128 = vmatpush2.msra.mxu0 %v1929_v28  ;;  %v2018_v8 = vld [vmem:[#allocation2 + $0x428] sm:$0xff]  ;;  %v2017_v28 = vld [vmem:[#allocation2 + $0x420] sm:$0xff] }
 0x769   :  { %2199 = vmatpush2.msra.mxu1 %v1993_v19  ;;  %2129 = vmatprep.subr.mxu0 %v1928_v21  ;;  %v2016_v19 = vld [vmem:[#allocation2 + $0x418] sm:$0xff]  ;;  %v2015_v21 = vld [vmem:[#allocation2 + $0x410] sm:$0xff] }
 0x76a   :  { %2200 = vmatprep.subr.mxu1 %v1992_v25  ;;  %2130 = vmatpush2.msra.mxu0 %v1927_v51  ;;  %v2014_v25 = vld [vmem:[#allocation2 + $0x408] sm:$0xff]  ;;  %v2013_v51 = vld [vmem:[#allocation2 + $0x400] sm:$0xff] }
 0x76b   :  { %2201 = vmatpush2.msra.mxu1 %v1991_v52  ;;  %2131 = vmatprep.subr.mxu0 %v1926_v54  ;;  %v2076_v52 = vld [vmem:[#allocation2 + $0x5f8] sm:$0xff]  ;;  %v2075_v54 = vld [vmem:[#allocation2 + $0x5f0] sm:$0xff] }
 0x76c   :  { %2202 = vmatprep.subr.mxu1 %v1990_v55  ;;  %2132 = vmatpush2.msra.mxu0 %v1925_v59  ;;  %v2074_v55 = vld [vmem:[#allocation2 + $0x5e8] sm:$0xff]  ;;  %v2073_v59 = vld [vmem:[#allocation2 + $0x5e0] sm:$0xff] }
 0x76d   :  { %2203 = vmatpush2.msra.mxu1 %v1989_v60  ;;  %2133 = vmatprep.subr.mxu0 %v1924_v61  ;;  %v2072_v60 = vld [vmem:[#allocation2 + $0x5d8] sm:$0xff]  ;;  %v2071_v61 = vld [vmem:[#allocation2 + $0x5d0] sm:$0xff] }
 0x76e   :  { %2204 = vmatprep.subr.mxu1 %v1988_v62  ;;  %2134 = vmatpush2.msra.mxu0 %v1923_v63  ;;  %v2070_v62 = vld [vmem:[#allocation2 + $0x5c8] sm:$0xff]  ;;  %v2069_v63 = vld [vmem:[#allocation2 + $0x5c0] sm:$0xff] }
 0x76f   :  { %2205 = vmatpush2.msra.mxu1 %v1987_v6  ;;  %2135 = vmatprep.subr.mxu0 %v1922_v11  ;;  %v2068_v6 = vld [vmem:[#allocation2 + $0x5b8] sm:$0xff]  ;;  %v2067_v11 = vld [vmem:[#allocation2 + $0x5b0] sm:$0xff] }
 0x770   :  { %2206 = vmatprep.subr.mxu1 %v1986_v12  ;;  %2136 = vmatpush2.msra.mxu0 %v1921_v13  ;;  %v2066_v12 = vld [vmem:[#allocation2 + $0x5a8] sm:$0xff]  ;;  %v2065_v13 = vld [vmem:[#allocation2 + $0x5a0] sm:$0xff] }
 0x771   :  { %2207 = vmatpush2.msra.mxu1 %v1985_v14  ;;  %2137 = vmatprep.subr.mxu0 %v1920_v16  ;;  %v2064_v14 = vld [vmem:[#allocation2 + $0x598] sm:$0xff]  ;;  %v2063_v16 = vld [vmem:[#allocation2 + $0x590] sm:$0xff] }
 0x772   :  { %2208 = vmatprep.subr.mxu1 %v1984_v22  ;;  %2138 = vmatpush2.msra.mxu0 %v1919_v26  ;;  %v2062_v22 = vld [vmem:[#allocation2 + $0x588] sm:$0xff]  ;;  %v2061_v26 = vld [vmem:[#allocation2 + $0x580] sm:$0xff] }
 0x773   :  { %2209 = vmatpush2.msra.mxu1 %v1983_v30  ;;  %2139 = vmatprep.subr.mxu0 %v1918_v34  ;;  %v2060_v30 = vld [vmem:[#allocation2 + $0x578] sm:$0xff]  ;;  %v2059_v34 = vld [vmem:[#allocation2 + $0x570] sm:$0xff] }
 0x774   :  { %2210 = vmatprep.subr.mxu1 %v1982_v20  ;;  %2140 = vmatpush2.msra.mxu0 %v1917_v38  ;;  %v2058_v20 = vld [vmem:[#allocation2 + $0x568] sm:$0xff]  ;;  %v2057_v38 = vld [vmem:[#allocation2 + $0x560] sm:$0xff] }
 0x775   :  { %2211 = vmatpush2.msra.mxu1 %v1981_v40  ;;  %2142 = vmatmul.mubr.f32.vlgmr.msra.gmra.mxu0 %v9724_v33  ;;  %v2056_v40 = vld [vmem:[#allocation2 + $0x558] sm:$0xff] }
 0x776   :  { %2213 = vmatmul.mubr.f32.vlgmr.msra.gmra.mxu1 %v9725_v44  ;;  %2219 = vmatprep.subr.mxu0 %v2044_v42  ;;  %v2055_v42 = vld [vmem:[#allocation2 + $0x550] sm:$0xff] }
 0x777   :  { %2283 = vmatprep.mubr.f32.mxu0 %v8480_v41  ;;  %2220 = vmatpush1.msra.mxu0 %v2043_v29  ;;  %v2054_v29 = vld [vmem:[#allocation2 + $0x548] sm:$0xff] }
 0x778   :  { %2372 = vmatprep.mubr.f32.mxu1 %v9701_v49  ;;  %2221 = vmatprep.subr.mxu0 %v2042_v45  ;;  %v2053_v45 = vld [vmem:[#allocation2 + $0x540] sm:$0xff] }
 0x779   :  { %2222 = vmatpush1.msra.mxu0 %v2041_v4  ;;  %v2052_v4 = vld [vmem:[#allocation2 + $0x538] sm:$0xff] }
 0x77a   :  { %2223 = vmatprep.subr.mxu0 %v2040_v46  ;;  %v2051_v46 = vld [vmem:[#allocation2 + $0x530] sm:$0xff] }
 0x77b   :  { %2224 = vmatpush1.msra.mxu0 %v2039_v9  ;;  %v2050_v9 = vld [vmem:[#allocation2 + $0x528] sm:$0xff] }
 0x77c   :  { %2225 = vmatprep.subr.mxu0 %v2038_v47  ;;  %v2049_v47 = vld [vmem:[#allocation2 + $0x520] sm:$0xff] }
 0x77d   :  { %2226 = vmatpush1.msra.mxu0 %v2037_v48  ;;  %v2048_v48 = vld [vmem:[#allocation2 + $0x518] sm:$0xff] }
 0x77e   :  { %2227 = vmatprep.subr.mxu0 %v2036_v0  ;;  %v2047_v0 = vld [vmem:[#allocation2 + $0x510] sm:$0xff] }
 0x77f   :  { %2228 = vmatpush1.msra.mxu0 %v2035_v1  ;;  %v2046_v1 = vld [vmem:[#allocation2 + $0x508] sm:$0xff] }
 0x780   :  { %2229 = vmatprep.subr.mxu0 %v2034_v5  ;;  %v2045_v5 = vld [vmem:[#allocation2 + $0x500] sm:$0xff] }
 0x781   :  { %2230 = vmatpush1.msra.mxu0 %v2033_v7 }
 0x782   :  { %2231 = vmatprep.subr.mxu0 %v2032_v10 }
 0x783   :  { %2232 = vmatpush1.msra.mxu0 %v2031_v23 }
 0x784   :  { %2233 = vmatprep.subr.mxu0 %v2030_v27 }
 0x785   :  { %2234 = vmatpush1.msra.mxu0 %v2029_v31 }
 0x786   :  { %2235 = vmatprep.subr.mxu0 %v2028_v3 }
 0x787   :  { %2236 = vmatpush1.msra.mxu0 %v2027_v37 }
 0x788   :  { %2237 = vmatprep.subr.mxu0 %v2026_v18 }
 0x789   :  { %2238 = vmatpush1.msra.mxu0 %v2025_v36 }
 0x78a   :  { %2239 = vmatprep.subr.mxu0 %v2024_v17 }
 0x78b   :  { %2240 = vmatpush1.msra.mxu0 %v2023_v24 }
 0x78c   :  { %2241 = vmatprep.subr.mxu0 %v2022_v15  ;;  %v2293_v15 = vld [vmem:[#allocation7 + $0x8] sm:$0xff] }
 0x78d   :  { %2242 = vmatpush1.msra.mxu0 %v2021_v39  ;;  %v2292_v39 = vld [vmem:[#allocation7] sm:$0xff] }
 0x78e   :  { %2243 = vmatprep.subr.mxu0 %v2020_v35 }
 0x78f   :  { %2244 = vmatpush1.msra.mxu0 %v2019_v2 }
 0x790   :  { %2245 = vmatprep.subr.mxu0 %v2018_v8 }
 0x791   :  { %2246 = vmatpush1.msra.mxu0 %v2017_v28  ;;  %v9726_v28 = vld [vmem:[#allocation70_spill] sm:$0xff] }
 0x792   :  { %2247 = vmatprep.subr.mxu0 %v2016_v19  ;;  %v9727_v19 = vld [vmem:[#allocation71_spill] sm:$0xff] }
 0x793   :  { %2248 = vmatpush1.msra.mxu0 %v2015_v21 }
 0x794   :  { %2249 = vmatprep.subr.mxu0 %v2014_v25  ;;  %v9728_v25 = vld [vmem:[#allocation60_spill] sm:$0xff] }
 0x795   :  { %2250 = vmatpush1.msra.mxu0 %v2013_v51 }
 0x796   :  { %2251 = vmatprep.subr.mxu0 %v2076_v52 }
 0x797   :  { %2252 = vmatpush2.msra.mxu0 %v2075_v54  ;;  %v9730_v54 = vld [vmem:[#allocation61_spill] sm:$0xff] }
 0x798   :  { %2253 = vmatprep.subr.mxu0 %v2074_v55 }
 0x799   :  { %2254 = vmatpush2.msra.mxu0 %v2073_v59 }
 0x79a   :  { %2255 = vmatprep.subr.mxu0 %v2072_v60  ;;  %v9732_v60 = vld [vmem:[#allocation62_spill] sm:$0xff] }
 0x79b   :  { %2256 = vmatpush2.msra.mxu0 %v2071_v61 }
 0x79c   :  { %2257 = vmatprep.subr.mxu0 %v2070_v62 }
 0x79d   :  { %2258 = vmatpush2.msra.mxu0 %v2069_v63  ;;  %v9734_v63 = vld [vmem:[#allocation63_spill] sm:$0xff] }
 0x79e   :  { %2259 = vmatprep.subr.mxu0 %v2068_v6 }
 0x79f   :  { %2260 = vmatpush2.msra.mxu0 %v2067_v11 }
 0x7a0   :  { %2261 = vmatprep.subr.mxu0 %v2066_v12 }
 0x7a1   :  { %2262 = vmatpush2.msra.mxu0 %v2065_v13 }
 0x7a2   :  { %2263 = vmatprep.subr.mxu0 %v2064_v14 }
 0x7a3   :  { %2264 = vmatpush2.msra.mxu0 %v2063_v16 }
 0x7a4   :  { %2265 = vmatprep.subr.mxu0 %v2062_v22 }
 0x7a5   :  { %2266 = vmatpush2.msra.mxu0 %v2061_v26 }
 0x7a6   :  { %2267 = vmatprep.subr.mxu0 %v2060_v30 }
 0x7a7   :  { %2268 = vmatpush2.msra.mxu0 %v2059_v34 }
 0x7a8   :  { %2269 = vmatprep.subr.mxu0 %v2058_v20 }
 0x7a9   :  { %2270 = vmatpush2.msra.mxu0 %v2057_v38 }
 0x7aa   :  { %2271 = vmatprep.subr.mxu0 %v2056_v40 }
 0x7ab   :  { %2272 = vmatpush2.msra.mxu0 %v2055_v42 }
 0x7ac   :  { %2273 = vmatprep.subr.mxu0 %v2054_v29 }
 0x7ad   :  { %2274 = vmatpush2.msra.mxu0 %v2053_v45 }
 0x7ae   :  { %2275 = vmatprep.subr.mxu0 %v2052_v4 }
 0x7af   :  { %2276 = vmatpush2.msra.mxu0 %v2051_v46 }
 0x7b0   :  { %2277 = vmatprep.subr.mxu0 %v2050_v9 }
 0x7b1   :  { %2278 = vmatpush2.msra.mxu0 %v2049_v47 }
 0x7b2   :  { %2279 = vmatprep.subr.mxu0 %v2048_v48 }
 0x7b3   :  { %2280 = vmatpush2.msra.mxu0 %v2047_v0 }
 0x7b4   :  { %2281 = vmatprep.subr.mxu0 %v2046_v1 }
 0x7b5   :  { %2282 = vmatpush2.msra.mxu0 %v2045_v5 }
 0x7b6   :  { %2284 = vmatmul.mubr.f32.vlgmr.msra.gmra.mxu0 %v8482_v32 }
 0x835   :  { %v2143_v7 = vpop.f32.mrf.mxu0 }
 0x836   :  { %v2214_v10 = vpop.f32.mrf.mxu1 }
 0x837   :  { %v2145_v23 = vpop.f32.mrf.mxu0  ;;  %v2215_v31 = vadd.f32 %v2214_v10, %v2143_v7 }
 0x838   :  { %v2216_v27 = vpop.f32.mrf.mxu1 }
 0x839   :  { %v2217_v37 = vadd.f32 %v2216_v27, %v2145_v23 }
 0x876   :  { %v2285_v3 = vpop.f32.mrf.mxu0 }
 0x877   :  { %v2286_v18 = vadd.f32 %v2285_v3, %v2215_v31 }
 0x878   :  { %v2287_v36 = vpop.f32.mrf.mxu0 }
 0x879   :  { %v2288_v17 = vadd.f32 %v2287_v36, %v2217_v37  ;;  %v2290_v24 = vmul.f32 2.0, %v2286_v18 }
 0x87b   :  { %v2291_v35 = vmul.f32 2.0, %v2288_v17  ;;  %v2294_v8 = vsub.f32 %v2290_v24, %v2292_v39 }
 0x87d   :  { %v2295_v2 = vsub.f32 %v2291_v35, %v2293_v15 }
 0x87f   :  { %2338 = vmatprep.subr.mxu1 %v2295_v2 }
 0x880   :  { %2339 = vmatpush1.msra.mxu1 %v2294_v8 }
 0x881   :  { %7598 = vmatmul.mubr.msk.f32.vlgmr.msra.gmra.mxu1 %vm60_vm0, %v9726_v28 }
 0x882   :  { %2378 = vmatprep.mubr.f32.mxu1 %v9701_v49 }
 0x885   :  { %7599 = vmatmul.mubr.msk.f32.gmra.mxu1 %vm60_vm0, %v9727_v19 }
 0x941   :  { %v2374_v21 = vpop.f32.mrf.mxu1 }
 0x942   :  { %v8520_v51 = vadd.f32 %v2374_v21, %v9728_v25 }
 0x943   :  { %v2376_v52 = vpop.f32.mrf.mxu1 }
 0x944   :  { %9729 = vst [vmem:[#allocation77_spill] sm:$0xff] %v8520_v51  ;;  %v8523_v55 = vadd.f32 %v2376_v52, %v9730_v54 }
 0x945   :  { %v2380_v59 = vpop.f32.mrf.mxu1 }
 0x946   :  { %9731 = vst [vmem:[#allocation78_spill] sm:$0xff] %v8523_v55  ;;  %v8526_v61 = vadd.f32 %v2380_v59, %v9732_v60 }
 0x947   :  { %v2382_v62 = vpop.f32.mrf.mxu1 }
 0x948   :  { %9733 = vst [vmem:[#allocation79_spill] sm:$0xff] %v8526_v61  ;;  %v8529_v6 = vadd.f32 %v2382_v62, %v9734_v63 }
 0x94a   :  { %9735 = vst [vmem:[#allocation53_spill] sm:$0xff] %v8529_v6 }
 0x94b   :  { %7983 = dma.done.wait [#allocation3 + $0x1], 24576 }
 0x94c   :  { %7984 = vsyncadd [#allocation3 + $0x1], 4294942720  ;;  %2662 = vmatprep.mubr.f32.mxu1 %v9722_v57  ;;  %2733 = vmatprep.mubr.f32.mxu0 %v9723_v58 }
 0x94d   :  { %7819 = shalt.err (!%p8126_p9)  }
 0x94e   :  { %2405 = dma.hbm_to_vmem [thread:$0]  %s8214_s1, 24576, %s8117_s27, [#allocation3] }
 0x94f   :  { %v2437_v11 = vld [vmem:[#allocation2 + $0x6f8] sm:$0xff]  ;;  %v2436_v13 = vld [vmem:[#allocation2 + $0x6f0] sm:$0xff]  ;;  %v2435_v16 = vld [vmem:[#allocation2 + $0x6e8] sm:$0xff] }
 0x950   :  { %v2501_v12 = vld [vmem:[#allocation2 + $0x8f8] sm:$0xff]  ;;  %2598 = vmatprep.subr.mxu1 %v2437_v11  ;;  %v2500_v14 = vld [vmem:[#allocation2 + $0x8f0] sm:$0xff]  ;;  %v2499_v22 = vld [vmem:[#allocation2 + $0x8e8] sm:$0xff] }
 0x951   :  { %2669 = vmatprep.subr.mxu0 %v2501_v12  ;;  %2599 = vmatpush1.msra.mxu1 %v2436_v13  ;;  %v2434_v26 = vld [vmem:[#allocation2 + $0x6e0] sm:$0xff]  ;;  %v2433_v34 = vld [vmem:[#allocation2 + $0x6d8] sm:$0xff]  ;;  %v2432_v38 = vld [vmem:[#allocation2 + $0x6d0] sm:$0xff] }
 0x952   :  { %2670 = vmatpush1.msra.mxu0 %v2500_v14  ;;  %v2498_v30 = vld [vmem:[#allocation2 + $0x8e0] sm:$0xff]  ;;  %2600 = vmatprep.subr.mxu1 %v2435_v16  ;;  %v2497_v20 = vld [vmem:[#allocation2 + $0x8d8] sm:$0xff]  ;;  %v2496_v40 = vld [vmem:[#allocation2 + $0x8d0] sm:$0xff] }
 0x953   :  { %2671 = vmatprep.subr.mxu0 %v2499_v22  ;;  %2601 = vmatpush1.msra.mxu1 %v2434_v26  ;;  %v2431_v42 = vld [vmem:[#allocation2 + $0x6c8] sm:$0xff]  ;;  %v2430_v45 = vld [vmem:[#allocation2 + $0x6c0] sm:$0xff]  ;;  %v2429_v46 = vld [vmem:[#allocation2 + $0x6b8] sm:$0xff] }
 0x954   :  { %2672 = vmatpush1.msra.mxu0 %v2498_v30  ;;  %v2495_v29 = vld [vmem:[#allocation2 + $0x8c8] sm:$0xff]  ;;  %2602 = vmatprep.subr.mxu1 %v2433_v34  ;;  %v2494_v4 = vld [vmem:[#allocation2 + $0x8c0] sm:$0xff]  ;;  %v2493_v9 = vld [vmem:[#allocation2 + $0x8b8] sm:$0xff] }
 0x955   :  { %2673 = vmatprep.subr.mxu0 %v2497_v20  ;;  %2603 = vmatpush1.msra.mxu1 %v2432_v38  ;;  %v2428_v47 = vld [vmem:[#allocation2 + $0x6b0] sm:$0xff]  ;;  %v2427_v0 = vld [vmem:[#allocation2 + $0x6a8] sm:$0xff]  ;;  %v2426_v5 = vld [vmem:[#allocation2 + $0x6a0] sm:$0xff] }
 0x956   :  { %2674 = vmatpush1.msra.mxu0 %v2496_v40  ;;  %2604 = vmatprep.subr.mxu1 %v2431_v42  ;;  %v2492_v48 = vld [vmem:[#allocation2 + $0x8b0] sm:$0xff]  ;;  %v2491_v1 = vld [vmem:[#allocation2 + $0x8a8] sm:$0xff]  ;;  %v2490_v7 = vld [vmem:[#allocation2 + $0x8a0] sm:$0xff] }
 0x957   :  { %2675 = vmatprep.subr.mxu0 %v2495_v29  ;;  %2605 = vmatpush1.msra.mxu1 %v2430_v45  ;;  %v2425_v10 = vld [vmem:[#allocation2 + $0x698] sm:$0xff]  ;;  %v2424_v27 = vld [vmem:[#allocation2 + $0x690] sm:$0xff]  ;;  %v2423_v3 = vld [vmem:[#allocation2 + $0x688] sm:$0xff] }
 0x958   :  { %2676 = vmatpush1.msra.mxu0 %v2494_v4  ;;  %2606 = vmatprep.subr.mxu1 %v2429_v46  ;;  %v2489_v23 = vld [vmem:[#allocation2 + $0x898] sm:$0xff]  ;;  %v2488_v31 = vld [vmem:[#allocation2 + $0x890] sm:$0xff]  ;;  %v2487_v37 = vld [vmem:[#allocation2 + $0x888] sm:$0xff] }
 0x959   :  { %2677 = vmatprep.subr.mxu0 %v2493_v9  ;;  %2607 = vmatpush1.msra.mxu1 %v2428_v47  ;;  %v2422_v18 = vld [vmem:[#allocation2 + $0x680] sm:$0xff]  ;;  %v2421_v17 = vld [vmem:[#allocation2 + $0x678] sm:$0xff]  ;;  %v2420_v15 = vld [vmem:[#allocation2 + $0x670] sm:$0xff] }
 0x95a   :  { %2678 = vmatpush1.msra.mxu0 %v2492_v48  ;;  %2608 = vmatprep.subr.mxu1 %v2427_v0  ;;  %v2486_v36 = vld [vmem:[#allocation2 + $0x880] sm:$0xff]  ;;  %v2485_v24 = vld [vmem:[#allocation2 + $0x878] sm:$0xff]  ;;  %v2484_v39 = vld [vmem:[#allocation2 + $0x870] sm:$0xff] }
 0x95b   :  { %2679 = vmatprep.subr.mxu0 %v2491_v1  ;;  %2609 = vmatpush1.msra.mxu1 %v2426_v5  ;;  %v2419_v35 = vld [vmem:[#allocation2 + $0x668] sm:$0xff]  ;;  %v2418_v8 = vld [vmem:[#allocation2 + $0x660] sm:$0xff]  ;;  %v2417_v25 = vld [vmem:[#allocation2 + $0x658] sm:$0xff] }
 0x95c   :  { %2680 = vmatpush1.msra.mxu0 %v2490_v7  ;;  %2610 = vmatprep.subr.mxu1 %v2425_v10  ;;  %v2483_v2 = vld [vmem:[#allocation2 + $0x868] sm:$0xff]  ;;  %v2482_v21 = vld [vmem:[#allocation2 + $0x860] sm:$0xff]  ;;  %v2481_v52 = vld [vmem:[#allocation2 + $0x858] sm:$0xff] }
 0x95d   :  { %2681 = vmatprep.subr.mxu0 %v2489_v23  ;;  %2611 = vmatpush1.msra.mxu1 %v2424_v27  ;;  %v2416_v54 = vld [vmem:[#allocation2 + $0x650] sm:$0xff]  ;;  %v2415_v60 = vld [vmem:[#allocation2 + $0x648] sm:$0xff]  ;;  %v2414_v63 = vld [vmem:[#allocation2 + $0x640] sm:$0xff] }
 0x95e   :  { %2682 = vmatpush1.msra.mxu0 %v2488_v31  ;;  %2612 = vmatprep.subr.mxu1 %v2423_v3  ;;  %v2480_v59 = vld [vmem:[#allocation2 + $0x850] sm:$0xff]  ;;  %v2479_v62 = vld [vmem:[#allocation2 + $0x848] sm:$0xff]  ;;  %v2478_v11 = vld [vmem:[#allocation2 + $0x840] sm:$0xff] }
 0x95f   :  { %2683 = vmatprep.subr.mxu0 %v2487_v37  ;;  %2613 = vmatpush1.msra.mxu1 %v2422_v18  ;;  %v2413_v12 = vld [vmem:[#allocation2 + $0x638] sm:$0xff]  ;;  %v2412_v14 = vld [vmem:[#allocation2 + $0x630] sm:$0xff]  ;;  %v2411_v22 = vld [vmem:[#allocation2 + $0x628] sm:$0xff] }
 0x960   :  { %2684 = vmatpush1.msra.mxu0 %v2486_v36  ;;  %2614 = vmatprep.subr.mxu1 %v2421_v17  ;;  %v2477_v13 = vld [vmem:[#allocation2 + $0x838] sm:$0xff]  ;;  %v2476_v16 = vld [vmem:[#allocation2 + $0x830] sm:$0xff]  ;;  %v2475_v26 = vld [vmem:[#allocation2 + $0x828] sm:$0xff] }
 0x961   :  { %2685 = vmatprep.subr.mxu0 %v2485_v24  ;;  %2615 = vmatpush1.msra.mxu1 %v2420_v15  ;;  %v2410_v30 = vld [vmem:[#allocation2 + $0x620] sm:$0xff]  ;;  %v2409_v20 = vld [vmem:[#allocation2 + $0x618] sm:$0xff]  ;;  %v2408_v40 = vld [vmem:[#allocation2 + $0x610] sm:$0xff] }
 0x962   :  { %2686 = vmatpush1.msra.mxu0 %v2484_v39  ;;  %2616 = vmatprep.subr.mxu1 %v2419_v35  ;;  %v2474_v34 = vld [vmem:[#allocation2 + $0x820] sm:$0xff]  ;;  %v2473_v38 = vld [vmem:[#allocation2 + $0x818] sm:$0xff]  ;;  %v2472_v42 = vld [vmem:[#allocation2 + $0x810] sm:$0xff] }
 0x963   :  { %2687 = vmatprep.subr.mxu0 %v2483_v2  ;;  %2617 = vmatpush1.msra.mxu1 %v2418_v8  ;;  %v2407_v29 = vld [vmem:[#allocation2 + $0x608] sm:$0xff]  ;;  %v2406_v4 = vld [vmem:[#allocation2 + $0x600] sm:$0xff]  ;;  %v2469_v9 = vld [vmem:[#allocation2 + $0x7f8] sm:$0xff] }
 0x964   :  { %2688 = vmatpush1.msra.mxu0 %v2482_v21  ;;  %2618 = vmatprep.subr.mxu1 %v2417_v25  ;;  %v2471_v45 = vld [vmem:[#allocation2 + $0x808] sm:$0xff]  ;;  %v2470_v46 = vld [vmem:[#allocation2 + $0x800] sm:$0xff]  ;;  %v2533_v47 = vld [vmem:[#allocation2 + $0x9f8] sm:$0xff] }
 0x965   :  { %2689 = vmatprep.subr.mxu0 %v2481_v52  ;;  %2619 = vmatpush1.msra.mxu1 %v2416_v54  ;;  %v2468_v48 = vld [vmem:[#allocation2 + $0x7f0] sm:$0xff]  ;;  %v2467_v1 = vld [vmem:[#allocation2 + $0x7e8] sm:$0xff]  ;;  %v2466_v7 = vld [vmem:[#allocation2 + $0x7e0] sm:$0xff] }
 0x966   :  { %2690 = vmatpush1.msra.mxu0 %v2480_v59  ;;  %2620 = vmatprep.subr.mxu1 %v2415_v60  ;;  %v2532_v0 = vld [vmem:[#allocation2 + $0x9f0] sm:$0xff]  ;;  %v2531_v5 = vld [vmem:[#allocation2 + $0x9e8] sm:$0xff]  ;;  %v2530_v10 = vld [vmem:[#allocation2 + $0x9e0] sm:$0xff] }
 0x967   :  { %2691 = vmatprep.subr.mxu0 %v2479_v62  ;;  %2621 = vmatpush1.msra.mxu1 %v2414_v63  ;;  %v2465_v23 = vld [vmem:[#allocation2 + $0x7d8] sm:$0xff]  ;;  %v2464_v31 = vld [vmem:[#allocation2 + $0x7d0] sm:$0xff]  ;;  %v2463_v37 = vld [vmem:[#allocation2 + $0x7c8] sm:$0xff] }
 0x968   :  { %2692 = vmatpush1.msra.mxu0 %v2478_v11  ;;  %2622 = vmatprep.subr.mxu1 %v2413_v12  ;;  %v2529_v27 = vld [vmem:[#allocation2 + $0x9d8] sm:$0xff]  ;;  %v2528_v3 = vld [vmem:[#allocation2 + $0x9d0] sm:$0xff]  ;;  %v2527_v18 = vld [vmem:[#allocation2 + $0x9c8] sm:$0xff] }
 0x969   :  { %2693 = vmatprep.subr.mxu0 %v2477_v13  ;;  %2623 = vmatpush1.msra.mxu1 %v2412_v14  ;;  %v2462_v36 = vld [vmem:[#allocation2 + $0x7c0] sm:$0xff]  ;;  %v2461_v24 = vld [vmem:[#allocation2 + $0x7b8] sm:$0xff]  ;;  %v2460_v39 = vld [vmem:[#allocation2 + $0x7b0] sm:$0xff] }
 0x96a   :  { %2694 = vmatpush1.msra.mxu0 %v2476_v16  ;;  %2624 = vmatprep.subr.mxu1 %v2411_v22  ;;  %v2526_v17 = vld [vmem:[#allocation2 + $0x9c0] sm:$0xff]  ;;  %v2525_v15 = vld [vmem:[#allocation2 + $0x9b8] sm:$0xff]  ;;  %v2524_v35 = vld [vmem:[#allocation2 + $0x9b0] sm:$0xff] }
 0x96b   :  { %2695 = vmatprep.subr.mxu0 %v2475_v26  ;;  %2625 = vmatpush1.msra.mxu1 %v2410_v30  ;;  %v2459_v2 = vld [vmem:[#allocation2 + $0x7a8] sm:$0xff]  ;;  %v2458_v21 = vld [vmem:[#allocation2 + $0x7a0] sm:$0xff]  ;;  %v2457_v52 = vld [vmem:[#allocation2 + $0x798] sm:$0xff] }
 0x96c   :  { %2696 = vmatpush1.msra.mxu0 %v2474_v34  ;;  %2626 = vmatprep.subr.mxu1 %v2409_v20  ;;  %v2523_v8 = vld [vmem:[#allocation2 + $0x9a8] sm:$0xff]  ;;  %v2522_v25 = vld [vmem:[#allocation2 + $0x9a0] sm:$0xff]  ;;  %v2521_v54 = vld [vmem:[#allocation2 + $0x998] sm:$0xff] }
 0x96d   :  { %2697 = vmatprep.subr.mxu0 %v2473_v38  ;;  %2627 = vmatpush1.msra.mxu1 %v2408_v40  ;;  %v2456_v59 = vld [vmem:[#allocation2 + $0x790] sm:$0xff]  ;;  %v2455_v62 = vld [vmem:[#allocation2 + $0x788] sm:$0xff]  ;;  %v2454_v11 = vld [vmem:[#allocation2 + $0x780] sm:$0xff] }
 0x96e   :  { %2698 = vmatpush1.msra.mxu0 %v2472_v42  ;;  %2628 = vmatprep.subr.mxu1 %v2407_v29  ;;  %v2520_v60 = vld [vmem:[#allocation2 + $0x990] sm:$0xff]  ;;  %v2519_v63 = vld [vmem:[#allocation2 + $0x988] sm:$0xff]  ;;  %v2518_v12 = vld [vmem:[#allocation2 + $0x980] sm:$0xff] }
 0x96f   :  { %2699 = vmatprep.subr.mxu0 %v2471_v45  ;;  %2629 = vmatpush1.msra.mxu1 %v2406_v4  ;;  %v2453_v13 = vld [vmem:[#allocation2 + $0x778] sm:$0xff]  ;;  %v2452_v16 = vld [vmem:[#allocation2 + $0x770] sm:$0xff]  ;;  %v2451_v26 = vld [vmem:[#allocation2 + $0x768] sm:$0xff] }
 0x970   :  { %2700 = vmatpush1.msra.mxu0 %v2470_v46  ;;  %2630 = vmatprep.subr.mxu1 %v2469_v9  ;;  %v2517_v14 = vld [vmem:[#allocation2 + $0x978] sm:$0xff]  ;;  %v2516_v22 = vld [vmem:[#allocation2 + $0x970] sm:$0xff]  ;;  %v2515_v30 = vld [vmem:[#allocation2 + $0x968] sm:$0xff] }
 0x971   :  { %2701 = vmatprep.subr.mxu0 %v2533_v47  ;;  %2631 = vmatpush2.msra.mxu1 %v2468_v48  ;;  %v2450_v34 = vld [vmem:[#allocation2 + $0x760] sm:$0xff]  ;;  %v2449_v38 = vld [vmem:[#allocation2 + $0x758] sm:$0xff]  ;;  %v2448_v42 = vld [vmem:[#allocation2 + $0x750] sm:$0xff] }
 0x972   :  { %2702 = vmatpush2.msra.mxu0 %v2532_v0  ;;  %2632 = vmatprep.subr.mxu1 %v2467_v1  ;;  %v2514_v20 = vld [vmem:[#allocation2 + $0x960] sm:$0xff]  ;;  %v2513_v40 = vld [vmem:[#allocation2 + $0x958] sm:$0xff]  ;;  %v2512_v29 = vld [vmem:[#allocation2 + $0x950] sm:$0xff] }
 0x973   :  { %2703 = vmatprep.subr.mxu0 %v2531_v5  ;;  %2633 = vmatpush2.msra.mxu1 %v2466_v7  ;;  %v2447_v45 = vld [vmem:[#allocation2 + $0x748] sm:$0xff]  ;;  %v2446_v46 = vld [vmem:[#allocation2 + $0x740] sm:$0xff]  ;;  %v2445_v47 = vld [vmem:[#allocation2 + $0x738] sm:$0xff] }
 0x974   :  { %2704 = vmatpush2.msra.mxu0 %v2530_v10  ;;  %2634 = vmatprep.subr.mxu1 %v2465_v23  ;;  %v2511_v4 = vld [vmem:[#allocation2 + $0x948] sm:$0xff]  ;;  %v2510_v9 = vld [vmem:[#allocation2 + $0x940] sm:$0xff]  ;;  %v2509_v48 = vld [vmem:[#allocation2 + $0x938] sm:$0xff] }
 0x975   :  { %2705 = vmatprep.subr.mxu0 %v2529_v27  ;;  %2635 = vmatpush2.msra.mxu1 %v2464_v31  ;;  %v2444_v0 = vld [vmem:[#allocation2 + $0x730] sm:$0xff]  ;;  %v2443_v5 = vld [vmem:[#allocation2 + $0x728] sm:$0xff]  ;;  %v2442_v10 = vld [vmem:[#allocation2 + $0x720] sm:$0xff] }
 0x976   :  { %2706 = vmatpush2.msra.mxu0 %v2528_v3  ;;  %2636 = vmatprep.subr.mxu1 %v2463_v37  ;;  %v2508_v1 = vld [vmem:[#allocation2 + $0x930] sm:$0xff]  ;;  %v2507_v7 = vld [vmem:[#allocation2 + $0x928] sm:$0xff]  ;;  %v2506_v23 = vld [vmem:[#allocation2 + $0x920] sm:$0xff] }
 0x977   :  { %2707 = vmatprep.subr.mxu0 %v2527_v18  ;;  %2637 = vmatpush2.msra.mxu1 %v2462_v36  ;;  %v2441_v27 = vld [vmem:[#allocation2 + $0x718] sm:$0xff]  ;;  %v2440_v3 = vld [vmem:[#allocation2 + $0x710] sm:$0xff]  ;;  %v2439_v18 = vld [vmem:[#allocation2 + $0x708] sm:$0xff] }
 0x978   :  { %2708 = vmatpush2.msra.mxu0 %v2526_v17  ;;  %2638 = vmatprep.subr.mxu1 %v2461_v24  ;;  %v2505_v31 = vld [vmem:[#allocation2 + $0x918] sm:$0xff]  ;;  %v2504_v37 = vld [vmem:[#allocation2 + $0x910] sm:$0xff]  ;;  %v2503_v36 = vld [vmem:[#allocation2 + $0x908] sm:$0xff] }
 0x979   :  { %2709 = vmatprep.subr.mxu0 %v2525_v15  ;;  %2639 = vmatpush2.msra.mxu1 %v2460_v39  ;;  %v2438_v17 = vld [vmem:[#allocation2 + $0x700] sm:$0xff]  ;;  %v2565_v15 = vld [vmem:[#allocation2 + $0xaf8] sm:$0xff]  ;;  %v2564_v39 = vld [vmem:[#allocation2 + $0xaf0] sm:$0xff] }
 0x97a   :  { %2710 = vmatpush2.msra.mxu0 %v2524_v35  ;;  %2640 = vmatprep.subr.mxu1 %v2459_v2  ;;  %v2502_v24 = vld [vmem:[#allocation2 + $0x900] sm:$0xff]  ;;  %v2563_v35 = vld [vmem:[#allocation2 + $0xae8] sm:$0xff] }
 0x97b   :  { %2711 = vmatprep.subr.mxu0 %v2523_v8  ;;  %2641 = vmatpush2.msra.mxu1 %v2458_v21  ;;  %v2562_v2 = vld [vmem:[#allocation2 + $0xae0] sm:$0xff]  ;;  %v2561_v8 = vld [vmem:[#allocation2 + $0xad8] sm:$0xff]  ;;  %v2560_v21 = vld [vmem:[#allocation2 + $0xad0] sm:$0xff] }
 0x97c   :  { %2712 = vmatpush2.msra.mxu0 %v2522_v25  ;;  %2642 = vmatprep.subr.mxu1 %v2457_v52  ;;  %v2559_v25 = vld [vmem:[#allocation2 + $0xac8] sm:$0xff]  ;;  %v2558_v52 = vld [vmem:[#allocation2 + $0xac0] sm:$0xff] }
 0x97d   :  { %2713 = vmatprep.subr.mxu0 %v2521_v54  ;;  %2643 = vmatpush2.msra.mxu1 %v2456_v59  ;;  %v2557_v54 = vld [vmem:[#allocation2 + $0xab8] sm:$0xff]  ;;  %v2556_v59 = vld [vmem:[#allocation2 + $0xab0] sm:$0xff] }
 0x97e   :  { %2714 = vmatpush2.msra.mxu0 %v2520_v60  ;;  %2644 = vmatprep.subr.mxu1 %v2455_v62  ;;  %v2555_v60 = vld [vmem:[#allocation2 + $0xaa8] sm:$0xff]  ;;  %v2554_v62 = vld [vmem:[#allocation2 + $0xaa0] sm:$0xff] }
 0x97f   :  { %2715 = vmatprep.subr.mxu0 %v2519_v63  ;;  %2645 = vmatpush2.msra.mxu1 %v2454_v11  ;;  %v2553_v63 = vld [vmem:[#allocation2 + $0xa98] sm:$0xff]  ;;  %v2552_v11 = vld [vmem:[#allocation2 + $0xa90] sm:$0xff] }
 0x980   :  { %2716 = vmatpush2.msra.mxu0 %v2518_v12  ;;  %2646 = vmatprep.subr.mxu1 %v2453_v13  ;;  %v2551_v12 = vld [vmem:[#allocation2 + $0xa88] sm:$0xff]  ;;  %v2550_v13 = vld [vmem:[#allocation2 + $0xa80] sm:$0xff] }
 0x981   :  { %2717 = vmatprep.subr.mxu0 %v2517_v14  ;;  %2647 = vmatpush2.msra.mxu1 %v2452_v16  ;;  %v2549_v14 = vld [vmem:[#allocation2 + $0xa78] sm:$0xff]  ;;  %v2548_v16 = vld [vmem:[#allocation2 + $0xa70] sm:$0xff] }
 0x982   :  { %2718 = vmatpush2.msra.mxu0 %v2516_v22  ;;  %2648 = vmatprep.subr.mxu1 %v2451_v26  ;;  %v2547_v22 = vld [vmem:[#allocation2 + $0xa68] sm:$0xff]  ;;  %v2546_v26 = vld [vmem:[#allocation2 + $0xa60] sm:$0xff] }
 0x983   :  { %2719 = vmatprep.subr.mxu0 %v2515_v30  ;;  %2649 = vmatpush2.msra.mxu1 %v2450_v34  ;;  %v2545_v30 = vld [vmem:[#allocation2 + $0xa58] sm:$0xff]  ;;  %v2544_v34 = vld [vmem:[#allocation2 + $0xa50] sm:$0xff] }
 0x984   :  { %2720 = vmatpush2.msra.mxu0 %v2514_v20  ;;  %2650 = vmatprep.subr.mxu1 %v2449_v38  ;;  %v2543_v20 = vld [vmem:[#allocation2 + $0xa48] sm:$0xff]  ;;  %v2542_v38 = vld [vmem:[#allocation2 + $0xa40] sm:$0xff] }
 0x985   :  { %2721 = vmatprep.subr.mxu0 %v2513_v40  ;;  %2651 = vmatpush2.msra.mxu1 %v2448_v42  ;;  %v2541_v40 = vld [vmem:[#allocation2 + $0xa38] sm:$0xff]  ;;  %v2540_v42 = vld [vmem:[#allocation2 + $0xa30] sm:$0xff] }
 0x986   :  { %2722 = vmatpush2.msra.mxu0 %v2512_v29  ;;  %2652 = vmatprep.subr.mxu1 %v2447_v45  ;;  %v2539_v29 = vld [vmem:[#allocation2 + $0xa28] sm:$0xff]  ;;  %v2538_v45 = vld [vmem:[#allocation2 + $0xa20] sm:$0xff] }
 0x987   :  { %2723 = vmatprep.subr.mxu0 %v2511_v4  ;;  %2653 = vmatpush2.msra.mxu1 %v2446_v46  ;;  %v2537_v4 = vld [vmem:[#allocation2 + $0xa18] sm:$0xff]  ;;  %v2536_v46 = vld [vmem:[#allocation2 + $0xa10] sm:$0xff] }
 0x988   :  { %2724 = vmatpush2.msra.mxu0 %v2510_v9  ;;  %2654 = vmatprep.subr.mxu1 %v2445_v47  ;;  %v2535_v9 = vld [vmem:[#allocation2 + $0xa08] sm:$0xff]  ;;  %v2534_v47 = vld [vmem:[#allocation2 + $0xa00] sm:$0xff] }
 0x989   :  { %2725 = vmatprep.subr.mxu0 %v2509_v48  ;;  %2655 = vmatpush2.msra.mxu1 %v2444_v0  ;;  %v2597_v48 = vld [vmem:[#allocation2 + $0xbf8] sm:$0xff]  ;;  %v2596_v0 = vld [vmem:[#allocation2 + $0xbf0] sm:$0xff] }
 0x98a   :  { %2726 = vmatpush2.msra.mxu0 %v2508_v1  ;;  %2656 = vmatprep.subr.mxu1 %v2443_v5  ;;  %v2595_v1 = vld [vmem:[#allocation2 + $0xbe8] sm:$0xff]  ;;  %v2594_v5 = vld [vmem:[#allocation2 + $0xbe0] sm:$0xff] }
 0x98b   :  { %2727 = vmatprep.subr.mxu0 %v2507_v7  ;;  %2657 = vmatpush2.msra.mxu1 %v2442_v10  ;;  %v2593_v7 = vld [vmem:[#allocation2 + $0xbd8] sm:$0xff]  ;;  %v2592_v10 = vld [vmem:[#allocation2 + $0xbd0] sm:$0xff] }
 0x98c   :  { %2728 = vmatpush2.msra.mxu0 %v2506_v23  ;;  %2658 = vmatprep.subr.mxu1 %v2441_v27  ;;  %v2591_v23 = vld [vmem:[#allocation2 + $0xbc8] sm:$0xff]  ;;  %v2590_v27 = vld [vmem:[#allocation2 + $0xbc0] sm:$0xff] }
 0x98d   :  { %2729 = vmatprep.subr.mxu0 %v2505_v31  ;;  %2659 = vmatpush2.msra.mxu1 %v2440_v3  ;;  %v2589_v31 = vld [vmem:[#allocation2 + $0xbb8] sm:$0xff]  ;;  %v2588_v3 = vld [vmem:[#allocation2 + $0xbb0] sm:$0xff] }
 0x98e   :  { %2730 = vmatpush2.msra.mxu0 %v2504_v37  ;;  %2660 = vmatprep.subr.mxu1 %v2439_v18  ;;  %v2587_v37 = vld [vmem:[#allocation2 + $0xba8] sm:$0xff]  ;;  %v2586_v18 = vld [vmem:[#allocation2 + $0xba0] sm:$0xff] }
 0x98f   :  { %2731 = vmatprep.subr.mxu0 %v2503_v36  ;;  %2661 = vmatpush2.msra.mxu1 %v2438_v17  ;;  %v2585_v36 = vld [vmem:[#allocation2 + $0xb98] sm:$0xff]  ;;  %v2584_v17 = vld [vmem:[#allocation2 + $0xb90] sm:$0xff] }
 0x990   :  { %2732 = vmatpush2.msra.mxu0 %v2502_v24  ;;  %2663 = vmatmul.mubr.f32.vlgmr.msra.gmra.mxu1 %v9724_v33  ;;  %v2583_v24 = vld [vmem:[#allocation2 + $0xb88] sm:$0xff] }
 0x991   :  { %2734 = vmatmul.mubr.f32.vlgmr.msra.gmra.mxu0 %v9725_v44  ;;  %2740 = vmatprep.subr.mxu1 %v2565_v15  ;;  %v2582_v15 = vld [vmem:[#allocation2 + $0xb80] sm:$0xff] }
 0x992   :  { %2804 = vmatprep.mubr.f32.mxu1 %v8480_v41  ;;  %2741 = vmatpush1.msra.mxu1 %v2564_v39  ;;  %v2581_v39 = vld [vmem:[#allocation2 + $0xb78] sm:$0xff] }
 0x993   :  { %2887 = vmatprep.mubr.f32.mxu0 %v9701_v49  ;;  %2742 = vmatprep.subr.mxu1 %v2563_v35  ;;  %v2580_v35 = vld [vmem:[#allocation2 + $0xb70] sm:$0xff] }
 0x994   :  { %2743 = vmatpush1.msra.mxu1 %v2562_v2  ;;  %v2579_v2 = vld [vmem:[#allocation2 + $0xb68] sm:$0xff] }
 0x995   :  { %2744 = vmatprep.subr.mxu1 %v2561_v8  ;;  %v2578_v8 = vld [vmem:[#allocation2 + $0xb60] sm:$0xff] }
 0x996   :  { %2745 = vmatpush1.msra.mxu1 %v2560_v21  ;;  %v2577_v21 = vld [vmem:[#allocation2 + $0xb58] sm:$0xff] }
 0x997   :  { %2746 = vmatprep.subr.mxu1 %v2559_v25  ;;  %v2576_v25 = vld [vmem:[#allocation2 + $0xb50] sm:$0xff] }
 0x998   :  { %2747 = vmatpush1.msra.mxu1 %v2558_v52  ;;  %v2575_v52 = vld [vmem:[#allocation2 + $0xb48] sm:$0xff] }
 0x999   :  { %2748 = vmatprep.subr.mxu1 %v2557_v54  ;;  %v2574_v54 = vld [vmem:[#allocation2 + $0xb40] sm:$0xff] }
 0x99a   :  { %2749 = vmatpush1.msra.mxu1 %v2556_v59  ;;  %v2573_v59 = vld [vmem:[#allocation2 + $0xb38] sm:$0xff] }
 0x99b   :  { %2750 = vmatprep.subr.mxu1 %v2555_v60  ;;  %v2572_v60 = vld [vmem:[#allocation2 + $0xb30] sm:$0xff] }
 0x99c   :  { %2751 = vmatpush1.msra.mxu1 %v2554_v62  ;;  %v2571_v62 = vld [vmem:[#allocation2 + $0xb28] sm:$0xff] }
 0x99d   :  { %2752 = vmatprep.subr.mxu1 %v2553_v63  ;;  %v2570_v63 = vld [vmem:[#allocation2 + $0xb20] sm:$0xff] }
 0x99e   :  { %2753 = vmatpush1.msra.mxu1 %v2552_v11  ;;  %v2569_v11 = vld [vmem:[#allocation2 + $0xb18] sm:$0xff] }
 0x99f   :  { %2754 = vmatprep.subr.mxu1 %v2551_v12  ;;  %v2568_v12 = vld [vmem:[#allocation2 + $0xb10] sm:$0xff] }
 0x9a0   :  { %2755 = vmatpush1.msra.mxu1 %v2550_v13  ;;  %v2567_v13 = vld [vmem:[#allocation2 + $0xb08] sm:$0xff] }
 0x9a1   :  { %2756 = vmatprep.subr.mxu1 %v2549_v14  ;;  %v2566_v14 = vld [vmem:[#allocation2 + $0xb00] sm:$0xff] }
 0x9a2   :  { %2757 = vmatpush1.msra.mxu1 %v2548_v16 }
 0x9a3   :  { %2758 = vmatprep.subr.mxu1 %v2547_v22 }
 0x9a4   :  { %2759 = vmatpush1.msra.mxu1 %v2546_v26 }
 0x9a5   :  { %2760 = vmatprep.subr.mxu1 %v2545_v30 }
 0x9a6   :  { %2761 = vmatpush1.msra.mxu1 %v2544_v34 }
 0x9a7   :  { %2762 = vmatprep.subr.mxu1 %v2543_v20 }
 0x9a8   :  { %2763 = vmatpush1.msra.mxu1 %v2542_v38 }
 0x9a9   :  { %2764 = vmatprep.subr.mxu1 %v2541_v40 }
 0x9aa   :  { %2765 = vmatpush1.msra.mxu1 %v2540_v42 }
 0x9ab   :  { %2766 = vmatprep.subr.mxu1 %v2539_v29 }
 0x9ac   :  { %2767 = vmatpush1.msra.mxu1 %v2538_v45 }
 0x9ad   :  { %2768 = vmatprep.subr.mxu1 %v2537_v4  ;;  %v2814_v4 = vld [vmem:[#allocation7 + $0x18] sm:$0xff] }
 0x9ae   :  { %2769 = vmatpush1.msra.mxu1 %v2536_v46  ;;  %v2813_v46 = vld [vmem:[#allocation7 + $0x10] sm:$0xff] }
 0x9af   :  { %2770 = vmatprep.subr.mxu1 %v2535_v9 }
 0x9b0   :  { %2771 = vmatpush1.msra.mxu1 %v2534_v47 }
 0x9b1   :  { %2772 = vmatprep.subr.mxu1 %v2597_v48 }
 0x9b2   :  { %2773 = vmatpush2.msra.mxu1 %v2596_v0 }
 0x9b3   :  { %2774 = vmatprep.subr.mxu1 %v2595_v1  ;;  %v9736_v1 = vld [vmem:[#allocation66_spill] sm:$0xff] }
 0x9b4   :  { %2775 = vmatpush2.msra.mxu1 %v2594_v5 }
 0x9b5   :  { %2776 = vmatprep.subr.mxu1 %v2593_v7 }
 0x9b6   :  { %2777 = vmatpush2.msra.mxu1 %v2592_v10  ;;  %v9738_v10 = vld [vmem:[#allocation67_spill] sm:$0xff] }
 0x9b7   :  { %2778 = vmatprep.subr.mxu1 %v2591_v23 }
 0x9b8   :  { %2779 = vmatpush2.msra.mxu1 %v2590_v27 }
 0x9b9   :  { %2780 = vmatprep.subr.mxu1 %v2589_v31  ;;  %v9740_v31 = vld [vmem:[#allocation68_spill] sm:$0xff] }
 0x9ba   :  { %2781 = vmatpush2.msra.mxu1 %v2588_v3 }
 0x9bb   :  { %2782 = vmatprep.subr.mxu1 %v2587_v37 }
 0x9bc   :  { %2783 = vmatpush2.msra.mxu1 %v2586_v18  ;;  %v9742_v18 = vld [vmem:[#allocation69_spill] sm:$0xff] }
 0x9bd   :  { %2784 = vmatprep.subr.mxu1 %v2585_v36 }
 0x9be   :  { %2785 = vmatpush2.msra.mxu1 %v2584_v17 }
 0x9bf   :  { %2786 = vmatprep.subr.mxu1 %v2583_v24 }
 0x9c0   :  { %2787 = vmatpush2.msra.mxu1 %v2582_v15 }
 0x9c1   :  { %2788 = vmatprep.subr.mxu1 %v2581_v39 }
 0x9c2   :  { %2789 = vmatpush2.msra.mxu1 %v2580_v35 }
 0x9c3   :  { %2790 = vmatprep.subr.mxu1 %v2579_v2 }
 0x9c4   :  { %2791 = vmatpush2.msra.mxu1 %v2578_v8 }
 0x9c5   :  { %2792 = vmatprep.subr.mxu1 %v2577_v21 }
 0x9c6   :  { %2793 = vmatpush2.msra.mxu1 %v2576_v25 }
 0x9c7   :  { %2794 = vmatprep.subr.mxu1 %v2575_v52 }
 0x9c8   :  { %2795 = vmatpush2.msra.mxu1 %v2574_v54 }
 0x9c9   :  { %2796 = vmatprep.subr.mxu1 %v2573_v59 }
 0x9ca   :  { %2797 = vmatpush2.msra.mxu1 %v2572_v60 }
 0x9cb   :  { %2798 = vmatprep.subr.mxu1 %v2571_v62 }
 0x9cc   :  { %2799 = vmatpush2.msra.mxu1 %v2570_v63 }
 0x9cd   :  { %2800 = vmatprep.subr.mxu1 %v2569_v11 }
 0x9ce   :  { %2801 = vmatpush2.msra.mxu1 %v2568_v12 }
 0x9cf   :  { %2802 = vmatprep.subr.mxu1 %v2567_v13 }
 0x9d0   :  { %2803 = vmatpush2.msra.mxu1 %v2566_v14 }
 0x9d1   :  { %2805 = vmatmul.mubr.f32.vlgmr.msra.gmra.mxu1 %v8482_v32 }
 0xa50   :  { %v2664_v16 = vpop.f32.mrf.mxu1 }
 0xa51   :  { %v2735_v22 = vpop.f32.mrf.mxu0 }
 0xa52   :  { %v2666_v26 = vpop.f32.mrf.mxu1  ;;  %v2736_v34 = vadd.f32 %v2735_v22, %v2664_v16 }
 0xa53   :  { %v2737_v30 = vpop.f32.mrf.mxu0 }
 0xa54   :  { %v2738_v38 = vadd.f32 %v2737_v30, %v2666_v26 }
 0xa91   :  { %v2806_v20 = vpop.f32.mrf.mxu1 }
 0xa92   :  { %v2807_v40 = vadd.f32 %v2806_v20, %v2736_v34 }
 0xa93   :  { %v2808_v42 = vpop.f32.mrf.mxu1 }
 0xa94   :  { %v2809_v29 = vadd.f32 %v2808_v42, %v2738_v38  ;;  %v2811_v45 = vmul.f32 2.0, %v2807_v40 }
 0xa96   :  { %v2812_v9 = vmul.f32 2.0, %v2809_v29  ;;  %v2815_v48 = vsub.f32 %v2811_v45, %v2813_v46 }
 0xa98   :  { %v2816_v47 = vsub.f32 %v2812_v9, %v2814_v4 }
 0xa9a   :  { %2853 = vmatprep.subr.mxu0 %v2816_v47 }
 0xa9b   :  { %2854 = vmatpush1.msra.mxu0 %v2815_v48 }
 0xa9c   :  { %7600 = vmatmul.mubr.msk.f32.vlgmr.msra.gmra.mxu0 %vm60_vm0, %v9726_v28 }
 0xa9d   :  { %2893 = vmatprep.mubr.f32.mxu0 %v9701_v49 }
 0xaa0   :  { %7601 = vmatmul.mubr.msk.f32.gmra.mxu0 %vm60_vm0, %v9727_v19 }
 0xb5c   :  { %v2889_v0 = vpop.f32.mrf.mxu0 }
 0xb5d   :  { %v8548_v5 = vadd.f32 %v2889_v0, %v9736_v1 }
 0xb5e   :  { %v2891_v7 = vpop.f32.mrf.mxu0 }
 0xb5f   :  { %9737 = vst [vmem:[#allocation51_spill] sm:$0xff] %v8548_v5  ;;  %v8551_v23 = vadd.f32 %v2891_v7, %v9738_v10 }
 0xb60   :  { %v2895_v27 = vpop.f32.mrf.mxu0 }
 0xb61   :  { %9739 = vst [vmem:[#allocation52_spill] sm:$0xff] %v8551_v23  ;;  %v8554_v3 = vadd.f32 %v2895_v27, %v9740_v31 }
 0xb62   :  { %v2897_v37 = vpop.f32.mrf.mxu0 }
 0xb63   :  { %9741 = vst [vmem:[#allocation54_spill] sm:$0xff] %v8554_v3  ;;  %v8557_v36 = vadd.f32 %v2897_v37, %v9742_v18 }
 0xb65   :  { %9743 = vst [vmem:[#allocation55_spill] sm:$0xff] %v8557_v36 }
 0xb66   :  { %7985 = dma.done.wait [#allocation3], 24576 }
 0xb67   :  { %7986 = vsyncadd [#allocation3], 4294942720  ;;  %3166 = vmatprep.mubr.f32.mxu0 %v9722_v57  ;;  %3237 = vmatprep.mubr.f32.mxu1 %v9723_v58  ;;  %v9744_v17 = vmov 0   ;;  %v8566_v24 = vld [vmem:[%s9600_s6 + $0x20] sm:$0xff]  ;;  %v8571_v15 = vld [vmem:[%s9600_s6 + $0x28] sm:$0xff] }
 0xb68   :  { %7659 = vset.pattern.permute.xlu1 %v9744_v17  ;;  %7660 = vset.pattern.permute.xlu0 %v9744_v17  ;;  %9745 = vst [vmem:[#allocation56_spill] sm:$0xff] %v8566_v24  ;;  %9746 = vst [vmem:[#allocation57_spill] sm:$0xff] %v8571_v15  ;;  %v8576_v57 = vld [vmem:[%s9600_s6 + $0x30] sm:$0xff]  ;;  %v8581_v58 = vld [vmem:[%s9600_s6 + $0x38] sm:$0xff] }
 0xb69   :  { %9747 = vst [vmem:[#allocation58_spill] sm:$0xff] %v8576_v57  ;;  %9748 = vst [vmem:[#allocation64_spill] sm:$0xff] %v8581_v58  ;;  %v2941_v39 = vld [vmem:[#allocation2 + $0xf8] sm:$0xff]  ;;  %v2940_v2 = vld [vmem:[#allocation2 + $0xf0] sm:$0xff] }
 0xb6a   :  { %v3005_v35 = vld [vmem:[#allocation2 + $0x2f8] sm:$0xff]  ;;  %3102 = vmatprep.subr.mxu0 %v2941_v39  ;;  %v3004_v8 = vld [vmem:[#allocation2 + $0x2f0] sm:$0xff]  ;;  %v2939_v21 = vld [vmem:[#allocation2 + $0xe8] sm:$0xff] }
 0xb6b   :  { %3173 = vmatprep.subr.mxu1 %v3005_v35  ;;  %3103 = vmatpush1.msra.mxu0 %v2940_v2  ;;  %v3003_v25 = vld [vmem:[#allocation2 + $0x2e8] sm:$0xff]  ;;  %v2938_v52 = vld [vmem:[#allocation2 + $0xe0] sm:$0xff]  ;;  %v2937_v59 = vld [vmem:[#allocation2 + $0xd8] sm:$0xff] }
 0xb6c   :  { %3174 = vmatpush1.msra.mxu1 %v3004_v8  ;;  %v3002_v54 = vld [vmem:[#allocation2 + $0x2e0] sm:$0xff]  ;;  %3104 = vmatprep.subr.mxu0 %v2939_v21  ;;  %v3001_v60 = vld [vmem:[#allocation2 + $0x2d8] sm:$0xff]  ;;  %v2936_v62 = vld [vmem:[#allocation2 + $0xd0] sm:$0xff] }
 0xb6d   :  { %3175 = vmatprep.subr.mxu1 %v3003_v25  ;;  %3105 = vmatpush1.msra.mxu0 %v2938_v52  ;;  %v3000_v63 = vld [vmem:[#allocation2 + $0x2d0] sm:$0xff]  ;;  %v2935_v11 = vld [vmem:[#allocation2 + $0xc8] sm:$0xff]  ;;  %v2934_v13 = vld [vmem:[#allocation2 + $0xc0] sm:$0xff] }
 0xb6e   :  { %3176 = vmatpush1.msra.mxu1 %v3002_v54  ;;  %v2999_v12 = vld [vmem:[#allocation2 + $0x2c8] sm:$0xff]  ;;  %3106 = vmatprep.subr.mxu0 %v2937_v59  ;;  %v2998_v14 = vld [vmem:[#allocation2 + $0x2c0] sm:$0xff]  ;;  %v2933_v16 = vld [vmem:[#allocation2 + $0xb8] sm:$0xff] }
 0xb6f   :  { %3177 = vmatprep.subr.mxu1 %v3001_v60  ;;  %3107 = vmatpush1.msra.mxu0 %v2936_v62  ;;  %v2997_v22 = vld [vmem:[#allocation2 + $0x2b8] sm:$0xff]  ;;  %v2932_v26 = vld [vmem:[#allocation2 + $0xb0] sm:$0xff]  ;;  %v2931_v34 = vld [vmem:[#allocation2 + $0xa8] sm:$0xff] }
 0xb70   :  { %3178 = vmatpush1.msra.mxu1 %v3000_v63  ;;  %3108 = vmatprep.subr.mxu0 %v2935_v11  ;;  %v2996_v30 = vld [vmem:[#allocation2 + $0x2b0] sm:$0xff]  ;;  %v2995_v20 = vld [vmem:[#allocation2 + $0x2a8] sm:$0xff]  ;;  %v2930_v38 = vld [vmem:[#allocation2 + $0xa0] sm:$0xff] }
 0xb71   :  { %3179 = vmatprep.subr.mxu1 %v2999_v12  ;;  %3109 = vmatpush1.msra.mxu0 %v2934_v13  ;;  %v2994_v40 = vld [vmem:[#allocation2 + $0x2a0] sm:$0xff]  ;;  %v2929_v42 = vld [vmem:[#allocation2 + $0x98] sm:$0xff]  ;;  %v2928_v45 = vld [vmem:[#allocation2 + $0x90] sm:$0xff] }
 0xb72   :  { %3180 = vmatpush1.msra.mxu1 %v2998_v14  ;;  %3110 = vmatprep.subr.mxu0 %v2933_v16  ;;  %v2993_v29 = vld [vmem:[#allocation2 + $0x298] sm:$0xff]  ;;  %v2992_v4 = vld [vmem:[#allocation2 + $0x290] sm:$0xff]  ;;  %v2927_v46 = vld [vmem:[#allocation2 + $0x88] sm:$0xff] }
 0xb73   :  { %3181 = vmatprep.subr.mxu1 %v2997_v22  ;;  %3111 = vmatpush1.msra.mxu0 %v2932_v26  ;;  %v2991_v9 = vld [vmem:[#allocation2 + $0x288] sm:$0xff]  ;;  %v2926_v47 = vld [vmem:[#allocation2 + $0x80] sm:$0xff]  ;;  %v2925_v0 = vld [vmem:[#allocation2 + $0x78] sm:$0xff] }
 0xb74   :  { %3182 = vmatpush1.msra.mxu1 %v2996_v30  ;;  %3112 = vmatprep.subr.mxu0 %v2931_v34  ;;  %v2990_v48 = vld [vmem:[#allocation2 + $0x280] sm:$0xff]  ;;  %v2989_v1 = vld [vmem:[#allocation2 + $0x278] sm:$0xff]  ;;  %v2924_v7 = vld [vmem:[#allocation2 + $0x70] sm:$0xff] }
 0xb75   :  { %3183 = vmatprep.subr.mxu1 %v2995_v20  ;;  %3113 = vmatpush1.msra.mxu0 %v2930_v38  ;;  %v2988_v10 = vld [vmem:[#allocation2 + $0x270] sm:$0xff]  ;;  %v2923_v27 = vld [vmem:[#allocation2 + $0x68] sm:$0xff]  ;;  %v2922_v37 = vld [vmem:[#allocation2 + $0x60] sm:$0xff] }
 0xb76   :  { %3184 = vmatpush1.msra.mxu1 %v2994_v40  ;;  %3114 = vmatprep.subr.mxu0 %v2929_v42  ;;  %v2987_v31 = vld [vmem:[#allocation2 + $0x268] sm:$0xff]  ;;  %v2986_v18 = vld [vmem:[#allocation2 + $0x260] sm:$0xff]  ;;  %v2921_v39 = vld [vmem:[#allocation2 + $0x58] sm:$0xff] }
 0xb77   :  { %3185 = vmatprep.subr.mxu1 %v2993_v29  ;;  %3115 = vmatpush1.msra.mxu0 %v2928_v45  ;;  %v2985_v35 = vld [vmem:[#allocation2 + $0x258] sm:$0xff]  ;;  %v2920_v2 = vld [vmem:[#allocation2 + $0x50] sm:$0xff]  ;;  %v2919_v21 = vld [vmem:[#allocation2 + $0x48] sm:$0xff] }
 0xb78   :  { %3186 = vmatpush1.msra.mxu1 %v2992_v4  ;;  %3116 = vmatprep.subr.mxu0 %v2927_v46  ;;  %v2984_v8 = vld [vmem:[#allocation2 + $0x250] sm:$0xff]  ;;  %v2983_v25 = vld [vmem:[#allocation2 + $0x248] sm:$0xff]  ;;  %v2918_v52 = vld [vmem:[#allocation2 + $0x40] sm:$0xff] }
 0xb79   :  { %3187 = vmatprep.subr.mxu1 %v2991_v9  ;;  %3117 = vmatpush1.msra.mxu0 %v2926_v47  ;;  %v2982_v54 = vld [vmem:[#allocation2 + $0x240] sm:$0xff]  ;;  %v2917_v59 = vld [vmem:[#allocation2 + $0x38] sm:$0xff]  ;;  %v2916_v62 = vld [vmem:[#allocation2 + $0x30] sm:$0xff] }
 0xb7a   :  { %3188 = vmatpush1.msra.mxu1 %v2990_v48  ;;  %3118 = vmatprep.subr.mxu0 %v2925_v0  ;;  %v2981_v60 = vld [vmem:[#allocation2 + $0x238] sm:$0xff]  ;;  %v2980_v63 = vld [vmem:[#allocation2 + $0x230] sm:$0xff]  ;;  %v2915_v11 = vld [vmem:[#allocation2 + $0x28] sm:$0xff] }
 0xb7b   :  { %3189 = vmatprep.subr.mxu1 %v2989_v1  ;;  %3119 = vmatpush1.msra.mxu0 %v2924_v7  ;;  %v2979_v12 = vld [vmem:[#allocation2 + $0x228] sm:$0xff]  ;;  %v2914_v13 = vld [vmem:[#allocation2 + $0x20] sm:$0xff]  ;;  %v2913_v16 = vld [vmem:[#allocation2 + $0x18] sm:$0xff] }
 0xb7c   :  { %3190 = vmatpush1.msra.mxu1 %v2988_v10  ;;  %3120 = vmatprep.subr.mxu0 %v2923_v27  ;;  %v2978_v14 = vld [vmem:[#allocation2 + $0x220] sm:$0xff]  ;;  %v2977_v22 = vld [vmem:[#allocation2 + $0x218] sm:$0xff]  ;;  %v2912_v26 = vld [vmem:[#allocation2 + $0x10] sm:$0xff] }
 0xb7d   :  { %3191 = vmatprep.subr.mxu1 %v2987_v31  ;;  %3121 = vmatpush1.msra.mxu0 %v2922_v37  ;;  %v2976_v30 = vld [vmem:[#allocation2 + $0x210] sm:$0xff]  ;;  %v2911_v34 = vld [vmem:[#allocation2 + $0x8] sm:$0xff]  ;;  %v2910_v38 = vld [vmem:[#allocation2] sm:$0xff] }
 0xb7e   :  { %3192 = vmatpush1.msra.mxu1 %v2986_v18  ;;  %3122 = vmatprep.subr.mxu0 %v2921_v39  ;;  %v2975_v20 = vld [vmem:[#allocation2 + $0x208] sm:$0xff]  ;;  %v2974_v40 = vld [vmem:[#allocation2 + $0x200] sm:$0xff]  ;;  %v2973_v42 = vld [vmem:[#allocation2 + $0x1f8] sm:$0xff] }
 0xb7f   :  { %3193 = vmatprep.subr.mxu1 %v2985_v35  ;;  %3123 = vmatpush1.msra.mxu0 %v2920_v2  ;;  %v3037_v29 = vld [vmem:[#allocation2 + $0x3f8] sm:$0xff]  ;;  %v2972_v45 = vld [vmem:[#allocation2 + $0x1f0] sm:$0xff]  ;;  %v2971_v46 = vld [vmem:[#allocation2 + $0x1e8] sm:$0xff] }
 0xb80   :  { %3194 = vmatpush1.msra.mxu1 %v2984_v8  ;;  %3124 = vmatprep.subr.mxu0 %v2919_v21  ;;  %v3036_v4 = vld [vmem:[#allocation2 + $0x3f0] sm:$0xff]  ;;  %v3035_v9 = vld [vmem:[#allocation2 + $0x3e8] sm:$0xff]  ;;  %v2970_v47 = vld [vmem:[#allocation2 + $0x1e0] sm:$0xff] }
 0xb81   :  { %3195 = vmatprep.subr.mxu1 %v2983_v25  ;;  %3125 = vmatpush1.msra.mxu0 %v2918_v52  ;;  %v3034_v48 = vld [vmem:[#allocation2 + $0x3e0] sm:$0xff]  ;;  %v2969_v0 = vld [vmem:[#allocation2 + $0x1d8] sm:$0xff]  ;;  %v2968_v7 = vld [vmem:[#allocation2 + $0x1d0] sm:$0xff] }
 0xb82   :  { %3196 = vmatpush1.msra.mxu1 %v2982_v54  ;;  %3126 = vmatprep.subr.mxu0 %v2917_v59  ;;  %v3033_v1 = vld [vmem:[#allocation2 + $0x3d8] sm:$0xff]  ;;  %v3032_v10 = vld [vmem:[#allocation2 + $0x3d0] sm:$0xff]  ;;  %v2967_v27 = vld [vmem:[#allocation2 + $0x1c8] sm:$0xff] }
 0xb83   :  { %3197 = vmatprep.subr.mxu1 %v2981_v60  ;;  %3127 = vmatpush1.msra.mxu0 %v2916_v62  ;;  %v3031_v31 = vld [vmem:[#allocation2 + $0x3c8] sm:$0xff]  ;;  %v2966_v37 = vld [vmem:[#allocation2 + $0x1c0] sm:$0xff]  ;;  %v2965_v39 = vld [vmem:[#allocation2 + $0x1b8] sm:$0xff] }
 0xb84   :  { %3198 = vmatpush1.msra.mxu1 %v2980_v63  ;;  %3128 = vmatprep.subr.mxu0 %v2915_v11  ;;  %v3030_v18 = vld [vmem:[#allocation2 + $0x3c0] sm:$0xff]  ;;  %v3029_v35 = vld [vmem:[#allocation2 + $0x3b8] sm:$0xff]  ;;  %v2964_v2 = vld [vmem:[#allocation2 + $0x1b0] sm:$0xff] }
 0xb85   :  { %3199 = vmatprep.subr.mxu1 %v2979_v12  ;;  %3129 = vmatpush1.msra.mxu0 %v2914_v13  ;;  %v3028_v8 = vld [vmem:[#allocation2 + $0x3b0] sm:$0xff]  ;;  %v2963_v21 = vld [vmem:[#allocation2 + $0x1a8] sm:$0xff]  ;;  %v2962_v52 = vld [vmem:[#allocation2 + $0x1a0] sm:$0xff] }
 0xb86   :  { %3200 = vmatpush1.msra.mxu1 %v2978_v14  ;;  %3130 = vmatprep.subr.mxu0 %v2913_v16  ;;  %v3027_v25 = vld [vmem:[#allocation2 + $0x3a8] sm:$0xff]  ;;  %v3026_v54 = vld [vmem:[#allocation2 + $0x3a0] sm:$0xff]  ;;  %v2961_v59 = vld [vmem:[#allocation2 + $0x198] sm:$0xff] }
 0xb87   :  { %3201 = vmatprep.subr.mxu1 %v2977_v22  ;;  %3131 = vmatpush1.msra.mxu0 %v2912_v26  ;;  %v3025_v60 = vld [vmem:[#allocation2 + $0x398] sm:$0xff]  ;;  %v2960_v62 = vld [vmem:[#allocation2 + $0x190] sm:$0xff]  ;;  %v2959_v11 = vld [vmem:[#allocation2 + $0x188] sm:$0xff] }
 0xb88   :  { %3202 = vmatpush1.msra.mxu1 %v2976_v30  ;;  %3132 = vmatprep.subr.mxu0 %v2911_v34  ;;  %v3024_v63 = vld [vmem:[#allocation2 + $0x390] sm:$0xff]  ;;  %v3023_v12 = vld [vmem:[#allocation2 + $0x388] sm:$0xff]  ;;  %v2958_v13 = vld [vmem:[#allocation2 + $0x180] sm:$0xff] }
 0xb89   :  { %3203 = vmatprep.subr.mxu1 %v2975_v20  ;;  %3133 = vmatpush1.msra.mxu0 %v2910_v38  ;;  %v3022_v14 = vld [vmem:[#allocation2 + $0x380] sm:$0xff]  ;;  %v2957_v16 = vld [vmem:[#allocation2 + $0x178] sm:$0xff]  ;;  %v2956_v26 = vld [vmem:[#allocation2 + $0x170] sm:$0xff] }
 0xb8a   :  { %3204 = vmatpush1.msra.mxu1 %v2974_v40  ;;  %3134 = vmatprep.subr.mxu0 %v2973_v42  ;;  %v3021_v22 = vld [vmem:[#allocation2 + $0x378] sm:$0xff]  ;;  %v3020_v30 = vld [vmem:[#allocation2 + $0x370] sm:$0xff]  ;;  %v2955_v34 = vld [vmem:[#allocation2 + $0x168] sm:$0xff] }
 0xb8b   :  { %3205 = vmatprep.subr.mxu1 %v3037_v29  ;;  %3135 = vmatpush2.msra.mxu0 %v2972_v45  ;;  %v3019_v20 = vld [vmem:[#allocation2 + $0x368] sm:$0xff]  ;;  %v2954_v38 = vld [vmem:[#allocation2 + $0x160] sm:$0xff]  ;;  %v2953_v42 = vld [vmem:[#allocation2 + $0x158] sm:$0xff] }
 0xb8c   :  { %3206 = vmatpush2.msra.mxu1 %v3036_v4  ;;  %3136 = vmatprep.subr.mxu0 %v2971_v46  ;;  %v3018_v40 = vld [vmem:[#allocation2 + $0x360] sm:$0xff]  ;;  %v3017_v29 = vld [vmem:[#allocation2 + $0x358] sm:$0xff]  ;;  %v2952_v45 = vld [vmem:[#allocation2 + $0x150] sm:$0xff] }
 0xb8d   :  { %3207 = vmatprep.subr.mxu1 %v3035_v9  ;;  %3137 = vmatpush2.msra.mxu0 %v2970_v47  ;;  %v3016_v4 = vld [vmem:[#allocation2 + $0x350] sm:$0xff]  ;;  %v2951_v46 = vld [vmem:[#allocation2 + $0x148] sm:$0xff]  ;;  %v2950_v47 = vld [vmem:[#allocation2 + $0x140] sm:$0xff] }
 0xb8e   :  { %3208 = vmatpush2.msra.mxu1 %v3034_v48  ;;  %3138 = vmatprep.subr.mxu0 %v2969_v0  ;;  %v3015_v9 = vld [vmem:[#allocation2 + $0x348] sm:$0xff]  ;;  %v3014_v48 = vld [vmem:[#allocation2 + $0x340] sm:$0xff]  ;;  %v2949_v0 = vld [vmem:[#allocation2 + $0x138] sm:$0xff] }
 0xb8f   :  { %3209 = vmatprep.subr.mxu1 %v3033_v1  ;;  %3139 = vmatpush2.msra.mxu0 %v2968_v7  ;;  %v3013_v1 = vld [vmem:[#allocation2 + $0x338] sm:$0xff]  ;;  %v2948_v7 = vld [vmem:[#allocation2 + $0x130] sm:$0xff]  ;;  %v8667_v57 = vld [vmem:[#allocation2 + $0x5c8] sm:$0xff] }
 0xb90   :  { %3210 = vmatpush2.msra.mxu1 %v3032_v10  ;;  %3140 = vmatprep.subr.mxu0 %v2967_v27  ;;  %v3012_v10 = vld [vmem:[#allocation2 + $0x330] sm:$0xff]  ;;  %v2947_v27 = vld [vmem:[#allocation2 + $0x128] sm:$0xff]  ;;  %v8663_v17 = vld [vmem:[#allocation2 + $0x5d8] sm:$0xff] }
 0xb91   :  { %3211 = vmatprep.subr.mxu1 %v3031_v31  ;;  %3141 = vmatpush2.msra.mxu0 %v2966_v37  ;;  %v3011_v31 = vld [vmem:[#allocation2 + $0x328] sm:$0xff]  ;;  %v2946_v37 = vld [vmem:[#allocation2 + $0x120] sm:$0xff]  ;;  %v8665_v58 = vld [vmem:[#allocation2 + $0x5d0] sm:$0xff] }
 0xb92   :  { %3212 = vmatpush2.msra.mxu1 %v3030_v18  ;;  %3142 = vmatprep.subr.mxu0 %v2965_v39  ;;  %v3010_v18 = vld [vmem:[#allocation2 + $0x320] sm:$0xff]  ;;  %v2945_v39 = vld [vmem:[#allocation2 + $0x118] sm:$0xff]  ;;  %v8673_v56 = vld [vmem:[#allocation2 + $0x5b0] sm:$0xff] }
 0xb93   :  { %3213 = vmatprep.subr.mxu1 %v3029_v35  ;;  %3143 = vmatpush2.msra.mxu0 %v2964_v2  ;;  %v3009_v35 = vld [vmem:[#allocation2 + $0x318] sm:$0xff]  ;;  %v2944_v2 = vld [vmem:[#allocation2 + $0x110] sm:$0xff]  ;;  %v8669_v15 = vld [vmem:[#allocation2 + $0x5c0] sm:$0xff] }
 0xb94   :  { %3214 = vmatpush2.msra.mxu1 %v3028_v8  ;;  %3144 = vmatprep.subr.mxu0 %v2963_v21  ;;  %v3008_v8 = vld [vmem:[#allocation2 + $0x310] sm:$0xff]  ;;  %v8583_v21 = vld [vmem:[#allocation2 + $0x108] sm:$0xff]  ;;  %v8671_v24 = vld [vmem:[#allocation2 + $0x5b8] sm:$0xff] }
 0xb95   :  { %3215 = vmatprep.subr.mxu1 %v3027_v25  ;;  %3145 = vmatpush2.msra.mxu0 %v2962_v52  ;;  %v8585_v25 = vld [vmem:[#allocation2 + $0x308] sm:$0xff]  ;;  %v8587_v52 = vld [vmem:[#allocation2 + $0x100] sm:$0xff]  ;;  %v8679_v50 = vld [vmem:[#allocation2 + $0x598] sm:$0xff] }
 0xb96   :  { %3216 = vmatpush2.msra.mxu1 %v3026_v54  ;;  %3146 = vmatprep.subr.mxu0 %v2961_v59  ;;  %v8589_v54 = vld [vmem:[#allocation2 + $0x300] sm:$0xff]  ;;  %v8591_v59 = vld [vmem:[#allocation2 + $0x4f8] sm:$0xff]  ;;  %v8675_v53 = vld [vmem:[#allocation2 + $0x5a8] sm:$0xff] }
 0xb97   :  { %3217 = vmatprep.subr.mxu1 %v3025_v60  ;;  %3147 = vmatpush2.msra.mxu0 %v2960_v62  ;;  %v8593_v60 = vld [vmem:[#allocation2 + $0x4f0] sm:$0xff]  ;;  %v8595_v62 = vld [vmem:[#allocation2 + $0x4e8] sm:$0xff]  ;;  %v8677_v36 = vld [vmem:[#allocation2 + $0x5a0] sm:$0xff] }
 0xb98   :  { %3218 = vmatpush2.msra.mxu1 %v3024_v63  ;;  %3148 = vmatprep.subr.mxu0 %v2959_v11  ;;  %v8597_v63 = vld [vmem:[#allocation2 + $0x4e0] sm:$0xff]  ;;  %v8599_v11 = vld [vmem:[#allocation2 + $0x4d8] sm:$0xff]  ;;  %v8681_v43 = vld [vmem:[#allocation2 + $0x590] sm:$0xff] }
 0xb99   :  { %3219 = vmatprep.subr.mxu1 %v3023_v12  ;;  %3149 = vmatpush2.msra.mxu0 %v2958_v13  ;;  %v8601_v12 = vld [vmem:[#allocation2 + $0x4d0] sm:$0xff]  ;;  %v8603_v13 = vld [vmem:[#allocation2 + $0x4c8] sm:$0xff]  ;;  %v8685_v3 = vld [vmem:[#allocation2 + $0x580] sm:$0xff] }
 0xb9a   :  { %3220 = vmatpush2.msra.mxu1 %v3022_v14  ;;  %3150 = vmatprep.subr.mxu0 %v2957_v16  ;;  %v8605_v14 = vld [vmem:[#allocation2 + $0x4c0] sm:$0xff]  ;;  %v8607_v16 = vld [vmem:[#allocation2 + $0x4b8] sm:$0xff]  ;;  %v8683_v23 = vld [vmem:[#allocation2 + $0x588] sm:$0xff]  ;;  %9750 = vst [vmem:[#allocation65_spill] sm:$0xff] %v8685_v3 }
 0xb9b   :  { %3221 = vmatprep.subr.mxu1 %v3021_v22  ;;  %3151 = vmatpush2.msra.mxu0 %v2956_v26  ;;  %v8609_v22 = vld [vmem:[#allocation2 + $0x4b0] sm:$0xff]  ;;  %v8611_v26 = vld [vmem:[#allocation2 + $0x4a8] sm:$0xff]  ;;  %9749 = vst [vmem:[#allocation59_spill] sm:$0xff] %v8683_v23  ;;  %v8687_v5 = vld [vmem:[#allocation2 + $0x578] sm:$0xff] }
 0xb9c   :  { %3222 = vmatpush2.msra.mxu1 %v3020_v30  ;;  %3152 = vmatprep.subr.mxu0 %v2955_v34  ;;  %v8613_v30 = vld [vmem:[#allocation2 + $0x4a0] sm:$0xff]  ;;  %v8615_v34 = vld [vmem:[#allocation2 + $0x498] sm:$0xff]  ;;  %v8689_v6 = vld [vmem:[#allocation2 + $0x570] sm:$0xff] }
 0xb9d   :  { %3223 = vmatprep.subr.mxu1 %v3019_v20  ;;  %3153 = vmatpush2.msra.mxu0 %v2954_v38  ;;  %v8617_v20 = vld [vmem:[#allocation2 + $0x490] sm:$0xff]  ;;  %v8619_v38 = vld [vmem:[#allocation2 + $0x488] sm:$0xff]  ;;  %v8693_v55 = vld [vmem:[#allocation2 + $0x560] sm:$0xff] }
 0xb9e   :  { %3224 = vmatpush2.msra.mxu1 %v3018_v40  ;;  %3154 = vmatprep.subr.mxu0 %v2953_v42  ;;  %v8621_v40 = vld [vmem:[#allocation2 + $0x480] sm:$0xff]  ;;  %v8623_v42 = vld [vmem:[#allocation2 + $0x478] sm:$0xff]  ;;  %v8691_v61 = vld [vmem:[#allocation2 + $0x568] sm:$0xff]  ;;  %9752 = vst [vmem:[#allocation61_spill] sm:$0xff] %v8693_v55 }
 0xb9f   :  { %3225 = vmatprep.subr.mxu1 %v3017_v29  ;;  %3155 = vmatpush2.msra.mxu0 %v2952_v45  ;;  %v8625_v29 = vld [vmem:[#allocation2 + $0x470] sm:$0xff]  ;;  %v8627_v45 = vld [vmem:[#allocation2 + $0x468] sm:$0xff]  ;;  %9751 = vst [vmem:[#allocation60_spill] sm:$0xff] %v8691_v61  ;;  %v8695_v51 = vld [vmem:[#allocation2 + $0x558] sm:$0xff] }
 0xba0   :  { %3226 = vmatpush2.msra.mxu1 %v3016_v4  ;;  %3156 = vmatprep.subr.mxu0 %v2951_v46  ;;  %v8629_v4 = vld [vmem:[#allocation2 + $0x460] sm:$0xff]  ;;  %v8631_v46 = vld [vmem:[#allocation2 + $0x458] sm:$0xff]  ;;  %9753 = vst [vmem:[#allocation62_spill] sm:$0xff] %v8695_v51  ;;  %v8697_v19 = vld [vmem:[#allocation2 + $0x550] sm:$0xff] }
 0xba1   :  { %3227 = vmatprep.subr.mxu1 %v3015_v9  ;;  %3157 = vmatpush2.msra.mxu0 %v2950_v47  ;;  %v8633_v9 = vld [vmem:[#allocation2 + $0x450] sm:$0xff]  ;;  %v8635_v47 = vld [vmem:[#allocation2 + $0x448] sm:$0xff]  ;;  %v8701_v32 = vld [vmem:[#allocation2 + $0x540] sm:$0xff] }
 0xba2   :  { %3228 = vmatpush2.msra.mxu1 %v3014_v48  ;;  %3158 = vmatprep.subr.mxu0 %v2949_v0  ;;  %v8637_v48 = vld [vmem:[#allocation2 + $0x440] sm:$0xff]  ;;  %v8639_v0 = vld [vmem:[#allocation2 + $0x438] sm:$0xff]  ;;  %v8699_v28 = vld [vmem:[#allocation2 + $0x548] sm:$0xff]  ;;  %9755 = vst [vmem:[#allocation66_spill] sm:$0xff] %v8701_v32 }
 0xba3   :  { %3229 = vmatprep.subr.mxu1 %v3013_v1  ;;  %3159 = vmatpush2.msra.mxu0 %v2948_v7  ;;  %v8641_v1 = vld [vmem:[#allocation2 + $0x430] sm:$0xff]  ;;  %v8643_v7 = vld [vmem:[#allocation2 + $0x428] sm:$0xff]  ;;  %9754 = vst [vmem:[#allocation63_spill] sm:$0xff] %v8699_v28  ;;  %v8703_v23 = vld [vmem:[#allocation2 + $0x538] sm:$0xff] }
 0xba4   :  { %3230 = vmatpush2.msra.mxu1 %v3012_v10  ;;  %3160 = vmatprep.subr.mxu0 %v2947_v27  ;;  %v8645_v10 = vld [vmem:[#allocation2 + $0x420] sm:$0xff]  ;;  %v8647_v27 = vld [vmem:[#allocation2 + $0x418] sm:$0xff]  ;;  %9756 = vst [vmem:[#allocation67_spill] sm:$0xff] %v8703_v23  ;;  %v8705_v3 = vld [vmem:[#allocation2 + $0x530] sm:$0xff] }
 0xba5   :  { %3231 = vmatprep.subr.mxu1 %v3011_v31  ;;  %3161 = vmatpush2.msra.mxu0 %v2946_v37  ;;  %v8649_v31 = vld [vmem:[#allocation2 + $0x410] sm:$0xff]  ;;  %v8651_v37 = vld [vmem:[#allocation2 + $0x408] sm:$0xff]  ;;  %v8711_v55 = vld [vmem:[#allocation2 + $0x520] sm:$0xff] }
 0xba6   :  { %3232 = vmatpush2.msra.mxu1 %v3010_v18  ;;  %3162 = vmatprep.subr.mxu0 %v2945_v39  ;;  %v8653_v18 = vld [vmem:[#allocation2 + $0x400] sm:$0xff]  ;;  %v8655_v39 = vld [vmem:[#allocation2 + $0x5f8] sm:$0xff]  ;;  %v8709_v61 = vld [vmem:[#allocation2 + $0x528] sm:$0xff] }
 0xba7   :  { %3233 = vmatprep.subr.mxu1 %v3009_v35  ;;  %3163 = vmatpush2.msra.mxu0 %v2944_v2  ;;  %v8657_v35 = vld [vmem:[#allocation2 + $0x5f0] sm:$0xff]  ;;  %v8659_v2 = vld [vmem:[#allocation2 + $0x5e8] sm:$0xff]  ;;  %v8713_v51 = vld [vmem:[#allocation2 + $0x518] sm:$0xff] }
 0xba8   :  { %3234 = vmatpush2.msra.mxu1 %v3008_v8  ;;  %v8661_v8 = vld [vmem:[#allocation2 + $0x5e0] sm:$0xff]  ;;  %3164 = vmatprep.subr.mxu0 %v8583_v21  ;;  %v8717_v28 = vld [vmem:[#allocation2 + $0x510] sm:$0xff]  ;;  %v8719_v32 = vld [vmem:[#allocation2 + $0x508] sm:$0xff] }
 0xba9   :  { %3235 = vmatprep.subr.mxu1 %v8585_v25  ;;  %3165 = vmatpush2.msra.mxu0 %v8587_v52  ;;  %v8721_v23 = vld [vmem:[#allocation2 + $0x500] sm:$0xff] }
 0xbaa   :  { %3236 = vmatpush2.msra.mxu1 %v8589_v54  ;;  %3167 = vmatmul.mubr.f32.vlgmr.msra.gmra.mxu0 %v9724_v33 }
 0xbab   :  { %3238 = vmatmul.mubr.f32.vlgmr.msra.gmra.mxu1 %v9725_v44 }
 0xbac   :  { %7840 = shalt.err (!%p8126_p9)  }
 0xbad   :  { %3895 = dma.hbm_to_vmem [thread:$0]  %s9594_s0, 24576, %s8117_s27, [#allocation3]  ;;  %3244 = vmatprep.subr.mxu0 %v8591_v59  ;;  %3308 = vmatprep.mubr.f32.mxu0 %v8480_v41  ;;  %v9757_v41 = vld [vmem:[#allocation59_spill] sm:$0xff]  ;;  %v9758_v33 = vld [vmem:[#allocation65_spill] sm:$0xff]  ;;  %v9759_v44 = vld [vmem:[#allocation60_spill] sm:$0xff]  ;;  %vm3576_vm1 = vcmask 130048  }
 0xbae   :  { %3245 = vmatpush1.msra.mxu0 %v8593_v60  ;;  %3391 = vmatprep.mubr.f32.mxu1 %v9701_v49  ;;  %v3317_v21 = vld [vmem:[#allocation7 + $0x20] sm:$0xff]  ;;  %v9766_v52 = vld [vmem:[#allocation70_spill] sm:$0xff]  ;;  %v9767_v54 = vld [vmem:[#allocation71_spill] sm:$0xff] }
 0xbaf   :  { %3246 = vmatprep.subr.mxu0 %v8595_v62  ;;  %v9768_v59 = vld [vmem:[#allocation77_spill] sm:$0xff]  ;;  %v9769_v60 = vld [vmem:[#allocation78_spill] sm:$0xff] }
 0xbb0   :  { %3247 = vmatpush1.msra.mxu0 %v8597_v63  ;;  %v3424_v62 = vadd.f32 %v9769_v60, %v9768_v59  ;;  %v9770_v63 = vld [vmem:[#allocation79_spill] sm:$0xff] }
 0xbb1   :  { %3248 = vmatprep.subr.mxu0 %v8599_v11  ;;  %v9771_v11 = vld [vmem:[#allocation53_spill] sm:$0xff] }
 0xbb2   :  { %3249 = vmatpush1.msra.mxu0 %v8601_v12  ;;  %v3431_v12 = vadd.f32 %v9771_v11, %v9770_v63 }
 0xbb3   :  { %3250 = vmatprep.subr.mxu0 %v8603_v13  ;;  %v9772_v13 = vld [vmem:[#allocation51_spill] sm:$0xff] }
 0xbb4   :  { %3251 = vmatpush1.msra.mxu0 %v8605_v14  ;;  %v3425_v14 = vadd.f32 %v3424_v62, %v9772_v13 }
 0xbb5   :  { %3252 = vmatprep.subr.mxu0 %v8607_v16  ;;  %v9773_v16 = vld [vmem:[#allocation54_spill] sm:$0xff] }
 0xbb6   :  { %3253 = vmatpush1.msra.mxu0 %v8609_v22  ;;  %v3432_v22 = vadd.f32 %v3431_v12, %v9773_v16 }
 0xbb7   :  { %3254 = vmatprep.subr.mxu0 %v8611_v26  ;;  %v9774_v26 = vld [vmem:[#allocation52_spill] sm:$0xff] }
 0xbb8   :  { %3255 = vmatpush1.msra.mxu0 %v8613_v30  ;;  %v3426_v30 = vadd.f32 %v3425_v14, %v9774_v26  ;;  %v3561_v14 = vld [vmem:[%s9601_s7 + $0x8] sm:$0xff] }
 0xbb9   :  { %3256 = vmatprep.subr.mxu0 %v8615_v34 }
 0xbba   :  { %3257 = vmatpush1.msra.mxu0 %v8617_v20  ;;  %v9775_v20 = vld [vmem:[#allocation73_spill] sm:$0xff] }
 0xbbb   :  { %3258 = vmatprep.subr.mxu0 %v8619_v38 }
 0xbbc   :  { %3259 = vmatpush1.msra.mxu0 %v8621_v40 }
 0xbbd   :  { %3260 = vmatprep.subr.mxu0 %v8623_v42  ;;  %v9776_v42 = vld [vmem:[#allocation74_spill] sm:$0xff] }
 0xbbe   :  { %3261 = vmatpush1.msra.mxu0 %v8625_v29 }
 0xbbf   :  { %3262 = vmatprep.subr.mxu0 %v8627_v45  ;;  %v9777_v45 = vld [vmem:[#allocation55_spill] sm:$0xff] }
 0xbc0   :  { %3263 = vmatpush1.msra.mxu0 %v8629_v4  ;;  %v3433_v4 = vadd.f32 %v3432_v22, %v9777_v45 }
 0xbc1   :  { %3264 = vmatprep.subr.mxu0 %v8631_v46 }
 0xbc2   :  { %3265 = vmatpush1.msra.mxu0 %v8633_v9 }
 0xbc3   :  { %3266 = vmatprep.subr.mxu0 %v8635_v47  ;;  %v9778_v47 = vld [vmem:[#allocation75_spill] sm:$0xff] }
 0xbc4   :  { %3267 = vmatpush1.msra.mxu0 %v8637_v48 }
 0xbc5   :  { %3268 = vmatprep.subr.mxu0 %v8639_v0 }
 0xbc6   :  { %3269 = vmatpush1.msra.mxu0 %v8641_v1 }
 0xbc7   :  { %3270 = vmatprep.subr.mxu0 %v8643_v7 }
 0xbc8   :  { %3271 = vmatpush1.msra.mxu0 %v8645_v10  ;;  %v9779_v10 = vld [vmem:[#allocation76_spill] sm:$0xff] }
 0xbc9   :  { %3272 = vmatprep.subr.mxu0 %v8647_v27 }
 0xbca   :  { %3273 = vmatpush1.msra.mxu0 %v8649_v31 }
 0xbcb   :  { %3274 = vmatprep.subr.mxu0 %v8651_v37 }
 0xbcc   :  { %3275 = vmatpush1.msra.mxu0 %v8653_v18 }
 0xbcd   :  { %3276 = vmatprep.subr.mxu0 %v8655_v39 }
 0xbce   :  { %3277 = vmatpush2.msra.mxu0 %v8657_v35 }
 0xbcf   :  { %3278 = vmatprep.subr.mxu0 %v8659_v2 }
 0xbd0   :  { %3279 = vmatpush2.msra.mxu0 %v8661_v8 }
 0xbd1   :  { %3280 = vmatprep.subr.mxu0 %v8663_v17  ;;  %v9760_v17 = vld [vmem:[#allocation61_spill] sm:$0xff] }
 0xbd2   :  { %3281 = vmatpush2.msra.mxu0 %v8665_v58 }
 0xbd3   :  { %3282 = vmatprep.subr.mxu0 %v8667_v57 }
 0xbd4   :  { %3283 = vmatpush2.msra.mxu0 %v8669_v15 }
 0xbd5   :  { %3284 = vmatprep.subr.mxu0 %v8671_v24 }
 0xbd6   :  { %3285 = vmatpush2.msra.mxu0 %v8673_v56  ;;  %v9761_v56 = vld [vmem:[#allocation62_spill] sm:$0xff] }
 0xbd7   :  { %3286 = vmatprep.subr.mxu0 %v8675_v53  ;;  %v9762_v53 = vld [vmem:[#allocation63_spill] sm:$0xff] }
 0xbd8   :  { %3287 = vmatpush2.msra.mxu0 %v8677_v36 }
 0xbd9   :  { %3288 = vmatprep.subr.mxu0 %v8679_v50  ;;  %v9763_v50 = vld [vmem:[#allocation66_spill] sm:$0xff] }
 0xbda   :  { %3289 = vmatpush2.msra.mxu0 %v8681_v43  ;;  %v9764_v43 = vld [vmem:[#allocation67_spill] sm:$0xff] }
 0xbdb   :  { %3290 = vmatprep.subr.mxu0 %v9757_v41 }
 0xbdc   :  { %3291 = vmatpush2.msra.mxu0 %v9758_v33 }
 0xbdd   :  { %3292 = vmatprep.subr.mxu0 %v8687_v5 }
 0xbde   :  { %3293 = vmatpush2.msra.mxu0 %v8689_v6 }
 0xbdf   :  { %3294 = vmatprep.subr.mxu0 %v9759_v44 }
 0xbe0   :  { %3295 = vmatpush2.msra.mxu0 %v9760_v17 }
 0xbe1   :  { %3296 = vmatprep.subr.mxu0 %v9761_v56 }
 0xbe2   :  { %3297 = vmatpush2.msra.mxu0 %v8697_v19  ;;  %v9765_v19 = vld [vmem:[#allocation72_spill] sm:$0xff] }
 0xbe3   :  { %3298 = vmatprep.subr.mxu0 %v9762_v53 }
 0xbe4   :  { %3299 = vmatpush2.msra.mxu0 %v9763_v50 }
 0xbe5   :  { %3300 = vmatprep.subr.mxu0 %v9764_v43 }
 0xbe6   :  { %3301 = vmatpush2.msra.mxu0 %v8705_v3 }
 0xbe7   :  { %3302 = vmatprep.subr.mxu0 %v8709_v61 }
 0xbe8   :  { %3303 = vmatpush2.msra.mxu0 %v8711_v55 }
 0xbe9   :  { %3304 = vmatprep.subr.mxu0 %v8713_v51 }
 0xbea   :  { %3305 = vmatpush2.msra.mxu0 %v8717_v28  ;;  %v3318_v28 = vld [vmem:[#allocation7 + $0x28] sm:$0xff] }
 0xbeb   :  { %3306 = vmatprep.subr.mxu0 %v8719_v32 }
 0xbec   :  { %3307 = vmatpush2.msra.mxu0 %v8721_v23 }
 0xbed   :  { %3309 = vmatmul.mubr.f32.vlgmr.msra.gmra.mxu0 %v9765_v19 }
 0xbee   :  { %3742 = vmatprep.mubr.f32.mxu0 %v9701_v49 }
 0xc6a   :  { %v3168_v6 = vpop.f32.mrf.mxu0 }
 0xc6b   :  { %v3239_v5 = vpop.f32.mrf.mxu1 }
 0xc6c   :  { %v3170_v36 = vpop.f32.mrf.mxu0  ;;  %v3240_v24 = vadd.f32 %v3239_v5, %v3168_v6 }
 0xc6d   :  { %v3241_v3 = vpop.f32.mrf.mxu1 }
 0xc6e   :  { %v3242_v15 = vadd.f32 %v3241_v3, %v3170_v36 }
 0xcad   :  { %v3310_v61 = vpop.f32.mrf.mxu0 }
 0xcae   :  { %v3311_v55 = vadd.f32 %v3310_v61, %v3240_v24 }
 0xcaf   :  { %v3312_v57 = vpop.f32.mrf.mxu0 }
 0xcb0   :  { %v3313_v51 = vadd.f32 %v3312_v57, %v3242_v15  ;;  %v3315_v58 = vmul.f32 2.0, %v3311_v55 }
 0xcb2   :  { %v3316_v32 = vmul.f32 2.0, %v3313_v51  ;;  %v3319_v23 = vsub.f32 %v3315_v58, %v3317_v21 }
 0xcb4   :  { %v3320_v25 = vsub.f32 %v3316_v32, %v3318_v28 }
 0xcb6   :  { %3357 = vmatprep.subr.mxu1 %v3320_v25 }
 0xcb7   :  { %3358 = vmatpush1.msra.mxu1 %v3319_v23 }
 0xcb8   :  { %7602 = vmatmul.mubr.msk.f32.vlgmr.msra.gmra.mxu1 %vm60_vm0, %v9766_v52 }
 0xcb9   :  { %3397 = vmatprep.mubr.f32.mxu1 %v9701_v49 }
 0xcbc   :  { %7603 = vmatmul.mubr.msk.f32.gmra.mxu1 %vm60_vm0, %v9767_v54 }
 0xcbd   :  { %3653 = vmatprep.mubr.f32.mxu1 %v9701_v49 }
 0xd78   :  { %v3393_v34 = vpop.f32.mrf.mxu1 }
 0xd79   :  { %v3404_v38 = vadd.f32 %v3393_v34, %v9775_v20  ;;  %v3485_v20 = vld [vmem:[%s9598_s4] sm:$0xff] }
 0xd7a   :  { %v3395_v40 = vpop.f32.mrf.mxu1 }
 0xd7b   :  { %v3405_v29 = vadd.f32 %v3395_v40, %v9776_v42  ;;  %v3427_v46 = vadd.f32 %v3426_v30, %v3404_v38  ;;  %v3560_v42 = vld [vmem:[%s9601_s7] sm:$0xff] }
 0xd7c   :  { %v3399_v9 = vpop.f32.mrf.mxu1 }
 0xd7d   :  { %v3406_v48 = vadd.f32 %v3399_v9, %v9778_v47  ;;  %v3428_v0 = vadd.f32 %v3427_v46, %v3405_v29 }
 0xd7e   :  { %v3401_v1 = vpop.f32.mrf.mxu1 }
 0xd7f   :  { %v3434_v7 = vadd.f32 %v3433_v4, %v3406_v48  ;;  %v3407_v27 = vadd.f32 %v3401_v1, %v9779_v10  ;;  %3429 = vadd.xlane.f32.xlu0 %v3428_v0 }
 0xd81   :  { %v3435_v31 = vadd.f32 %v3434_v7, %v3407_v27 }
 0xd83   :  { %3436 = vadd.xlane.f32.xlu0 %v3435_v31 }
 0xe08   :  { %v3430_v37 = vpop.xlane.xlu0 %3429 }
 0xe0c   :  { %v3437_v18 = vpop.xlane.xlu0 %3436 }
 0xe0d   :  { %v3438_v39 = vadd.f32 %v3437_v18, %v3430_v37 }
 0xe0f   :  { %v3439_v35 = vmul.f32 0.0006510417, %v3438_v39 }
 0xe11   :  { %3442 = vperm.xlu1 %7659, %v3439_v35  }
 0xe8c   :  { %v3443_v2 = vpop.permute.xlu1 %3442 }
 0xe8d   :  { %v3451_v8 = vsub.f32 %v9770_v63, %v3443_v2  ;;  %v3452_v41 = vsub.f32 %v9771_v11, %v3443_v2  ;;  %v3453_v33 = vsub.f32 %v9773_v16, %v3443_v2  ;;  %v3445_v44 = vsub.f32 %v9768_v59, %v3443_v2 }
 0xe8e   :  { %v3446_v17 = vsub.f32 %v9769_v60, %v3443_v2  ;;  %v3454_v56 = vsub.f32 %v9777_v45, %v3443_v2  ;;  %v3447_v43 = vsub.f32 %v9772_v13, %v3443_v2  ;;  %v8824_v19 = vsub.f32 %v3406_v48, %v3443_v2  ;;  %v3489_v13 = vld [vmem:[%s9599_s5] sm:$0xff] }
 0xe8f   :  { %v3463_v53 = vmul.f32 %v3451_v8, %v3451_v8  ;;  %v3464_v50 = vmul.f32 %v3452_v41, %v3452_v41  ;;  %v3465_v6 = vmul.f32 %v3453_v33, %v3453_v33  ;;  %v3457_v36 = vmul.f32 %v3445_v44, %v3445_v44 }
 0xe90   :  { %v3448_v3 = vsub.f32 %v9774_v26, %v3443_v2  ;;  %v3458_v24 = vmul.f32 %v3446_v17, %v3446_v17  ;;  %v8827_v61 = vsub.f32 %v3407_v27, %v3443_v2  ;;  %v3466_v15 = vmul.f32 %v3454_v56, %v3454_v56 }
 0xe91   :  { %v3476_v5 = vadd.f32 %v3464_v50, %v3463_v53  ;;  %v8829_v57 = vsub.f32 %v3404_v38, %v3443_v2  ;;  %v3459_v51 = vmul.f32 %v3447_v43, %v3447_v43  ;;  %v3467_v28 = vmul.f32 %v8824_v19, %v8824_v19 }
 0xe92   :  { %v3469_v58 = vadd.f32 %v3458_v24, %v3457_v36  ;;  %v3450_v32 = vsub.f32 %v3405_v29, %v3443_v2  ;;  %v3460_v25 = vmul.f32 %v3448_v3, %v3448_v3  ;;  %v3468_v52 = vmul.f32 %v8827_v61, %v8827_v61  ;;  %v3562_v36 = vld [vmem:[%s9600_s6] sm:$0xff] }
 0xe93   :  { %v3477_v55 = vadd.f32 %v3476_v5, %v3465_v6  ;;  %v3461_v59 = vmul.f32 %v8829_v57, %v8829_v57 }
 0xe94   :  { %v3470_v23 = vadd.f32 %v3469_v58, %v3459_v51  ;;  %v3462_v63 = vmul.f32 %v3450_v32, %v3450_v32 }
 0xe95   :  { %v3478_v21 = vadd.f32 %v3477_v55, %v3466_v15 }
 0xe96   :  { %v3471_v60 = vadd.f32 %v3470_v23, %v3460_v25 }
 0xe97   :  { %v3479_v54 = vadd.f32 %v3478_v21, %v3467_v28  ;;  %v3564_v21 = vld [vmem:[%s9600_s6 + $0x10] sm:$0xff] }
 0xe98   :  { %v3472_v11 = vadd.f32 %v3471_v60, %v3461_v59 }
 0xe99   :  { %v3480_v62 = vadd.f32 %v3479_v54, %v3468_v52 }
 0xe9a   :  { %v3473_v12 = vadd.f32 %v3472_v11, %v3462_v63 }
 0xe9b   :  { %3481 = vadd.xlane.f32.xlu0 %v3480_v62 }
 0xe9c   :  { %3474 = vadd.xlane.f32.xlu1 %v3473_v12 }
 0xead   :  { %3509 = vperm.xlu1 %7659, %v3489_v13  }
 0xeb1   :  { %3573 = vperm.xlu1 %7659, %v3561_v14  }
 0xf24   :  { %v3482_v16 = vpop.xlane.xlu0 %3481 }
 0xf25   :  { %v3475_v22 = vpop.xlane.xlu1 %3474 }
 0xf26   :  { %v3483_v26 = vadd.f32 %v3482_v16, %v3475_v22 }
 0xf28   :  { %v3484_v30 = vmul.f32 0.0006510417, %v3483_v26 }
 0xf29   :  { %v3510_v47 = vpop.permute.xlu1 %3509 }
 0xf2a   :  { %v3486_v34 = vadd.f32 1e-05, %v3484_v30 }
 0xf2c   :  { %7661 = vrsqrt.f32 %v3486_v34 }
 0xf2d   :  { %v3574_v12 = vpop.permute.xlu1 %3573 }
 0xf39   :  { %v7662_v38 = vpop.eup %7661 }
 0xf3a   :  { %v3488_v40 = vmul.f32 %v7662_v38, %v3485_v20 }
 0xf3c   :  { %3492 = vperm.xlu0 %7660, %v3488_v40  }
 0xf40   :  { %3568 = vperm.xlu0 %7660, %v3560_v42  }
 0xfb7   :  { %v3493_v29 = vpop.permute.xlu0 %3492 }
 0xfb8   :  { %v3502_v45 = vmul.f32 %v3493_v29, %v3452_v41  ;;  %v3504_v4 = vmul.f32 %v3493_v29, %v3454_v56  ;;  %v3501_v46 = vmul.f32 %v3493_v29, %v3451_v8  ;;  %v3503_v9 = vmul.f32 %v3493_v29, %v3453_v33 }
 0xfb9   :  { %v3496_v48 = vmul.f32 %v3493_v29, %v3446_v17  ;;  %v3498_v0 = vmul.f32 %v3493_v29, %v3448_v3  ;;  %v3495_v1 = vmul.f32 %v3493_v29, %v3445_v44  ;;  %v3497_v7 = vmul.f32 %v3493_v29, %v3447_v43 }
 0xfba   :  { %v3519_v10 = vadd.f32 %v3510_v47, %v3502_v45  ;;  %v3521_v27 = vadd.f32 %v3510_v47, %v3504_v4  ;;  %v3518_v31 = vadd.f32 %v3510_v47, %v3501_v46  ;;  %v3520_v37 = vadd.f32 %v3510_v47, %v3503_v9 }
 0xfbb   :  { %v3513_v18 = vadd.f32 %v3510_v47, %v3496_v48  ;;  %v3515_v39 = vadd.f32 %v3510_v47, %v3498_v0  ;;  %v3512_v35 = vadd.f32 %v3510_v47, %v3495_v1  ;;  %v3514_v2 = vadd.f32 %v3510_v47, %v3497_v7  ;;  %v8922_v25 = vpop.permute.xlu0 %3568 }
 0xfbc   :  { %v8849_v53 = vmax.f32 %v3519_v10, 0.0  ;;  %v8851_v50 = vmax.f32 %v3521_v27, 0.0  ;;  %v8853_v41 = vmax.f32 %v3518_v31, 0.0  ;;  %v8855_v8 = vmax.f32 %v3520_v37, 0.0 }
 0xfbd   :  { %v8857_v33 = vmax.f32 %v3513_v18, 0.0  ;;  %v8861_v44 = vmax.f32 %v3515_v39, 0.0  ;;  %v3506_v17 = vmul.f32 %v3493_v29, %v8827_v61  ;;  %v3505_v56 = vmul.f32 %v3493_v29, %v8824_v19 }
 0xfbe   :  { %3617 = vmatprep.subr.mxu1 %v8849_v53  ;;  %3706 = vmatprep.subr.mxu0 %v8851_v50  ;;  %v3500_v43 = vmul.f32 %v3493_v29, %v3450_v32  ;;  %v8867_v6 = vmax.f32 %v3512_v35, 0.0  ;;  %v8869_v5 = vmax.f32 %v3514_v2, 0.0  ;;  %v3499_v3 = vmul.f32 %v3493_v29, %v8829_v57  ;;  %v3563_v57 = vld [vmem:[%s9600_s6 + $0x8] sm:$0xff]  ;;  %v3565_v32 = vld [vmem:[%s9600_s6 + $0x18] sm:$0xff] }
 0xfbf   :  { %9780 = vst [vmem:[#allocation68_spill] sm:$0xff] %v8857_v33  ;;  %9781 = vst [vmem:[#allocation69_spill] sm:$0xff] %v8861_v44  ;;  %3618 = vmatpush1.msra.mxu1 %v8853_v41  ;;  %3707 = vmatpush1.msra.mxu0 %v8855_v8  ;;  %v3523_v19 = vadd.f32 %v3510_v47, %v3506_v17  ;;  %v3522_v24 = vadd.f32 %v3510_v47, %v3505_v56 }
 0xfc0   :  { %3619 = vmatprep.subr.mxu1 %v8857_v33  ;;  %3708 = vmatprep.subr.mxu0 %v8861_v44  ;;  %v3517_v61 = vadd.f32 %v3510_v47, %v3500_v43  ;;  %v3516_v15 = vadd.f32 %v3510_v47, %v3499_v3 }
 0xfc1   :  { %3620 = vmatpush1.msra.mxu1 %v8867_v6  ;;  %3709 = vmatpush1.msra.mxu0 %v8869_v5  ;;  %v8881_v55 = vmax.f32 %v3523_v19, 0.0  ;;  %v8883_v51 = vmax.f32 %v3522_v24, 0.0 }
 0xfc2   :  { %7604 = vmatmul.mubr.msk.f32.vlgmr.msra.gmra.mxu1 %vm3576_vm1, %v3562_v36  ;;  %7608 = vmatmul.mubr.msk.f32.vlgmr.msra.gmra.mxu0 %vm3576_vm1, %v3562_v36  ;;  %v8891_v58 = vmax.f32 %v3517_v61, 0.0  ;;  %v8894_v28 = vmax.f32 %v3516_v15, 0.0 }
 0xfc3   :  { %9782 = vst [vmem:[#allocation59_spill] sm:$0xff] %v8881_v55  ;;  %9783 = vst [vmem:[#allocation65_spill] sm:$0xff] %v8883_v51  ;;  %3659 = vmatprep.mubr.f32.mxu1 %v9701_v49  ;;  %3748 = vmatprep.mubr.f32.mxu0 %v9701_v49 }
 0xfc4   :  { %3795 = vmatprep.subr.mxu1 %v8881_v55  ;;  %9784 = vst [vmem:[#allocation60_spill] sm:$0xff] %v8894_v28 }
 0xfc5   :  { %3796 = vmatpush1.msra.mxu1 %v8883_v51 }
 0xfc6   :  { %3797 = vmatprep.subr.mxu1 %v8891_v58  ;;  %7605 = vmatmul.mubr.msk.f32.gmra.mxu1 %vm3576_vm1, %v3563_v57 }
 0xfc7   :  { %3798 = vmatpush1.msra.mxu1 %v8894_v28  ;;  %7609 = vmatmul.mubr.msk.f32.gmra.mxu0 %vm3576_vm1, %v3563_v57 }
 0xfc8   :  { %3665 = vmatprep.mubr.f32.mxu1 %v9701_v49  ;;  %3754 = vmatprep.mubr.f32.mxu0 %v9701_v49 }
 0xfca   :  { %7606 = vmatmul.mubr.msk.f32.gmra.mxu1 %vm3576_vm1, %v3564_v21 }
 0xfcb   :  { %7610 = vmatmul.mubr.msk.f32.gmra.mxu0 %vm3576_vm1, %v3564_v21  ;;  %3671 = vmatprep.mubr.f32.mxu1 %v9701_v49 }
 0xfcc   :  { %3760 = vmatprep.mubr.f32.mxu0 %v9701_v49 }
 0xfce   :  { %7607 = vmatmul.mubr.msk.f32.gmra.mxu1 %vm3576_vm1, %v3565_v32 }
 0xfcf   :  { %7611 = vmatmul.mubr.msk.f32.gmra.mxu0 %vm3576_vm1, %v3565_v32  ;;  %3831 = vmatprep.mubr.f32.mxu1 %v9701_v49 }
 0xfd2   :  { %7612 = vmatmul.mubr.msk.f32.vlgmr.msra.gmra.mxu1 %vm3576_vm1, %v3562_v36 }
 0xfd3   :  { %3837 = vmatprep.mubr.f32.mxu1 %v9701_v49 }
 0xfd6   :  { %7613 = vmatmul.mubr.msk.f32.gmra.mxu1 %vm3576_vm1, %v3563_v57 }
 0xfd7   :  { %3843 = vmatprep.mubr.f32.mxu1 %v9701_v49 }
 0xfda   :  { %7614 = vmatmul.mubr.msk.f32.gmra.mxu1 %vm3576_vm1, %v3564_v21 }
 0xfdb   :  { %3849 = vmatprep.mubr.f32.mxu1 %v9701_v49 }
 0xfde   :  { %7615 = vmatmul.mubr.msk.f32.gmra.mxu1 %vm3576_vm1, %v3565_v32 }
0x1082   :  { %v3655_v23 = vpop.f32.mrf.mxu1  ;;  %v3744_v52 = vpop.f32.mrf.mxu0 }
0x1083   :  { %v3656_v54 = vadd.f32 %v3655_v23, %v8922_v25  ;;  %v3745_v59 = vadd.f32 %v3744_v52, %v8922_v25 }
0x1084   :  { %v3657_v60 = vpop.f32.mrf.mxu1  ;;  %v3746_v62 = vpop.f32.mrf.mxu0 }
0x1085   :  { %3856 = vst [vmem:[#allocation10] sm:$0xff] %v3656_v54  ;;  %3858 = vst [vmem:[#allocation10 + $0x10] sm:$0xff] %v3745_v59  ;;  %v3658_v63 = vadd.f32 %v3657_v60, %v8922_v25  ;;  %v3747_v11 = vadd.f32 %v3746_v62, %v8922_v25 }
0x1086   :  { %v3661_v13 = vpop.f32.mrf.mxu1 }
0x1087   :  { %3857 = vst [vmem:[#allocation10 + $0x8] sm:$0xff] %v3658_v63  ;;  %3859 = vst [vmem:[#allocation10 + $0x18] sm:$0xff] %v3747_v11  ;;  %v3662_v14 = vadd.f32 %v3661_v13, %v3574_v12  ;;  %v3750_v16 = vpop.f32.mrf.mxu0 }
0x1088   :  { %v3751_v22 = vadd.f32 %v3750_v16, %v3574_v12  ;;  %v3663_v26 = vpop.f32.mrf.mxu1 }
0x1089   :  { %3862 = vst [vmem:[#allocation10 + $0x30] sm:$0xff] %v3662_v14  ;;  %v3664_v30 = vadd.f32 %v3663_v26, %v3574_v12  ;;  %v3752_v34 = vpop.f32.mrf.mxu0 }
0x108a   :  { %3864 = vst [vmem:[#allocation10 + $0x40] sm:$0xff] %v3751_v22  ;;  %v3753_v20 = vadd.f32 %v3752_v34, %v3574_v12  ;;  %v3667_v38 = vpop.f32.mrf.mxu1 }
0x108b   :  { %3863 = vst [vmem:[#allocation10 + $0x38] sm:$0xff] %v3664_v30  ;;  %v3668_v40 = vadd.f32 %v3667_v38, %v8922_v25  ;;  %v3756_v42 = vpop.f32.mrf.mxu0 }
0x108c   :  { %3865 = vst [vmem:[#allocation10 + $0x48] sm:$0xff] %v3753_v20  ;;  %v3757_v29 = vadd.f32 %v3756_v42, %v8922_v25  ;;  %v3669_v45 = vpop.f32.mrf.mxu1 }
0x108d   :  { %3868 = vst [vmem:[#allocation10 + $0x60] sm:$0xff] %v3668_v40  ;;  %v3670_v4 = vadd.f32 %v3669_v45, %v8922_v25  ;;  %v3758_v46 = vpop.f32.mrf.mxu0 }
0x108e   :  { %3870 = vst [vmem:[#allocation10 + $0x70] sm:$0xff] %v3757_v29  ;;  %v3759_v9 = vadd.f32 %v3758_v46, %v8922_v25  ;;  %v3673_v47 = vpop.f32.mrf.mxu1 }
0x108f   :  { %3869 = vst [vmem:[#allocation10 + $0x68] sm:$0xff] %v3670_v4  ;;  %v3674_v48 = vadd.f32 %v3673_v47, %v3574_v12  ;;  %v3762_v0 = vpop.f32.mrf.mxu0 }
0x1090   :  { %3871 = vst [vmem:[#allocation10 + $0x78] sm:$0xff] %v3759_v9  ;;  %v3763_v1 = vadd.f32 %v3762_v0, %v3574_v12  ;;  %v3675_v7 = vpop.f32.mrf.mxu1 }
0x1091   :  { %3874 = vst [vmem:[#allocation10 + $0x90] sm:$0xff] %v3674_v48  ;;  %v3676_v10 = vadd.f32 %v3675_v7, %v3574_v12  ;;  %v3764_v27 = vpop.f32.mrf.mxu0 }
0x1092   :  { %3876 = vst [vmem:[#allocation10 + $0xa0] sm:$0xff] %v3763_v1  ;;  %v3765_v31 = vadd.f32 %v3764_v27, %v3574_v12  ;;  %v3833_v37 = vpop.f32.mrf.mxu1 }
0x1093   :  { %3875 = vst [vmem:[#allocation10 + $0x98] sm:$0xff] %v3676_v10  ;;  %v3834_v18 = vadd.f32 %v3833_v37, %v8922_v25 }
0x1094   :  { %3877 = vst [vmem:[#allocation10 + $0xa8] sm:$0xff] %v3765_v31  ;;  %v3835_v39 = vpop.f32.mrf.mxu1 }
0x1095   :  { %3860 = vst [vmem:[#allocation10 + $0x20] sm:$0xff] %v3834_v18  ;;  %v3836_v35 = vadd.f32 %v3835_v39, %v8922_v25 }
0x1096   :  { %v3839_v2 = vpop.f32.mrf.mxu1 }
0x1097   :  { %3861 = vst [vmem:[#allocation10 + $0x28] sm:$0xff] %v3836_v35  ;;  %v3840_v17 = vadd.f32 %v3839_v2, %v3574_v12 }
0x1098   :  { %v3841_v56 = vpop.f32.mrf.mxu1 }
0x1099   :  { %3866 = vst [vmem:[#allocation10 + $0x50] sm:$0xff] %v3840_v17  ;;  %v3842_v43 = vadd.f32 %v3841_v56, %v3574_v12 }
0x109a   :  { %v3845_v36 = vpop.f32.mrf.mxu1 }
0x109b   :  { %3867 = vst [vmem:[#allocation10 + $0x58] sm:$0xff] %v3842_v43  ;;  %v3846_v3 = vadd.f32 %v3845_v36, %v8922_v25 }
0x109c   :  { %v3847_v19 = vpop.f32.mrf.mxu1 }
0x109d   :  { %3872 = vst [vmem:[#allocation10 + $0x80] sm:$0xff] %v3846_v3  ;;  %v3848_v24 = vadd.f32 %v3847_v19, %v8922_v25 }
0x109e   :  { %v3851_v61 = vpop.f32.mrf.mxu1 }
0x109f   :  { %3873 = vst [vmem:[#allocation10 + $0x88] sm:$0xff] %v3848_v24  ;;  %v3852_v15 = vadd.f32 %v3851_v61, %v3574_v12 }
0x10a0   :  { %v3853_v57 = vpop.f32.mrf.mxu1 }
0x10a1   :  { %3878 = vst [vmem:[#allocation10 + $0xb0] sm:$0xff] %v3852_v15  ;;  %v3854_v21 = vadd.f32 %v3853_v57, %v3574_v12 }
0x10a3   :  { %3879 = vst [vmem:[#allocation10 + $0xb8] sm:$0xff] %v3854_v21 }
0x10a4   :  { %7987 = dma.done.wait [#allocation3], 24576 }
0x10a5   :  { %7988 = vsyncadd [#allocation3], 4294942720  ;;  %4165 = vmatprep.mubr.f32.mxu0 %v8857_v33  ;;  %4242 = vmatprep.mubr.f32.mxu1 %v8861_v44 }
0x10a6   :  { %7862 = shalt.err (!%p8175_p0)  }
0x10a7   :  { %3908 = dma.hbm_to_vmem [thread:$0]  %s8163_s15, 24576, %s8167_s17, [#allocation3 + $0x1] }
0x10a8   :  { %v3940_v32 = vld [vmem:[#allocation2 + $0xf8] sm:$0xff]  ;;  %v3939_v23 = vld [vmem:[#allocation2 + $0xf0] sm:$0xff]  ;;  %v3938_v54 = vld [vmem:[#allocation2 + $0xe8] sm:$0xff] }
0x10a9   :  { %v4004_v25 = vld [vmem:[#allocation2 + $0x2f8] sm:$0xff]  ;;  %4101 = vmatprep.subr.mxu0 %v3940_v32  ;;  %v4003_v52 = vld [vmem:[#allocation2 + $0x2f0] sm:$0xff]  ;;  %v4002_v59 = vld [vmem:[#allocation2 + $0x2e8] sm:$0xff] }
0x10aa   :  { %4178 = vmatprep.subr.mxu1 %v4004_v25  ;;  %4102 = vmatpush1.msra.mxu0 %v3939_v23  ;;  %v3937_v60 = vld [vmem:[#allocation2 + $0xe0] sm:$0xff]  ;;  %v3936_v63 = vld [vmem:[#allocation2 + $0xd8] sm:$0xff]  ;;  %v3935_v12 = vld [vmem:[#allocation2 + $0xd0] sm:$0xff] }
0x10ab   :  { %4179 = vmatpush1.msra.mxu1 %v4003_v52  ;;  %v4001_v62 = vld [vmem:[#allocation2 + $0x2e0] sm:$0xff]  ;;  %4103 = vmatprep.subr.mxu0 %v3938_v54  ;;  %v4000_v11 = vld [vmem:[#allocation2 + $0x2d8] sm:$0xff]  ;;  %v3999_v13 = vld [vmem:[#allocation2 + $0x2d0] sm:$0xff] }
0x10ac   :  { %4180 = vmatprep.subr.mxu1 %v4002_v59  ;;  %4104 = vmatpush1.msra.mxu0 %v3937_v60  ;;  %v3934_v14 = vld [vmem:[#allocation2 + $0xc8] sm:$0xff]  ;;  %v3933_v22 = vld [vmem:[#allocation2 + $0xc0] sm:$0xff]  ;;  %v3932_v30 = vld [vmem:[#allocation2 + $0xb8] sm:$0xff] }
0x10ad   :  { %4181 = vmatpush1.msra.mxu1 %v4001_v62  ;;  %v3998_v16 = vld [vmem:[#allocation2 + $0x2c8] sm:$0xff]  ;;  %4105 = vmatprep.subr.mxu0 %v3936_v63  ;;  %v3997_v26 = vld [vmem:[#allocation2 + $0x2c0] sm:$0xff]  ;;  %v3996_v34 = vld [vmem:[#allocation2 + $0x2b8] sm:$0xff] }
0x10ae   :  { %4182 = vmatprep.subr.mxu1 %v4000_v11  ;;  %4106 = vmatpush1.msra.mxu0 %v3935_v12  ;;  %v3931_v20 = vld [vmem:[#allocation2 + $0xb0] sm:$0xff]  ;;  %v3930_v40 = vld [vmem:[#allocation2 + $0xa8] sm:$0xff]  ;;  %v3929_v29 = vld [vmem:[#allocation2 + $0xa0] sm:$0xff] }
0x10af   :  { %4183 = vmatpush1.msra.mxu1 %v3999_v13  ;;  %4107 = vmatprep.subr.mxu0 %v3934_v14  ;;  %v3995_v38 = vld [vmem:[#allocation2 + $0x2b0] sm:$0xff]  ;;  %v3994_v42 = vld [vmem:[#allocation2 + $0x2a8] sm:$0xff]  ;;  %v3993_v45 = vld [vmem:[#allocation2 + $0x2a0] sm:$0xff] }
0x10b0   :  { %4184 = vmatprep.subr.mxu1 %v3998_v16  ;;  %4108 = vmatpush1.msra.mxu0 %v3933_v22  ;;  %v3928_v4 = vld [vmem:[#allocation2 + $0x98] sm:$0xff]  ;;  %v3927_v9 = vld [vmem:[#allocation2 + $0x90] sm:$0xff]  ;;  %v3926_v48 = vld [vmem:[#allocation2 + $0x88] sm:$0xff] }
0x10b1   :  { %4185 = vmatpush1.msra.mxu1 %v3997_v26  ;;  %4109 = vmatprep.subr.mxu0 %v3932_v30  ;;  %v3992_v46 = vld [vmem:[#allocation2 + $0x298] sm:$0xff]  ;;  %v3991_v47 = vld [vmem:[#allocation2 + $0x290] sm:$0xff]  ;;  %v3990_v0 = vld [vmem:[#allocation2 + $0x288] sm:$0xff] }
0x10b2   :  { %4186 = vmatprep.subr.mxu1 %v3996_v34  ;;  %4110 = vmatpush1.msra.mxu0 %v3931_v20  ;;  %v3925_v1 = vld [vmem:[#allocation2 + $0x80] sm:$0xff]  ;;  %v3924_v10 = vld [vmem:[#allocation2 + $0x78] sm:$0xff]  ;;  %v3923_v31 = vld [vmem:[#allocation2 + $0x70] sm:$0xff] }
0x10b3   :  { %4187 = vmatpush1.msra.mxu1 %v3995_v38  ;;  %4111 = vmatprep.subr.mxu0 %v3930_v40  ;;  %v3989_v7 = vld [vmem:[#allocation2 + $0x280] sm:$0xff]  ;;  %v3988_v27 = vld [vmem:[#allocation2 + $0x278] sm:$0xff]  ;;  %v3987_v37 = vld [vmem:[#allocation2 + $0x270] sm:$0xff] }
0x10b4   :  { %4188 = vmatprep.subr.mxu1 %v3994_v42  ;;  %4112 = vmatpush1.msra.mxu0 %v3929_v29  ;;  %v3922_v18 = vld [vmem:[#allocation2 + $0x68] sm:$0xff]  ;;  %v3921_v35 = vld [vmem:[#allocation2 + $0x60] sm:$0xff]  ;;  %v3920_v17 = vld [vmem:[#allocation2 + $0x58] sm:$0xff] }
0x10b5   :  { %4189 = vmatpush1.msra.mxu1 %v3993_v45  ;;  %4113 = vmatprep.subr.mxu0 %v3928_v4  ;;  %v3986_v39 = vld [vmem:[#allocation2 + $0x268] sm:$0xff]  ;;  %v3985_v2 = vld [vmem:[#allocation2 + $0x260] sm:$0xff]  ;;  %v3984_v56 = vld [vmem:[#allocation2 + $0x258] sm:$0xff] }
0x10b6   :  { %4190 = vmatprep.subr.mxu1 %v3992_v46  ;;  %4114 = vmatpush1.msra.mxu0 %v3927_v9  ;;  %v3919_v43 = vld [vmem:[#allocation2 + $0x50] sm:$0xff]  ;;  %v3918_v3 = vld [vmem:[#allocation2 + $0x48] sm:$0xff]  ;;  %v3917_v24 = vld [vmem:[#allocation2 + $0x40] sm:$0xff] }
0x10b7   :  { %4191 = vmatpush1.msra.mxu1 %v3991_v47  ;;  %4115 = vmatprep.subr.mxu0 %v3926_v48  ;;  %v3983_v36 = vld [vmem:[#allocation2 + $0x250] sm:$0xff]  ;;  %v3982_v19 = vld [vmem:[#allocation2 + $0x248] sm:$0xff]  ;;  %v3981_v61 = vld [vmem:[#allocation2 + $0x240] sm:$0xff] }
0x10b8   :  { %4192 = vmatprep.subr.mxu1 %v3990_v0  ;;  %4116 = vmatpush1.msra.mxu0 %v3925_v1  ;;  %v3916_v15 = vld [vmem:[#allocation2 + $0x38] sm:$0xff]  ;;  %v3915_v21 = vld [vmem:[#allocation2 + $0x30] sm:$0xff]  ;;  %v3914_v25 = vld [vmem:[#allocation2 + $0x28] sm:$0xff] }
0x10b9   :  { %4193 = vmatpush1.msra.mxu1 %v3989_v7  ;;  %4117 = vmatprep.subr.mxu0 %v3924_v10  ;;  %v3980_v57 = vld [vmem:[#allocation2 + $0x238] sm:$0xff]  ;;  %v3979_v32 = vld [vmem:[#allocation2 + $0x230] sm:$0xff]  ;;  %v3978_v23 = vld [vmem:[#allocation2 + $0x228] sm:$0xff] }
0x10ba   :  { %4194 = vmatprep.subr.mxu1 %v3988_v27  ;;  %4118 = vmatpush1.msra.mxu0 %v3923_v31  ;;  %v3913_v52 = vld [vmem:[#allocation2 + $0x20] sm:$0xff]  ;;  %v3912_v59 = vld [vmem:[#allocation2 + $0x18] sm:$0xff]  ;;  %v3911_v62 = vld [vmem:[#allocation2 + $0x10] sm:$0xff] }
0x10bb   :  { %4195 = vmatpush1.msra.mxu1 %v3987_v37  ;;  %4119 = vmatprep.subr.mxu0 %v3922_v18  ;;  %v3977_v54 = vld [vmem:[#allocation2 + $0x220] sm:$0xff]  ;;  %v3976_v60 = vld [vmem:[#allocation2 + $0x218] sm:$0xff]  ;;  %v3975_v63 = vld [vmem:[#allocation2 + $0x210] sm:$0xff] }
0x10bc   :  { %4196 = vmatprep.subr.mxu1 %v3986_v39  ;;  %4120 = vmatpush1.msra.mxu0 %v3921_v35  ;;  %v3910_v11 = vld [vmem:[#allocation2 + $0x8] sm:$0xff]  ;;  %v3909_v13 = vld [vmem:[#allocation2] sm:$0xff]  ;;  %v3972_v16 = vld [vmem:[#allocation2 + $0x1f8] sm:$0xff] }
0x10bd   :  { %4197 = vmatpush1.msra.mxu1 %v3985_v2  ;;  %4121 = vmatprep.subr.mxu0 %v3920_v17  ;;  %v3974_v12 = vld [vmem:[#allocation2 + $0x208] sm:$0xff]  ;;  %v3973_v14 = vld [vmem:[#allocation2 + $0x200] sm:$0xff]  ;;  %v4036_v22 = vld [vmem:[#allocation2 + $0x3f8] sm:$0xff] }
0x10be   :  { %4198 = vmatprep.subr.mxu1 %v3984_v56  ;;  %4122 = vmatpush1.msra.mxu0 %v3919_v43  ;;  %v3971_v26 = vld [vmem:[#allocation2 + $0x1f0] sm:$0xff]  ;;  %v3970_v34 = vld [vmem:[#allocation2 + $0x1e8] sm:$0xff]  ;;  %v3969_v38 = vld [vmem:[#allocation2 + $0x1e0] sm:$0xff] }
0x10bf   :  { %4199 = vmatpush1.msra.mxu1 %v3983_v36  ;;  %4123 = vmatprep.subr.mxu0 %v3918_v3  ;;  %v4035_v30 = vld [vmem:[#allocation2 + $0x3f0] sm:$0xff]  ;;  %v4034_v20 = vld [vmem:[#allocation2 + $0x3e8] sm:$0xff]  ;;  %v4033_v40 = vld [vmem:[#allocation2 + $0x3e0] sm:$0xff] }
0x10c0   :  { %4200 = vmatprep.subr.mxu1 %v3982_v19  ;;  %4124 = vmatpush1.msra.mxu0 %v3917_v24  ;;  %v3968_v42 = vld [vmem:[#allocation2 + $0x1d8] sm:$0xff]  ;;  %v3967_v45 = vld [vmem:[#allocation2 + $0x1d0] sm:$0xff]  ;;  %v3966_v46 = vld [vmem:[#allocation2 + $0x1c8] sm:$0xff] }
0x10c1   :  { %4201 = vmatpush1.msra.mxu1 %v3981_v61  ;;  %4125 = vmatprep.subr.mxu0 %v3916_v15  ;;  %v4032_v29 = vld [vmem:[#allocation2 + $0x3d8] sm:$0xff]  ;;  %v4031_v4 = vld [vmem:[#allocation2 + $0x3d0] sm:$0xff]  ;;  %v4030_v9 = vld [vmem:[#allocation2 + $0x3c8] sm:$0xff] }
0x10c2   :  { %4202 = vmatprep.subr.mxu1 %v3980_v57  ;;  %4126 = vmatpush1.msra.mxu0 %v3915_v21  ;;  %v3965_v47 = vld [vmem:[#allocation2 + $0x1c0] sm:$0xff]  ;;  %v3964_v0 = vld [vmem:[#allocation2 + $0x1b8] sm:$0xff]  ;;  %v3963_v7 = vld [vmem:[#allocation2 + $0x1b0] sm:$0xff] }
0x10c3   :  { %4203 = vmatpush1.msra.mxu1 %v3979_v32  ;;  %4127 = vmatprep.subr.mxu0 %v3914_v25  ;;  %v4029_v48 = vld [vmem:[#allocation2 + $0x3c0] sm:$0xff]  ;;  %v4028_v1 = vld [vmem:[#allocation2 + $0x3b8] sm:$0xff]  ;;  %v4027_v10 = vld [vmem:[#allocation2 + $0x3b0] sm:$0xff] }
0x10c4   :  { %4204 = vmatprep.subr.mxu1 %v3978_v23  ;;  %4128 = vmatpush1.msra.mxu0 %v3913_v52  ;;  %v3962_v27 = vld [vmem:[#allocation2 + $0x1a8] sm:$0xff]  ;;  %v3961_v37 = vld [vmem:[#allocation2 + $0x1a0] sm:$0xff]  ;;  %v3960_v39 = vld [vmem:[#allocation2 + $0x198] sm:$0xff] }
0x10c5   :  { %4205 = vmatpush1.msra.mxu1 %v3977_v54  ;;  %4129 = vmatprep.subr.mxu0 %v3912_v59  ;;  %v4026_v31 = vld [vmem:[#allocation2 + $0x3a8] sm:$0xff]  ;;  %v4025_v18 = vld [vmem:[#allocation2 + $0x3a0] sm:$0xff]  ;;  %v4024_v35 = vld [vmem:[#allocation2 + $0x398] sm:$0xff] }
0x10c6   :  { %4206 = vmatprep.subr.mxu1 %v3976_v60  ;;  %4130 = vmatpush1.msra.mxu0 %v3911_v62  ;;  %v3959_v2 = vld [vmem:[#allocation2 + $0x190] sm:$0xff]  ;;  %v3958_v56 = vld [vmem:[#allocation2 + $0x188] sm:$0xff]  ;;  %v3957_v36 = vld [vmem:[#allocation2 + $0x180] sm:$0xff] }
0x10c7   :  { %4207 = vmatpush1.msra.mxu1 %v3975_v63  ;;  %4131 = vmatprep.subr.mxu0 %v3910_v11  ;;  %v4023_v17 = vld [vmem:[#allocation2 + $0x390] sm:$0xff]  ;;  %v4022_v43 = vld [vmem:[#allocation2 + $0x388] sm:$0xff]  ;;  %v4021_v3 = vld [vmem:[#allocation2 + $0x380] sm:$0xff] }
0x10c8   :  { %4208 = vmatprep.subr.mxu1 %v3974_v12  ;;  %4132 = vmatpush1.msra.mxu0 %v3909_v13  ;;  %v3956_v19 = vld [vmem:[#allocation2 + $0x178] sm:$0xff]  ;;  %v3955_v61 = vld [vmem:[#allocation2 + $0x170] sm:$0xff]  ;;  %v3954_v57 = vld [vmem:[#allocation2 + $0x168] sm:$0xff] }
0x10c9   :  { %4209 = vmatpush1.msra.mxu1 %v3973_v14  ;;  %4133 = vmatprep.subr.mxu0 %v3972_v16  ;;  %v4020_v24 = vld [vmem:[#allocation2 + $0x378] sm:$0xff]  ;;  %v4019_v15 = vld [vmem:[#allocation2 + $0x370] sm:$0xff]  ;;  %v4018_v21 = vld [vmem:[#allocation2 + $0x368] sm:$0xff] }
0x10ca   :  { %4210 = vmatprep.subr.mxu1 %v4036_v22  ;;  %4134 = vmatpush2.msra.mxu0 %v3971_v26  ;;  %v3953_v32 = vld [vmem:[#allocation2 + $0x160] sm:$0xff]  ;;  %v3952_v23 = vld [vmem:[#allocation2 + $0x158] sm:$0xff]  ;;  %v3951_v54 = vld [vmem:[#allocation2 + $0x150] sm:$0xff] }
0x10cb   :  { %4211 = vmatpush2.msra.mxu1 %v4035_v30  ;;  %4135 = vmatprep.subr.mxu0 %v3970_v34  ;;  %v4017_v25 = vld [vmem:[#allocation2 + $0x360] sm:$0xff]  ;;  %v4016_v52 = vld [vmem:[#allocation2 + $0x358] sm:$0xff]  ;;  %v4015_v59 = vld [vmem:[#allocation2 + $0x350] sm:$0xff] }
0x10cc   :  { %4212 = vmatprep.subr.mxu1 %v4034_v20  ;;  %4136 = vmatpush2.msra.mxu0 %v3969_v38  ;;  %v3950_v60 = vld [vmem:[#allocation2 + $0x148] sm:$0xff]  ;;  %v3949_v63 = vld [vmem:[#allocation2 + $0x140] sm:$0xff]  ;;  %v3948_v12 = vld [vmem:[#allocation2 + $0x138] sm:$0xff] }
0x10cd   :  { %4213 = vmatpush2.msra.mxu1 %v4033_v40  ;;  %4137 = vmatprep.subr.mxu0 %v3968_v42  ;;  %v4014_v62 = vld [vmem:[#allocation2 + $0x348] sm:$0xff]  ;;  %v4013_v11 = vld [vmem:[#allocation2 + $0x340] sm:$0xff]  ;;  %v4012_v13 = vld [vmem:[#allocation2 + $0x338] sm:$0xff] }
0x10ce   :  { %4214 = vmatprep.subr.mxu1 %v4032_v29  ;;  %4138 = vmatpush2.msra.mxu0 %v3967_v45  ;;  %v3947_v14 = vld [vmem:[#allocation2 + $0x130] sm:$0xff]  ;;  %v3946_v22 = vld [vmem:[#allocation2 + $0x128] sm:$0xff]  ;;  %v3945_v30 = vld [vmem:[#allocation2 + $0x120] sm:$0xff] }
0x10cf   :  { %4215 = vmatpush2.msra.mxu1 %v4031_v4  ;;  %4139 = vmatprep.subr.mxu0 %v3966_v46  ;;  %v4011_v16 = vld [vmem:[#allocation2 + $0x330] sm:$0xff]  ;;  %v4010_v26 = vld [vmem:[#allocation2 + $0x328] sm:$0xff]  ;;  %v4009_v34 = vld [vmem:[#allocation2 + $0x320] sm:$0xff] }
0x10d0   :  { %4216 = vmatprep.subr.mxu1 %v4030_v9  ;;  %4140 = vmatpush2.msra.mxu0 %v3965_v47  ;;  %v3944_v20 = vld [vmem:[#allocation2 + $0x118] sm:$0xff]  ;;  %v3943_v40 = vld [vmem:[#allocation2 + $0x110] sm:$0xff]  ;;  %v3942_v29 = vld [vmem:[#allocation2 + $0x108] sm:$0xff] }
0x10d1   :  { %4217 = vmatpush2.msra.mxu1 %v4029_v48  ;;  %4141 = vmatprep.subr.mxu0 %v3964_v0  ;;  %v4008_v38 = vld [vmem:[#allocation2 + $0x318] sm:$0xff]  ;;  %v4007_v42 = vld [vmem:[#allocation2 + $0x310] sm:$0xff]  ;;  %v4006_v45 = vld [vmem:[#allocation2 + $0x308] sm:$0xff] }
0x10d2   :  { %4218 = vmatprep.subr.mxu1 %v4028_v1  ;;  %4142 = vmatpush2.msra.mxu0 %v3963_v7  ;;  %v3941_v4 = vld [vmem:[#allocation2 + $0x100] sm:$0xff]  ;;  %v4068_v9 = vld [vmem:[#allocation2 + $0x4f8] sm:$0xff]  ;;  %v4067_v47 = vld [vmem:[#allocation2 + $0x4f0] sm:$0xff] }
0x10d3   :  { %4219 = vmatpush2.msra.mxu1 %v4027_v10  ;;  %4143 = vmatprep.subr.mxu0 %v3962_v27  ;;  %v4005_v46 = vld [vmem:[#allocation2 + $0x300] sm:$0xff]  ;;  %v4066_v48 = vld [vmem:[#allocation2 + $0x4e8] sm:$0xff]  ;;  %v4064_v1 = vld [vmem:[#allocation2 + $0x4d8] sm:$0xff] }
0x10d4   :  { %4220 = vmatprep.subr.mxu1 %v4026_v31  ;;  %4144 = vmatpush2.msra.mxu0 %v3961_v37  ;;  %v4065_v0 = vld [vmem:[#allocation2 + $0x4e0] sm:$0xff]  ;;  %v4063_v7 = vld [vmem:[#allocation2 + $0x4d0] sm:$0xff]  ;;  %v4062_v10 = vld [vmem:[#allocation2 + $0x4c8] sm:$0xff] }
0x10d5   :  { %4221 = vmatpush2.msra.mxu1 %v4025_v18  ;;  %4145 = vmatprep.subr.mxu0 %v3960_v39  ;;  %v4061_v27 = vld [vmem:[#allocation2 + $0x4c0] sm:$0xff]  ;;  %v4060_v31 = vld [vmem:[#allocation2 + $0x4b8] sm:$0xff]  ;;  %v4059_v37 = vld [vmem:[#allocation2 + $0x4b0] sm:$0xff] }
0x10d6   :  { %4222 = vmatprep.subr.mxu1 %v4024_v35  ;;  %4146 = vmatpush2.msra.mxu0 %v3959_v2  ;;  %v4058_v18 = vld [vmem:[#allocation2 + $0x4a8] sm:$0xff]  ;;  %v4057_v39 = vld [vmem:[#allocation2 + $0x4a0] sm:$0xff]  ;;  %v4056_v35 = vld [vmem:[#allocation2 + $0x498] sm:$0xff] }
0x10d7   :  { %4223 = vmatpush2.msra.mxu1 %v4023_v17  ;;  %4147 = vmatprep.subr.mxu0 %v3958_v56  ;;  %v4055_v2 = vld [vmem:[#allocation2 + $0x490] sm:$0xff]  ;;  %v4054_v17 = vld [vmem:[#allocation2 + $0x488] sm:$0xff]  ;;  %v4053_v56 = vld [vmem:[#allocation2 + $0x480] sm:$0xff] }
0x10d8   :  { %4224 = vmatprep.subr.mxu1 %v4022_v43  ;;  %4148 = vmatpush2.msra.mxu0 %v3957_v36  ;;  %v4052_v43 = vld [vmem:[#allocation2 + $0x478] sm:$0xff]  ;;  %v4051_v36 = vld [vmem:[#allocation2 + $0x470] sm:$0xff] }
0x10d9   :  { %4225 = vmatpush2.msra.mxu1 %v4021_v3  ;;  %4149 = vmatprep.subr.mxu0 %v3956_v19  ;;  %v4050_v3 = vld [vmem:[#allocation2 + $0x468] sm:$0xff]  ;;  %v4049_v19 = vld [vmem:[#allocation2 + $0x460] sm:$0xff] }
0x10da   :  { %4226 = vmatprep.subr.mxu1 %v4020_v24  ;;  %4150 = vmatpush2.msra.mxu0 %v3955_v61  ;;  %v4048_v24 = vld [vmem:[#allocation2 + $0x458] sm:$0xff]  ;;  %v4047_v61 = vld [vmem:[#allocation2 + $0x450] sm:$0xff] }
0x10db   :  { %4227 = vmatpush2.msra.mxu1 %v4019_v15  ;;  %4151 = vmatprep.subr.mxu0 %v3954_v57  ;;  %v4046_v15 = vld [vmem:[#allocation2 + $0x448] sm:$0xff]  ;;  %v4045_v57 = vld [vmem:[#allocation2 + $0x440] sm:$0xff] }
0x10dc   :  { %4228 = vmatprep.subr.mxu1 %v4018_v21  ;;  %4152 = vmatpush2.msra.mxu0 %v3953_v32  ;;  %v4044_v21 = vld [vmem:[#allocation2 + $0x438] sm:$0xff]  ;;  %v4043_v32 = vld [vmem:[#allocation2 + $0x430] sm:$0xff] }
0x10dd   :  { %4229 = vmatpush2.msra.mxu1 %v4017_v25  ;;  %4153 = vmatprep.subr.mxu0 %v3952_v23  ;;  %v4042_v25 = vld [vmem:[#allocation2 + $0x428] sm:$0xff]  ;;  %v4041_v23 = vld [vmem:[#allocation2 + $0x420] sm:$0xff] }
0x10de   :  { %4230 = vmatprep.subr.mxu1 %v4016_v52  ;;  %4154 = vmatpush2.msra.mxu0 %v3951_v54  ;;  %v4040_v52 = vld [vmem:[#allocation2 + $0x418] sm:$0xff]  ;;  %v4039_v54 = vld [vmem:[#allocation2 + $0x410] sm:$0xff] }
0x10df   :  { %4231 = vmatpush2.msra.mxu1 %v4015_v59  ;;  %4155 = vmatprep.subr.mxu0 %v3950_v60  ;;  %v4038_v59 = vld [vmem:[#allocation2 + $0x408] sm:$0xff]  ;;  %v4037_v60 = vld [vmem:[#allocation2 + $0x400] sm:$0xff] }
0x10e0   :  { %4232 = vmatprep.subr.mxu1 %v4014_v62  ;;  %4156 = vmatpush2.msra.mxu0 %v3949_v63  ;;  %v4100_v62 = vld [vmem:[#allocation2 + $0x5f8] sm:$0xff]  ;;  %v4099_v63 = vld [vmem:[#allocation2 + $0x5f0] sm:$0xff] }
0x10e1   :  { %4233 = vmatpush2.msra.mxu1 %v4013_v11  ;;  %4157 = vmatprep.subr.mxu0 %v3948_v12  ;;  %v4098_v11 = vld [vmem:[#allocation2 + $0x5e8] sm:$0xff]  ;;  %v4097_v12 = vld [vmem:[#allocation2 + $0x5e0] sm:$0xff] }
0x10e2   :  { %4234 = vmatprep.subr.mxu1 %v4012_v13  ;;  %4158 = vmatpush2.msra.mxu0 %v3947_v14  ;;  %v4096_v13 = vld [vmem:[#allocation2 + $0x5d8] sm:$0xff]  ;;  %v4095_v14 = vld [vmem:[#allocation2 + $0x5d0] sm:$0xff] }
0x10e3   :  { %4235 = vmatpush2.msra.mxu1 %v4011_v16  ;;  %4159 = vmatprep.subr.mxu0 %v3946_v22  ;;  %v4094_v16 = vld [vmem:[#allocation2 + $0x5c8] sm:$0xff]  ;;  %v4093_v22 = vld [vmem:[#allocation2 + $0x5c0] sm:$0xff] }
0x10e4   :  { %4236 = vmatprep.subr.mxu1 %v4010_v26  ;;  %4160 = vmatpush2.msra.mxu0 %v3945_v30  ;;  %v4092_v26 = vld [vmem:[#allocation2 + $0x5b8] sm:$0xff]  ;;  %v4091_v30 = vld [vmem:[#allocation2 + $0x5b0] sm:$0xff] }
0x10e5   :  { %4237 = vmatpush2.msra.mxu1 %v4009_v34  ;;  %4161 = vmatprep.subr.mxu0 %v3944_v20  ;;  %v4090_v34 = vld [vmem:[#allocation2 + $0x5a8] sm:$0xff]  ;;  %v4089_v20 = vld [vmem:[#allocation2 + $0x5a0] sm:$0xff] }
0x10e6   :  { %4238 = vmatprep.subr.mxu1 %v4008_v38  ;;  %4162 = vmatpush2.msra.mxu0 %v3943_v40  ;;  %v4088_v38 = vld [vmem:[#allocation2 + $0x598] sm:$0xff]  ;;  %v4087_v40 = vld [vmem:[#allocation2 + $0x590] sm:$0xff] }
0x10e7   :  { %4239 = vmatpush2.msra.mxu1 %v4007_v42  ;;  %4163 = vmatprep.subr.mxu0 %v3942_v29  ;;  %v4086_v42 = vld [vmem:[#allocation2 + $0x588] sm:$0xff]  ;;  %v4085_v29 = vld [vmem:[#allocation2 + $0x580] sm:$0xff] }
0x10e8   :  { %4240 = vmatprep.subr.mxu1 %v4006_v45  ;;  %4164 = vmatpush2.msra.mxu0 %v3941_v4  ;;  %v4084_v45 = vld [vmem:[#allocation2 + $0x578] sm:$0xff]  ;;  %v4083_v4 = vld [vmem:[#allocation2 + $0x570] sm:$0xff] }
0x10e9   :  { %4241 = vmatpush2.msra.mxu1 %v4005_v46  ;;  %4166 = vmatmul.mubr.f32.vlgmr.msra.gmra.mxu0 %v8867_v6  ;;  %v4082_v46 = vld [vmem:[#allocation2 + $0x568] sm:$0xff] }
0x10ea   :  { %4243 = vmatmul.mubr.f32.vlgmr.msra.gmra.mxu1 %v8869_v5  ;;  %4255 = vmatprep.subr.mxu0 %v4068_v9  ;;  %v4081_v9 = vld [vmem:[#allocation2 + $0x560] sm:$0xff] }
0x10eb   :  { %4171 = vmatprep.mubr.f32.mxu0 %v8849_v53  ;;  %4256 = vmatpush1.msra.mxu0 %v4067_v47  ;;  %v4080_v47 = vld [vmem:[#allocation2 + $0x558] sm:$0xff] }
0x10ec   :  { %4248 = vmatprep.mubr.f32.mxu1 %v8851_v50  ;;  %4257 = vmatprep.subr.mxu0 %v4066_v48  ;;  %v4079_v48 = vld [vmem:[#allocation2 + $0x550] sm:$0xff] }
0x10ed   :  { %4258 = vmatpush1.msra.mxu0 %v4065_v0  ;;  %v4078_v0 = vld [vmem:[#allocation2 + $0x548] sm:$0xff] }
0x10ee   :  { %4249 = vmatmul.mubr.f32.gmra.mxu1 %v8855_v8  ;;  %4259 = vmatprep.subr.mxu0 %v4064_v1  ;;  %v4077_v1 = vld [vmem:[#allocation2 + $0x540] sm:$0xff] }
0x10ef   :  { %4172 = vmatmul.mubr.f32.gmra.mxu0 %v8853_v41  ;;  %4420 = vmatprep.mubr.f32.mxu1 %v9701_v49 }
0x10f0   :  { %4260 = vmatpush1.msra.mxu0 %v4063_v7  ;;  %4319 = vmatprep.mubr.f32.mxu0 %v8891_v58  ;;  %v4076_v7 = vld [vmem:[#allocation2 + $0x538] sm:$0xff] }
0x10f1   :  { %4261 = vmatprep.subr.mxu0 %v4062_v10  ;;  %v4075_v10 = vld [vmem:[#allocation2 + $0x530] sm:$0xff] }
0x10f2   :  { %4262 = vmatpush1.msra.mxu0 %v4061_v27  ;;  %v4074_v27 = vld [vmem:[#allocation2 + $0x528] sm:$0xff] }
0x10f3   :  { %4263 = vmatprep.subr.mxu0 %v4060_v31  ;;  %v4073_v31 = vld [vmem:[#allocation2 + $0x520] sm:$0xff] }
0x10f4   :  { %4264 = vmatpush1.msra.mxu0 %v4059_v37  ;;  %v4072_v37 = vld [vmem:[#allocation2 + $0x518] sm:$0xff] }
0x10f5   :  { %4265 = vmatprep.subr.mxu0 %v4058_v18  ;;  %v4071_v18 = vld [vmem:[#allocation2 + $0x510] sm:$0xff] }
0x10f6   :  { %4266 = vmatpush1.msra.mxu0 %v4057_v39  ;;  %v4070_v39 = vld [vmem:[#allocation2 + $0x508] sm:$0xff] }
0x10f7   :  { %4267 = vmatprep.subr.mxu0 %v4056_v35  ;;  %v4069_v35 = vld [vmem:[#allocation2 + $0x500] sm:$0xff] }
0x10f8   :  { %4268 = vmatpush1.msra.mxu0 %v4055_v2 }
0x10f9   :  { %4269 = vmatprep.subr.mxu0 %v4054_v17 }
0x10fa   :  { %4270 = vmatpush1.msra.mxu0 %v4053_v56 }
0x10fb   :  { %4271 = vmatprep.subr.mxu0 %v4052_v43 }
0x10fc   :  { %4272 = vmatpush1.msra.mxu0 %v4051_v36 }
0x10fd   :  { %4273 = vmatprep.subr.mxu0 %v4050_v3 }
0x10fe   :  { %4274 = vmatpush1.msra.mxu0 %v4049_v19 }
0x10ff   :  { %4275 = vmatprep.subr.mxu0 %v4048_v24 }
0x1100   :  { %4276 = vmatpush1.msra.mxu0 %v4047_v61 }
0x1101   :  { %4277 = vmatprep.subr.mxu0 %v4046_v15 }
0x1102   :  { %4278 = vmatpush1.msra.mxu0 %v4045_v57 }
0x1103   :  { %4279 = vmatprep.subr.mxu0 %v4044_v21 }
0x1104   :  { %4280 = vmatpush1.msra.mxu0 %v4043_v32 }
0x1105   :  { %4281 = vmatprep.subr.mxu0 %v4042_v25 }
0x1106   :  { %4282 = vmatpush1.msra.mxu0 %v4041_v23 }
0x1107   :  { %4283 = vmatprep.subr.mxu0 %v4040_v52 }
0x1108   :  { %4284 = vmatpush1.msra.mxu0 %v4039_v54 }
0x1109   :  { %4285 = vmatprep.subr.mxu0 %v4038_v59 }
0x110a   :  { %4286 = vmatpush1.msra.mxu0 %v4037_v60 }
0x110b   :  { %4287 = vmatprep.subr.mxu0 %v4100_v62 }
0x110c   :  { %4288 = vmatpush2.msra.mxu0 %v4099_v63  ;;  %v9789_v63 = vld [vmem:[#allocation56_spill] sm:$0xff] }
0x110d   :  { %4289 = vmatprep.subr.mxu0 %v4098_v11  ;;  %v9790_v11 = vld [vmem:[#allocation57_spill] sm:$0xff] }
0x110e   :  { %4290 = vmatpush2.msra.mxu0 %v4097_v12  ;;  %v9791_v12 = vld [vmem:[#allocation58_spill] sm:$0xff] }
0x110f   :  { %4291 = vmatprep.subr.mxu0 %v4096_v13  ;;  %v9792_v13 = vld [vmem:[#allocation64_spill] sm:$0xff] }
0x1110   :  { %4292 = vmatpush2.msra.mxu0 %v4095_v14  ;;  %v4336_v14 = vld [vmem:[#allocation10] sm:$0xff] }
0x1111   :  { %4293 = vmatprep.subr.mxu0 %v4094_v16 }
0x1112   :  { %4294 = vmatpush2.msra.mxu0 %v4093_v22  ;;  %v4337_v22 = vld [vmem:[#allocation10 + $0x8] sm:$0xff] }
0x1113   :  { %4295 = vmatprep.subr.mxu0 %v4092_v26 }
0x1114   :  { %4296 = vmatpush2.msra.mxu0 %v4091_v30 }
0x1115   :  { %4297 = vmatprep.subr.mxu0 %v4090_v34  ;;  %v4338_v34 = vld [vmem:[#allocation10 + $0x30] sm:$0xff] }
0x1116   :  { %4298 = vmatpush2.msra.mxu0 %v4089_v20 }
0x1117   :  { %4299 = vmatprep.subr.mxu0 %v4088_v38 }
0x1118   :  { %4300 = vmatpush2.msra.mxu0 %v4087_v40  ;;  %v4339_v40 = vld [vmem:[#allocation10 + $0x38] sm:$0xff] }
0x1119   :  { %4301 = vmatprep.subr.mxu0 %v4086_v42 }
0x111a   :  { %4302 = vmatpush2.msra.mxu0 %v4085_v29 }
0x111b   :  { %4303 = vmatprep.subr.mxu0 %v4084_v45  ;;  %v4340_v45 = vld [vmem:[#allocation10 + $0x60] sm:$0xff] }
0x111c   :  { %4304 = vmatpush2.msra.mxu0 %v4083_v4 }
0x111d   :  { %4305 = vmatprep.subr.mxu0 %v4082_v46 }
0x111e   :  { %4306 = vmatpush2.msra.mxu0 %v4081_v9  ;;  %v4341_v9 = vld [vmem:[#allocation10 + $0x68] sm:$0xff] }
0x111f   :  { %4307 = vmatprep.subr.mxu0 %v4080_v47 }
0x1120   :  { %4308 = vmatpush2.msra.mxu0 %v4079_v48 }
0x1121   :  { %4309 = vmatprep.subr.mxu0 %v4078_v0  ;;  %v4342_v0 = vld [vmem:[#allocation10 + $0x90] sm:$0xff] }
0x1122   :  { %4310 = vmatpush2.msra.mxu0 %v4077_v1 }
0x1123   :  { %4311 = vmatprep.subr.mxu0 %v4076_v7 }
0x1124   :  { %4312 = vmatpush2.msra.mxu0 %v4075_v10  ;;  %v4343_v10 = vld [vmem:[#allocation10 + $0x98] sm:$0xff] }
0x1125   :  { %4313 = vmatprep.subr.mxu0 %v4074_v27 }
0x1126   :  { %4314 = vmatpush2.msra.mxu0 %v4073_v31 }
0x1127   :  { %4315 = vmatprep.subr.mxu0 %v4072_v37 }
0x1128   :  { %4316 = vmatpush2.msra.mxu0 %v4071_v18 }
0x1129   :  { %4317 = vmatprep.subr.mxu0 %v4070_v39 }
0x112a   :  { %4318 = vmatpush2.msra.mxu0 %v4069_v35 }
0x112b   :  { %4320 = vmatmul.mubr.f32.vlgmr.msra.gmra.mxu0 %v8894_v28 }
0x112c   :  { %4325 = vmatprep.mubr.f32.mxu0 %v8881_v55 }
0x112f   :  { %4326 = vmatmul.mubr.f32.gmra.mxu0 %v8883_v51 }
0x11a9   :  { %v4167_v2 = vpop.f32.mrf.mxu0 }
0x11aa   :  { %v4244_v17 = vpop.f32.mrf.mxu1 }
0x11ab   :  { %v4169_v56 = vpop.f32.mrf.mxu0  ;;  %v4245_v54 = vadd.f32 %v4244_v17, %v4167_v2 }
0x11ac   :  { %v4246_v36 = vpop.f32.mrf.mxu1 }
0x11ad   :  { %v4247_v23 = vadd.f32 %v4246_v36, %v4169_v56 }
0x11ae   :  { %v4250_v3 = vpop.f32.mrf.mxu1 }
0x11af   :  { %v4173_v43 = vpop.f32.mrf.mxu0 }
0x11b0   :  { %v4252_v61 = vpop.f32.mrf.mxu1  ;;  %v4251_v32 = vadd.f32 %v4250_v3, %v4173_v43 }
0x11b1   :  { %v4175_v19 = vpop.f32.mrf.mxu0 }
0x11b2   :  { %v4253_v21 = vadd.f32 %v4252_v61, %v4175_v19 }
0x11eb   :  { %v4321_v24 = vpop.f32.mrf.mxu0 }
0x11ec   :  { %v8960_v62 = vadd.f32 %v4321_v24, %v4245_v54 }
0x11ed   :  { %v4323_v15 = vpop.f32.mrf.mxu0 }
0x11ee   :  { %v8957_v60 = vadd.f32 %v4323_v15, %v4247_v23  ;;  %9788 = vst [vmem:[#allocation66_spill] sm:$0xff] %v8960_v62 }
0x11ef   :  { %v4327_v57 = vpop.f32.mrf.mxu0 }
0x11f0   :  { %v8955_v59 = vadd.f32 %v4327_v57, %v4251_v32  ;;  %9787 = vst [vmem:[#allocation63_spill] sm:$0xff] %v8957_v60 }
0x11f1   :  { %v4329_v25 = vpop.f32.mrf.mxu0 }
0x11f2   :  { %v8953_v52 = vadd.f32 %v4329_v25, %v4253_v21  ;;  %9786 = vst [vmem:[#allocation62_spill] sm:$0xff] %v8955_v59 }
0x11f4   :  { %9785 = vst [vmem:[#allocation61_spill] sm:$0xff] %v8953_v52  ;;  %4384 = vmatprep.subr.mxu1 %v8953_v52 }
0x11f5   :  { %4385 = vmatpush1.msra.mxu1 %v8955_v59 }
0x11f6   :  { %4386 = vmatprep.subr.mxu1 %v8957_v60 }
0x11f7   :  { %4387 = vmatpush1.msra.mxu1 %v8960_v62 }
0x11f8   :  { %7620 = vmatmul.mubr.msk.f32.vlgmr.msra.gmra.mxu1 %vm3576_vm1, %v9789_v63 }
0x11f9   :  { %4426 = vmatprep.mubr.f32.mxu1 %v9701_v49 }
0x11fc   :  { %7621 = vmatmul.mubr.msk.f32.gmra.mxu1 %vm3576_vm1, %v9790_v11 }
0x11fd   :  { %4432 = vmatprep.mubr.f32.mxu1 %v9701_v49 }
0x1200   :  { %7622 = vmatmul.mubr.msk.f32.gmra.mxu1 %vm3576_vm1, %v9791_v12 }
0x1201   :  { %4438 = vmatprep.mubr.f32.mxu1 %v9701_v49 }
0x1204   :  { %7623 = vmatmul.mubr.msk.f32.gmra.mxu1 %vm3576_vm1, %v9792_v13 }
0x12b8   :  { %v4422_v16 = vpop.f32.mrf.mxu1 }
0x12b9   :  { %v4445_v26 = vadd.f32 %v4422_v16, %v4336_v14 }
0x12ba   :  { %v4424_v30 = vpop.f32.mrf.mxu1 }
0x12bb   :  { %4453 = vst [vmem:[#allocation10] sm:$0xff] %v4445_v26  ;;  %v4446_v20 = vadd.f32 %v4424_v30, %v4337_v22 }
0x12bc   :  { %v4428_v38 = vpop.f32.mrf.mxu1 }
0x12bd   :  { %4454 = vst [vmem:[#allocation10 + $0x8] sm:$0xff] %v4446_v20  ;;  %v4447_v42 = vadd.f32 %v4428_v38, %v4338_v34 }
0x12be   :  { %v4430_v29 = vpop.f32.mrf.mxu1 }
0x12bf   :  { %4455 = vst [vmem:[#allocation10 + $0x30] sm:$0xff] %v4447_v42  ;;  %v4448_v4 = vadd.f32 %v4430_v29, %v4339_v40 }
0x12c0   :  { %v4434_v46 = vpop.f32.mrf.mxu1 }
0x12c1   :  { %4456 = vst [vmem:[#allocation10 + $0x38] sm:$0xff] %v4448_v4  ;;  %v4449_v47 = vadd.f32 %v4434_v46, %v4340_v45 }
0x12c2   :  { %v4436_v48 = vpop.f32.mrf.mxu1 }
0x12c3   :  { %4457 = vst [vmem:[#allocation10 + $0x60] sm:$0xff] %v4449_v47  ;;  %v4450_v1 = vadd.f32 %v4436_v48, %v4341_v9 }
0x12c4   :  { %v4440_v7 = vpop.f32.mrf.mxu1 }
0x12c5   :  { %4458 = vst [vmem:[#allocation10 + $0x68] sm:$0xff] %v4450_v1  ;;  %v4451_v27 = vadd.f32 %v4440_v7, %v4342_v0 }
0x12c6   :  { %v4442_v31 = vpop.f32.mrf.mxu1 }
0x12c7   :  { %4459 = vst [vmem:[#allocation10 + $0x90] sm:$0xff] %v4451_v27  ;;  %v4452_v37 = vadd.f32 %v4442_v31, %v4343_v10 }
0x12c9   :  { %4460 = vst [vmem:[#allocation10 + $0x98] sm:$0xff] %v4452_v37 }
0x12ca   :  { %7989 = dma.done.wait [#allocation3 + $0x1], 24576 }
0x12cb   :  { %7990 = vsyncadd [#allocation3 + $0x1], 4294942720  ;;  %4730 = vmatprep.mubr.f32.mxu1 %v8857_v33  ;;  %4807 = vmatprep.mubr.f32.mxu0 %v8861_v44 }
0x12cc   :  { %7885 = shalt.err (!%p8126_p9)  }
0x12cd   :  { %4473 = dma.hbm_to_vmem [thread:$0]  %s8214_s1, 24576, %s8117_s27, [#allocation3] }
0x12ce   :  { %v4505_v18 = vld [vmem:[#allocation2 + $0x6f8] sm:$0xff]  ;;  %v4504_v35 = vld [vmem:[#allocation2 + $0x6f0] sm:$0xff]  ;;  %v4503_v17 = vld [vmem:[#allocation2 + $0x6e8] sm:$0xff] }
0x12cf   :  { %v4569_v39 = vld [vmem:[#allocation2 + $0x8f8] sm:$0xff]  ;;  %4666 = vmatprep.subr.mxu1 %v4505_v18  ;;  %v4568_v2 = vld [vmem:[#allocation2 + $0x8f0] sm:$0xff]  ;;  %v4567_v56 = vld [vmem:[#allocation2 + $0x8e8] sm:$0xff] }
0x12d0   :  { %4743 = vmatprep.subr.mxu0 %v4569_v39  ;;  %4667 = vmatpush1.msra.mxu1 %v4504_v35  ;;  %v4502_v43 = vld [vmem:[#allocation2 + $0x6e0] sm:$0xff]  ;;  %v4501_v3 = vld [vmem:[#allocation2 + $0x6d8] sm:$0xff]  ;;  %v4500_v24 = vld [vmem:[#allocation2 + $0x6d0] sm:$0xff] }
0x12d1   :  { %4744 = vmatpush1.msra.mxu0 %v4568_v2  ;;  %v4566_v36 = vld [vmem:[#allocation2 + $0x8e0] sm:$0xff]  ;;  %4668 = vmatprep.subr.mxu1 %v4503_v17  ;;  %v4565_v19 = vld [vmem:[#allocation2 + $0x8d8] sm:$0xff]  ;;  %v4564_v61 = vld [vmem:[#allocation2 + $0x8d0] sm:$0xff] }
0x12d2   :  { %4745 = vmatprep.subr.mxu0 %v4567_v56  ;;  %4669 = vmatpush1.msra.mxu1 %v4502_v43  ;;  %v4499_v15 = vld [vmem:[#allocation2 + $0x6c8] sm:$0xff]  ;;  %v4498_v21 = vld [vmem:[#allocation2 + $0x6c0] sm:$0xff]  ;;  %v4497_v25 = vld [vmem:[#allocation2 + $0x6b8] sm:$0xff] }
0x12d3   :  { %4746 = vmatpush1.msra.mxu0 %v4566_v36  ;;  %v4563_v57 = vld [vmem:[#allocation2 + $0x8c8] sm:$0xff]  ;;  %4670 = vmatprep.subr.mxu1 %v4501_v3  ;;  %v4562_v32 = vld [vmem:[#allocation2 + $0x8c0] sm:$0xff]  ;;  %v4561_v23 = vld [vmem:[#allocation2 + $0x8b8] sm:$0xff] }
0x12d4   :  { %4747 = vmatprep.subr.mxu0 %v4565_v19  ;;  %4671 = vmatpush1.msra.mxu1 %v4500_v24  ;;  %v4496_v54 = vld [vmem:[#allocation2 + $0x6b0] sm:$0xff]  ;;  %v4495_v16 = vld [vmem:[#allocation2 + $0x6a8] sm:$0xff]  ;;  %v4494_v26 = vld [vmem:[#allocation2 + $0x6a0] sm:$0xff] }
0x12d5   :  { %4748 = vmatpush1.msra.mxu0 %v4564_v61  ;;  %4672 = vmatprep.subr.mxu1 %v4499_v15  ;;  %v4560_v14 = vld [vmem:[#allocation2 + $0x8b0] sm:$0xff]  ;;  %v4559_v22 = vld [vmem:[#allocation2 + $0x8a8] sm:$0xff]  ;;  %v4558_v30 = vld [vmem:[#allocation2 + $0x8a0] sm:$0xff] }
0x12d6   :  { %4749 = vmatprep.subr.mxu0 %v4563_v57  ;;  %4673 = vmatpush1.msra.mxu1 %v4498_v21  ;;  %v4493_v34 = vld [vmem:[#allocation2 + $0x698] sm:$0xff]  ;;  %v4492_v38 = vld [vmem:[#allocation2 + $0x690] sm:$0xff]  ;;  %v4491_v42 = vld [vmem:[#allocation2 + $0x688] sm:$0xff] }
0x12d7   :  { %4750 = vmatpush1.msra.mxu0 %v4562_v32  ;;  %4674 = vmatprep.subr.mxu1 %v4497_v25  ;;  %v4557_v20 = vld [vmem:[#allocation2 + $0x898] sm:$0xff]  ;;  %v4556_v40 = vld [vmem:[#allocation2 + $0x890] sm:$0xff]  ;;  %v4555_v29 = vld [vmem:[#allocation2 + $0x888] sm:$0xff] }
0x12d8   :  { %4751 = vmatprep.subr.mxu0 %v4561_v23  ;;  %4675 = vmatpush1.msra.mxu1 %v4496_v54  ;;  %v4490_v45 = vld [vmem:[#allocation2 + $0x680] sm:$0xff]  ;;  %v4489_v46 = vld [vmem:[#allocation2 + $0x678] sm:$0xff]  ;;  %v4488_v47 = vld [vmem:[#allocation2 + $0x670] sm:$0xff] }
0x12d9   :  { %4752 = vmatpush1.msra.mxu0 %v4560_v14  ;;  %4676 = vmatprep.subr.mxu1 %v4495_v16  ;;  %v4554_v4 = vld [vmem:[#allocation2 + $0x880] sm:$0xff]  ;;  %v4553_v9 = vld [vmem:[#allocation2 + $0x878] sm:$0xff]  ;;  %v4552_v48 = vld [vmem:[#allocation2 + $0x870] sm:$0xff] }
0x12da   :  { %4753 = vmatprep.subr.mxu0 %v4559_v22  ;;  %4677 = vmatpush1.msra.mxu1 %v4494_v26  ;;  %v4487_v0 = vld [vmem:[#allocation2 + $0x668] sm:$0xff]  ;;  %v4486_v7 = vld [vmem:[#allocation2 + $0x660] sm:$0xff]  ;;  %v4485_v27 = vld [vmem:[#allocation2 + $0x658] sm:$0xff] }
0x12db   :  { %4754 = vmatpush1.msra.mxu0 %v4558_v30  ;;  %4678 = vmatprep.subr.mxu1 %v4493_v34  ;;  %v4551_v1 = vld [vmem:[#allocation2 + $0x868] sm:$0xff]  ;;  %v4550_v10 = vld [vmem:[#allocation2 + $0x860] sm:$0xff]  ;;  %v4549_v31 = vld [vmem:[#allocation2 + $0x858] sm:$0xff] }
0x12dc   :  { %4755 = vmatprep.subr.mxu0 %v4557_v20  ;;  %4679 = vmatpush1.msra.mxu1 %v4492_v38  ;;  %v4484_v37 = vld [vmem:[#allocation2 + $0x650] sm:$0xff]  ;;  %v4483_v39 = vld [vmem:[#allocation2 + $0x648] sm:$0xff]  ;;  %v4482_v2 = vld [vmem:[#allocation2 + $0x640] sm:$0xff] }
0x12dd   :  { %4756 = vmatpush1.msra.mxu0 %v4556_v40  ;;  %4680 = vmatprep.subr.mxu1 %v4491_v42  ;;  %v4548_v18 = vld [vmem:[#allocation2 + $0x850] sm:$0xff]  ;;  %v4547_v35 = vld [vmem:[#allocation2 + $0x848] sm:$0xff]  ;;  %v4546_v17 = vld [vmem:[#allocation2 + $0x840] sm:$0xff] }
0x12de   :  { %4757 = vmatprep.subr.mxu0 %v4555_v29  ;;  %4681 = vmatpush1.msra.mxu1 %v4490_v45  ;;  %v4481_v56 = vld [vmem:[#allocation2 + $0x638] sm:$0xff]  ;;  %v4480_v36 = vld [vmem:[#allocation2 + $0x630] sm:$0xff]  ;;  %v4479_v19 = vld [vmem:[#allocation2 + $0x628] sm:$0xff] }
0x12df   :  { %4758 = vmatpush1.msra.mxu0 %v4554_v4  ;;  %4682 = vmatprep.subr.mxu1 %v4489_v46  ;;  %v4545_v43 = vld [vmem:[#allocation2 + $0x838] sm:$0xff]  ;;  %v4544_v3 = vld [vmem:[#allocation2 + $0x830] sm:$0xff]  ;;  %v4543_v24 = vld [vmem:[#allocation2 + $0x828] sm:$0xff] }
0x12e0   :  { %4759 = vmatprep.subr.mxu0 %v4553_v9  ;;  %4683 = vmatpush1.msra.mxu1 %v4488_v47  ;;  %v4478_v61 = vld [vmem:[#allocation2 + $0x620] sm:$0xff]  ;;  %v4477_v57 = vld [vmem:[#allocation2 + $0x618] sm:$0xff]  ;;  %v4476_v32 = vld [vmem:[#allocation2 + $0x610] sm:$0xff] }
0x12e1   :  { %4760 = vmatpush1.msra.mxu0 %v4552_v48  ;;  %4684 = vmatprep.subr.mxu1 %v4487_v0  ;;  %v4542_v15 = vld [vmem:[#allocation2 + $0x820] sm:$0xff]  ;;  %v4541_v21 = vld [vmem:[#allocation2 + $0x818] sm:$0xff]  ;;  %v4540_v25 = vld [vmem:[#allocation2 + $0x810] sm:$0xff] }
0x12e2   :  { %4761 = vmatprep.subr.mxu0 %v4551_v1  ;;  %4685 = vmatpush1.msra.mxu1 %v4486_v7  ;;  %v4475_v23 = vld [vmem:[#allocation2 + $0x608] sm:$0xff]  ;;  %v4474_v14 = vld [vmem:[#allocation2 + $0x600] sm:$0xff]  ;;  %v4537_v22 = vld [vmem:[#allocation2 + $0x7f8] sm:$0xff] }
0x12e3   :  { %4762 = vmatpush1.msra.mxu0 %v4550_v10  ;;  %4686 = vmatprep.subr.mxu1 %v4485_v27  ;;  %v4539_v54 = vld [vmem:[#allocation2 + $0x808] sm:$0xff]  ;;  %v4538_v16 = vld [vmem:[#allocation2 + $0x800] sm:$0xff]  ;;  %v4601_v26 = vld [vmem:[#allocation2 + $0x9f8] sm:$0xff] }
0x12e4   :  { %4763 = vmatprep.subr.mxu0 %v4549_v31  ;;  %4687 = vmatpush1.msra.mxu1 %v4484_v37  ;;  %v4536_v30 = vld [vmem:[#allocation2 + $0x7f0] sm:$0xff]  ;;  %v4535_v20 = vld [vmem:[#allocation2 + $0x7e8] sm:$0xff]  ;;  %v4534_v40 = vld [vmem:[#allocation2 + $0x7e0] sm:$0xff] }
0x12e5   :  { %4764 = vmatpush1.msra.mxu0 %v4548_v18  ;;  %4688 = vmatprep.subr.mxu1 %v4483_v39  ;;  %v4600_v34 = vld [vmem:[#allocation2 + $0x9f0] sm:$0xff]  ;;  %v4599_v38 = vld [vmem:[#allocation2 + $0x9e8] sm:$0xff]  ;;  %v4598_v42 = vld [vmem:[#allocation2 + $0x9e0] sm:$0xff] }
0x12e6   :  { %4765 = vmatprep.subr.mxu0 %v4547_v35  ;;  %4689 = vmatpush1.msra.mxu1 %v4482_v2  ;;  %v4533_v29 = vld [vmem:[#allocation2 + $0x7d8] sm:$0xff]  ;;  %v4532_v4 = vld [vmem:[#allocation2 + $0x7d0] sm:$0xff]  ;;  %v4531_v9 = vld [vmem:[#allocation2 + $0x7c8] sm:$0xff] }
0x12e7   :  { %4766 = vmatpush1.msra.mxu0 %v4546_v17  ;;  %4690 = vmatprep.subr.mxu1 %v4481_v56  ;;  %v4597_v45 = vld [vmem:[#allocation2 + $0x9d8] sm:$0xff]  ;;  %v4596_v46 = vld [vmem:[#allocation2 + $0x9d0] sm:$0xff]  ;;  %v4595_v47 = vld [vmem:[#allocation2 + $0x9c8] sm:$0xff] }
0x12e8   :  { %4767 = vmatprep.subr.mxu0 %v4545_v43  ;;  %4691 = vmatpush1.msra.mxu1 %v4480_v36  ;;  %v4530_v48 = vld [vmem:[#allocation2 + $0x7c0] sm:$0xff]  ;;  %v4529_v1 = vld [vmem:[#allocation2 + $0x7b8] sm:$0xff]  ;;  %v4528_v10 = vld [vmem:[#allocation2 + $0x7b0] sm:$0xff] }
0x12e9   :  { %4768 = vmatpush1.msra.mxu0 %v4544_v3  ;;  %4692 = vmatprep.subr.mxu1 %v4479_v19  ;;  %v4594_v0 = vld [vmem:[#allocation2 + $0x9c0] sm:$0xff]  ;;  %v4593_v7 = vld [vmem:[#allocation2 + $0x9b8] sm:$0xff]  ;;  %v4592_v27 = vld [vmem:[#allocation2 + $0x9b0] sm:$0xff] }
0x12ea   :  { %4769 = vmatprep.subr.mxu0 %v4543_v24  ;;  %4693 = vmatpush1.msra.mxu1 %v4478_v61  ;;  %v4527_v31 = vld [vmem:[#allocation2 + $0x7a8] sm:$0xff]  ;;  %v4526_v18 = vld [vmem:[#allocation2 + $0x7a0] sm:$0xff]  ;;  %v4525_v35 = vld [vmem:[#allocation2 + $0x798] sm:$0xff] }
0x12eb   :  { %4770 = vmatpush1.msra.mxu0 %v4542_v15  ;;  %4694 = vmatprep.subr.mxu1 %v4477_v57  ;;  %v4591_v37 = vld [vmem:[#allocation2 + $0x9a8] sm:$0xff]  ;;  %v4590_v39 = vld [vmem:[#allocation2 + $0x9a0] sm:$0xff]  ;;  %v4589_v2 = vld [vmem:[#allocation2 + $0x998] sm:$0xff] }
0x12ec   :  { %4771 = vmatprep.subr.mxu0 %v4541_v21  ;;  %4695 = vmatpush1.msra.mxu1 %v4476_v32  ;;  %v4524_v17 = vld [vmem:[#allocation2 + $0x790] sm:$0xff]  ;;  %v4523_v43 = vld [vmem:[#allocation2 + $0x788] sm:$0xff]  ;;  %v4522_v3 = vld [vmem:[#allocation2 + $0x780] sm:$0xff] }
0x12ed   :  { %4772 = vmatpush1.msra.mxu0 %v4540_v25  ;;  %4696 = vmatprep.subr.mxu1 %v4475_v23  ;;  %v4588_v56 = vld [vmem:[#allocation2 + $0x990] sm:$0xff]  ;;  %v4587_v36 = vld [vmem:[#allocation2 + $0x988] sm:$0xff]  ;;  %v4586_v19 = vld [vmem:[#allocation2 + $0x980] sm:$0xff] }
0x12ee   :  { %4773 = vmatprep.subr.mxu0 %v4539_v54  ;;  %4697 = vmatpush1.msra.mxu1 %v4474_v14  ;;  %v4521_v24 = vld [vmem:[#allocation2 + $0x778] sm:$0xff]  ;;  %v4520_v15 = vld [vmem:[#allocation2 + $0x770] sm:$0xff]  ;;  %v4519_v21 = vld [vmem:[#allocation2 + $0x768] sm:$0xff] }
0x12ef   :  { %4774 = vmatpush1.msra.mxu0 %v4538_v16  ;;  %4698 = vmatprep.subr.mxu1 %v4537_v22  ;;  %v4585_v61 = vld [vmem:[#allocation2 + $0x978] sm:$0xff]  ;;  %v4584_v57 = vld [vmem:[#allocation2 + $0x970] sm:$0xff]  ;;  %v4583_v32 = vld [vmem:[#allocation2 + $0x968] sm:$0xff] }
0x12f0   :  { %4775 = vmatprep.subr.mxu0 %v4601_v26  ;;  %4699 = vmatpush2.msra.mxu1 %v4536_v30  ;;  %v4518_v25 = vld [vmem:[#allocation2 + $0x760] sm:$0xff]  ;;  %v4517_v54 = vld [vmem:[#allocation2 + $0x758] sm:$0xff]  ;;  %v4516_v16 = vld [vmem:[#allocation2 + $0x750] sm:$0xff] }
0x12f1   :  { %4776 = vmatpush2.msra.mxu0 %v4600_v34  ;;  %4700 = vmatprep.subr.mxu1 %v4535_v20  ;;  %v4582_v23 = vld [vmem:[#allocation2 + $0x960] sm:$0xff]  ;;  %v4581_v14 = vld [vmem:[#allocation2 + $0x958] sm:$0xff]  ;;  %v4580_v22 = vld [vmem:[#allocation2 + $0x950] sm:$0xff] }
0x12f2   :  { %4777 = vmatprep.subr.mxu0 %v4599_v38  ;;  %4701 = vmatpush2.msra.mxu1 %v4534_v40  ;;  %v4515_v26 = vld [vmem:[#allocation2 + $0x748] sm:$0xff]  ;;  %v4514_v34 = vld [vmem:[#allocation2 + $0x740] sm:$0xff]  ;;  %v4513_v38 = vld [vmem:[#allocation2 + $0x738] sm:$0xff] }
0x12f3   :  { %4778 = vmatpush2.msra.mxu0 %v4598_v42  ;;  %4702 = vmatprep.subr.mxu1 %v4533_v29  ;;  %v4579_v30 = vld [vmem:[#allocation2 + $0x948] sm:$0xff]  ;;  %v4578_v20 = vld [vmem:[#allocation2 + $0x940] sm:$0xff]  ;;  %v4577_v40 = vld [vmem:[#allocation2 + $0x938] sm:$0xff] }
0x12f4   :  { %4779 = vmatprep.subr.mxu0 %v4597_v45  ;;  %4703 = vmatpush2.msra.mxu1 %v4532_v4  ;;  %v4512_v42 = vld [vmem:[#allocation2 + $0x730] sm:$0xff]  ;;  %v4511_v45 = vld [vmem:[#allocation2 + $0x728] sm:$0xff] }
0x12f5   :  { %4780 = vmatpush2.msra.mxu0 %v4596_v46  ;;  %4704 = vmatprep.subr.mxu1 %v4531_v9  ;;  %v4576_v29 = vld [vmem:[#allocation2 + $0x930] sm:$0xff]  ;;  %v4575_v4 = vld [vmem:[#allocation2 + $0x928] sm:$0xff]  ;;  %v4510_v46 = vld [vmem:[#allocation2 + $0x720] sm:$0xff] }
0x12f6   :  { %4781 = vmatprep.subr.mxu0 %v4595_v47  ;;  %4705 = vmatpush2.msra.mxu1 %v4530_v48  ;;  %v4574_v9 = vld [vmem:[#allocation2 + $0x920] sm:$0xff]  ;;  %v4509_v47 = vld [vmem:[#allocation2 + $0x718] sm:$0xff] }
0x12f7   :  { %4782 = vmatpush2.msra.mxu0 %v4594_v0  ;;  %4706 = vmatprep.subr.mxu1 %v4529_v1  ;;  %v4573_v48 = vld [vmem:[#allocation2 + $0x918] sm:$0xff]  ;;  %v4508_v0 = vld [vmem:[#allocation2 + $0x710] sm:$0xff] }
0x12f8   :  { %4783 = vmatprep.subr.mxu0 %v4593_v7  ;;  %4707 = vmatpush2.msra.mxu1 %v4528_v10  ;;  %v4572_v1 = vld [vmem:[#allocation2 + $0x910] sm:$0xff]  ;;  %v4507_v7 = vld [vmem:[#allocation2 + $0x708] sm:$0xff] }
0x12f9   :  { %4784 = vmatpush2.msra.mxu0 %v4592_v27  ;;  %4708 = vmatprep.subr.mxu1 %v4527_v31  ;;  %v4571_v10 = vld [vmem:[#allocation2 + $0x908] sm:$0xff]  ;;  %v4506_v27 = vld [vmem:[#allocation2 + $0x700] sm:$0xff] }
0x12fa   :  { %4785 = vmatprep.subr.mxu0 %v4591_v37  ;;  %4709 = vmatpush2.msra.mxu1 %v4526_v18  ;;  %v4570_v31 = vld [vmem:[#allocation2 + $0x900] sm:$0xff]  ;;  %v4633_v37 = vld [vmem:[#allocation2 + $0xaf8] sm:$0xff]  ;;  %v4632_v18 = vld [vmem:[#allocation2 + $0xaf0] sm:$0xff] }
0x12fb   :  { %4786 = vmatpush2.msra.mxu0 %v4590_v39  ;;  %4710 = vmatprep.subr.mxu1 %v4525_v35  ;;  %v4631_v39 = vld [vmem:[#allocation2 + $0xae8] sm:$0xff]  ;;  %v4630_v35 = vld [vmem:[#allocation2 + $0xae0] sm:$0xff] }
0x12fc   :  { %4787 = vmatprep.subr.mxu0 %v4589_v2  ;;  %4711 = vmatpush2.msra.mxu1 %v4524_v17  ;;  %v4629_v2 = vld [vmem:[#allocation2 + $0xad8] sm:$0xff]  ;;  %v4628_v17 = vld [vmem:[#allocation2 + $0xad0] sm:$0xff] }
0x12fd   :  { %4788 = vmatpush2.msra.mxu0 %v4588_v56  ;;  %4712 = vmatprep.subr.mxu1 %v4523_v43  ;;  %v4627_v56 = vld [vmem:[#allocation2 + $0xac8] sm:$0xff]  ;;  %v4626_v43 = vld [vmem:[#allocation2 + $0xac0] sm:$0xff] }
0x12fe   :  { %4789 = vmatprep.subr.mxu0 %v4587_v36  ;;  %4713 = vmatpush2.msra.mxu1 %v4522_v3  ;;  %v4625_v36 = vld [vmem:[#allocation2 + $0xab8] sm:$0xff]  ;;  %v4624_v3 = vld [vmem:[#allocation2 + $0xab0] sm:$0xff] }
0x12ff   :  { %4790 = vmatpush2.msra.mxu0 %v4586_v19  ;;  %4714 = vmatprep.subr.mxu1 %v4521_v24  ;;  %v4623_v19 = vld [vmem:[#allocation2 + $0xaa8] sm:$0xff]  ;;  %v4622_v24 = vld [vmem:[#allocation2 + $0xaa0] sm:$0xff] }
0x1300   :  { %4791 = vmatprep.subr.mxu0 %v4585_v61  ;;  %4715 = vmatpush2.msra.mxu1 %v4520_v15  ;;  %v4621_v61 = vld [vmem:[#allocation2 + $0xa98] sm:$0xff]  ;;  %v4620_v15 = vld [vmem:[#allocation2 + $0xa90] sm:$0xff] }
0x1301   :  { %4792 = vmatpush2.msra.mxu0 %v4584_v57  ;;  %4716 = vmatprep.subr.mxu1 %v4519_v21  ;;  %v4619_v57 = vld [vmem:[#allocation2 + $0xa88] sm:$0xff]  ;;  %v4618_v21 = vld [vmem:[#allocation2 + $0xa80] sm:$0xff] }
0x1302   :  { %4793 = vmatprep.subr.mxu0 %v4583_v32  ;;  %4717 = vmatpush2.msra.mxu1 %v4518_v25  ;;  %v4617_v32 = vld [vmem:[#allocation2 + $0xa78] sm:$0xff]  ;;  %v4616_v25 = vld [vmem:[#allocation2 + $0xa70] sm:$0xff] }
0x1303   :  { %4794 = vmatpush2.msra.mxu0 %v4582_v23  ;;  %4718 = vmatprep.subr.mxu1 %v4517_v54  ;;  %v4615_v23 = vld [vmem:[#allocation2 + $0xa68] sm:$0xff]  ;;  %v4614_v54 = vld [vmem:[#allocation2 + $0xa60] sm:$0xff] }
0x1304   :  { %4795 = vmatprep.subr.mxu0 %v4581_v14  ;;  %4719 = vmatpush2.msra.mxu1 %v4516_v16  ;;  %v4613_v14 = vld [vmem:[#allocation2 + $0xa58] sm:$0xff]  ;;  %v4612_v16 = vld [vmem:[#allocation2 + $0xa50] sm:$0xff] }
0x1305   :  { %4796 = vmatpush2.msra.mxu0 %v4580_v22  ;;  %4720 = vmatprep.subr.mxu1 %v4515_v26  ;;  %v4611_v22 = vld [vmem:[#allocation2 + $0xa48] sm:$0xff]  ;;  %v4610_v26 = vld [vmem:[#allocation2 + $0xa40] sm:$0xff] }
0x1306   :  { %4797 = vmatprep.subr.mxu0 %v4579_v30  ;;  %4721 = vmatpush2.msra.mxu1 %v4514_v34  ;;  %v4609_v30 = vld [vmem:[#allocation2 + $0xa38] sm:$0xff]  ;;  %v4608_v34 = vld [vmem:[#allocation2 + $0xa30] sm:$0xff] }
0x1307   :  { %4798 = vmatpush2.msra.mxu0 %v4578_v20  ;;  %4722 = vmatprep.subr.mxu1 %v4513_v38  ;;  %v4607_v20 = vld [vmem:[#allocation2 + $0xa28] sm:$0xff]  ;;  %v4606_v38 = vld [vmem:[#allocation2 + $0xa20] sm:$0xff] }
0x1308   :  { %4799 = vmatprep.subr.mxu0 %v4577_v40  ;;  %4723 = vmatpush2.msra.mxu1 %v4512_v42  ;;  %v4605_v40 = vld [vmem:[#allocation2 + $0xa18] sm:$0xff]  ;;  %v4604_v42 = vld [vmem:[#allocation2 + $0xa10] sm:$0xff] }
0x1309   :  { %4800 = vmatpush2.msra.mxu0 %v4576_v29  ;;  %4724 = vmatprep.subr.mxu1 %v4511_v45  ;;  %v4603_v29 = vld [vmem:[#allocation2 + $0xa08] sm:$0xff]  ;;  %v4602_v45 = vld [vmem:[#allocation2 + $0xa00] sm:$0xff] }
0x130a   :  { %4801 = vmatprep.subr.mxu0 %v4575_v4  ;;  %4725 = vmatpush2.msra.mxu1 %v4510_v46  ;;  %v4665_v4 = vld [vmem:[#allocation2 + $0xbf8] sm:$0xff]  ;;  %v4664_v46 = vld [vmem:[#allocation2 + $0xbf0] sm:$0xff] }
0x130b   :  { %4802 = vmatpush2.msra.mxu0 %v4574_v9  ;;  %4726 = vmatprep.subr.mxu1 %v4509_v47  ;;  %v4663_v9 = vld [vmem:[#allocation2 + $0xbe8] sm:$0xff]  ;;  %v4662_v47 = vld [vmem:[#allocation2 + $0xbe0] sm:$0xff] }
0x130c   :  { %4803 = vmatprep.subr.mxu0 %v4573_v48  ;;  %4727 = vmatpush2.msra.mxu1 %v4508_v0  ;;  %v4661_v48 = vld [vmem:[#allocation2 + $0xbd8] sm:$0xff]  ;;  %v4660_v0 = vld [vmem:[#allocation2 + $0xbd0] sm:$0xff] }
0x130d   :  { %4804 = vmatpush2.msra.mxu0 %v4572_v1  ;;  %4728 = vmatprep.subr.mxu1 %v4507_v7  ;;  %v4659_v1 = vld [vmem:[#allocation2 + $0xbc8] sm:$0xff]  ;;  %v4658_v7 = vld [vmem:[#allocation2 + $0xbc0] sm:$0xff] }
0x130e   :  { %4805 = vmatprep.subr.mxu0 %v4571_v10  ;;  %4729 = vmatpush2.msra.mxu1 %v4506_v27  ;;  %v4657_v10 = vld [vmem:[#allocation2 + $0xbb8] sm:$0xff]  ;;  %v4656_v27 = vld [vmem:[#allocation2 + $0xbb0] sm:$0xff] }
0x130f   :  { %4806 = vmatpush2.msra.mxu0 %v4570_v31  ;;  %4731 = vmatmul.mubr.f32.vlgmr.msra.gmra.mxu1 %v8867_v6  ;;  %v4655_v31 = vld [vmem:[#allocation2 + $0xba8] sm:$0xff] }
0x1310   :  { %4808 = vmatmul.mubr.f32.vlgmr.msra.gmra.mxu0 %v8869_v5  ;;  %4820 = vmatprep.subr.mxu1 %v4633_v37  ;;  %v4654_v37 = vld [vmem:[#allocation2 + $0xba0] sm:$0xff] }
0x1311   :  { %4736 = vmatprep.mubr.f32.mxu1 %v8849_v53  ;;  %4821 = vmatpush1.msra.mxu1 %v4632_v18  ;;  %v4653_v18 = vld [vmem:[#allocation2 + $0xb98] sm:$0xff] }
0x1312   :  { %4813 = vmatprep.mubr.f32.mxu0 %v8851_v50  ;;  %4822 = vmatprep.subr.mxu1 %v4631_v39  ;;  %v4652_v39 = vld [vmem:[#allocation2 + $0xb90] sm:$0xff] }
0x1313   :  { %4823 = vmatpush1.msra.mxu1 %v4630_v35  ;;  %v4651_v35 = vld [vmem:[#allocation2 + $0xb88] sm:$0xff] }
0x1314   :  { %4814 = vmatmul.mubr.f32.gmra.mxu0 %v8855_v8  ;;  %4824 = vmatprep.subr.mxu1 %v4629_v2  ;;  %v4650_v2 = vld [vmem:[#allocation2 + $0xb80] sm:$0xff] }
0x1315   :  { %4737 = vmatmul.mubr.f32.gmra.mxu1 %v8853_v41  ;;  %4973 = vmatprep.mubr.f32.mxu0 %v9701_v49 }
0x1316   :  { %4825 = vmatpush1.msra.mxu1 %v4628_v17  ;;  %4884 = vmatprep.mubr.f32.mxu1 %v8891_v58  ;;  %v4649_v17 = vld [vmem:[#allocation2 + $0xb78] sm:$0xff] }
0x1317   :  { %4826 = vmatprep.subr.mxu1 %v4627_v56  ;;  %v4648_v56 = vld [vmem:[#allocation2 + $0xb70] sm:$0xff] }
0x1318   :  { %4827 = vmatpush1.msra.mxu1 %v4626_v43  ;;  %v4647_v43 = vld [vmem:[#allocation2 + $0xb68] sm:$0xff] }
0x1319   :  { %4828 = vmatprep.subr.mxu1 %v4625_v36  ;;  %v4646_v36 = vld [vmem:[#allocation2 + $0xb60] sm:$0xff] }
0x131a   :  { %4829 = vmatpush1.msra.mxu1 %v4624_v3  ;;  %v4645_v3 = vld [vmem:[#allocation2 + $0xb58] sm:$0xff] }
0x131b   :  { %4830 = vmatprep.subr.mxu1 %v4623_v19  ;;  %v4644_v19 = vld [vmem:[#allocation2 + $0xb50] sm:$0xff] }
0x131c   :  { %4831 = vmatpush1.msra.mxu1 %v4622_v24  ;;  %v4643_v24 = vld [vmem:[#allocation2 + $0xb48] sm:$0xff] }
0x131d   :  { %4832 = vmatprep.subr.mxu1 %v4621_v61  ;;  %v4642_v61 = vld [vmem:[#allocation2 + $0xb40] sm:$0xff] }
0x131e   :  { %4833 = vmatpush1.msra.mxu1 %v4620_v15  ;;  %v4641_v15 = vld [vmem:[#allocation2 + $0xb38] sm:$0xff] }
0x131f   :  { %4834 = vmatprep.subr.mxu1 %v4619_v57  ;;  %v4640_v57 = vld [vmem:[#allocation2 + $0xb30] sm:$0xff] }
0x1320   :  { %4835 = vmatpush1.msra.mxu1 %v4618_v21  ;;  %v4639_v21 = vld [vmem:[#allocation2 + $0xb28] sm:$0xff] }
0x1321   :  { %4836 = vmatprep.subr.mxu1 %v4617_v32  ;;  %v4638_v32 = vld [vmem:[#allocation2 + $0xb20] sm:$0xff] }
0x1322   :  { %4837 = vmatpush1.msra.mxu1 %v4616_v25  ;;  %v4637_v25 = vld [vmem:[#allocation2 + $0xb18] sm:$0xff] }
0x1323   :  { %4838 = vmatprep.subr.mxu1 %v4615_v23  ;;  %v4636_v23 = vld [vmem:[#allocation2 + $0xb10] sm:$0xff] }
0x1324   :  { %4839 = vmatpush1.msra.mxu1 %v4614_v54  ;;  %v4635_v54 = vld [vmem:[#allocation2 + $0xb08] sm:$0xff] }
0x1325   :  { %4840 = vmatprep.subr.mxu1 %v4613_v14  ;;  %v4634_v14 = vld [vmem:[#allocation2 + $0xb00] sm:$0xff] }
0x1326   :  { %4841 = vmatpush1.msra.mxu1 %v4612_v16 }
0x1327   :  { %4842 = vmatprep.subr.mxu1 %v4611_v22 }
0x1328   :  { %4843 = vmatpush1.msra.mxu1 %v4610_v26 }
0x1329   :  { %4844 = vmatprep.subr.mxu1 %v4609_v30 }
0x132a   :  { %4845 = vmatpush1.msra.mxu1 %v4608_v34 }
0x132b   :  { %4846 = vmatprep.subr.mxu1 %v4607_v20 }
0x132c   :  { %4847 = vmatpush1.msra.mxu1 %v4606_v38 }
0x132d   :  { %4848 = vmatprep.subr.mxu1 %v4605_v40 }
0x132e   :  { %4849 = vmatpush1.msra.mxu1 %v4604_v42 }
0x132f   :  { %4850 = vmatprep.subr.mxu1 %v4603_v29 }
0x1330   :  { %4851 = vmatpush1.msra.mxu1 %v4602_v45 }
0x1331   :  { %4852 = vmatprep.subr.mxu1 %v4665_v4 }
0x1332   :  { %4853 = vmatpush2.msra.mxu1 %v4664_v46 }
0x1333   :  { %4854 = vmatprep.subr.mxu1 %v4663_v9 }
0x1334   :  { %4855 = vmatpush2.msra.mxu1 %v4662_v47 }
0x1335   :  { %4856 = vmatprep.subr.mxu1 %v4661_v48 }
0x1336   :  { %4857 = vmatpush2.msra.mxu1 %v4660_v0 }
0x1337   :  { %4858 = vmatprep.subr.mxu1 %v4659_v1 }
0x1338   :  { %4859 = vmatpush2.msra.mxu1 %v4658_v7 }
0x1339   :  { %4860 = vmatprep.subr.mxu1 %v4657_v10 }
0x133a   :  { %4861 = vmatpush2.msra.mxu1 %v4656_v27  ;;  %v4901_v27 = vld [vmem:[#allocation10 + $0x10] sm:$0xff] }
0x133b   :  { %4862 = vmatprep.subr.mxu1 %v4655_v31 }
0x133c   :  { %4863 = vmatpush2.msra.mxu1 %v4654_v37  ;;  %v4902_v37 = vld [vmem:[#allocation10 + $0x18] sm:$0xff] }
0x133d   :  { %4864 = vmatprep.subr.mxu1 %v4653_v18 }
0x133e   :  { %4865 = vmatpush2.msra.mxu1 %v4652_v39 }
0x133f   :  { %4866 = vmatprep.subr.mxu1 %v4651_v35  ;;  %v4903_v35 = vld [vmem:[#allocation10 + $0x40] sm:$0xff] }
0x1340   :  { %4867 = vmatpush2.msra.mxu1 %v4650_v2 }
0x1341   :  { %4868 = vmatprep.subr.mxu1 %v4649_v17 }
0x1342   :  { %4869 = vmatpush2.msra.mxu1 %v4648_v56  ;;  %v4904_v56 = vld [vmem:[#allocation10 + $0x48] sm:$0xff] }
0x1343   :  { %4870 = vmatprep.subr.mxu1 %v4647_v43 }
0x1344   :  { %4871 = vmatpush2.msra.mxu1 %v4646_v36 }
0x1345   :  { %4872 = vmatprep.subr.mxu1 %v4645_v3  ;;  %v4905_v3 = vld [vmem:[#allocation10 + $0x70] sm:$0xff] }
0x1346   :  { %4873 = vmatpush2.msra.mxu1 %v4644_v19 }
0x1347   :  { %4874 = vmatprep.subr.mxu1 %v4643_v24 }
0x1348   :  { %4875 = vmatpush2.msra.mxu1 %v4642_v61  ;;  %v4906_v61 = vld [vmem:[#allocation10 + $0x78] sm:$0xff] }
0x1349   :  { %4876 = vmatprep.subr.mxu1 %v4641_v15 }
0x134a   :  { %4877 = vmatpush2.msra.mxu1 %v4640_v57 }
0x134b   :  { %4878 = vmatprep.subr.mxu1 %v4639_v21  ;;  %v4907_v21 = vld [vmem:[#allocation10 + $0xa0] sm:$0xff] }
0x134c   :  { %4879 = vmatpush2.msra.mxu1 %v4638_v32 }
0x134d   :  { %4880 = vmatprep.subr.mxu1 %v4637_v25 }
0x134e   :  { %4881 = vmatpush2.msra.mxu1 %v4636_v23  ;;  %v4908_v23 = vld [vmem:[#allocation10 + $0xa8] sm:$0xff] }
0x134f   :  { %4882 = vmatprep.subr.mxu1 %v4635_v54 }
0x1350   :  { %4883 = vmatpush2.msra.mxu1 %v4634_v14 }
0x1351   :  { %4885 = vmatmul.mubr.f32.vlgmr.msra.gmra.mxu1 %v8894_v28 }
0x1352   :  { %4890 = vmatprep.mubr.f32.mxu1 %v8881_v55 }
0x1355   :  { %4891 = vmatmul.mubr.f32.gmra.mxu1 %v8883_v51 }
0x13cf   :  { %v4732_v16 = vpop.f32.mrf.mxu1 }
0x13d0   :  { %v4809_v22 = vpop.f32.mrf.mxu0 }
0x13d1   :  { %v4734_v26 = vpop.f32.mrf.mxu1  ;;  %v4810_v0 = vadd.f32 %v4809_v22, %v4732_v16 }
0x13d2   :  { %v4811_v34 = vpop.f32.mrf.mxu0 }
0x13d3   :  { %v4812_v47 = vadd.f32 %v4811_v34, %v4734_v26 }
0x13d4   :  { %v4815_v20 = vpop.f32.mrf.mxu0 }
0x13d5   :  { %v4738_v30 = vpop.f32.mrf.mxu1 }
0x13d6   :  { %v4817_v42 = vpop.f32.mrf.mxu0  ;;  %v4816_v46 = vadd.f32 %v4815_v20, %v4738_v30 }
0x13d7   :  { %v4740_v38 = vpop.f32.mrf.mxu1 }
0x13d8   :  { %v4818_v4 = vadd.f32 %v4817_v42, %v4740_v38 }
0x1411   :  { %v4886_v40 = vpop.f32.mrf.mxu1 }
0x1412   :  { %v9000_v10 = vadd.f32 %v4886_v40, %v4810_v0 }
0x1413   :  { %v4888_v29 = vpop.f32.mrf.mxu1 }
0x1414   :  { %v8997_v7 = vadd.f32 %v4888_v29, %v4812_v47  ;;  %9796 = vst [vmem:[#allocation71_spill] sm:$0xff] %v9000_v10 }
0x1415   :  { %v4892_v45 = vpop.f32.mrf.mxu1 }
0x1416   :  { %v8995_v1 = vadd.f32 %v4892_v45, %v4816_v46  ;;  %9795 = vst [vmem:[#allocation70_spill] sm:$0xff] %v8997_v7 }
0x1417   :  { %v4894_v9 = vpop.f32.mrf.mxu1 }
0x1418   :  { %v8993_v48 = vadd.f32 %v4894_v9, %v4818_v4  ;;  %9794 = vst [vmem:[#allocation72_spill] sm:$0xff] %v8995_v1 }
0x141a   :  { %9793 = vst [vmem:[#allocation67_spill] sm:$0xff] %v8993_v48  ;;  %4937 = vmatprep.subr.mxu0 %v8993_v48 }
0x141b   :  { %4938 = vmatpush1.msra.mxu0 %v8995_v1 }
0x141c   :  { %4939 = vmatprep.subr.mxu0 %v8997_v7 }
0x141d   :  { %4940 = vmatpush1.msra.mxu0 %v9000_v10 }
0x141e   :  { %7624 = vmatmul.mubr.msk.f32.vlgmr.msra.gmra.mxu0 %vm3576_vm1, %v9789_v63 }
0x141f   :  { %4979 = vmatprep.mubr.f32.mxu0 %v9701_v49 }
0x1422   :  { %7625 = vmatmul.mubr.msk.f32.gmra.mxu0 %vm3576_vm1, %v9790_v11 }
0x1423   :  { %4985 = vmatprep.mubr.f32.mxu0 %v9701_v49 }
0x1426   :  { %7626 = vmatmul.mubr.msk.f32.gmra.mxu0 %vm3576_vm1, %v9791_v12 }
0x1427   :  { %4991 = vmatprep.mubr.f32.mxu0 %v9701_v49 }
0x142a   :  { %7627 = vmatmul.mubr.msk.f32.gmra.mxu0 %vm3576_vm1, %v9792_v13 }
0x14de   :  { %v4975_v31 = vpop.f32.mrf.mxu0 }
0x14df   :  { %v4998_v18 = vadd.f32 %v4975_v31, %v4901_v27 }
0x14e0   :  { %v4977_v39 = vpop.f32.mrf.mxu0 }
0x14e1   :  { %5006 = vst [vmem:[#allocation10 + $0x10] sm:$0xff] %v4998_v18  ;;  %v4999_v2 = vadd.f32 %v4977_v39, %v4902_v37 }
0x14e2   :  { %v4981_v17 = vpop.f32.mrf.mxu0 }
0x14e3   :  { %5007 = vst [vmem:[#allocation10 + $0x18] sm:$0xff] %v4999_v2  ;;  %v5000_v43 = vadd.f32 %v4981_v17, %v4903_v35 }
0x14e4   :  { %v4983_v36 = vpop.f32.mrf.mxu0 }
0x14e5   :  { %5008 = vst [vmem:[#allocation10 + $0x40] sm:$0xff] %v5000_v43  ;;  %v5001_v19 = vadd.f32 %v4983_v36, %v4904_v56 }
0x14e6   :  { %v4987_v24 = vpop.f32.mrf.mxu0 }
0x14e7   :  { %5009 = vst [vmem:[#allocation10 + $0x48] sm:$0xff] %v5001_v19  ;;  %v5002_v15 = vadd.f32 %v4987_v24, %v4905_v3 }
0x14e8   :  { %v4989_v57 = vpop.f32.mrf.mxu0 }
0x14e9   :  { %5010 = vst [vmem:[#allocation10 + $0x70] sm:$0xff] %v5002_v15  ;;  %v5003_v32 = vadd.f32 %v4989_v57, %v4906_v61 }
0x14ea   :  { %v4993_v25 = vpop.f32.mrf.mxu0 }
0x14eb   :  { %5011 = vst [vmem:[#allocation10 + $0x78] sm:$0xff] %v5003_v32  ;;  %v5004_v54 = vadd.f32 %v4993_v25, %v4907_v21 }
0x14ec   :  { %v4995_v14 = vpop.f32.mrf.mxu0 }
0x14ed   :  { %5012 = vst [vmem:[#allocation10 + $0xa0] sm:$0xff] %v5004_v54  ;;  %v5005_v16 = vadd.f32 %v4995_v14, %v4908_v23 }
0x14ef   :  { %5013 = vst [vmem:[#allocation10 + $0xa8] sm:$0xff] %v5005_v16 }
0x14f0   :  { %7991 = dma.done.wait [#allocation3], 24576 }
0x14f1   :  { %7992 = vsyncadd [#allocation3], 4294942720  ;;  %5272 = vmatprep.mubr.f32.mxu0 %v8857_v33  ;;  %5349 = vmatprep.mubr.f32.mxu1 %v8861_v44  ;;  %v9021_v22 = vld [vmem:[%s9600_s6 + $0x40] sm:$0xff]  ;;  %v9026_v26 = vld [vmem:[%s9600_s6 + $0x48] sm:$0xff] }
0x14f2   :  { %9797 = vst [vmem:[#allocation77_spill] sm:$0xff] %v9021_v22  ;;  %9798 = vst [vmem:[#allocation78_spill] sm:$0xff] %v9026_v26  ;;  %v9031_v30 = vld [vmem:[%s9600_s6 + $0x50] sm:$0xff]  ;;  %v9036_v34 = vld [vmem:[%s9600_s6 + $0x58] sm:$0xff] }
0x14f3   :  { %9799 = vst [vmem:[#allocation79_spill] sm:$0xff] %v9031_v30  ;;  %9800 = vst [vmem:[#allocation53_spill] sm:$0xff] %v9036_v34  ;;  %v5047_v20 = vld [vmem:[#allocation2 + $0xf8] sm:$0xff]  ;;  %v5046_v40 = vld [vmem:[#allocation2 + $0xf0] sm:$0xff] }
0x14f4   :  { %v5111_v38 = vld [vmem:[#allocation2 + $0x2f8] sm:$0xff]  ;;  %5208 = vmatprep.subr.mxu0 %v5047_v20  ;;  %v5110_v42 = vld [vmem:[#allocation2 + $0x2f0] sm:$0xff]  ;;  %v5045_v29 = vld [vmem:[#allocation2 + $0xe8] sm:$0xff] }
0x14f5   :  { %5285 = vmatprep.subr.mxu1 %v5111_v38  ;;  %5209 = vmatpush1.msra.mxu0 %v5046_v40  ;;  %v5109_v45 = vld [vmem:[#allocation2 + $0x2e8] sm:$0xff]  ;;  %v5044_v4 = vld [vmem:[#allocation2 + $0xe0] sm:$0xff]  ;;  %v5043_v9 = vld [vmem:[#allocation2 + $0xd8] sm:$0xff] }
0x14f6   :  { %5286 = vmatpush1.msra.mxu1 %v5110_v42  ;;  %v5108_v46 = vld [vmem:[#allocation2 + $0x2e0] sm:$0xff]  ;;  %5210 = vmatprep.subr.mxu0 %v5045_v29  ;;  %v5107_v47 = vld [vmem:[#allocation2 + $0x2d8] sm:$0xff]  ;;  %v5042_v0 = vld [vmem:[#allocation2 + $0xd0] sm:$0xff] }
0x14f7   :  { %5287 = vmatprep.subr.mxu1 %v5109_v45  ;;  %5211 = vmatpush1.msra.mxu0 %v5044_v4  ;;  %v5106_v27 = vld [vmem:[#allocation2 + $0x2d0] sm:$0xff]  ;;  %v5041_v31 = vld [vmem:[#allocation2 + $0xc8] sm:$0xff]  ;;  %v5040_v18 = vld [vmem:[#allocation2 + $0xc0] sm:$0xff] }
0x14f8   :  { %5288 = vmatpush1.msra.mxu1 %v5108_v46  ;;  %v5105_v37 = vld [vmem:[#allocation2 + $0x2c8] sm:$0xff]  ;;  %5212 = vmatprep.subr.mxu0 %v5043_v9  ;;  %v5104_v39 = vld [vmem:[#allocation2 + $0x2c0] sm:$0xff]  ;;  %v5039_v35 = vld [vmem:[#allocation2 + $0xb8] sm:$0xff] }
0x14f9   :  { %5289 = vmatprep.subr.mxu1 %v5107_v47  ;;  %5213 = vmatpush1.msra.mxu0 %v5042_v0  ;;  %v5103_v2 = vld [vmem:[#allocation2 + $0x2b8] sm:$0xff]  ;;  %v5038_v17 = vld [vmem:[#allocation2 + $0xb0] sm:$0xff]  ;;  %v5037_v43 = vld [vmem:[#allocation2 + $0xa8] sm:$0xff] }
0x14fa   :  { %5290 = vmatpush1.msra.mxu1 %v5106_v27  ;;  %5214 = vmatprep.subr.mxu0 %v5041_v31  ;;  %v5102_v56 = vld [vmem:[#allocation2 + $0x2b0] sm:$0xff]  ;;  %v5101_v36 = vld [vmem:[#allocation2 + $0x2a8] sm:$0xff]  ;;  %v5036_v3 = vld [vmem:[#allocation2 + $0xa0] sm:$0xff] }
0x14fb   :  { %5291 = vmatprep.subr.mxu1 %v5105_v37  ;;  %5215 = vmatpush1.msra.mxu0 %v5040_v18  ;;  %v5100_v19 = vld [vmem:[#allocation2 + $0x2a0] sm:$0xff]  ;;  %v5035_v24 = vld [vmem:[#allocation2 + $0x98] sm:$0xff]  ;;  %v5034_v15 = vld [vmem:[#allocation2 + $0x90] sm:$0xff] }
0x14fc   :  { %5292 = vmatpush1.msra.mxu1 %v5104_v39  ;;  %5216 = vmatprep.subr.mxu0 %v5039_v35  ;;  %v5099_v61 = vld [vmem:[#allocation2 + $0x298] sm:$0xff]  ;;  %v5098_v57 = vld [vmem:[#allocation2 + $0x290] sm:$0xff]  ;;  %v5033_v21 = vld [vmem:[#allocation2 + $0x88] sm:$0xff] }
0x14fd   :  { %5293 = vmatprep.subr.mxu1 %v5103_v2  ;;  %5217 = vmatpush1.msra.mxu0 %v5038_v17  ;;  %v5097_v32 = vld [vmem:[#allocation2 + $0x288] sm:$0xff]  ;;  %v5032_v25 = vld [vmem:[#allocation2 + $0x80] sm:$0xff]  ;;  %v5031_v54 = vld [vmem:[#allocation2 + $0x78] sm:$0xff] }
0x14fe   :  { %5294 = vmatpush1.msra.mxu1 %v5102_v56  ;;  %5218 = vmatprep.subr.mxu0 %v5037_v43  ;;  %v5096_v23 = vld [vmem:[#allocation2 + $0x280] sm:$0xff]  ;;  %v5095_v14 = vld [vmem:[#allocation2 + $0x278] sm:$0xff]  ;;  %v5030_v16 = vld [vmem:[#allocation2 + $0x70] sm:$0xff] }
0x14ff   :  { %5295 = vmatprep.subr.mxu1 %v5101_v36  ;;  %5219 = vmatpush1.msra.mxu0 %v5036_v3  ;;  %v5094_v20 = vld [vmem:[#allocation2 + $0x270] sm:$0xff]  ;;  %v5029_v38 = vld [vmem:[#allocation2 + $0x68] sm:$0xff]  ;;  %v5028_v42 = vld [vmem:[#allocation2 + $0x60] sm:$0xff] }
0x1500   :  { %5296 = vmatpush1.msra.mxu1 %v5100_v19  ;;  %5220 = vmatprep.subr.mxu0 %v5035_v24  ;;  %v5093_v40 = vld [vmem:[#allocation2 + $0x268] sm:$0xff]  ;;  %v5092_v29 = vld [vmem:[#allocation2 + $0x260] sm:$0xff]  ;;  %v5027_v45 = vld [vmem:[#allocation2 + $0x58] sm:$0xff] }
0x1501   :  { %5297 = vmatprep.subr.mxu1 %v5099_v61  ;;  %5221 = vmatpush1.msra.mxu0 %v5034_v15  ;;  %v5091_v4 = vld [vmem:[#allocation2 + $0x258] sm:$0xff]  ;;  %v5026_v46 = vld [vmem:[#allocation2 + $0x50] sm:$0xff]  ;;  %v5025_v47 = vld [vmem:[#allocation2 + $0x48] sm:$0xff] }
0x1502   :  { %5298 = vmatpush1.msra.mxu1 %v5098_v57  ;;  %5222 = vmatprep.subr.mxu0 %v5033_v21  ;;  %v5090_v9 = vld [vmem:[#allocation2 + $0x250] sm:$0xff]  ;;  %v5089_v0 = vld [vmem:[#allocation2 + $0x248] sm:$0xff]  ;;  %v5024_v27 = vld [vmem:[#allocation2 + $0x40] sm:$0xff] }
0x1503   :  { %5299 = vmatprep.subr.mxu1 %v5097_v32  ;;  %5223 = vmatpush1.msra.mxu0 %v5032_v25  ;;  %v5088_v31 = vld [vmem:[#allocation2 + $0x240] sm:$0xff]  ;;  %v5023_v37 = vld [vmem:[#allocation2 + $0x38] sm:$0xff]  ;;  %v5022_v39 = vld [vmem:[#allocation2 + $0x30] sm:$0xff] }
0x1504   :  { %5300 = vmatpush1.msra.mxu1 %v5096_v23  ;;  %5224 = vmatprep.subr.mxu0 %v5031_v54  ;;  %v5087_v18 = vld [vmem:[#allocation2 + $0x238] sm:$0xff]  ;;  %v5086_v35 = vld [vmem:[#allocation2 + $0x230] sm:$0xff]  ;;  %v5021_v2 = vld [vmem:[#allocation2 + $0x28] sm:$0xff] }
0x1505   :  { %5301 = vmatprep.subr.mxu1 %v5095_v14  ;;  %5225 = vmatpush1.msra.mxu0 %v5030_v16  ;;  %v5085_v17 = vld [vmem:[#allocation2 + $0x228] sm:$0xff]  ;;  %v5020_v56 = vld [vmem:[#allocation2 + $0x20] sm:$0xff]  ;;  %v5019_v36 = vld [vmem:[#allocation2 + $0x18] sm:$0xff] }
0x1506   :  { %5302 = vmatpush1.msra.mxu1 %v5094_v20  ;;  %5226 = vmatprep.subr.mxu0 %v5029_v38  ;;  %v5084_v43 = vld [vmem:[#allocation2 + $0x220] sm:$0xff]  ;;  %v5083_v3 = vld [vmem:[#allocation2 + $0x218] sm:$0xff]  ;;  %v5018_v19 = vld [vmem:[#allocation2 + $0x10] sm:$0xff] }
0x1507   :  { %5303 = vmatprep.subr.mxu1 %v5093_v40  ;;  %5227 = vmatpush1.msra.mxu0 %v5028_v42  ;;  %v5082_v24 = vld [vmem:[#allocation2 + $0x210] sm:$0xff]  ;;  %v5017_v61 = vld [vmem:[#allocation2 + $0x8] sm:$0xff]  ;;  %v5016_v57 = vld [vmem:[#allocation2] sm:$0xff] }
0x1508   :  { %5304 = vmatpush1.msra.mxu1 %v5092_v29  ;;  %5228 = vmatprep.subr.mxu0 %v5027_v45  ;;  %v5081_v15 = vld [vmem:[#allocation2 + $0x208] sm:$0xff]  ;;  %v5080_v21 = vld [vmem:[#allocation2 + $0x200] sm:$0xff]  ;;  %v5079_v32 = vld [vmem:[#allocation2 + $0x1f8] sm:$0xff] }
0x1509   :  { %5305 = vmatprep.subr.mxu1 %v5091_v4  ;;  %5229 = vmatpush1.msra.mxu0 %v5026_v46  ;;  %v5143_v25 = vld [vmem:[#allocation2 + $0x3f8] sm:$0xff]  ;;  %v5078_v23 = vld [vmem:[#allocation2 + $0x1f0] sm:$0xff]  ;;  %v5077_v14 = vld [vmem:[#allocation2 + $0x1e8] sm:$0xff] }
0x150a   :  { %5306 = vmatpush1.msra.mxu1 %v5090_v9  ;;  %5230 = vmatprep.subr.mxu0 %v5025_v47  ;;  %v5142_v54 = vld [vmem:[#allocation2 + $0x3f0] sm:$0xff]  ;;  %v5141_v16 = vld [vmem:[#allocation2 + $0x3e8] sm:$0xff]  ;;  %v5076_v20 = vld [vmem:[#allocation2 + $0x1e0] sm:$0xff] }
0x150b   :  { %5307 = vmatprep.subr.mxu1 %v5089_v0  ;;  %5231 = vmatpush1.msra.mxu0 %v5024_v27  ;;  %v5140_v38 = vld [vmem:[#allocation2 + $0x3e0] sm:$0xff]  ;;  %v5075_v40 = vld [vmem:[#allocation2 + $0x1d8] sm:$0xff]  ;;  %v5074_v29 = vld [vmem:[#allocation2 + $0x1d0] sm:$0xff] }
0x150c   :  { %5308 = vmatpush1.msra.mxu1 %v5088_v31  ;;  %5232 = vmatprep.subr.mxu0 %v5023_v37  ;;  %v5139_v42 = vld [vmem:[#allocation2 + $0x3d8] sm:$0xff]  ;;  %v5138_v45 = vld [vmem:[#allocation2 + $0x3d0] sm:$0xff]  ;;  %v5073_v4 = vld [vmem:[#allocation2 + $0x1c8] sm:$0xff] }
0x150d   :  { %5309 = vmatprep.subr.mxu1 %v5087_v18  ;;  %5233 = vmatpush1.msra.mxu0 %v5022_v39  ;;  %v5137_v46 = vld [vmem:[#allocation2 + $0x3c8] sm:$0xff]  ;;  %v5072_v9 = vld [vmem:[#allocation2 + $0x1c0] sm:$0xff]  ;;  %v5071_v0 = vld [vmem:[#allocation2 + $0x1b8] sm:$0xff] }
0x150e   :  { %5310 = vmatpush1.msra.mxu1 %v5086_v35  ;;  %5234 = vmatprep.subr.mxu0 %v5021_v2  ;;  %v5136_v47 = vld [vmem:[#allocation2 + $0x3c0] sm:$0xff]  ;;  %v5135_v27 = vld [vmem:[#allocation2 + $0x3b8] sm:$0xff]  ;;  %v5070_v31 = vld [vmem:[#allocation2 + $0x1b0] sm:$0xff] }
0x150f   :  { %5311 = vmatprep.subr.mxu1 %v5085_v17  ;;  %5235 = vmatpush1.msra.mxu0 %v5020_v56  ;;  %v5134_v37 = vld [vmem:[#allocation2 + $0x3b0] sm:$0xff]  ;;  %v5069_v18 = vld [vmem:[#allocation2 + $0x1a8] sm:$0xff]  ;;  %v5068_v35 = vld [vmem:[#allocation2 + $0x1a0] sm:$0xff] }
0x1510   :  { %5312 = vmatpush1.msra.mxu1 %v5084_v43  ;;  %5236 = vmatprep.subr.mxu0 %v5019_v36  ;;  %v5133_v39 = vld [vmem:[#allocation2 + $0x3a8] sm:$0xff]  ;;  %v5132_v2 = vld [vmem:[#allocation2 + $0x3a0] sm:$0xff]  ;;  %v5067_v17 = vld [vmem:[#allocation2 + $0x198] sm:$0xff] }
0x1511   :  { %5313 = vmatprep.subr.mxu1 %v5083_v3  ;;  %5237 = vmatpush1.msra.mxu0 %v5018_v19  ;;  %v5131_v56 = vld [vmem:[#allocation2 + $0x398] sm:$0xff]  ;;  %v5066_v43 = vld [vmem:[#allocation2 + $0x190] sm:$0xff]  ;;  %v5065_v3 = vld [vmem:[#allocation2 + $0x188] sm:$0xff] }
0x1512   :  { %5314 = vmatpush1.msra.mxu1 %v5082_v24  ;;  %5238 = vmatprep.subr.mxu0 %v5017_v61  ;;  %v5130_v36 = vld [vmem:[#allocation2 + $0x390] sm:$0xff]  ;;  %v5129_v19 = vld [vmem:[#allocation2 + $0x388] sm:$0xff]  ;;  %v5064_v24 = vld [vmem:[#allocation2 + $0x180] sm:$0xff] }
0x1513   :  { %5315 = vmatprep.subr.mxu1 %v5081_v15  ;;  %5239 = vmatpush1.msra.mxu0 %v5016_v57  ;;  %v5128_v61 = vld [vmem:[#allocation2 + $0x380] sm:$0xff]  ;;  %v5063_v15 = vld [vmem:[#allocation2 + $0x178] sm:$0xff]  ;;  %v9112_v30 = vld [vmem:[#allocation2 + $0x5f0] sm:$0xff] }
0x1514   :  { %5316 = vmatpush1.msra.mxu1 %v5080_v21  ;;  %5240 = vmatprep.subr.mxu0 %v5079_v32  ;;  %v5127_v57 = vld [vmem:[#allocation2 + $0x378] sm:$0xff]  ;;  %v5062_v21 = vld [vmem:[#allocation2 + $0x170] sm:$0xff]  ;;  %v9108_v44 = vld [vmem:[#allocation2 + $0x400] sm:$0xff] }
0x1515   :  { %5317 = vmatprep.subr.mxu1 %v5143_v25  ;;  %5241 = vmatpush2.msra.mxu0 %v5078_v23  ;;  %v5126_v32 = vld [vmem:[#allocation2 + $0x370] sm:$0xff]  ;;  %v5061_v25 = vld [vmem:[#allocation2 + $0x168] sm:$0xff]  ;;  %v9110_v34 = vld [vmem:[#allocation2 + $0x5f8] sm:$0xff] }
0x1516   :  { %5318 = vmatpush2.msra.mxu1 %v5142_v54  ;;  %5242 = vmatprep.subr.mxu0 %v5077_v14  ;;  %v5125_v23 = vld [vmem:[#allocation2 + $0x368] sm:$0xff]  ;;  %v5060_v54 = vld [vmem:[#allocation2 + $0x160] sm:$0xff]  ;;  %v9118_v33 = vld [vmem:[#allocation2 + $0x5d8] sm:$0xff] }
0x1517   :  { %5319 = vmatprep.subr.mxu1 %v5141_v16  ;;  %5243 = vmatpush2.msra.mxu0 %v5076_v20  ;;  %v5124_v14 = vld [vmem:[#allocation2 + $0x360] sm:$0xff]  ;;  %v5059_v16 = vld [vmem:[#allocation2 + $0x158] sm:$0xff]  ;;  %v9114_v26 = vld [vmem:[#allocation2 + $0x5e8] sm:$0xff] }
0x1518   :  { %5320 = vmatpush2.msra.mxu1 %v5140_v38  ;;  %5244 = vmatprep.subr.mxu0 %v5075_v40  ;;  %v5123_v20 = vld [vmem:[#allocation2 + $0x358] sm:$0xff]  ;;  %v5058_v38 = vld [vmem:[#allocation2 + $0x150] sm:$0xff]  ;;  %v9116_v22 = vld [vmem:[#allocation2 + $0x5e0] sm:$0xff] }
0x1519   :  { %5321 = vmatprep.subr.mxu1 %v5139_v42  ;;  %5245 = vmatpush2.msra.mxu0 %v5074_v29  ;;  %v5122_v40 = vld [vmem:[#allocation2 + $0x350] sm:$0xff]  ;;  %v5057_v42 = vld [vmem:[#allocation2 + $0x148] sm:$0xff]  ;;  %v9124_v48 = vld [vmem:[#allocation2 + $0x5c0] sm:$0xff] }
0x151a   :  { %5322 = vmatpush2.msra.mxu1 %v5138_v45  ;;  %5246 = vmatprep.subr.mxu0 %v5073_v4  ;;  %v5121_v29 = vld [vmem:[#allocation2 + $0x348] sm:$0xff]  ;;  %v5056_v45 = vld [vmem:[#allocation2 + $0x140] sm:$0xff]  ;;  %v9120_v59 = vld [vmem:[#allocation2 + $0x5d0] sm:$0xff] }
0x151b   :  { %5323 = vmatprep.subr.mxu1 %v5137_v46  ;;  %5247 = vmatpush2.msra.mxu0 %v5072_v9  ;;  %v5120_v4 = vld [vmem:[#allocation2 + $0x340] sm:$0xff]  ;;  %v5055_v46 = vld [vmem:[#allocation2 + $0x138] sm:$0xff]  ;;  %v9122_v1 = vld [vmem:[#allocation2 + $0x5c8] sm:$0xff] }
0x151c   :  { %5324 = vmatpush2.msra.mxu1 %v5136_v47  ;;  %5248 = vmatprep.subr.mxu0 %v5071_v0  ;;  %v5119_v9 = vld [vmem:[#allocation2 + $0x338] sm:$0xff]  ;;  %v5054_v47 = vld [vmem:[#allocation2 + $0x130] sm:$0xff]  ;;  %v9130_v62 = vld [vmem:[#allocation2 + $0x5a8] sm:$0xff] }
0x151d   :  { %5325 = vmatprep.subr.mxu1 %v5135_v27  ;;  %5249 = vmatpush2.msra.mxu0 %v5070_v31  ;;  %v5118_v0 = vld [vmem:[#allocation2 + $0x330] sm:$0xff]  ;;  %v5053_v27 = vld [vmem:[#allocation2 + $0x128] sm:$0xff]  ;;  %v9126_v52 = vld [vmem:[#allocation2 + $0x5b8] sm:$0xff]  ;;  %9802 = vst [vmem:[#allocation54_spill] sm:$0xff] %v9130_v62 }
0x151e   :  { %5326 = vmatpush2.msra.mxu1 %v5134_v37  ;;  %5250 = vmatprep.subr.mxu0 %v5069_v18  ;;  %v5117_v31 = vld [vmem:[#allocation2 + $0x328] sm:$0xff]  ;;  %v5052_v37 = vld [vmem:[#allocation2 + $0x120] sm:$0xff]  ;;  %v9128_v10 = vld [vmem:[#allocation2 + $0x5b0] sm:$0xff] }
0x151f   :  { %5327 = vmatprep.subr.mxu1 %v5133_v39  ;;  %5251 = vmatpush2.msra.mxu0 %v5068_v35  ;;  %v5116_v18 = vld [vmem:[#allocation2 + $0x320] sm:$0xff]  ;;  %v5051_v39 = vld [vmem:[#allocation2 + $0x118] sm:$0xff]  ;;  %9801 = vst [vmem:[#allocation51_spill] sm:$0xff] %v9128_v10  ;;  %v9136_v13 = vld [vmem:[#allocation2 + $0x590] sm:$0xff] }
0x1520   :  { %5328 = vmatpush2.msra.mxu1 %v5132_v2  ;;  %5252 = vmatprep.subr.mxu0 %v5067_v17  ;;  %v5115_v35 = vld [vmem:[#allocation2 + $0x318] sm:$0xff]  ;;  %v5050_v2 = vld [vmem:[#allocation2 + $0x110] sm:$0xff]  ;;  %v9132_v7 = vld [vmem:[#allocation2 + $0x5a0] sm:$0xff]  ;;  %9804 = vst [vmem:[#allocation73_spill] sm:$0xff] %v9136_v13 }
0x1521   :  { %5329 = vmatprep.subr.mxu1 %v5131_v56  ;;  %5253 = vmatpush2.msra.mxu0 %v5066_v43  ;;  %v5114_v17 = vld [vmem:[#allocation2 + $0x310] sm:$0xff]  ;;  %v9038_v56 = vld [vmem:[#allocation2 + $0x108] sm:$0xff]  ;;  %9803 = vst [vmem:[#allocation52_spill] sm:$0xff] %v9132_v7  ;;  %v9134_v60 = vld [vmem:[#allocation2 + $0x598] sm:$0xff] }
0x1522   :  { %5330 = vmatpush2.msra.mxu1 %v5130_v36  ;;  %5254 = vmatprep.subr.mxu0 %v5065_v3  ;;  %v9040_v43 = vld [vmem:[#allocation2 + $0x308] sm:$0xff]  ;;  %v9042_v36 = vld [vmem:[#allocation2 + $0x100] sm:$0xff]  ;;  %v9142_v63 = vld [vmem:[#allocation2 + $0x578] sm:$0xff] }
0x1523   :  { %5331 = vmatprep.subr.mxu1 %v5129_v19  ;;  %5255 = vmatpush2.msra.mxu0 %v5064_v24  ;;  %v9044_v3 = vld [vmem:[#allocation2 + $0x300] sm:$0xff]  ;;  %v9046_v19 = vld [vmem:[#allocation2 + $0x4f8] sm:$0xff]  ;;  %v9048_v24 = vld [vmem:[#allocation2 + $0x4f0] sm:$0xff] }
0x1524   :  { %5332 = vmatpush2.msra.mxu1 %v5128_v61  ;;  %5256 = vmatprep.subr.mxu0 %v5063_v15  ;;  %v9050_v61 = vld [vmem:[#allocation2 + $0x4e8] sm:$0xff]  ;;  %v9052_v15 = vld [vmem:[#allocation2 + $0x4e0] sm:$0xff]  ;;  %v9144_v51 = vld [vmem:[#allocation2 + $0x570] sm:$0xff] }
0x1525   :  { %5333 = vmatprep.subr.mxu1 %v5127_v57  ;;  %5257 = vmatpush2.msra.mxu0 %v5062_v21  ;;  %v9054_v57 = vld [vmem:[#allocation2 + $0x4d8] sm:$0xff]  ;;  %v9056_v21 = vld [vmem:[#allocation2 + $0x4d0] sm:$0xff]  ;;  %v9138_v12 = vld [vmem:[#allocation2 + $0x588] sm:$0xff] }
0x1526   :  { %5334 = vmatpush2.msra.mxu1 %v5126_v32  ;;  %5258 = vmatprep.subr.mxu0 %v5061_v25  ;;  %v9058_v32 = vld [vmem:[#allocation2 + $0x4c8] sm:$0xff]  ;;  %v9060_v25 = vld [vmem:[#allocation2 + $0x4c0] sm:$0xff]  ;;  %9805 = vst [vmem:[#allocation74_spill] sm:$0xff] %v9138_v12  ;;  %v9150_v10 = vld [vmem:[#allocation2 + $0x558] sm:$0xff] }
0x1527   :  { %5335 = vmatprep.subr.mxu1 %v5125_v23  ;;  %5259 = vmatpush2.msra.mxu0 %v5060_v54  ;;  %v9062_v23 = vld [vmem:[#allocation2 + $0x4b8] sm:$0xff]  ;;  %v9064_v54 = vld [vmem:[#allocation2 + $0x4b0] sm:$0xff]  ;;  %v9140_v11 = vld [vmem:[#allocation2 + $0x580] sm:$0xff]  ;;  %9809 = vst [vmem:[#allocation80_spill] sm:$0xff] %v9150_v10 }
0x1528   :  { %5336 = vmatpush2.msra.mxu1 %v5124_v14  ;;  %5260 = vmatprep.subr.mxu0 %v5059_v16  ;;  %v9066_v14 = vld [vmem:[#allocation2 + $0x4a8] sm:$0xff]  ;;  %v9068_v16 = vld [vmem:[#allocation2 + $0x4a0] sm:$0xff]  ;;  %9806 = vst [vmem:[#allocation55_spill] sm:$0xff] %v9140_v11  ;;  %v9152_v62 = vld [vmem:[#allocation2 + $0x550] sm:$0xff] }
0x1529   :  { %5337 = vmatprep.subr.mxu1 %v5123_v20  ;;  %5261 = vmatpush2.msra.mxu0 %v5058_v38  ;;  %v9070_v20 = vld [vmem:[#allocation2 + $0x498] sm:$0xff]  ;;  %v9072_v38 = vld [vmem:[#allocation2 + $0x490] sm:$0xff]  ;;  %v9146_v55 = vld [vmem:[#allocation2 + $0x568] sm:$0xff] }
0x152a   :  { %5338 = vmatpush2.msra.mxu1 %v5122_v40  ;;  %5262 = vmatprep.subr.mxu0 %v5057_v42  ;;  %v9074_v40 = vld [vmem:[#allocation2 + $0x488] sm:$0xff]  ;;  %v9076_v42 = vld [vmem:[#allocation2 + $0x480] sm:$0xff]  ;;  %9807 = vst [vmem:[#allocation75_spill] sm:$0xff] %v9146_v55  ;;  %v9158_v12 = vld [vmem:[#allocation2 + $0x538] sm:$0xff] }
0x152b   :  { %5339 = vmatprep.subr.mxu1 %v5121_v29  ;;  %5263 = vmatpush2.msra.mxu0 %v5056_v45  ;;  %v9078_v29 = vld [vmem:[#allocation2 + $0x478] sm:$0xff]  ;;  %v9080_v45 = vld [vmem:[#allocation2 + $0x470] sm:$0xff]  ;;  %v9148_v28 = vld [vmem:[#allocation2 + $0x560] sm:$0xff]  ;;  %9812 = vst [vmem:[#allocation83_spill] sm:$0xff] %v9158_v12 }
0x152c   :  { %5340 = vmatpush2.msra.mxu1 %v5120_v4  ;;  %5264 = vmatprep.subr.mxu0 %v5055_v46  ;;  %v9082_v4 = vld [vmem:[#allocation2 + $0x468] sm:$0xff]  ;;  %v9084_v46 = vld [vmem:[#allocation2 + $0x460] sm:$0xff]  ;;  %9808 = vst [vmem:[#allocation76_spill] sm:$0xff] %v9148_v28  ;;  %v9160_v11 = vld [vmem:[#allocation2 + $0x530] sm:$0xff] }
0x152d   :  { %5341 = vmatprep.subr.mxu1 %v5119_v9  ;;  %5265 = vmatpush2.msra.mxu0 %v5054_v47  ;;  %v9086_v9 = vld [vmem:[#allocation2 + $0x458] sm:$0xff]  ;;  %v9088_v47 = vld [vmem:[#allocation2 + $0x450] sm:$0xff]  ;;  %v9154_v7 = vld [vmem:[#allocation2 + $0x548] sm:$0xff] }
0x152e   :  { %5342 = vmatpush2.msra.mxu1 %v5118_v0  ;;  %5266 = vmatprep.subr.mxu0 %v5053_v27  ;;  %v9090_v0 = vld [vmem:[#allocation2 + $0x448] sm:$0xff]  ;;  %v9092_v27 = vld [vmem:[#allocation2 + $0x440] sm:$0xff]  ;;  %9810 = vst [vmem:[#allocation81_spill] sm:$0xff] %v9154_v7  ;;  %v9168_v10 = vld [vmem:[#allocation2 + $0x518] sm:$0xff] }
0x152f   :  { %5343 = vmatprep.subr.mxu1 %v5117_v31  ;;  %5267 = vmatpush2.msra.mxu0 %v5052_v37  ;;  %v9094_v31 = vld [vmem:[#allocation2 + $0x438] sm:$0xff]  ;;  %v9096_v37 = vld [vmem:[#allocation2 + $0x430] sm:$0xff]  ;;  %v9156_v13 = vld [vmem:[#allocation2 + $0x540] sm:$0xff] }
0x1530   :  { %5344 = vmatpush2.msra.mxu1 %v5116_v18  ;;  %5268 = vmatprep.subr.mxu0 %v5051_v39  ;;  %v9098_v18 = vld [vmem:[#allocation2 + $0x428] sm:$0xff]  ;;  %v9100_v39 = vld [vmem:[#allocation2 + $0x420] sm:$0xff]  ;;  %9811 = vst [vmem:[#allocation82_spill] sm:$0xff] %v9156_v13  ;;  %v9172_v7 = vld [vmem:[#allocation2 + $0x510] sm:$0xff] }
0x1531   :  { %5345 = vmatprep.subr.mxu1 %v5115_v35  ;;  %5269 = vmatpush2.msra.mxu0 %v5050_v2  ;;  %v9102_v35 = vld [vmem:[#allocation2 + $0x418] sm:$0xff]  ;;  %v9104_v2 = vld [vmem:[#allocation2 + $0x410] sm:$0xff]  ;;  %v9164_v55 = vld [vmem:[#allocation2 + $0x528] sm:$0xff] }
0x1532   :  { %5346 = vmatpush2.msra.mxu1 %v5114_v17  ;;  %v9106_v17 = vld [vmem:[#allocation2 + $0x408] sm:$0xff]  ;;  %5270 = vmatprep.subr.mxu0 %v9038_v56  ;;  %v9166_v28 = vld [vmem:[#allocation2 + $0x520] sm:$0xff] }
0x1533   :  { %5347 = vmatprep.subr.mxu1 %v9040_v43  ;;  %5271 = vmatpush2.msra.mxu0 %v9042_v36  ;;  %v9174_v13 = vld [vmem:[#allocation2 + $0x508] sm:$0xff]  ;;  %v9176_v12 = vld [vmem:[#allocation2 + $0x500] sm:$0xff] }
0x1534   :  { %5348 = vmatpush2.msra.mxu1 %v9044_v3  ;;  %5273 = vmatmul.mubr.f32.vlgmr.msra.gmra.mxu0 %v8867_v6 }
0x1535   :  { %5350 = vmatmul.mubr.f32.vlgmr.msra.gmra.mxu1 %v8869_v5 }
0x1536   :  { %7906 = shalt.err (!%p8126_p9)  }
0x1537   :  { %5583 = dma.hbm_to_vmem [thread:$0]  %s9594_s0, 24576, %s8117_s27, [#allocation3]  ;;  %5362 = vmatprep.subr.mxu0 %v9046_v19  ;;  %5278 = vmatprep.mubr.f32.mxu0 %v8849_v53  ;;  %v9813_v56 = vld [vmem:[#allocation51_spill] sm:$0xff] }
0x1538   :  { %5363 = vmatpush1.msra.mxu0 %v9048_v24  ;;  %5355 = vmatprep.mubr.f32.mxu1 %v8851_v50 }
0x1539   :  { %5364 = vmatprep.subr.mxu0 %v9050_v61  ;;  %5356 = vmatmul.mubr.f32.gmra.mxu1 %v8855_v8 }
0x153a   :  { %5365 = vmatpush1.msra.mxu0 %v9052_v15  ;;  %5515 = vmatprep.mubr.f32.mxu1 %v9701_v49 }
0x153b   :  { %5366 = vmatprep.subr.mxu0 %v9054_v57  ;;  %5279 = vmatmul.mubr.f32.gmra.mxu0 %v8853_v41 }
0x153c   :  { %5367 = vmatpush1.msra.mxu0 %v9056_v21  ;;  %5426 = vmatprep.mubr.f32.mxu0 %v8891_v58 }
0x153d   :  { %5368 = vmatprep.subr.mxu0 %v9058_v32 }
0x153e   :  { %5369 = vmatpush1.msra.mxu0 %v9060_v25 }
0x153f   :  { %5370 = vmatprep.subr.mxu0 %v9062_v23 }
0x1540   :  { %5371 = vmatpush1.msra.mxu0 %v9064_v54 }
0x1541   :  { %5372 = vmatprep.subr.mxu0 %v9066_v14  ;;  %v9828_v14 = vld [vmem:[#allocation56_spill] sm:$0xff] }
0x1542   :  { %5373 = vmatpush1.msra.mxu0 %v9068_v16  ;;  %v9829_v16 = vld [vmem:[#allocation57_spill] sm:$0xff] }
0x1543   :  { %5374 = vmatprep.subr.mxu0 %v9070_v20  ;;  %v9830_v20 = vld [vmem:[#allocation58_spill] sm:$0xff] }
0x1544   :  { %5375 = vmatpush1.msra.mxu0 %v9072_v38  ;;  %v9831_v38 = vld [vmem:[#allocation64_spill] sm:$0xff] }
0x1545   :  { %5376 = vmatprep.subr.mxu0 %v9074_v40  ;;  %v5443_v40 = vld [vmem:[#allocation10 + $0x20] sm:$0xff] }
0x1546   :  { %5377 = vmatpush1.msra.mxu0 %v9076_v42 }
0x1547   :  { %5378 = vmatprep.subr.mxu0 %v9078_v29  ;;  %v5444_v29 = vld [vmem:[#allocation10 + $0x28] sm:$0xff] }
0x1548   :  { %5379 = vmatpush1.msra.mxu0 %v9080_v45 }
0x1549   :  { %5380 = vmatprep.subr.mxu0 %v9082_v4 }
0x154a   :  { %5381 = vmatpush1.msra.mxu0 %v9084_v46  ;;  %v5445_v46 = vld [vmem:[#allocation10 + $0x50] sm:$0xff] }
0x154b   :  { %5382 = vmatprep.subr.mxu0 %v9086_v9 }
0x154c   :  { %5383 = vmatpush1.msra.mxu0 %v9088_v47 }
0x154d   :  { %5384 = vmatprep.subr.mxu0 %v9090_v0  ;;  %v5446_v0 = vld [vmem:[#allocation10 + $0x58] sm:$0xff] }
0x154e   :  { %5385 = vmatpush1.msra.mxu0 %v9092_v27 }
0x154f   :  { %5386 = vmatprep.subr.mxu0 %v9094_v31 }
0x1550   :  { %5387 = vmatpush1.msra.mxu0 %v9096_v37  ;;  %v5447_v37 = vld [vmem:[#allocation10 + $0x80] sm:$0xff] }
0x1551   :  { %5388 = vmatprep.subr.mxu0 %v9098_v18 }
0x1552   :  { %5389 = vmatpush1.msra.mxu0 %v9100_v39 }
0x1553   :  { %5390 = vmatprep.subr.mxu0 %v9102_v35  ;;  %v5448_v35 = vld [vmem:[#allocation10 + $0x88] sm:$0xff] }
0x1554   :  { %5391 = vmatpush1.msra.mxu0 %v9104_v2 }
0x1555   :  { %5392 = vmatprep.subr.mxu0 %v9106_v17 }
0x1556   :  { %5393 = vmatpush1.msra.mxu0 %v9108_v44  ;;  %v9814_v44 = vld [vmem:[#allocation54_spill] sm:$0xff] }
0x1557   :  { %5394 = vmatprep.subr.mxu0 %v9110_v34  ;;  %v9815_v34 = vld [vmem:[#allocation52_spill] sm:$0xff] }
0x1558   :  { %5395 = vmatpush2.msra.mxu0 %v9112_v30  ;;  %v9824_v30 = vld [vmem:[#allocation83_spill] sm:$0xff] }
0x1559   :  { %5396 = vmatprep.subr.mxu0 %v9114_v26  ;;  %v9816_v26 = vld [vmem:[#allocation73_spill] sm:$0xff] }
0x155a   :  { %5397 = vmatpush2.msra.mxu0 %v9116_v22  ;;  %v9817_v22 = vld [vmem:[#allocation74_spill] sm:$0xff] }
0x155b   :  { %5398 = vmatprep.subr.mxu0 %v9118_v33  ;;  %v9818_v33 = vld [vmem:[#allocation55_spill] sm:$0xff] }
0x155c   :  { %5399 = vmatpush2.msra.mxu0 %v9120_v59  ;;  %v9819_v59 = vld [vmem:[#allocation75_spill] sm:$0xff] }
0x155d   :  { %5400 = vmatprep.subr.mxu0 %v9122_v1  ;;  %v9822_v1 = vld [vmem:[#allocation81_spill] sm:$0xff] }
0x155e   :  { %5401 = vmatpush2.msra.mxu0 %v9124_v48  ;;  %v9821_v48 = vld [vmem:[#allocation80_spill] sm:$0xff] }
0x155f   :  { %5402 = vmatprep.subr.mxu0 %v9126_v52  ;;  %v9820_v52 = vld [vmem:[#allocation76_spill] sm:$0xff] }
0x1560   :  { %5403 = vmatpush2.msra.mxu0 %v9813_v56  ;;  %v5449_v56 = vld [vmem:[#allocation10 + $0xb0] sm:$0xff] }
0x1561   :  { %5404 = vmatprep.subr.mxu0 %v9814_v44 }
0x1562   :  { %5405 = vmatpush2.msra.mxu0 %v9815_v34 }
0x1563   :  { %5406 = vmatprep.subr.mxu0 %v9134_v60  ;;  %v9823_v60 = vld [vmem:[#allocation82_spill] sm:$0xff] }
0x1564   :  { %5407 = vmatpush2.msra.mxu0 %v9816_v26  ;;  %v5450_v26 = vld [vmem:[#allocation10 + $0xb8] sm:$0xff] }
0x1565   :  { %5408 = vmatprep.subr.mxu0 %v9817_v22 }
0x1566   :  { %5409 = vmatpush2.msra.mxu0 %v9818_v33 }
0x1567   :  { %5410 = vmatprep.subr.mxu0 %v9142_v63  ;;  %v9827_v63 = vld [vmem:[#allocation65_spill] sm:$0xff] }
0x1568   :  { %5411 = vmatpush2.msra.mxu0 %v9144_v51  ;;  %v9825_v51 = vld [vmem:[#allocation60_spill] sm:$0xff] }
0x1569   :  { %5412 = vmatprep.subr.mxu0 %v9819_v59 }
0x156a   :  { %5413 = vmatpush2.msra.mxu0 %v9820_v52 }
0x156b   :  { %5414 = vmatprep.subr.mxu0 %v9821_v48 }
0x156c   :  { %5415 = vmatpush2.msra.mxu0 %v9152_v62  ;;  %v9826_v62 = vld [vmem:[#allocation59_spill] sm:$0xff] }
0x156d   :  { %5416 = vmatprep.subr.mxu0 %v9822_v1 }
0x156e   :  { %5417 = vmatpush2.msra.mxu0 %v9823_v60 }
0x156f   :  { %5418 = vmatprep.subr.mxu0 %v9824_v30 }
0x1570   :  { %5419 = vmatpush2.msra.mxu0 %v9160_v11 }
0x1571   :  { %5420 = vmatprep.subr.mxu0 %v9164_v55 }
0x1572   :  { %5421 = vmatpush2.msra.mxu0 %v9166_v28 }
0x1573   :  { %5422 = vmatprep.subr.mxu0 %v9168_v10 }
0x1574   :  { %5423 = vmatpush2.msra.mxu0 %v9172_v7 }
0x1575   :  { %5424 = vmatprep.subr.mxu0 %v9174_v13 }
0x1576   :  { %5425 = vmatpush2.msra.mxu0 %v9176_v12 }
0x1577   :  { %5427 = vmatmul.mubr.f32.vlgmr.msra.gmra.mxu0 %v9825_v51 }
0x1578   :  { %5432 = vmatprep.mubr.f32.mxu0 %v9826_v62 }
0x157b   :  { %5433 = vmatmul.mubr.f32.gmra.mxu0 %v9827_v63 }
0x15f4   :  { %v5274_v43 = vpop.f32.mrf.mxu0 }
0x15f5   :  { %v5351_v11 = vpop.f32.mrf.mxu1 }
0x15f6   :  { %v5276_v36 = vpop.f32.mrf.mxu0  ;;  %v5352_v32 = vadd.f32 %v5351_v11, %v5274_v43 }
0x15f7   :  { %v5353_v3 = vpop.f32.mrf.mxu1 }
0x15f8   :  { %v5354_v57 = vadd.f32 %v5353_v3, %v5276_v36 }
0x15f9   :  { %v5357_v28 = vpop.f32.mrf.mxu1 }
0x15fb   :  { %v5280_v55 = vpop.f32.mrf.mxu0  ;;  %v5359_v24 = vpop.f32.mrf.mxu1 }
0x15fc   :  { %v5358_v15 = vadd.f32 %v5357_v28, %v5280_v55 }
0x15fd   :  { %v5282_v19 = vpop.f32.mrf.mxu0 }
0x15fe   :  { %v5360_v13 = vadd.f32 %v5359_v24, %v5282_v19 }
0x1637   :  { %v5428_v10 = vpop.f32.mrf.mxu0 }
0x1638   :  { %v9266_v54 = vadd.f32 %v5428_v10, %v5352_v32 }
0x1639   :  { %v5430_v7 = vpop.f32.mrf.mxu0 }
0x163a   :  { %v9263_v23 = vadd.f32 %v5430_v7, %v5354_v57 }
0x163b   :  { %v5434_v61 = vpop.f32.mrf.mxu0 }
0x163c   :  { %v9261_v25 = vadd.f32 %v5434_v61, %v5358_v15 }
0x163d   :  { %v5436_v12 = vpop.f32.mrf.mxu0 }
0x163e   :  { %v9259_v21 = vadd.f32 %v5436_v12, %v5360_v13 }
0x1640   :  { %5479 = vmatprep.subr.mxu1 %v9259_v21 }
0x1641   :  { %5480 = vmatpush1.msra.mxu1 %v9261_v25 }
0x1642   :  { %5481 = vmatprep.subr.mxu1 %v9263_v23 }
0x1643   :  { %5482 = vmatpush1.msra.mxu1 %v9266_v54 }
0x1644   :  { %7628 = vmatmul.mubr.msk.f32.vlgmr.msra.gmra.mxu1 %vm3576_vm1, %v9828_v14 }
0x1645   :  { %5521 = vmatprep.mubr.f32.mxu1 %v9701_v49 }
0x1648   :  { %7629 = vmatmul.mubr.msk.f32.gmra.mxu1 %vm3576_vm1, %v9829_v16 }
0x1649   :  { %5527 = vmatprep.mubr.f32.mxu1 %v9701_v49 }
0x164c   :  { %7630 = vmatmul.mubr.msk.f32.gmra.mxu1 %vm3576_vm1, %v9830_v20 }
0x164d   :  { %5533 = vmatprep.mubr.f32.mxu1 %v9701_v49 }
0x1650   :  { %7631 = vmatmul.mubr.msk.f32.gmra.mxu1 %vm3576_vm1, %v9831_v38 }
0x1704   :  { %v5517_v42 = vpop.f32.mrf.mxu1 }
0x1705   :  { %v5540_v45 = vadd.f32 %v5517_v42, %v5443_v40 }
0x1706   :  { %v5519_v4 = vpop.f32.mrf.mxu1 }
0x1707   :  { %5548 = vst [vmem:[#allocation10 + $0x20] sm:$0xff] %v5540_v45  ;;  %v5541_v9 = vadd.f32 %v5519_v4, %v5444_v29 }
0x1708   :  { %v5523_v47 = vpop.f32.mrf.mxu1 }
0x1709   :  { %5549 = vst [vmem:[#allocation10 + $0x28] sm:$0xff] %v5541_v9  ;;  %v5542_v27 = vadd.f32 %v5523_v47, %v5445_v46 }
0x170a   :  { %v5525_v31 = vpop.f32.mrf.mxu1 }
0x170b   :  { %5550 = vst [vmem:[#allocation10 + $0x50] sm:$0xff] %v5542_v27  ;;  %v5543_v18 = vadd.f32 %v5525_v31, %v5446_v0 }
0x170c   :  { %v5529_v39 = vpop.f32.mrf.mxu1 }
0x170d   :  { %5551 = vst [vmem:[#allocation10 + $0x58] sm:$0xff] %v5543_v18  ;;  %v5544_v2 = vadd.f32 %v5529_v39, %v5447_v37 }
0x170e   :  { %v5531_v17 = vpop.f32.mrf.mxu1 }
0x170f   :  { %5552 = vst [vmem:[#allocation10 + $0x80] sm:$0xff] %v5544_v2  ;;  %v5545_v44 = vadd.f32 %v5531_v17, %v5448_v35 }
0x1710   :  { %v5535_v34 = vpop.f32.mrf.mxu1 }
0x1711   :  { %5553 = vst [vmem:[#allocation10 + $0x88] sm:$0xff] %v5545_v44  ;;  %v5546_v22 = vadd.f32 %v5535_v34, %v5449_v56 }
0x1712   :  { %v5537_v33 = vpop.f32.mrf.mxu1 }
0x1713   :  { %5554 = vst [vmem:[#allocation10 + $0xb0] sm:$0xff] %v5546_v22  ;;  %v5547_v59 = vadd.f32 %v5537_v33, %v5450_v26 }
0x1715   :  { %5555 = vst [vmem:[#allocation10 + $0xb8] sm:$0xff] %v5547_v59 }
0x1716   :  { %7993 = dma.done.wait [#allocation3], 24576 }
0x1717   :  { %7994 = vsyncadd [#allocation3], 4294942720  ;;  %v9832_v52 = vld [vmem:[#allocation63_spill] sm:$0xff]  ;;  %v9833_v48 = vld [vmem:[#allocation70_spill] sm:$0xff] }
0x1718   :  { %5853 = vmatprep.mubr.f32.mxu1 %v9832_v52  ;;  %5930 = vmatprep.mubr.f32.mxu0 %v9833_v48 }
0x1719   :  { %7928 = shalt.err (!%p8175_p0)  }
0x171a   :  { %5596 = dma.hbm_to_vmem [thread:$0]  %s8163_s15, 24576, %s8167_s17, [#allocation3 + $0x1] }
0x171b   :  { %v5628_v1 = vld [vmem:[#allocation2 + $0xf8] sm:$0xff]  ;;  %v5627_v30 = vld [vmem:[#allocation2 + $0xf0] sm:$0xff]  ;;  %v5626_v11 = vld [vmem:[#allocation2 + $0xe8] sm:$0xff] }
0x171c   :  { %v5692_v60 = vld [vmem:[#allocation2 + $0x2f8] sm:$0xff]  ;;  %5789 = vmatprep.subr.mxu1 %v5628_v1  ;;  %v5691_v43 = vld [vmem:[#allocation2 + $0x2f0] sm:$0xff]  ;;  %v5690_v36 = vld [vmem:[#allocation2 + $0x2e8] sm:$0xff] }
0x171d   :  { %5866 = vmatprep.subr.mxu0 %v5692_v60  ;;  %5790 = vmatpush1.msra.mxu1 %v5627_v30  ;;  %v5625_v55 = vld [vmem:[#allocation2 + $0xe0] sm:$0xff]  ;;  %v5624_v28 = vld [vmem:[#allocation2 + $0xd8] sm:$0xff]  ;;  %v5623_v10 = vld [vmem:[#allocation2 + $0xd0] sm:$0xff] }
0x171e   :  { %5867 = vmatpush1.msra.mxu0 %v5691_v43  ;;  %v5689_v3 = vld [vmem:[#allocation2 + $0x2e0] sm:$0xff]  ;;  %5791 = vmatprep.subr.mxu1 %v5626_v11  ;;  %v5688_v19 = vld [vmem:[#allocation2 + $0x2d8] sm:$0xff]  ;;  %v5687_v24 = vld [vmem:[#allocation2 + $0x2d0] sm:$0xff] }
0x171f   :  { %5868 = vmatprep.subr.mxu0 %v5690_v36  ;;  %5792 = vmatpush1.msra.mxu1 %v5625_v55  ;;  %v5622_v7 = vld [vmem:[#allocation2 + $0xc8] sm:$0xff]  ;;  %v5621_v13 = vld [vmem:[#allocation2 + $0xc0] sm:$0xff]  ;;  %v5620_v12 = vld [vmem:[#allocation2 + $0xb8] sm:$0xff] }
0x1720   :  { %5869 = vmatpush1.msra.mxu0 %v5689_v3  ;;  %v5686_v61 = vld [vmem:[#allocation2 + $0x2c8] sm:$0xff]  ;;  %5793 = vmatprep.subr.mxu1 %v5624_v28  ;;  %v5685_v15 = vld [vmem:[#allocation2 + $0x2c0] sm:$0xff]  ;;  %v5684_v57 = vld [vmem:[#allocation2 + $0x2b8] sm:$0xff] }
0x1721   :  { %5870 = vmatprep.subr.mxu0 %v5688_v19  ;;  %5794 = vmatpush1.msra.mxu1 %v5623_v10  ;;  %v5619_v32 = vld [vmem:[#allocation2 + $0xb0] sm:$0xff]  ;;  %v5618_v16 = vld [vmem:[#allocation2 + $0xa8] sm:$0xff]  ;;  %v5617_v38 = vld [vmem:[#allocation2 + $0xa0] sm:$0xff] }
0x1722   :  { %5871 = vmatpush1.msra.mxu0 %v5687_v24  ;;  %5795 = vmatprep.subr.mxu1 %v5622_v7  ;;  %v5683_v14 = vld [vmem:[#allocation2 + $0x2b0] sm:$0xff]  ;;  %v5682_v20 = vld [vmem:[#allocation2 + $0x2a8] sm:$0xff]  ;;  %v5681_v40 = vld [vmem:[#allocation2 + $0x2a0] sm:$0xff] }
0x1723   :  { %5872 = vmatprep.subr.mxu0 %v5686_v61  ;;  %5796 = vmatpush1.msra.mxu1 %v5621_v13  ;;  %v5616_v42 = vld [vmem:[#allocation2 + $0x98] sm:$0xff]  ;;  %v5615_v45 = vld [vmem:[#allocation2 + $0x90] sm:$0xff]  ;;  %v5614_v46 = vld [vmem:[#allocation2 + $0x88] sm:$0xff] }
0x1724   :  { %5873 = vmatpush1.msra.mxu0 %v5685_v15  ;;  %5797 = vmatprep.subr.mxu1 %v5620_v12  ;;  %v5680_v29 = vld [vmem:[#allocation2 + $0x298] sm:$0xff]  ;;  %v5679_v4 = vld [vmem:[#allocation2 + $0x290] sm:$0xff]  ;;  %v5678_v9 = vld [vmem:[#allocation2 + $0x288] sm:$0xff] }
0x1725   :  { %5874 = vmatprep.subr.mxu0 %v5684_v57  ;;  %5798 = vmatpush1.msra.mxu1 %v5619_v32  ;;  %v5613_v47 = vld [vmem:[#allocation2 + $0x80] sm:$0xff]  ;;  %v5612_v27 = vld [vmem:[#allocation2 + $0x78] sm:$0xff]  ;;  %v5611_v37 = vld [vmem:[#allocation2 + $0x70] sm:$0xff] }
0x1726   :  { %5875 = vmatpush1.msra.mxu0 %v5683_v14  ;;  %5799 = vmatprep.subr.mxu1 %v5618_v16  ;;  %v5677_v0 = vld [vmem:[#allocation2 + $0x280] sm:$0xff]  ;;  %v5676_v31 = vld [vmem:[#allocation2 + $0x278] sm:$0xff]  ;;  %v5675_v18 = vld [vmem:[#allocation2 + $0x270] sm:$0xff] }
0x1727   :  { %5876 = vmatprep.subr.mxu0 %v5682_v20  ;;  %5800 = vmatpush1.msra.mxu1 %v5617_v38  ;;  %v5610_v39 = vld [vmem:[#allocation2 + $0x68] sm:$0xff]  ;;  %v5609_v2 = vld [vmem:[#allocation2 + $0x60] sm:$0xff]  ;;  %v5608_v56 = vld [vmem:[#allocation2 + $0x58] sm:$0xff] }
0x1728   :  { %5877 = vmatpush1.msra.mxu0 %v5681_v40  ;;  %5801 = vmatprep.subr.mxu1 %v5616_v42  ;;  %v5674_v35 = vld [vmem:[#allocation2 + $0x268] sm:$0xff]  ;;  %v5673_v17 = vld [vmem:[#allocation2 + $0x260] sm:$0xff]  ;;  %v5672_v44 = vld [vmem:[#allocation2 + $0x258] sm:$0xff] }
0x1729   :  { %5878 = vmatprep.subr.mxu0 %v5680_v29  ;;  %5802 = vmatpush1.msra.mxu1 %v5615_v45  ;;  %v5607_v34 = vld [vmem:[#allocation2 + $0x50] sm:$0xff]  ;;  %v5606_v22 = vld [vmem:[#allocation2 + $0x48] sm:$0xff]  ;;  %v5605_v59 = vld [vmem:[#allocation2 + $0x40] sm:$0xff] }
0x172a   :  { %5879 = vmatpush1.msra.mxu0 %v5679_v4  ;;  %5803 = vmatprep.subr.mxu1 %v5614_v46  ;;  %v5671_v26 = vld [vmem:[#allocation2 + $0x250] sm:$0xff]  ;;  %v5670_v33 = vld [vmem:[#allocation2 + $0x248] sm:$0xff]  ;;  %v5669_v1 = vld [vmem:[#allocation2 + $0x240] sm:$0xff] }
0x172b   :  { %5880 = vmatprep.subr.mxu0 %v5678_v9  ;;  %5804 = vmatpush1.msra.mxu1 %v5613_v47  ;;  %v5604_v60 = vld [vmem:[#allocation2 + $0x38] sm:$0xff]  ;;  %v5603_v43 = vld [vmem:[#allocation2 + $0x30] sm:$0xff]  ;;  %v5602_v36 = vld [vmem:[#allocation2 + $0x28] sm:$0xff] }
0x172c   :  { %5881 = vmatpush1.msra.mxu0 %v5677_v0  ;;  %5805 = vmatprep.subr.mxu1 %v5612_v27  ;;  %v5668_v30 = vld [vmem:[#allocation2 + $0x238] sm:$0xff]  ;;  %v5667_v11 = vld [vmem:[#allocation2 + $0x230] sm:$0xff]  ;;  %v5666_v55 = vld [vmem:[#allocation2 + $0x228] sm:$0xff] }
0x172d   :  { %5882 = vmatprep.subr.mxu0 %v5676_v31  ;;  %5806 = vmatpush1.msra.mxu1 %v5611_v37  ;;  %v5601_v3 = vld [vmem:[#allocation2 + $0x20] sm:$0xff]  ;;  %v5600_v19 = vld [vmem:[#allocation2 + $0x18] sm:$0xff]  ;;  %v5599_v24 = vld [vmem:[#allocation2 + $0x10] sm:$0xff] }
0x172e   :  { %5883 = vmatpush1.msra.mxu0 %v5675_v18  ;;  %5807 = vmatprep.subr.mxu1 %v5610_v39  ;;  %v5665_v28 = vld [vmem:[#allocation2 + $0x220] sm:$0xff]  ;;  %v5664_v10 = vld [vmem:[#allocation2 + $0x218] sm:$0xff]  ;;  %v5663_v7 = vld [vmem:[#allocation2 + $0x210] sm:$0xff] }
0x172f   :  { %5884 = vmatprep.subr.mxu0 %v5674_v35  ;;  %5808 = vmatpush1.msra.mxu1 %v5609_v2  ;;  %v5598_v61 = vld [vmem:[#allocation2 + $0x8] sm:$0xff]  ;;  %v5597_v15 = vld [vmem:[#allocation2] sm:$0xff]  ;;  %v5660_v57 = vld [vmem:[#allocation2 + $0x1f8] sm:$0xff] }
0x1730   :  { %5885 = vmatpush1.msra.mxu0 %v5673_v17  ;;  %5809 = vmatprep.subr.mxu1 %v5608_v56  ;;  %v5662_v13 = vld [vmem:[#allocation2 + $0x208] sm:$0xff]  ;;  %v5661_v12 = vld [vmem:[#allocation2 + $0x200] sm:$0xff]  ;;  %v5724_v32 = vld [vmem:[#allocation2 + $0x3f8] sm:$0xff] }
0x1731   :  { %5886 = vmatprep.subr.mxu0 %v5672_v44  ;;  %5810 = vmatpush1.msra.mxu1 %v5607_v34  ;;  %v5659_v14 = vld [vmem:[#allocation2 + $0x1f0] sm:$0xff]  ;;  %v5658_v20 = vld [vmem:[#allocation2 + $0x1e8] sm:$0xff]  ;;  %v5657_v40 = vld [vmem:[#allocation2 + $0x1e0] sm:$0xff] }
0x1732   :  { %5887 = vmatpush1.msra.mxu0 %v5671_v26  ;;  %5811 = vmatprep.subr.mxu1 %v5606_v22  ;;  %v5723_v16 = vld [vmem:[#allocation2 + $0x3f0] sm:$0xff]  ;;  %v5722_v38 = vld [vmem:[#allocation2 + $0x3e8] sm:$0xff]  ;;  %v5721_v42 = vld [vmem:[#allocation2 + $0x3e0] sm:$0xff] }
0x1733   :  { %5888 = vmatprep.subr.mxu0 %v5670_v33  ;;  %5812 = vmatpush1.msra.mxu1 %v5605_v59  ;;  %v5656_v29 = vld [vmem:[#allocation2 + $0x1d8] sm:$0xff]  ;;  %v5655_v4 = vld [vmem:[#allocation2 + $0x1d0] sm:$0xff]  ;;  %v5654_v9 = vld [vmem:[#allocation2 + $0x1c8] sm:$0xff] }
0x1734   :  { %5889 = vmatpush1.msra.mxu0 %v5669_v1  ;;  %5813 = vmatprep.subr.mxu1 %v5604_v60  ;;  %v5720_v45 = vld [vmem:[#allocation2 + $0x3d8] sm:$0xff]  ;;  %v5719_v46 = vld [vmem:[#allocation2 + $0x3d0] sm:$0xff]  ;;  %v5718_v47 = vld [vmem:[#allocation2 + $0x3c8] sm:$0xff] }
0x1735   :  { %5890 = vmatprep.subr.mxu0 %v5668_v30  ;;  %5814 = vmatpush1.msra.mxu1 %v5603_v43  ;;  %v5653_v0 = vld [vmem:[#allocation2 + $0x1c0] sm:$0xff]  ;;  %v5652_v31 = vld [vmem:[#allocation2 + $0x1b8] sm:$0xff]  ;;  %v5651_v18 = vld [vmem:[#allocation2 + $0x1b0] sm:$0xff] }
0x1736   :  { %5891 = vmatpush1.msra.mxu0 %v5667_v11  ;;  %5815 = vmatprep.subr.mxu1 %v5602_v36  ;;  %v5717_v27 = vld [vmem:[#allocation2 + $0x3c0] sm:$0xff]  ;;  %v5716_v37 = vld [vmem:[#allocation2 + $0x3b8] sm:$0xff]  ;;  %v5715_v39 = vld [vmem:[#allocation2 + $0x3b0] sm:$0xff] }
0x1737   :  { %5892 = vmatprep.subr.mxu0 %v5666_v55  ;;  %5816 = vmatpush1.msra.mxu1 %v5601_v3  ;;  %v5650_v35 = vld [vmem:[#allocation2 + $0x1a8] sm:$0xff]  ;;  %v5649_v17 = vld [vmem:[#allocation2 + $0x1a0] sm:$0xff]  ;;  %v5648_v44 = vld [vmem:[#allocation2 + $0x198] sm:$0xff] }
0x1738   :  { %5893 = vmatpush1.msra.mxu0 %v5665_v28  ;;  %5817 = vmatprep.subr.mxu1 %v5600_v19  ;;  %v5714_v2 = vld [vmem:[#allocation2 + $0x3a8] sm:$0xff]  ;;  %v5713_v56 = vld [vmem:[#allocation2 + $0x3a0] sm:$0xff]  ;;  %v5712_v34 = vld [vmem:[#allocation2 + $0x398] sm:$0xff] }
0x1739   :  { %5894 = vmatprep.subr.mxu0 %v5664_v10  ;;  %5818 = vmatpush1.msra.mxu1 %v5599_v24  ;;  %v5647_v26 = vld [vmem:[#allocation2 + $0x190] sm:$0xff]  ;;  %v5646_v33 = vld [vmem:[#allocation2 + $0x188] sm:$0xff]  ;;  %v5645_v1 = vld [vmem:[#allocation2 + $0x180] sm:$0xff] }
0x173a   :  { %5895 = vmatpush1.msra.mxu0 %v5663_v7  ;;  %5819 = vmatprep.subr.mxu1 %v5598_v61  ;;  %v5711_v22 = vld [vmem:[#allocation2 + $0x390] sm:$0xff]  ;;  %v5710_v59 = vld [vmem:[#allocation2 + $0x388] sm:$0xff]  ;;  %v5709_v60 = vld [vmem:[#allocation2 + $0x380] sm:$0xff] }
0x173b   :  { %5896 = vmatprep.subr.mxu0 %v5662_v13  ;;  %5820 = vmatpush1.msra.mxu1 %v5597_v15  ;;  %v5644_v30 = vld [vmem:[#allocation2 + $0x178] sm:$0xff]  ;;  %v5643_v11 = vld [vmem:[#allocation2 + $0x170] sm:$0xff]  ;;  %v5642_v55 = vld [vmem:[#allocation2 + $0x168] sm:$0xff] }
0x173c   :  { %5897 = vmatpush1.msra.mxu0 %v5661_v12  ;;  %5821 = vmatprep.subr.mxu1 %v5660_v57  ;;  %v5708_v43 = vld [vmem:[#allocation2 + $0x378] sm:$0xff]  ;;  %v5707_v36 = vld [vmem:[#allocation2 + $0x370] sm:$0xff]  ;;  %v5706_v3 = vld [vmem:[#allocation2 + $0x368] sm:$0xff] }
0x173d   :  { %5898 = vmatprep.subr.mxu0 %v5724_v32  ;;  %5822 = vmatpush2.msra.mxu1 %v5659_v14  ;;  %v5641_v28 = vld [vmem:[#allocation2 + $0x160] sm:$0xff]  ;;  %v5640_v10 = vld [vmem:[#allocation2 + $0x158] sm:$0xff]  ;;  %v5639_v7 = vld [vmem:[#allocation2 + $0x150] sm:$0xff] }
0x173e   :  { %5899 = vmatpush2.msra.mxu0 %v5723_v16  ;;  %5823 = vmatprep.subr.mxu1 %v5658_v20  ;;  %v5705_v19 = vld [vmem:[#allocation2 + $0x360] sm:$0xff]  ;;  %v5704_v24 = vld [vmem:[#allocation2 + $0x358] sm:$0xff]  ;;  %v5703_v61 = vld [vmem:[#allocation2 + $0x350] sm:$0xff] }
0x173f   :  { %5900 = vmatprep.subr.mxu0 %v5722_v38  ;;  %5824 = vmatpush2.msra.mxu1 %v5657_v40  ;;  %v5638_v13 = vld [vmem:[#allocation2 + $0x148] sm:$0xff]  ;;  %v5637_v12 = vld [vmem:[#allocation2 + $0x140] sm:$0xff]  ;;  %v5636_v32 = vld [vmem:[#allocation2 + $0x138] sm:$0xff] }
0x1740   :  { %5901 = vmatpush2.msra.mxu0 %v5721_v42  ;;  %5825 = vmatprep.subr.mxu1 %v5656_v29  ;;  %v5702_v15 = vld [vmem:[#allocation2 + $0x348] sm:$0xff]  ;;  %v5701_v57 = vld [vmem:[#allocation2 + $0x340] sm:$0xff]  ;;  %v5700_v14 = vld [vmem:[#allocation2 + $0x338] sm:$0xff] }
0x1741   :  { %5902 = vmatprep.subr.mxu0 %v5720_v45  ;;  %5826 = vmatpush2.msra.mxu1 %v5655_v4  ;;  %v5635_v16 = vld [vmem:[#allocation2 + $0x130] sm:$0xff]  ;;  %v5634_v38 = vld [vmem:[#allocation2 + $0x128] sm:$0xff]  ;;  %v5633_v42 = vld [vmem:[#allocation2 + $0x120] sm:$0xff] }
0x1742   :  { %5903 = vmatpush2.msra.mxu0 %v5719_v46  ;;  %5827 = vmatprep.subr.mxu1 %v5654_v9  ;;  %v5699_v20 = vld [vmem:[#allocation2 + $0x330] sm:$0xff]  ;;  %v5698_v40 = vld [vmem:[#allocation2 + $0x328] sm:$0xff]  ;;  %v5697_v29 = vld [vmem:[#allocation2 + $0x320] sm:$0xff] }
0x1743   :  { %5904 = vmatprep.subr.mxu0 %v5718_v47  ;;  %5828 = vmatpush2.msra.mxu1 %v5653_v0  ;;  %v5632_v45 = vld [vmem:[#allocation2 + $0x118] sm:$0xff]  ;;  %v5631_v46 = vld [vmem:[#allocation2 + $0x110] sm:$0xff]  ;;  %v5630_v47 = vld [vmem:[#allocation2 + $0x108] sm:$0xff] }
0x1744   :  { %5905 = vmatpush2.msra.mxu0 %v5717_v27  ;;  %5829 = vmatprep.subr.mxu1 %v5652_v31  ;;  %v5696_v4 = vld [vmem:[#allocation2 + $0x318] sm:$0xff]  ;;  %v5695_v9 = vld [vmem:[#allocation2 + $0x310] sm:$0xff]  ;;  %v5694_v0 = vld [vmem:[#allocation2 + $0x308] sm:$0xff] }
0x1745   :  { %5906 = vmatprep.subr.mxu0 %v5716_v37  ;;  %5830 = vmatpush2.msra.mxu1 %v5651_v18  ;;  %v5629_v27 = vld [vmem:[#allocation2 + $0x100] sm:$0xff]  ;;  %v5756_v37 = vld [vmem:[#allocation2 + $0x4f8] sm:$0xff]  ;;  %v5755_v18 = vld [vmem:[#allocation2 + $0x4f0] sm:$0xff] }
0x1746   :  { %5907 = vmatpush2.msra.mxu0 %v5715_v39  ;;  %5831 = vmatprep.subr.mxu1 %v5650_v35  ;;  %v5693_v31 = vld [vmem:[#allocation2 + $0x300] sm:$0xff]  ;;  %v9834_v39 = vld [vmem:[#allocation66_spill] sm:$0xff]  ;;  %v9835_v35 = vld [vmem:[#allocation71_spill] sm:$0xff] }
0x1747   :  { %5908 = vmatprep.subr.mxu0 %v5714_v2  ;;  %5832 = vmatpush2.msra.mxu1 %v5649_v17  ;;  %v5754_v2 = vld [vmem:[#allocation2 + $0x4e8] sm:$0xff]  ;;  %v5753_v17 = vld [vmem:[#allocation2 + $0x4e0] sm:$0xff] }
0x1748   :  { %5909 = vmatpush2.msra.mxu0 %v5713_v56  ;;  %5833 = vmatprep.subr.mxu1 %v5648_v44  ;;  %v9836_v56 = vld [vmem:[#allocation61_spill] sm:$0xff]  ;;  %v5752_v44 = vld [vmem:[#allocation2 + $0x4d8] sm:$0xff] }
0x1749   :  { %5910 = vmatprep.subr.mxu0 %v5712_v34  ;;  %5834 = vmatpush2.msra.mxu1 %v5647_v26  ;;  %v9837_v34 = vld [vmem:[#allocation67_spill] sm:$0xff] }
0x174a   :  { %5911 = vmatpush2.msra.mxu0 %v5711_v22  ;;  %5835 = vmatprep.subr.mxu1 %v5646_v33  ;;  %v5751_v26 = vld [vmem:[#allocation2 + $0x4d0] sm:$0xff]  ;;  %v5750_v22 = vld [vmem:[#allocation2 + $0x4c8] sm:$0xff]  ;;  %v9838_v33 = vld [vmem:[#allocation72_spill] sm:$0xff] }
0x174b   :  { %5912 = vmatprep.subr.mxu0 %v5710_v59  ;;  %5836 = vmatpush2.msra.mxu1 %v5645_v1  ;;  %v5749_v59 = vld [vmem:[#allocation2 + $0x4c0] sm:$0xff]  ;;  %v9839_v1 = vld [vmem:[#allocation62_spill] sm:$0xff] }
0x174c   :  { %5913 = vmatpush2.msra.mxu0 %v5709_v60  ;;  %5837 = vmatprep.subr.mxu1 %v5644_v30  ;;  %v5748_v60 = vld [vmem:[#allocation2 + $0x4b8] sm:$0xff]  ;;  %v5747_v30 = vld [vmem:[#allocation2 + $0x4b0] sm:$0xff] }
0x174d   :  { %5914 = vmatprep.subr.mxu0 %v5708_v43  ;;  %5838 = vmatpush2.msra.mxu1 %v5643_v11  ;;  %v5746_v43 = vld [vmem:[#allocation2 + $0x4a8] sm:$0xff]  ;;  %v5745_v11 = vld [vmem:[#allocation2 + $0x4a0] sm:$0xff] }
0x174e   :  { %5915 = vmatpush2.msra.mxu0 %v5707_v36  ;;  %5839 = vmatprep.subr.mxu1 %v5642_v55  ;;  %v5744_v36 = vld [vmem:[#allocation2 + $0x498] sm:$0xff]  ;;  %v5743_v55 = vld [vmem:[#allocation2 + $0x490] sm:$0xff] }
0x174f   :  { %5916 = vmatprep.subr.mxu0 %v5706_v3  ;;  %5840 = vmatpush2.msra.mxu1 %v5641_v28  ;;  %v5742_v3 = vld [vmem:[#allocation2 + $0x488] sm:$0xff]  ;;  %v5741_v28 = vld [vmem:[#allocation2 + $0x480] sm:$0xff] }
0x1750   :  { %5917 = vmatpush2.msra.mxu0 %v5705_v19  ;;  %5841 = vmatprep.subr.mxu1 %v5640_v10  ;;  %v5740_v19 = vld [vmem:[#allocation2 + $0x478] sm:$0xff]  ;;  %v5739_v10 = vld [vmem:[#allocation2 + $0x470] sm:$0xff] }
0x1751   :  { %5918 = vmatprep.subr.mxu0 %v5704_v24  ;;  %5842 = vmatpush2.msra.mxu1 %v5639_v7  ;;  %v5738_v24 = vld [vmem:[#allocation2 + $0x468] sm:$0xff]  ;;  %v5737_v7 = vld [vmem:[#allocation2 + $0x460] sm:$0xff] }
0x1752   :  { %5919 = vmatpush2.msra.mxu0 %v5703_v61  ;;  %5843 = vmatprep.subr.mxu1 %v5638_v13  ;;  %v5736_v61 = vld [vmem:[#allocation2 + $0x458] sm:$0xff]  ;;  %v5735_v13 = vld [vmem:[#allocation2 + $0x450] sm:$0xff] }
0x1753   :  { %5920 = vmatprep.subr.mxu0 %v5702_v15  ;;  %5844 = vmatpush2.msra.mxu1 %v5637_v12  ;;  %v5734_v15 = vld [vmem:[#allocation2 + $0x448] sm:$0xff]  ;;  %v5733_v12 = vld [vmem:[#allocation2 + $0x440] sm:$0xff] }
0x1754   :  { %5921 = vmatpush2.msra.mxu0 %v5701_v57  ;;  %5845 = vmatprep.subr.mxu1 %v5636_v32  ;;  %v5732_v57 = vld [vmem:[#allocation2 + $0x438] sm:$0xff]  ;;  %v5731_v32 = vld [vmem:[#allocation2 + $0x430] sm:$0xff] }
0x1755   :  { %5922 = vmatprep.subr.mxu0 %v5700_v14  ;;  %5846 = vmatpush2.msra.mxu1 %v5635_v16  ;;  %v5730_v14 = vld [vmem:[#allocation2 + $0x428] sm:$0xff]  ;;  %v5729_v16 = vld [vmem:[#allocation2 + $0x420] sm:$0xff] }
0x1756   :  { %5923 = vmatpush2.msra.mxu0 %v5699_v20  ;;  %5847 = vmatprep.subr.mxu1 %v5634_v38  ;;  %v5728_v20 = vld [vmem:[#allocation2 + $0x418] sm:$0xff]  ;;  %v5727_v38 = vld [vmem:[#allocation2 + $0x410] sm:$0xff] }
0x1757   :  { %5924 = vmatprep.subr.mxu0 %v5698_v40  ;;  %5848 = vmatpush2.msra.mxu1 %v5633_v42  ;;  %v5726_v40 = vld [vmem:[#allocation2 + $0x408] sm:$0xff]  ;;  %v5725_v42 = vld [vmem:[#allocation2 + $0x400] sm:$0xff] }
0x1758   :  { %5925 = vmatpush2.msra.mxu0 %v5697_v29  ;;  %5849 = vmatprep.subr.mxu1 %v5632_v45  ;;  %v5788_v29 = vld [vmem:[#allocation2 + $0x5f8] sm:$0xff]  ;;  %v5787_v45 = vld [vmem:[#allocation2 + $0x5f0] sm:$0xff] }
0x1759   :  { %5926 = vmatprep.subr.mxu0 %v5696_v4  ;;  %5850 = vmatpush2.msra.mxu1 %v5631_v46  ;;  %v5786_v4 = vld [vmem:[#allocation2 + $0x5e8] sm:$0xff]  ;;  %v5785_v46 = vld [vmem:[#allocation2 + $0x5e0] sm:$0xff] }
0x175a   :  { %5927 = vmatpush2.msra.mxu0 %v5695_v9  ;;  %5851 = vmatprep.subr.mxu1 %v5630_v47  ;;  %v5784_v9 = vld [vmem:[#allocation2 + $0x5d8] sm:$0xff]  ;;  %v5783_v47 = vld [vmem:[#allocation2 + $0x5d0] sm:$0xff] }
0x175b   :  { %5928 = vmatprep.subr.mxu0 %v5694_v0  ;;  %5852 = vmatpush2.msra.mxu1 %v5629_v27  ;;  %v5782_v0 = vld [vmem:[#allocation2 + $0x5c8] sm:$0xff]  ;;  %v5781_v27 = vld [vmem:[#allocation2 + $0x5c0] sm:$0xff] }
0x175c   :  { %5929 = vmatpush2.msra.mxu0 %v5693_v31  ;;  %5854 = vmatmul.mubr.f32.vlgmr.msra.gmra.mxu1 %v9834_v39  ;;  %v5780_v31 = vld [vmem:[#allocation2 + $0x5b8] sm:$0xff] }
0x175d   :  { %5931 = vmatmul.mubr.f32.vlgmr.msra.gmra.mxu0 %v9835_v35  ;;  %5943 = vmatprep.subr.mxu1 %v5756_v37  ;;  %v5779_v37 = vld [vmem:[#allocation2 + $0x5b0] sm:$0xff] }
0x175e   :  { %5859 = vmatprep.mubr.f32.mxu1 %v9836_v56  ;;  %5944 = vmatpush1.msra.mxu1 %v5755_v18  ;;  %v5778_v18 = vld [vmem:[#allocation2 + $0x5a8] sm:$0xff] }
0x175f   :  { %5936 = vmatprep.mubr.f32.mxu0 %v9837_v34  ;;  %5945 = vmatprep.subr.mxu1 %v5754_v2  ;;  %v5777_v2 = vld [vmem:[#allocation2 + $0x5a0] sm:$0xff] }
0x1760   :  { %5946 = vmatpush1.msra.mxu1 %v5753_v17  ;;  %v5776_v17 = vld [vmem:[#allocation2 + $0x598] sm:$0xff] }
0x1761   :  { %5937 = vmatmul.mubr.f32.gmra.mxu0 %v9838_v33  ;;  %5947 = vmatprep.subr.mxu1 %v5752_v44  ;;  %v5775_v44 = vld [vmem:[#allocation2 + $0x590] sm:$0xff] }
0x1762   :  { %5860 = vmatmul.mubr.f32.gmra.mxu1 %v9839_v1  ;;  %6120 = vmatprep.mubr.f32.mxu0 %v9701_v49 }
0x1763   :  { %5948 = vmatpush1.msra.mxu1 %v5751_v26  ;;  %6007 = vmatprep.mubr.f32.mxu1 %v9263_v23  ;;  %v5774_v26 = vld [vmem:[#allocation2 + $0x588] sm:$0xff] }
0x1764   :  { %5949 = vmatprep.subr.mxu1 %v5750_v22  ;;  %v5773_v22 = vld [vmem:[#allocation2 + $0x580] sm:$0xff] }
0x1765   :  { %5950 = vmatpush1.msra.mxu1 %v5749_v59  ;;  %v5772_v59 = vld [vmem:[#allocation2 + $0x578] sm:$0xff] }
0x1766   :  { %5951 = vmatprep.subr.mxu1 %v5748_v60  ;;  %v5771_v60 = vld [vmem:[#allocation2 + $0x570] sm:$0xff] }
0x1767   :  { %5952 = vmatpush1.msra.mxu1 %v5747_v30  ;;  %v5770_v30 = vld [vmem:[#allocation2 + $0x568] sm:$0xff] }
0x1768   :  { %5953 = vmatprep.subr.mxu1 %v5746_v43  ;;  %v5769_v43 = vld [vmem:[#allocation2 + $0x560] sm:$0xff] }
0x1769   :  { %5954 = vmatpush1.msra.mxu1 %v5745_v11  ;;  %v5768_v11 = vld [vmem:[#allocation2 + $0x558] sm:$0xff] }
0x176a   :  { %5955 = vmatprep.subr.mxu1 %v5744_v36  ;;  %v5767_v36 = vld [vmem:[#allocation2 + $0x550] sm:$0xff] }
0x176b   :  { %5956 = vmatpush1.msra.mxu1 %v5743_v55  ;;  %v5766_v55 = vld [vmem:[#allocation2 + $0x548] sm:$0xff] }
0x176c   :  { %5957 = vmatprep.subr.mxu1 %v5742_v3  ;;  %v5765_v3 = vld [vmem:[#allocation2 + $0x540] sm:$0xff] }
0x176d   :  { %5958 = vmatpush1.msra.mxu1 %v5741_v28  ;;  %v5764_v28 = vld [vmem:[#allocation2 + $0x538] sm:$0xff] }
0x176e   :  { %5959 = vmatprep.subr.mxu1 %v5740_v19  ;;  %v5763_v19 = vld [vmem:[#allocation2 + $0x530] sm:$0xff] }
0x176f   :  { %5960 = vmatpush1.msra.mxu1 %v5739_v10  ;;  %v5762_v10 = vld [vmem:[#allocation2 + $0x528] sm:$0xff] }
0x1770   :  { %5961 = vmatprep.subr.mxu1 %v5738_v24  ;;  %v5761_v24 = vld [vmem:[#allocation2 + $0x520] sm:$0xff] }
0x1771   :  { %5962 = vmatpush1.msra.mxu1 %v5737_v7  ;;  %v5760_v7 = vld [vmem:[#allocation2 + $0x518] sm:$0xff] }
0x1772   :  { %5963 = vmatprep.subr.mxu1 %v5736_v61  ;;  %v5759_v61 = vld [vmem:[#allocation2 + $0x510] sm:$0xff] }
0x1773   :  { %5964 = vmatpush1.msra.mxu1 %v5735_v13  ;;  %v5758_v13 = vld [vmem:[#allocation2 + $0x508] sm:$0xff] }
0x1774   :  { %5965 = vmatprep.subr.mxu1 %v5734_v15  ;;  %v5757_v15 = vld [vmem:[#allocation2 + $0x500] sm:$0xff] }
0x1775   :  { %5966 = vmatpush1.msra.mxu1 %v5733_v12 }
0x1776   :  { %5967 = vmatprep.subr.mxu1 %v5732_v57 }
0x1777   :  { %5968 = vmatpush1.msra.mxu1 %v5731_v32 }
0x1778   :  { %5969 = vmatprep.subr.mxu1 %v5730_v14 }
0x1779   :  { %5970 = vmatpush1.msra.mxu1 %v5729_v16 }
0x177a   :  { %5971 = vmatprep.subr.mxu1 %v5728_v20 }
0x177b   :  { %5972 = vmatpush1.msra.mxu1 %v5727_v38 }
0x177c   :  { %5973 = vmatprep.subr.mxu1 %v5726_v40 }
0x177d   :  { %5974 = vmatpush1.msra.mxu1 %v5725_v42 }
0x177e   :  { %5975 = vmatprep.subr.mxu1 %v5788_v29 }
0x177f   :  { %5976 = vmatpush2.msra.mxu1 %v5787_v45 }
0x1780   :  { %5977 = vmatprep.subr.mxu1 %v5786_v4 }
0x1781   :  { %5978 = vmatpush2.msra.mxu1 %v5785_v46 }
0x1782   :  { %5979 = vmatprep.subr.mxu1 %v5784_v9 }
0x1783   :  { %5980 = vmatpush2.msra.mxu1 %v5783_v47 }
0x1784   :  { %5981 = vmatprep.subr.mxu1 %v5782_v0 }
0x1785   :  { %5982 = vmatpush2.msra.mxu1 %v5781_v27 }
0x1786   :  { %5983 = vmatprep.subr.mxu1 %v5780_v31 }
0x1787   :  { %5984 = vmatpush2.msra.mxu1 %v5779_v37 }
0x1788   :  { %5985 = vmatprep.subr.mxu1 %v5778_v18 }
0x1789   :  { %5986 = vmatpush2.msra.mxu1 %v5777_v2 }
0x178a   :  { %5987 = vmatprep.subr.mxu1 %v5776_v17 }
0x178b   :  { %5988 = vmatpush2.msra.mxu1 %v5775_v44 }
0x178c   :  { %5989 = vmatprep.subr.mxu1 %v5774_v26 }
0x178d   :  { %5990 = vmatpush2.msra.mxu1 %v5773_v22 }
0x178e   :  { %5991 = vmatprep.subr.mxu1 %v5772_v59 }
0x178f   :  { %5992 = vmatpush2.msra.mxu1 %v5771_v60  ;;  %v9840_v60 = vld [vmem:[#allocation68_spill] sm:$0xff] }
0x1790   :  { %5993 = vmatprep.subr.mxu1 %v5770_v30 }
0x1791   :  { %5994 = vmatpush2.msra.mxu1 %v5769_v43 }
0x1792   :  { %5995 = vmatprep.subr.mxu1 %v5768_v11  ;;  %v9841_v11 = vld [vmem:[#allocation77_spill] sm:$0xff] }
0x1793   :  { %5996 = vmatpush2.msra.mxu1 %v5767_v36  ;;  %v9842_v36 = vld [vmem:[#allocation78_spill] sm:$0xff] }
0x1794   :  { %5997 = vmatprep.subr.mxu1 %v5766_v55 }
0x1795   :  { %5998 = vmatpush2.msra.mxu1 %v5765_v3  ;;  %v6037_v3 = vld [vmem:[#allocation10 + $0x8] sm:$0xff] }
0x1796   :  { %5999 = vmatprep.subr.mxu1 %v5764_v28 }
0x1797   :  { %6000 = vmatpush2.msra.mxu1 %v5763_v19 }
0x1798   :  { %6001 = vmatprep.subr.mxu1 %v5762_v10  ;;  %v6038_v10 = vld [vmem:[#allocation10 + $0x30] sm:$0xff] }
0x1799   :  { %6002 = vmatpush2.msra.mxu1 %v5761_v24 }
0x179a   :  { %6003 = vmatprep.subr.mxu1 %v5760_v7 }
0x179b   :  { %6004 = vmatpush2.msra.mxu1 %v5759_v61  ;;  %v6039_v61 = vld [vmem:[#allocation10 + $0x38] sm:$0xff] }
0x179c   :  { %6005 = vmatprep.subr.mxu1 %v5758_v13 }
0x179d   :  { %6006 = vmatpush2.msra.mxu1 %v5757_v15 }
0x179e   :  { %6008 = vmatmul.mubr.f32.vlgmr.msra.gmra.mxu1 %v9266_v54 }
0x179f   :  { %6013 = vmatprep.mubr.f32.mxu1 %v9259_v21 }
0x17a2   :  { %6014 = vmatmul.mubr.f32.gmra.mxu1 %v9261_v25 }
0x181c   :  { %v5855_v12 = vpop.f32.mrf.mxu1 }
0x181d   :  { %v5932_v57 = vpop.f32.mrf.mxu0 }
0x181e   :  { %v5857_v32 = vpop.f32.mrf.mxu1  ;;  %v5933_v46 = vadd.f32 %v5932_v57, %v5855_v12  ;;  %v6040_v12 = vld [vmem:[#allocation10 + $0x60] sm:$0xff] }
0x181f   :  { %v5934_v16 = vpop.f32.mrf.mxu0 }
0x1820   :  { %v5935_v45 = vadd.f32 %v5934_v16, %v5857_v32 }
0x1821   :  { %v5938_v20 = vpop.f32.mrf.mxu0 }
0x1822   :  { %v5861_v14 = vpop.f32.mrf.mxu1 }
0x1823   :  { %v5940_v42 = vpop.f32.mrf.mxu0  ;;  %v5939_v4 = vadd.f32 %v5938_v20, %v5861_v14  ;;  %v6041_v14 = vld [vmem:[#allocation10 + $0x68] sm:$0xff] }
0x1824   :  { %v5863_v38 = vpop.f32.mrf.mxu1 }
0x1825   :  { %v5941_v47 = vadd.f32 %v5940_v42, %v5863_v38  ;;  %v6042_v38 = vld [vmem:[#allocation10 + $0x90] sm:$0xff] }
0x185e   :  { %v6009_v40 = vpop.f32.mrf.mxu1 }
0x185f   :  { %v6010_v31 = vadd.f32 %v6009_v40, %v5933_v46 }
0x1860   :  { %v6011_v29 = vpop.f32.mrf.mxu1 }
0x1861   :  { %v6012_v0 = vadd.f32 %v6011_v29, %v5935_v45  ;;  %v6020_v26 = vmul.f32 2.0, %v6010_v31  ;;  %v6043_v29 = vld [vmem:[#allocation10 + $0x98] sm:$0xff] }
0x1862   :  { %v6015_v9 = vpop.f32.mrf.mxu1 }
0x1863   :  { %v6016_v27 = vadd.f32 %v6015_v9, %v5939_v4  ;;  %v6021_v17 = vmul.f32 2.0, %v6012_v0  ;;  %v6028_v43 = vsub.f32 %v6020_v26, %v8867_v6  ;;  %v6036_v6 = vld [vmem:[#allocation10] sm:$0xff] }
0x1864   :  { %v6017_v37 = vpop.f32.mrf.mxu1 }
0x1865   :  { %v6018_v18 = vadd.f32 %v6017_v37, %v5941_v47  ;;  %v6022_v2 = vmul.f32 2.0, %v6016_v27  ;;  %v6029_v30 = vsub.f32 %v6021_v17, %v9840_v60 }
0x1867   :  { %v6023_v44 = vmul.f32 2.0, %v6018_v18  ;;  %v6030_v59 = vsub.f32 %v6022_v2, %v8853_v41  ;;  %v9844_v41 = vld [vmem:[#allocation53_spill] sm:$0xff] }
0x1869   :  { %v6031_v22 = vsub.f32 %v6023_v44, %v8849_v53  ;;  %v9843_v53 = vld [vmem:[#allocation79_spill] sm:$0xff] }
0x186b   :  { %6084 = vmatprep.subr.mxu0 %v6031_v22 }
0x186c   :  { %6085 = vmatpush1.msra.mxu0 %v6030_v59 }
0x186d   :  { %6086 = vmatprep.subr.mxu0 %v6029_v30 }
0x186e   :  { %6087 = vmatpush1.msra.mxu0 %v6028_v43 }
0x186f   :  { %7636 = vmatmul.mubr.msk.f32.vlgmr.msra.gmra.mxu0 %vm3576_vm1, %v9841_v11 }
0x1870   :  { %6126 = vmatprep.mubr.f32.mxu0 %v9701_v49 }
0x1873   :  { %7637 = vmatmul.mubr.msk.f32.gmra.mxu0 %vm3576_vm1, %v9842_v36 }
0x1874   :  { %6132 = vmatprep.mubr.f32.mxu0 %v9701_v49 }
0x1877   :  { %7638 = vmatmul.mubr.msk.f32.gmra.mxu0 %vm3576_vm1, %v9843_v53 }
0x1878   :  { %6138 = vmatprep.mubr.f32.mxu0 %v9701_v49 }
0x187b   :  { %7639 = vmatmul.mubr.msk.f32.gmra.mxu0 %vm3576_vm1, %v9844_v41 }
0x192f   :  { %v6122_v55 = vpop.f32.mrf.mxu0 }
0x1930   :  { %v6145_v28 = vadd.f32 %v6122_v55, %v6036_v6 }
0x1931   :  { %v6124_v19 = vpop.f32.mrf.mxu0 }
0x1932   :  { %6153 = vst [vmem:[#allocation10] sm:$0xff] %v6145_v28  ;;  %v6146_v24 = vadd.f32 %v6124_v19, %v6037_v3 }
0x1933   :  { %v6128_v7 = vpop.f32.mrf.mxu0 }
0x1934   :  { %6154 = vst [vmem:[#allocation10 + $0x8] sm:$0xff] %v6146_v24  ;;  %v6147_v13 = vadd.f32 %v6128_v7, %v6038_v10 }
0x1935   :  { %v6130_v15 = vpop.f32.mrf.mxu0 }
0x1936   :  { %6155 = vst [vmem:[#allocation10 + $0x30] sm:$0xff] %v6147_v13  ;;  %v6148_v57 = vadd.f32 %v6130_v15, %v6039_v61 }
0x1937   :  { %v6134_v32 = vpop.f32.mrf.mxu0 }
0x1938   :  { %6156 = vst [vmem:[#allocation10 + $0x38] sm:$0xff] %v6148_v57  ;;  %v6149_v16 = vadd.f32 %v6134_v32, %v6040_v12 }
0x1939   :  { %v6136_v20 = vpop.f32.mrf.mxu0 }
0x193a   :  { %6157 = vst [vmem:[#allocation10 + $0x60] sm:$0xff] %v6149_v16  ;;  %v6150_v40 = vadd.f32 %v6136_v20, %v6041_v14 }
0x193b   :  { %v6140_v42 = vpop.f32.mrf.mxu0 }
0x193c   :  { %6158 = vst [vmem:[#allocation10 + $0x68] sm:$0xff] %v6150_v40  ;;  %v6151_v45 = vadd.f32 %v6140_v42, %v6042_v38 }
0x193d   :  { %v6142_v4 = vpop.f32.mrf.mxu0 }
0x193e   :  { %6159 = vst [vmem:[#allocation10 + $0x90] sm:$0xff] %v6151_v45  ;;  %v6152_v46 = vadd.f32 %v6142_v4, %v6043_v29 }
0x1940   :  { %6160 = vst [vmem:[#allocation10 + $0x98] sm:$0xff] %v6152_v46 }
0x1941   :  { %7995 = dma.done.wait [#allocation3 + $0x1], 24576 }
0x1942   :  { %7996 = vsyncadd [#allocation3 + $0x1], 4294942720  ;;  %6430 = vmatprep.mubr.f32.mxu0 %v9832_v52  ;;  %6507 = vmatprep.mubr.f32.mxu1 %v9833_v48 }
0x1943   :  { %7951 = shalt.err (!%p8126_p9)  }
0x1944   :  { %6173 = dma.hbm_to_vmem [thread:$0]  %s8214_s1, 24576, %s8117_s27, [#allocation3] }
0x1945   :  { %v6205_v9 = vld [vmem:[#allocation2 + $0x6f8] sm:$0xff]  ;;  %v6204_v0 = vld [vmem:[#allocation2 + $0x6f0] sm:$0xff]  ;;  %v6203_v31 = vld [vmem:[#allocation2 + $0x6e8] sm:$0xff] }
0x1946   :  { %v6269_v47 = vld [vmem:[#allocation2 + $0x8f8] sm:$0xff]  ;;  %6366 = vmatprep.subr.mxu0 %v6205_v9  ;;  %v6268_v27 = vld [vmem:[#allocation2 + $0x8f0] sm:$0xff]  ;;  %v6267_v37 = vld [vmem:[#allocation2 + $0x8e8] sm:$0xff] }
0x1947   :  { %6443 = vmatprep.subr.mxu1 %v6269_v47  ;;  %6367 = vmatpush1.msra.mxu0 %v6204_v0  ;;  %v6202_v18 = vld [vmem:[#allocation2 + $0x6e0] sm:$0xff]  ;;  %v6201_v17 = vld [vmem:[#allocation2 + $0x6d8] sm:$0xff]  ;;  %v6200_v26 = vld [vmem:[#allocation2 + $0x6d0] sm:$0xff] }
0x1948   :  { %6444 = vmatpush1.msra.mxu1 %v6268_v27  ;;  %v6266_v2 = vld [vmem:[#allocation2 + $0x8e0] sm:$0xff]  ;;  %6368 = vmatprep.subr.mxu0 %v6203_v31  ;;  %v6265_v44 = vld [vmem:[#allocation2 + $0x8d8] sm:$0xff]  ;;  %v6264_v22 = vld [vmem:[#allocation2 + $0x8d0] sm:$0xff] }
0x1949   :  { %6445 = vmatprep.subr.mxu1 %v6267_v37  ;;  %6369 = vmatpush1.msra.mxu0 %v6202_v18  ;;  %v6199_v59 = vld [vmem:[#allocation2 + $0x6c8] sm:$0xff]  ;;  %v6198_v30 = vld [vmem:[#allocation2 + $0x6c0] sm:$0xff]  ;;  %v6197_v6 = vld [vmem:[#allocation2 + $0x6b8] sm:$0xff] }
0x194a   :  { %6446 = vmatpush1.msra.mxu1 %v6266_v2  ;;  %v6263_v60 = vld [vmem:[#allocation2 + $0x8c8] sm:$0xff]  ;;  %6370 = vmatprep.subr.mxu0 %v6201_v17  ;;  %v6262_v43 = vld [vmem:[#allocation2 + $0x8c0] sm:$0xff]  ;;  %v6261_v55 = vld [vmem:[#allocation2 + $0x8b8] sm:$0xff] }
0x194b   :  { %6447 = vmatprep.subr.mxu1 %v6265_v44  ;;  %6371 = vmatpush1.msra.mxu0 %v6200_v26  ;;  %v6196_v3 = vld [vmem:[#allocation2 + $0x6b0] sm:$0xff]  ;;  %v6195_v19 = vld [vmem:[#allocation2 + $0x6a8] sm:$0xff]  ;;  %v6194_v24 = vld [vmem:[#allocation2 + $0x6a0] sm:$0xff] }
0x194c   :  { %6448 = vmatpush1.msra.mxu1 %v6264_v22  ;;  %6372 = vmatprep.subr.mxu0 %v6199_v59  ;;  %v6260_v28 = vld [vmem:[#allocation2 + $0x8b0] sm:$0xff]  ;;  %v6259_v10 = vld [vmem:[#allocation2 + $0x8a8] sm:$0xff]  ;;  %v6258_v7 = vld [vmem:[#allocation2 + $0x8a0] sm:$0xff] }
0x194d   :  { %6449 = vmatprep.subr.mxu1 %v6263_v60  ;;  %6373 = vmatpush1.msra.mxu0 %v6198_v30  ;;  %v6193_v61 = vld [vmem:[#allocation2 + $0x698] sm:$0xff]  ;;  %v6192_v15 = vld [vmem:[#allocation2 + $0x690] sm:$0xff]  ;;  %v6191_v57 = vld [vmem:[#allocation2 + $0x688] sm:$0xff] }
0x194e   :  { %6450 = vmatpush1.msra.mxu1 %v6262_v43  ;;  %6374 = vmatprep.subr.mxu0 %v6197_v6  ;;  %v6257_v13 = vld [vmem:[#allocation2 + $0x898] sm:$0xff]  ;;  %v6256_v12 = vld [vmem:[#allocation2 + $0x890] sm:$0xff]  ;;  %v6255_v32 = vld [vmem:[#allocation2 + $0x888] sm:$0xff] }
0x194f   :  { %6451 = vmatprep.subr.mxu1 %v6261_v55  ;;  %6375 = vmatpush1.msra.mxu0 %v6196_v3  ;;  %v6190_v14 = vld [vmem:[#allocation2 + $0x680] sm:$0xff]  ;;  %v6189_v20 = vld [vmem:[#allocation2 + $0x678] sm:$0xff]  ;;  %v6188_v40 = vld [vmem:[#allocation2 + $0x670] sm:$0xff] }
0x1950   :  { %6452 = vmatpush1.msra.mxu1 %v6260_v28  ;;  %6376 = vmatprep.subr.mxu0 %v6195_v19  ;;  %v6254_v16 = vld [vmem:[#allocation2 + $0x880] sm:$0xff]  ;;  %v6253_v38 = vld [vmem:[#allocation2 + $0x878] sm:$0xff]  ;;  %v6252_v42 = vld [vmem:[#allocation2 + $0x870] sm:$0xff] }
0x1951   :  { %6453 = vmatprep.subr.mxu1 %v6259_v10  ;;  %6377 = vmatpush1.msra.mxu0 %v6194_v24  ;;  %v6187_v29 = vld [vmem:[#allocation2 + $0x668] sm:$0xff]  ;;  %v6186_v4 = vld [vmem:[#allocation2 + $0x660] sm:$0xff]  ;;  %v6185_v9 = vld [vmem:[#allocation2 + $0x658] sm:$0xff] }
0x1952   :  { %6454 = vmatpush1.msra.mxu1 %v6258_v7  ;;  %6378 = vmatprep.subr.mxu0 %v6193_v61  ;;  %v6251_v45 = vld [vmem:[#allocation2 + $0x868] sm:$0xff]  ;;  %v6250_v46 = vld [vmem:[#allocation2 + $0x860] sm:$0xff]  ;;  %v6249_v47 = vld [vmem:[#allocation2 + $0x858] sm:$0xff] }
0x1953   :  { %6455 = vmatprep.subr.mxu1 %v6257_v13  ;;  %6379 = vmatpush1.msra.mxu0 %v6192_v15  ;;  %v6184_v0 = vld [vmem:[#allocation2 + $0x650] sm:$0xff]  ;;  %v6183_v31 = vld [vmem:[#allocation2 + $0x648] sm:$0xff]  ;;  %v6182_v18 = vld [vmem:[#allocation2 + $0x640] sm:$0xff] }
0x1954   :  { %6456 = vmatpush1.msra.mxu1 %v6256_v12  ;;  %6380 = vmatprep.subr.mxu0 %v6191_v57  ;;  %v6248_v27 = vld [vmem:[#allocation2 + $0x850] sm:$0xff]  ;;  %v6247_v37 = vld [vmem:[#allocation2 + $0x848] sm:$0xff]  ;;  %v6246_v2 = vld [vmem:[#allocation2 + $0x840] sm:$0xff] }
0x1955   :  { %6457 = vmatprep.subr.mxu1 %v6255_v32  ;;  %6381 = vmatpush1.msra.mxu0 %v6190_v14  ;;  %v6181_v17 = vld [vmem:[#allocation2 + $0x638] sm:$0xff]  ;;  %v6180_v26 = vld [vmem:[#allocation2 + $0x630] sm:$0xff]  ;;  %v6179_v59 = vld [vmem:[#allocation2 + $0x628] sm:$0xff] }
0x1956   :  { %6458 = vmatpush1.msra.mxu1 %v6254_v16  ;;  %6382 = vmatprep.subr.mxu0 %v6189_v20  ;;  %v6245_v44 = vld [vmem:[#allocation2 + $0x838] sm:$0xff]  ;;  %v6244_v22 = vld [vmem:[#allocation2 + $0x830] sm:$0xff]  ;;  %v6243_v60 = vld [vmem:[#allocation2 + $0x828] sm:$0xff] }
0x1957   :  { %6459 = vmatprep.subr.mxu1 %v6253_v38  ;;  %6383 = vmatpush1.msra.mxu0 %v6188_v40  ;;  %v6178_v30 = vld [vmem:[#allocation2 + $0x620] sm:$0xff]  ;;  %v6177_v6 = vld [vmem:[#allocation2 + $0x618] sm:$0xff]  ;;  %v6176_v3 = vld [vmem:[#allocation2 + $0x610] sm:$0xff] }
0x1958   :  { %6460 = vmatpush1.msra.mxu1 %v6252_v42  ;;  %6384 = vmatprep.subr.mxu0 %v6187_v29  ;;  %v6242_v43 = vld [vmem:[#allocation2 + $0x820] sm:$0xff]  ;;  %v6241_v55 = vld [vmem:[#allocation2 + $0x818] sm:$0xff]  ;;  %v6240_v28 = vld [vmem:[#allocation2 + $0x810] sm:$0xff] }
0x1959   :  { %6461 = vmatprep.subr.mxu1 %v6251_v45  ;;  %6385 = vmatpush1.msra.mxu0 %v6186_v4  ;;  %v6175_v19 = vld [vmem:[#allocation2 + $0x608] sm:$0xff]  ;;  %v6174_v24 = vld [vmem:[#allocation2 + $0x600] sm:$0xff]  ;;  %v6237_v61 = vld [vmem:[#allocation2 + $0x7f8] sm:$0xff] }
0x195a   :  { %6462 = vmatpush1.msra.mxu1 %v6250_v46  ;;  %6386 = vmatprep.subr.mxu0 %v6185_v9  ;;  %v6239_v10 = vld [vmem:[#allocation2 + $0x808] sm:$0xff]  ;;  %v6238_v7 = vld [vmem:[#allocation2 + $0x800] sm:$0xff]  ;;  %v6301_v13 = vld [vmem:[#allocation2 + $0x9f8] sm:$0xff] }
0x195b   :  { %6463 = vmatprep.subr.mxu1 %v6249_v47  ;;  %6387 = vmatpush1.msra.mxu0 %v6184_v0  ;;  %v6236_v15 = vld [vmem:[#allocation2 + $0x7f0] sm:$0xff]  ;;  %v6235_v57 = vld [vmem:[#allocation2 + $0x7e8] sm:$0xff]  ;;  %v6234_v14 = vld [vmem:[#allocation2 + $0x7e0] sm:$0xff] }
0x195c   :  { %6464 = vmatpush1.msra.mxu1 %v6248_v27  ;;  %6388 = vmatprep.subr.mxu0 %v6183_v31  ;;  %v6300_v12 = vld [vmem:[#allocation2 + $0x9f0] sm:$0xff]  ;;  %v6299_v32 = vld [vmem:[#allocation2 + $0x9e8] sm:$0xff]  ;;  %v6298_v16 = vld [vmem:[#allocation2 + $0x9e0] sm:$0xff] }
0x195d   :  { %6465 = vmatprep.subr.mxu1 %v6247_v37  ;;  %6389 = vmatpush1.msra.mxu0 %v6182_v18  ;;  %v6233_v20 = vld [vmem:[#allocation2 + $0x7d8] sm:$0xff]  ;;  %v6232_v40 = vld [vmem:[#allocation2 + $0x7d0] sm:$0xff]  ;;  %v6231_v29 = vld [vmem:[#allocation2 + $0x7c8] sm:$0xff] }
0x195e   :  { %6466 = vmatpush1.msra.mxu1 %v6246_v2  ;;  %6390 = vmatprep.subr.mxu0 %v6181_v17  ;;  %v6297_v38 = vld [vmem:[#allocation2 + $0x9d8] sm:$0xff]  ;;  %v6296_v42 = vld [vmem:[#allocation2 + $0x9d0] sm:$0xff]  ;;  %v6295_v45 = vld [vmem:[#allocation2 + $0x9c8] sm:$0xff] }
0x195f   :  { %6467 = vmatprep.subr.mxu1 %v6245_v44  ;;  %6391 = vmatpush1.msra.mxu0 %v6180_v26  ;;  %v6230_v4 = vld [vmem:[#allocation2 + $0x7c0] sm:$0xff]  ;;  %v6229_v9 = vld [vmem:[#allocation2 + $0x7b8] sm:$0xff]  ;;  %v6228_v0 = vld [vmem:[#allocation2 + $0x7b0] sm:$0xff] }
0x1960   :  { %6468 = vmatpush1.msra.mxu1 %v6244_v22  ;;  %6392 = vmatprep.subr.mxu0 %v6179_v59  ;;  %v6294_v46 = vld [vmem:[#allocation2 + $0x9c0] sm:$0xff]  ;;  %v6293_v47 = vld [vmem:[#allocation2 + $0x9b8] sm:$0xff]  ;;  %v6292_v27 = vld [vmem:[#allocation2 + $0x9b0] sm:$0xff] }
0x1961   :  { %6469 = vmatprep.subr.mxu1 %v6243_v60  ;;  %6393 = vmatpush1.msra.mxu0 %v6178_v30  ;;  %v6227_v31 = vld [vmem:[#allocation2 + $0x7a8] sm:$0xff]  ;;  %v6226_v18 = vld [vmem:[#allocation2 + $0x7a0] sm:$0xff]  ;;  %v6225_v17 = vld [vmem:[#allocation2 + $0x798] sm:$0xff] }
0x1962   :  { %6470 = vmatpush1.msra.mxu1 %v6242_v43  ;;  %6394 = vmatprep.subr.mxu0 %v6177_v6  ;;  %v6291_v37 = vld [vmem:[#allocation2 + $0x9a8] sm:$0xff]  ;;  %v6290_v2 = vld [vmem:[#allocation2 + $0x9a0] sm:$0xff]  ;;  %v6289_v44 = vld [vmem:[#allocation2 + $0x998] sm:$0xff] }
0x1963   :  { %6471 = vmatprep.subr.mxu1 %v6241_v55  ;;  %6395 = vmatpush1.msra.mxu0 %v6176_v3  ;;  %v6224_v26 = vld [vmem:[#allocation2 + $0x790] sm:$0xff]  ;;  %v6223_v59 = vld [vmem:[#allocation2 + $0x788] sm:$0xff]  ;;  %v6222_v30 = vld [vmem:[#allocation2 + $0x780] sm:$0xff] }
0x1964   :  { %6472 = vmatpush1.msra.mxu1 %v6240_v28  ;;  %6396 = vmatprep.subr.mxu0 %v6175_v19  ;;  %v6288_v22 = vld [vmem:[#allocation2 + $0x990] sm:$0xff]  ;;  %v6287_v60 = vld [vmem:[#allocation2 + $0x988] sm:$0xff]  ;;  %v6286_v43 = vld [vmem:[#allocation2 + $0x980] sm:$0xff] }
0x1965   :  { %6473 = vmatprep.subr.mxu1 %v6239_v10  ;;  %6397 = vmatpush1.msra.mxu0 %v6174_v24  ;;  %v6221_v6 = vld [vmem:[#allocation2 + $0x778] sm:$0xff]  ;;  %v6220_v3 = vld [vmem:[#allocation2 + $0x770] sm:$0xff]  ;;  %v6219_v19 = vld [vmem:[#allocation2 + $0x768] sm:$0xff] }
0x1966   :  { %6474 = vmatpush1.msra.mxu1 %v6238_v7  ;;  %6398 = vmatprep.subr.mxu0 %v6237_v61  ;;  %v6285_v55 = vld [vmem:[#allocation2 + $0x978] sm:$0xff]  ;;  %v6284_v28 = vld [vmem:[#allocation2 + $0x970] sm:$0xff]  ;;  %v6283_v10 = vld [vmem:[#allocation2 + $0x968] sm:$0xff] }
0x1967   :  { %6475 = vmatprep.subr.mxu1 %v6301_v13  ;;  %6399 = vmatpush2.msra.mxu0 %v6236_v15  ;;  %v6218_v24 = vld [vmem:[#allocation2 + $0x760] sm:$0xff]  ;;  %v6217_v61 = vld [vmem:[#allocation2 + $0x758] sm:$0xff]  ;;  %v6216_v15 = vld [vmem:[#allocation2 + $0x750] sm:$0xff] }
0x1968   :  { %6476 = vmatpush2.msra.mxu1 %v6300_v12  ;;  %6400 = vmatprep.subr.mxu0 %v6235_v57  ;;  %v6282_v7 = vld [vmem:[#allocation2 + $0x960] sm:$0xff]  ;;  %v6281_v13 = vld [vmem:[#allocation2 + $0x958] sm:$0xff]  ;;  %v6280_v12 = vld [vmem:[#allocation2 + $0x950] sm:$0xff] }
0x1969   :  { %6477 = vmatprep.subr.mxu1 %v6299_v32  ;;  %6401 = vmatpush2.msra.mxu0 %v6234_v14  ;;  %v6215_v57 = vld [vmem:[#allocation2 + $0x748] sm:$0xff]  ;;  %v6214_v14 = vld [vmem:[#allocation2 + $0x740] sm:$0xff] }
0x196a   :  { %6478 = vmatpush2.msra.mxu1 %v6298_v16  ;;  %6402 = vmatprep.subr.mxu0 %v6233_v20  ;;  %v6279_v32 = vld [vmem:[#allocation2 + $0x948] sm:$0xff]  ;;  %v6278_v16 = vld [vmem:[#allocation2 + $0x940] sm:$0xff]  ;;  %v6213_v20 = vld [vmem:[#allocation2 + $0x738] sm:$0xff] }
0x196b   :  { %6479 = vmatprep.subr.mxu1 %v6297_v38  ;;  %6403 = vmatpush2.msra.mxu0 %v6232_v40  ;;  %v6277_v38 = vld [vmem:[#allocation2 + $0x938] sm:$0xff]  ;;  %v6212_v40 = vld [vmem:[#allocation2 + $0x730] sm:$0xff] }
0x196c   :  { %6480 = vmatpush2.msra.mxu1 %v6296_v42  ;;  %6404 = vmatprep.subr.mxu0 %v6231_v29  ;;  %v6276_v42 = vld [vmem:[#allocation2 + $0x930] sm:$0xff]  ;;  %v6211_v29 = vld [vmem:[#allocation2 + $0x728] sm:$0xff] }
0x196d   :  { %6481 = vmatprep.subr.mxu1 %v6295_v45  ;;  %6405 = vmatpush2.msra.mxu0 %v6230_v4  ;;  %v6275_v45 = vld [vmem:[#allocation2 + $0x928] sm:$0xff]  ;;  %v6210_v4 = vld [vmem:[#allocation2 + $0x720] sm:$0xff] }
0x196e   :  { %6482 = vmatpush2.msra.mxu1 %v6294_v46  ;;  %6406 = vmatprep.subr.mxu0 %v6229_v9  ;;  %v6274_v46 = vld [vmem:[#allocation2 + $0x920] sm:$0xff]  ;;  %v6209_v9 = vld [vmem:[#allocation2 + $0x718] sm:$0xff] }
0x196f   :  { %6483 = vmatprep.subr.mxu1 %v6293_v47  ;;  %6407 = vmatpush2.msra.mxu0 %v6228_v0  ;;  %v6273_v47 = vld [vmem:[#allocation2 + $0x918] sm:$0xff]  ;;  %v6208_v0 = vld [vmem:[#allocation2 + $0x710] sm:$0xff] }
0x1970   :  { %6484 = vmatpush2.msra.mxu1 %v6292_v27  ;;  %6408 = vmatprep.subr.mxu0 %v6227_v31  ;;  %v6272_v27 = vld [vmem:[#allocation2 + $0x910] sm:$0xff]  ;;  %v6207_v31 = vld [vmem:[#allocation2 + $0x708] sm:$0xff] }
0x1971   :  { %6485 = vmatprep.subr.mxu1 %v6291_v37  ;;  %6409 = vmatpush2.msra.mxu0 %v6226_v18  ;;  %v6271_v37 = vld [vmem:[#allocation2 + $0x908] sm:$0xff]  ;;  %v6206_v18 = vld [vmem:[#allocation2 + $0x700] sm:$0xff] }
0x1972   :  { %6486 = vmatpush2.msra.mxu1 %v6290_v2  ;;  %6410 = vmatprep.subr.mxu0 %v6225_v17  ;;  %v6270_v2 = vld [vmem:[#allocation2 + $0x900] sm:$0xff]  ;;  %v6333_v17 = vld [vmem:[#allocation2 + $0xaf8] sm:$0xff] }
0x1973   :  { %6487 = vmatprep.subr.mxu1 %v6289_v44  ;;  %6411 = vmatpush2.msra.mxu0 %v6224_v26  ;;  %v6332_v44 = vld [vmem:[#allocation2 + $0xaf0] sm:$0xff]  ;;  %v6331_v26 = vld [vmem:[#allocation2 + $0xae8] sm:$0xff] }
0x1974   :  { %6488 = vmatpush2.msra.mxu1 %v6288_v22  ;;  %6412 = vmatprep.subr.mxu0 %v6223_v59  ;;  %v6330_v22 = vld [vmem:[#allocation2 + $0xae0] sm:$0xff]  ;;  %v6329_v59 = vld [vmem:[#allocation2 + $0xad8] sm:$0xff] }
0x1975   :  { %6489 = vmatprep.subr.mxu1 %v6287_v60  ;;  %6413 = vmatpush2.msra.mxu0 %v6222_v30  ;;  %v6328_v60 = vld [vmem:[#allocation2 + $0xad0] sm:$0xff]  ;;  %v6327_v30 = vld [vmem:[#allocation2 + $0xac8] sm:$0xff] }
0x1976   :  { %6490 = vmatpush2.msra.mxu1 %v6286_v43  ;;  %6414 = vmatprep.subr.mxu0 %v6221_v6  ;;  %v6326_v43 = vld [vmem:[#allocation2 + $0xac0] sm:$0xff]  ;;  %v6325_v6 = vld [vmem:[#allocation2 + $0xab8] sm:$0xff] }
0x1977   :  { %6491 = vmatprep.subr.mxu1 %v6285_v55  ;;  %6415 = vmatpush2.msra.mxu0 %v6220_v3  ;;  %v6324_v55 = vld [vmem:[#allocation2 + $0xab0] sm:$0xff]  ;;  %v6323_v3 = vld [vmem:[#allocation2 + $0xaa8] sm:$0xff] }
0x1978   :  { %6492 = vmatpush2.msra.mxu1 %v6284_v28  ;;  %6416 = vmatprep.subr.mxu0 %v6219_v19  ;;  %v6322_v28 = vld [vmem:[#allocation2 + $0xaa0] sm:$0xff]  ;;  %v6321_v19 = vld [vmem:[#allocation2 + $0xa98] sm:$0xff] }
0x1979   :  { %6493 = vmatprep.subr.mxu1 %v6283_v10  ;;  %6417 = vmatpush2.msra.mxu0 %v6218_v24  ;;  %v6320_v10 = vld [vmem:[#allocation2 + $0xa90] sm:$0xff]  ;;  %v6319_v24 = vld [vmem:[#allocation2 + $0xa88] sm:$0xff] }
0x197a   :  { %6494 = vmatpush2.msra.mxu1 %v6282_v7  ;;  %6418 = vmatprep.subr.mxu0 %v6217_v61  ;;  %v6318_v7 = vld [vmem:[#allocation2 + $0xa80] sm:$0xff]  ;;  %v6317_v61 = vld [vmem:[#allocation2 + $0xa78] sm:$0xff] }
0x197b   :  { %6495 = vmatprep.subr.mxu1 %v6281_v13  ;;  %6419 = vmatpush2.msra.mxu0 %v6216_v15  ;;  %v6316_v13 = vld [vmem:[#allocation2 + $0xa70] sm:$0xff]  ;;  %v6315_v15 = vld [vmem:[#allocation2 + $0xa68] sm:$0xff] }
0x197c   :  { %6496 = vmatpush2.msra.mxu1 %v6280_v12  ;;  %6420 = vmatprep.subr.mxu0 %v6215_v57  ;;  %v6314_v12 = vld [vmem:[#allocation2 + $0xa60] sm:$0xff]  ;;  %v6313_v57 = vld [vmem:[#allocation2 + $0xa58] sm:$0xff] }
0x197d   :  { %6497 = vmatprep.subr.mxu1 %v6279_v32  ;;  %6421 = vmatpush2.msra.mxu0 %v6214_v14  ;;  %v6312_v32 = vld [vmem:[#allocation2 + $0xa50] sm:$0xff]  ;;  %v6311_v14 = vld [vmem:[#allocation2 + $0xa48] sm:$0xff] }
0x197e   :  { %6498 = vmatpush2.msra.mxu1 %v6278_v16  ;;  %6422 = vmatprep.subr.mxu0 %v6213_v20  ;;  %v6310_v16 = vld [vmem:[#allocation2 + $0xa40] sm:$0xff]  ;;  %v6309_v20 = vld [vmem:[#allocation2 + $0xa38] sm:$0xff] }
0x197f   :  { %6499 = vmatprep.subr.mxu1 %v6277_v38  ;;  %6423 = vmatpush2.msra.mxu0 %v6212_v40  ;;  %v6308_v38 = vld [vmem:[#allocation2 + $0xa30] sm:$0xff]  ;;  %v6307_v40 = vld [vmem:[#allocation2 + $0xa28] sm:$0xff] }
0x1980   :  { %6500 = vmatpush2.msra.mxu1 %v6276_v42  ;;  %6424 = vmatprep.subr.mxu0 %v6211_v29  ;;  %v6306_v42 = vld [vmem:[#allocation2 + $0xa20] sm:$0xff]  ;;  %v6305_v29 = vld [vmem:[#allocation2 + $0xa18] sm:$0xff] }
0x1981   :  { %6501 = vmatprep.subr.mxu1 %v6275_v45  ;;  %6425 = vmatpush2.msra.mxu0 %v6210_v4  ;;  %v6304_v45 = vld [vmem:[#allocation2 + $0xa10] sm:$0xff]  ;;  %v6303_v4 = vld [vmem:[#allocation2 + $0xa08] sm:$0xff] }
0x1982   :  { %6502 = vmatpush2.msra.mxu1 %v6274_v46  ;;  %6426 = vmatprep.subr.mxu0 %v6209_v9  ;;  %v6302_v46 = vld [vmem:[#allocation2 + $0xa00] sm:$0xff]  ;;  %v6365_v9 = vld [vmem:[#allocation2 + $0xbf8] sm:$0xff] }
0x1983   :  { %6503 = vmatprep.subr.mxu1 %v6273_v47  ;;  %6427 = vmatpush2.msra.mxu0 %v6208_v0  ;;  %v6364_v47 = vld [vmem:[#allocation2 + $0xbf0] sm:$0xff]  ;;  %v6363_v0 = vld [vmem:[#allocation2 + $0xbe8] sm:$0xff] }
0x1984   :  { %6504 = vmatpush2.msra.mxu1 %v6272_v27  ;;  %6428 = vmatprep.subr.mxu0 %v6207_v31  ;;  %v6362_v27 = vld [vmem:[#allocation2 + $0xbe0] sm:$0xff]  ;;  %v6361_v31 = vld [vmem:[#allocation2 + $0xbd8] sm:$0xff] }
0x1985   :  { %6505 = vmatprep.subr.mxu1 %v6271_v37  ;;  %6429 = vmatpush2.msra.mxu0 %v6206_v18  ;;  %v6360_v37 = vld [vmem:[#allocation2 + $0xbd0] sm:$0xff]  ;;  %v6359_v18 = vld [vmem:[#allocation2 + $0xbc8] sm:$0xff] }
0x1986   :  { %6506 = vmatpush2.msra.mxu1 %v6270_v2  ;;  %6431 = vmatmul.mubr.f32.vlgmr.msra.gmra.mxu0 %v9834_v39  ;;  %v6358_v2 = vld [vmem:[#allocation2 + $0xbc0] sm:$0xff] }
0x1987   :  { %6508 = vmatmul.mubr.f32.vlgmr.msra.gmra.mxu1 %v9835_v35  ;;  %6520 = vmatprep.subr.mxu0 %v6333_v17  ;;  %v6357_v17 = vld [vmem:[#allocation2 + $0xbb8] sm:$0xff] }
0x1988   :  { %6436 = vmatprep.mubr.f32.mxu0 %v9836_v56  ;;  %6521 = vmatpush1.msra.mxu0 %v6332_v44  ;;  %v6356_v44 = vld [vmem:[#allocation2 + $0xbb0] sm:$0xff] }
0x1989   :  { %6513 = vmatprep.mubr.f32.mxu1 %v9837_v34  ;;  %6522 = vmatprep.subr.mxu0 %v6331_v26  ;;  %v6355_v26 = vld [vmem:[#allocation2 + $0xba8] sm:$0xff] }
0x198a   :  { %6523 = vmatpush1.msra.mxu0 %v6330_v22  ;;  %v6354_v22 = vld [vmem:[#allocation2 + $0xba0] sm:$0xff] }
0x198b   :  { %6514 = vmatmul.mubr.f32.gmra.mxu1 %v9838_v33  ;;  %6524 = vmatprep.subr.mxu0 %v6329_v59  ;;  %v6353_v59 = vld [vmem:[#allocation2 + $0xb98] sm:$0xff] }
0x198c   :  { %6437 = vmatmul.mubr.f32.gmra.mxu0 %v9839_v1  ;;  %6685 = vmatprep.mubr.f32.mxu1 %v9701_v49 }
0x198d   :  { %6525 = vmatpush1.msra.mxu0 %v6328_v60  ;;  %6584 = vmatprep.mubr.f32.mxu0 %v9263_v23  ;;  %v6352_v60 = vld [vmem:[#allocation2 + $0xb90] sm:$0xff] }
0x198e   :  { %6526 = vmatprep.subr.mxu0 %v6327_v30  ;;  %v6351_v30 = vld [vmem:[#allocation2 + $0xb88] sm:$0xff] }
0x198f   :  { %6527 = vmatpush1.msra.mxu0 %v6326_v43  ;;  %v6350_v43 = vld [vmem:[#allocation2 + $0xb80] sm:$0xff] }
0x1990   :  { %6528 = vmatprep.subr.mxu0 %v6325_v6  ;;  %v6349_v6 = vld [vmem:[#allocation2 + $0xb78] sm:$0xff] }
0x1991   :  { %6529 = vmatpush1.msra.mxu0 %v6324_v55  ;;  %v6348_v55 = vld [vmem:[#allocation2 + $0xb70] sm:$0xff] }
0x1992   :  { %6530 = vmatprep.subr.mxu0 %v6323_v3  ;;  %v6347_v3 = vld [vmem:[#allocation2 + $0xb68] sm:$0xff] }
0x1993   :  { %6531 = vmatpush1.msra.mxu0 %v6322_v28  ;;  %v6346_v28 = vld [vmem:[#allocation2 + $0xb60] sm:$0xff] }
0x1994   :  { %6532 = vmatprep.subr.mxu0 %v6321_v19  ;;  %v6345_v19 = vld [vmem:[#allocation2 + $0xb58] sm:$0xff] }
0x1995   :  { %6533 = vmatpush1.msra.mxu0 %v6320_v10  ;;  %v6344_v10 = vld [vmem:[#allocation2 + $0xb50] sm:$0xff] }
0x1996   :  { %6534 = vmatprep.subr.mxu0 %v6319_v24  ;;  %v6343_v24 = vld [vmem:[#allocation2 + $0xb48] sm:$0xff] }
0x1997   :  { %6535 = vmatpush1.msra.mxu0 %v6318_v7  ;;  %v6342_v7 = vld [vmem:[#allocation2 + $0xb40] sm:$0xff] }
0x1998   :  { %6536 = vmatprep.subr.mxu0 %v6317_v61  ;;  %v6341_v61 = vld [vmem:[#allocation2 + $0xb38] sm:$0xff] }
0x1999   :  { %6537 = vmatpush1.msra.mxu0 %v6316_v13  ;;  %v6340_v13 = vld [vmem:[#allocation2 + $0xb30] sm:$0xff] }
0x199a   :  { %6538 = vmatprep.subr.mxu0 %v6315_v15  ;;  %v6339_v15 = vld [vmem:[#allocation2 + $0xb28] sm:$0xff] }
0x199b   :  { %6539 = vmatpush1.msra.mxu0 %v6314_v12  ;;  %v6338_v12 = vld [vmem:[#allocation2 + $0xb20] sm:$0xff] }
0x199c   :  { %6540 = vmatprep.subr.mxu0 %v6313_v57  ;;  %v6337_v57 = vld [vmem:[#allocation2 + $0xb18] sm:$0xff] }
0x199d   :  { %6541 = vmatpush1.msra.mxu0 %v6312_v32  ;;  %v6336_v32 = vld [vmem:[#allocation2 + $0xb10] sm:$0xff] }
0x199e   :  { %6542 = vmatprep.subr.mxu0 %v6311_v14  ;;  %v6335_v14 = vld [vmem:[#allocation2 + $0xb08] sm:$0xff] }
0x199f   :  { %6543 = vmatpush1.msra.mxu0 %v6310_v16  ;;  %v6334_v16 = vld [vmem:[#allocation2 + $0xb00] sm:$0xff] }
0x19a0   :  { %6544 = vmatprep.subr.mxu0 %v6309_v20 }
0x19a1   :  { %6545 = vmatpush1.msra.mxu0 %v6308_v38 }
0x19a2   :  { %6546 = vmatprep.subr.mxu0 %v6307_v40 }
0x19a3   :  { %6547 = vmatpush1.msra.mxu0 %v6306_v42 }
0x19a4   :  { %6548 = vmatprep.subr.mxu0 %v6305_v29 }
0x19a5   :  { %6549 = vmatpush1.msra.mxu0 %v6304_v45 }
0x19a6   :  { %6550 = vmatprep.subr.mxu0 %v6303_v4 }
0x19a7   :  { %6551 = vmatpush1.msra.mxu0 %v6302_v46 }
0x19a8   :  { %6552 = vmatprep.subr.mxu0 %v6365_v9 }
0x19a9   :  { %6553 = vmatpush2.msra.mxu0 %v6364_v47 }
0x19aa   :  { %6554 = vmatprep.subr.mxu0 %v6363_v0 }
0x19ab   :  { %6555 = vmatpush2.msra.mxu0 %v6362_v27 }
0x19ac   :  { %6556 = vmatprep.subr.mxu0 %v6361_v31 }
0x19ad   :  { %6557 = vmatpush2.msra.mxu0 %v6360_v37 }
0x19ae   :  { %6558 = vmatprep.subr.mxu0 %v6359_v18 }
0x19af   :  { %6559 = vmatpush2.msra.mxu0 %v6358_v2 }
0x19b0   :  { %6560 = vmatprep.subr.mxu0 %v6357_v17 }
0x19b1   :  { %6561 = vmatpush2.msra.mxu0 %v6356_v44 }
0x19b2   :  { %6562 = vmatprep.subr.mxu0 %v6355_v26 }
0x19b3   :  { %6563 = vmatpush2.msra.mxu0 %v6354_v22 }
0x19b4   :  { %6564 = vmatprep.subr.mxu0 %v6353_v59 }
0x19b5   :  { %6565 = vmatpush2.msra.mxu0 %v6352_v60 }
0x19b6   :  { %6566 = vmatprep.subr.mxu0 %v6351_v30 }
0x19b7   :  { %6567 = vmatpush2.msra.mxu0 %v6350_v43 }
0x19b8   :  { %6568 = vmatprep.subr.mxu0 %v6349_v6 }
0x19b9   :  { %6569 = vmatpush2.msra.mxu0 %v6348_v55 }
0x19ba   :  { %6570 = vmatprep.subr.mxu0 %v6347_v3  ;;  %v9845_v3 = vld [vmem:[#allocation69_spill] sm:$0xff] }
0x19bb   :  { %6571 = vmatpush2.msra.mxu0 %v6346_v28 }
0x19bc   :  { %6572 = vmatprep.subr.mxu0 %v6345_v19 }
0x19bd   :  { %6573 = vmatpush2.msra.mxu0 %v6344_v10 }
0x19be   :  { %6574 = vmatprep.subr.mxu0 %v6343_v24 }
0x19bf   :  { %6575 = vmatpush2.msra.mxu0 %v6342_v7  ;;  %v6615_v7 = vld [vmem:[#allocation10 + $0x40] sm:$0xff] }
0x19c0   :  { %6576 = vmatprep.subr.mxu0 %v6341_v61 }
0x19c1   :  { %6577 = vmatpush2.msra.mxu0 %v6340_v13 }
0x19c2   :  { %6578 = vmatprep.subr.mxu0 %v6339_v15  ;;  %v6616_v15 = vld [vmem:[#allocation10 + $0x48] sm:$0xff] }
0x19c3   :  { %6579 = vmatpush2.msra.mxu0 %v6338_v12 }
0x19c4   :  { %6580 = vmatprep.subr.mxu0 %v6337_v57 }
0x19c5   :  { %6581 = vmatpush2.msra.mxu0 %v6336_v32  ;;  %v6617_v32 = vld [vmem:[#allocation10 + $0x70] sm:$0xff] }
0x19c6   :  { %6582 = vmatprep.subr.mxu0 %v6335_v14 }
0x19c7   :  { %6583 = vmatpush2.msra.mxu0 %v6334_v16 }
0x19c8   :  { %6585 = vmatmul.mubr.f32.vlgmr.msra.gmra.mxu0 %v9266_v54 }
0x19c9   :  { %6590 = vmatprep.mubr.f32.mxu0 %v9259_v21 }
0x19cc   :  { %6591 = vmatmul.mubr.f32.gmra.mxu0 %v9261_v25 }
0x1a46   :  { %v6432_v20 = vpop.f32.mrf.mxu0 }
0x1a47   :  { %v6509_v38 = vpop.f32.mrf.mxu1 }
0x1a48   :  { %v6434_v40 = vpop.f32.mrf.mxu0  ;;  %v6510_v31 = vadd.f32 %v6509_v38, %v6432_v20  ;;  %v6618_v20 = vld [vmem:[#allocation10 + $0x78] sm:$0xff] }
0x1a49   :  { %v6511_v29 = vpop.f32.mrf.mxu1 }
0x1a4a   :  { %v6512_v0 = vadd.f32 %v6511_v29, %v6434_v40 }
0x1a4b   :  { %v6515_v45 = vpop.f32.mrf.mxu1 }
0x1a4c   :  { %v6438_v42 = vpop.f32.mrf.mxu0 }
0x1a4d   :  { %v6517_v9 = vpop.f32.mrf.mxu1  ;;  %v6516_v27 = vadd.f32 %v6515_v45, %v6438_v42  ;;  %v6619_v42 = vld [vmem:[#allocation10 + $0xa0] sm:$0xff] }
0x1a4e   :  { %v6440_v4 = vpop.f32.mrf.mxu0 }
0x1a4f   :  { %v6518_v18 = vadd.f32 %v6517_v9, %v6440_v4  ;;  %v6620_v4 = vld [vmem:[#allocation10 + $0xa8] sm:$0xff] }
0x1a88   :  { %v6586_v46 = vpop.f32.mrf.mxu0 }
0x1a89   :  { %v6587_v44 = vadd.f32 %v6586_v46, %v6510_v31 }
0x1a8a   :  { %v6588_v47 = vpop.f32.mrf.mxu0 }
0x1a8b   :  { %v6589_v2 = vadd.f32 %v6588_v47, %v6512_v0  ;;  %v6597_v43 = vmul.f32 2.0, %v6587_v44 }
0x1a8c   :  { %v6592_v37 = vpop.f32.mrf.mxu0 }
0x1a8d   :  { %v6593_v17 = vadd.f32 %v6592_v37, %v6516_v27  ;;  %v6598_v60 = vmul.f32 2.0, %v6589_v2  ;;  %v6605_v19 = vsub.f32 %v6597_v43, %v8869_v5  ;;  %v6614_v5 = vld [vmem:[#allocation10 + $0x18] sm:$0xff] }
0x1a8e   :  { %v6594_v26 = vpop.f32.mrf.mxu0 }
0x1a8f   :  { %v6595_v22 = vadd.f32 %v6594_v26, %v6518_v18  ;;  %v6599_v59 = vmul.f32 2.0, %v6593_v17  ;;  %v6606_v28 = vsub.f32 %v6598_v60, %v9845_v3 }
0x1a91   :  { %v6600_v30 = vmul.f32 2.0, %v6595_v22  ;;  %v6607_v55 = vsub.f32 %v6599_v59, %v8855_v8 }
0x1a93   :  { %v6608_v6 = vsub.f32 %v6600_v30, %v8851_v50  ;;  %v6613_v50 = vld [vmem:[#allocation10 + $0x10] sm:$0xff] }
0x1a95   :  { %6649 = vmatprep.subr.mxu1 %v6608_v6 }
0x1a96   :  { %6650 = vmatpush1.msra.mxu1 %v6607_v55 }
0x1a97   :  { %6651 = vmatprep.subr.mxu1 %v6606_v28 }
0x1a98   :  { %6652 = vmatpush1.msra.mxu1 %v6605_v19 }
0x1a99   :  { %7640 = vmatmul.mubr.msk.f32.vlgmr.msra.gmra.mxu1 %vm3576_vm1, %v9841_v11 }
0x1a9a   :  { %6691 = vmatprep.mubr.f32.mxu1 %v9701_v49 }
0x1a9d   :  { %7641 = vmatmul.mubr.msk.f32.gmra.mxu1 %vm3576_vm1, %v9842_v36 }
0x1a9e   :  { %6697 = vmatprep.mubr.f32.mxu1 %v9701_v49 }
0x1aa1   :  { %7642 = vmatmul.mubr.msk.f32.gmra.mxu1 %vm3576_vm1, %v9843_v53 }
0x1aa2   :  { %6703 = vmatprep.mubr.f32.mxu1 %v9701_v49 }
0x1aa5   :  { %7643 = vmatmul.mubr.msk.f32.gmra.mxu1 %vm3576_vm1, %v9844_v41 }
0x1b59   :  { %v6687_v8 = vpop.f32.mrf.mxu1 }
0x1b5a   :  { %v6710_v10 = vadd.f32 %v6687_v8, %v6613_v50 }
0x1b5b   :  { %v6689_v24 = vpop.f32.mrf.mxu1 }
0x1b5c   :  { %6718 = vst [vmem:[#allocation10 + $0x10] sm:$0xff] %v6710_v10  ;;  %v6711_v61 = vadd.f32 %v6689_v24, %v6614_v5 }
0x1b5d   :  { %v6693_v13 = vpop.f32.mrf.mxu1 }
0x1b5e   :  { %6719 = vst [vmem:[#allocation10 + $0x18] sm:$0xff] %v6711_v61  ;;  %v6712_v12 = vadd.f32 %v6693_v13, %v6615_v7 }
0x1b5f   :  { %v6695_v57 = vpop.f32.mrf.mxu1 }
0x1b60   :  { %6720 = vst [vmem:[#allocation10 + $0x40] sm:$0xff] %v6712_v12  ;;  %v6713_v14 = vadd.f32 %v6695_v57, %v6616_v15 }
0x1b61   :  { %v6699_v16 = vpop.f32.mrf.mxu1 }
0x1b62   :  { %6721 = vst [vmem:[#allocation10 + $0x48] sm:$0xff] %v6713_v14  ;;  %v6714_v38 = vadd.f32 %v6699_v16, %v6617_v32 }
0x1b63   :  { %v6701_v40 = vpop.f32.mrf.mxu1 }
0x1b64   :  { %6722 = vst [vmem:[#allocation10 + $0x70] sm:$0xff] %v6714_v38  ;;  %v6715_v29 = vadd.f32 %v6701_v40, %v6618_v20 }
0x1b65   :  { %v6705_v45 = vpop.f32.mrf.mxu1 }
0x1b66   :  { %6723 = vst [vmem:[#allocation10 + $0x78] sm:$0xff] %v6715_v29  ;;  %v6716_v46 = vadd.f32 %v6705_v45, %v6619_v42 }
0x1b67   :  { %v6707_v9 = vpop.f32.mrf.mxu1 }
0x1b68   :  { %6724 = vst [vmem:[#allocation10 + $0xa0] sm:$0xff] %v6716_v46  ;;  %v6717_v47 = vadd.f32 %v6707_v9, %v6620_v4 }
0x1b6a   :  { %6725 = vst [vmem:[#allocation10 + $0xa8] sm:$0xff] %v6717_v47 }
0x1b6b   :  { %7997 = dma.done.wait [#allocation3], 24576 }
0x1b6c   :  { %7998 = vsyncadd [#allocation3], 4294942720  ;;  %6984 = vmatprep.mubr.f32.mxu1 %v9832_v52  ;;  %7061 = vmatprep.mubr.f32.mxu0 %v9833_v48  ;;  %v9846_v0 = vmov 0   ;;  %v6759_v27 = vld [vmem:[#allocation2 + $0xf8] sm:$0xff]  ;;  %v6758_v37 = vld [vmem:[#allocation2 + $0xf0] sm:$0xff] }
0x1b6d   :  { %7663 = vset.pattern.permute.xlu0 %v9846_v0  ;;  %7664 = vset.pattern.permute.xlu1 %v9846_v0  ;;  %v6823_v31 = vld [vmem:[#allocation2 + $0x2f8] sm:$0xff]  ;;  %v6822_v18 = vld [vmem:[#allocation2 + $0x2f0] sm:$0xff]  ;;  %v6757_v2 = vld [vmem:[#allocation2 + $0xe8] sm:$0xff] }
0x1b6e   :  { %6920 = vmatprep.subr.mxu1 %v6759_v27  ;;  %6997 = vmatprep.subr.mxu0 %v6823_v31  ;;  %v6821_v17 = vld [vmem:[#allocation2 + $0x2e8] sm:$0xff]  ;;  %v6756_v44 = vld [vmem:[#allocation2 + $0xe0] sm:$0xff]  ;;  %v6755_v22 = vld [vmem:[#allocation2 + $0xd8] sm:$0xff] }
0x1b6f   :  { %6921 = vmatpush1.msra.mxu1 %v6758_v37  ;;  %6998 = vmatpush1.msra.mxu0 %v6822_v18  ;;  %v6820_v26 = vld [vmem:[#allocation2 + $0x2e0] sm:$0xff]  ;;  %v6819_v52 = vld [vmem:[#allocation2 + $0x2d8] sm:$0xff]  ;;  %v6754_v48 = vld [vmem:[#allocation2 + $0xd0] sm:$0xff] }
0x1b70   :  { %6922 = vmatprep.subr.mxu1 %v6757_v2  ;;  %6999 = vmatprep.subr.mxu0 %v6821_v17  ;;  %v6818_v59 = vld [vmem:[#allocation2 + $0x2d0] sm:$0xff]  ;;  %v6753_v60 = vld [vmem:[#allocation2 + $0xc8] sm:$0xff]  ;;  %v6752_v43 = vld [vmem:[#allocation2 + $0xc0] sm:$0xff] }
0x1b71   :  { %6923 = vmatpush1.msra.mxu1 %v6756_v44  ;;  %7000 = vmatpush1.msra.mxu0 %v6820_v26  ;;  %v6817_v30 = vld [vmem:[#allocation2 + $0x2c8] sm:$0xff]  ;;  %v6816_v6 = vld [vmem:[#allocation2 + $0x2c0] sm:$0xff]  ;;  %v6751_v55 = vld [vmem:[#allocation2 + $0xb8] sm:$0xff] }
0x1b72   :  { %6924 = vmatprep.subr.mxu1 %v6755_v22  ;;  %7001 = vmatprep.subr.mxu0 %v6819_v52  ;;  %v6815_v3 = vld [vmem:[#allocation2 + $0x2b8] sm:$0xff]  ;;  %v6750_v28 = vld [vmem:[#allocation2 + $0xb0] sm:$0xff]  ;;  %v6749_v50 = vld [vmem:[#allocation2 + $0xa8] sm:$0xff] }
0x1b73   :  { %6925 = vmatpush1.msra.mxu1 %v6754_v48  ;;  %7002 = vmatpush1.msra.mxu0 %v6818_v59  ;;  %v6814_v19 = vld [vmem:[#allocation2 + $0x2b0] sm:$0xff]  ;;  %v6813_v8 = vld [vmem:[#allocation2 + $0x2a8] sm:$0xff]  ;;  %v6748_v5 = vld [vmem:[#allocation2 + $0xa0] sm:$0xff] }
0x1b74   :  { %6926 = vmatprep.subr.mxu1 %v6753_v60  ;;  %7003 = vmatprep.subr.mxu0 %v6817_v30  ;;  %v6812_v10 = vld [vmem:[#allocation2 + $0x2a0] sm:$0xff]  ;;  %v6747_v24 = vld [vmem:[#allocation2 + $0x98] sm:$0xff]  ;;  %v6746_v61 = vld [vmem:[#allocation2 + $0x90] sm:$0xff] }
0x1b75   :  { %6927 = vmatpush1.msra.mxu1 %v6752_v43  ;;  %7004 = vmatpush1.msra.mxu0 %v6816_v6  ;;  %v6811_v7 = vld [vmem:[#allocation2 + $0x298] sm:$0xff]  ;;  %v6810_v13 = vld [vmem:[#allocation2 + $0x290] sm:$0xff]  ;;  %v6745_v15 = vld [vmem:[#allocation2 + $0x88] sm:$0xff] }
0x1b76   :  { %6928 = vmatprep.subr.mxu1 %v6751_v55  ;;  %7005 = vmatprep.subr.mxu0 %v6815_v3  ;;  %v6809_v12 = vld [vmem:[#allocation2 + $0x288] sm:$0xff]  ;;  %v6744_v57 = vld [vmem:[#allocation2 + $0x80] sm:$0xff]  ;;  %v6743_v14 = vld [vmem:[#allocation2 + $0x78] sm:$0xff] }
0x1b77   :  { %6929 = vmatpush1.msra.mxu1 %v6750_v28  ;;  %7006 = vmatpush1.msra.mxu0 %v6814_v19  ;;  %v6808_v32 = vld [vmem:[#allocation2 + $0x280] sm:$0xff]  ;;  %v6807_v16 = vld [vmem:[#allocation2 + $0x278] sm:$0xff]  ;;  %v6742_v20 = vld [vmem:[#allocation2 + $0x70] sm:$0xff] }
0x1b78   :  { %6930 = vmatprep.subr.mxu1 %v6749_v50  ;;  %7007 = vmatprep.subr.mxu0 %v6813_v8  ;;  %v6806_v38 = vld [vmem:[#allocation2 + $0x270] sm:$0xff]  ;;  %v6741_v40 = vld [vmem:[#allocation2 + $0x68] sm:$0xff]  ;;  %v6740_v29 = vld [vmem:[#allocation2 + $0x60] sm:$0xff] }
0x1b79   :  { %6931 = vmatpush1.msra.mxu1 %v6748_v5  ;;  %7008 = vmatpush1.msra.mxu0 %v6812_v10  ;;  %v6805_v42 = vld [vmem:[#allocation2 + $0x268] sm:$0xff]  ;;  %v6804_v45 = vld [vmem:[#allocation2 + $0x260] sm:$0xff]  ;;  %v6739_v4 = vld [vmem:[#allocation2 + $0x58] sm:$0xff] }
0x1b7a   :  { %6932 = vmatprep.subr.mxu1 %v6747_v24  ;;  %7009 = vmatprep.subr.mxu0 %v6811_v7  ;;  %v6803_v46 = vld [vmem:[#allocation2 + $0x258] sm:$0xff]  ;;  %v6738_v9 = vld [vmem:[#allocation2 + $0x50] sm:$0xff]  ;;  %v6737_v0 = vld [vmem:[#allocation2 + $0x48] sm:$0xff] }
0x1b7b   :  { %6933 = vmatpush1.msra.mxu1 %v6746_v61  ;;  %7010 = vmatpush1.msra.mxu0 %v6810_v13  ;;  %v6802_v47 = vld [vmem:[#allocation2 + $0x250] sm:$0xff]  ;;  %v6801_v27 = vld [vmem:[#allocation2 + $0x248] sm:$0xff]  ;;  %v6736_v31 = vld [vmem:[#allocation2 + $0x40] sm:$0xff] }
0x1b7c   :  { %6934 = vmatprep.subr.mxu1 %v6745_v15  ;;  %7011 = vmatprep.subr.mxu0 %v6809_v12  ;;  %v6800_v37 = vld [vmem:[#allocation2 + $0x240] sm:$0xff]  ;;  %v6735_v18 = vld [vmem:[#allocation2 + $0x38] sm:$0xff]  ;;  %v6734_v17 = vld [vmem:[#allocation2 + $0x30] sm:$0xff] }
0x1b7d   :  { %6935 = vmatpush1.msra.mxu1 %v6744_v57  ;;  %7012 = vmatpush1.msra.mxu0 %v6808_v32  ;;  %v6799_v2 = vld [vmem:[#allocation2 + $0x238] sm:$0xff]  ;;  %v6798_v44 = vld [vmem:[#allocation2 + $0x230] sm:$0xff]  ;;  %v6733_v26 = vld [vmem:[#allocation2 + $0x28] sm:$0xff] }
0x1b7e   :  { %6936 = vmatprep.subr.mxu1 %v6743_v14  ;;  %7013 = vmatprep.subr.mxu0 %v6807_v16  ;;  %v6797_v22 = vld [vmem:[#allocation2 + $0x228] sm:$0xff]  ;;  %v6732_v52 = vld [vmem:[#allocation2 + $0x20] sm:$0xff]  ;;  %v6731_v59 = vld [vmem:[#allocation2 + $0x18] sm:$0xff] }
0x1b7f   :  { %6937 = vmatpush1.msra.mxu1 %v6742_v20  ;;  %7014 = vmatpush1.msra.mxu0 %v6806_v38  ;;  %v6796_v48 = vld [vmem:[#allocation2 + $0x220] sm:$0xff]  ;;  %v6795_v60 = vld [vmem:[#allocation2 + $0x218] sm:$0xff]  ;;  %v6730_v30 = vld [vmem:[#allocation2 + $0x10] sm:$0xff] }
0x1b80   :  { %6938 = vmatprep.subr.mxu1 %v6741_v40  ;;  %7015 = vmatprep.subr.mxu0 %v6805_v42  ;;  %v6794_v43 = vld [vmem:[#allocation2 + $0x210] sm:$0xff]  ;;  %v6729_v6 = vld [vmem:[#allocation2 + $0x8] sm:$0xff]  ;;  %v6728_v3 = vld [vmem:[#allocation2] sm:$0xff] }
0x1b81   :  { %6939 = vmatpush1.msra.mxu1 %v6740_v29  ;;  %7016 = vmatpush1.msra.mxu0 %v6804_v45  ;;  %v6793_v55 = vld [vmem:[#allocation2 + $0x208] sm:$0xff]  ;;  %v6792_v28 = vld [vmem:[#allocation2 + $0x200] sm:$0xff]  ;;  %v6791_v19 = vld [vmem:[#allocation2 + $0x1f8] sm:$0xff] }
0x1b82   :  { %6940 = vmatprep.subr.mxu1 %v6739_v4  ;;  %7017 = vmatprep.subr.mxu0 %v6803_v46  ;;  %v6855_v50 = vld [vmem:[#allocation2 + $0x3f8] sm:$0xff]  ;;  %v6790_v8 = vld [vmem:[#allocation2 + $0x1f0] sm:$0xff]  ;;  %v6789_v10 = vld [vmem:[#allocation2 + $0x1e8] sm:$0xff] }
0x1b83   :  { %6941 = vmatpush1.msra.mxu1 %v6738_v9  ;;  %7018 = vmatpush1.msra.mxu0 %v6802_v47  ;;  %v6854_v5 = vld [vmem:[#allocation2 + $0x3f0] sm:$0xff]  ;;  %v6853_v24 = vld [vmem:[#allocation2 + $0x3e8] sm:$0xff]  ;;  %v6788_v7 = vld [vmem:[#allocation2 + $0x1e0] sm:$0xff] }
0x1b84   :  { %6942 = vmatprep.subr.mxu1 %v6737_v0  ;;  %7019 = vmatprep.subr.mxu0 %v6801_v27  ;;  %v6852_v61 = vld [vmem:[#allocation2 + $0x3e0] sm:$0xff]  ;;  %v6787_v13 = vld [vmem:[#allocation2 + $0x1d8] sm:$0xff]  ;;  %v6786_v12 = vld [vmem:[#allocation2 + $0x1d0] sm:$0xff] }
0x1b85   :  { %6943 = vmatpush1.msra.mxu1 %v6736_v31  ;;  %7020 = vmatpush1.msra.mxu0 %v6800_v37  ;;  %v6851_v15 = vld [vmem:[#allocation2 + $0x3d8] sm:$0xff]  ;;  %v6850_v57 = vld [vmem:[#allocation2 + $0x3d0] sm:$0xff]  ;;  %v6785_v32 = vld [vmem:[#allocation2 + $0x1c8] sm:$0xff] }
0x1b86   :  { %6944 = vmatprep.subr.mxu1 %v6735_v18  ;;  %7021 = vmatprep.subr.mxu0 %v6799_v2  ;;  %v6849_v14 = vld [vmem:[#allocation2 + $0x3c8] sm:$0xff]  ;;  %v6784_v16 = vld [vmem:[#allocation2 + $0x1c0] sm:$0xff]  ;;  %v6783_v38 = vld [vmem:[#allocation2 + $0x1b8] sm:$0xff] }
0x1b87   :  { %6945 = vmatpush1.msra.mxu1 %v6734_v17  ;;  %7022 = vmatpush1.msra.mxu0 %v6798_v44  ;;  %v6848_v20 = vld [vmem:[#allocation2 + $0x3c0] sm:$0xff]  ;;  %v6847_v40 = vld [vmem:[#allocation2 + $0x3b8] sm:$0xff]  ;;  %v6782_v42 = vld [vmem:[#allocation2 + $0x1b0] sm:$0xff] }
0x1b88   :  { %6946 = vmatprep.subr.mxu1 %v6733_v26  ;;  %7023 = vmatprep.subr.mxu0 %v6797_v22  ;;  %v6846_v29 = vld [vmem:[#allocation2 + $0x3b0] sm:$0xff]  ;;  %v6781_v45 = vld [vmem:[#allocation2 + $0x1a8] sm:$0xff]  ;;  %v6780_v46 = vld [vmem:[#allocation2 + $0x1a0] sm:$0xff] }
0x1b89   :  { %6947 = vmatpush1.msra.mxu1 %v6732_v52  ;;  %7024 = vmatpush1.msra.mxu0 %v6796_v48  ;;  %v6845_v4 = vld [vmem:[#allocation2 + $0x3a8] sm:$0xff]  ;;  %v6844_v9 = vld [vmem:[#allocation2 + $0x3a0] sm:$0xff]  ;;  %v6779_v47 = vld [vmem:[#allocation2 + $0x198] sm:$0xff] }
0x1b8a   :  { %6948 = vmatprep.subr.mxu1 %v6731_v59  ;;  %7025 = vmatprep.subr.mxu0 %v6795_v60  ;;  %v6843_v0 = vld [vmem:[#allocation2 + $0x398] sm:$0xff]  ;;  %v6778_v27 = vld [vmem:[#allocation2 + $0x190] sm:$0xff]  ;;  %v6777_v37 = vld [vmem:[#allocation2 + $0x188] sm:$0xff] }
0x1b8b   :  { %6949 = vmatpush1.msra.mxu1 %v6730_v30  ;;  %7026 = vmatpush1.msra.mxu0 %v6794_v43  ;;  %v6842_v31 = vld [vmem:[#allocation2 + $0x390] sm:$0xff]  ;;  %v6841_v18 = vld [vmem:[#allocation2 + $0x388] sm:$0xff]  ;;  %v6776_v2 = vld [vmem:[#allocation2 + $0x180] sm:$0xff] }
0x1b8c   :  { %6950 = vmatprep.subr.mxu1 %v6729_v6  ;;  %7027 = vmatprep.subr.mxu0 %v6793_v55  ;;  %v6840_v17 = vld [vmem:[#allocation2 + $0x380] sm:$0xff]  ;;  %v6775_v44 = vld [vmem:[#allocation2 + $0x178] sm:$0xff]  ;;  %v6774_v22 = vld [vmem:[#allocation2 + $0x170] sm:$0xff] }
0x1b8d   :  { %6951 = vmatpush1.msra.mxu1 %v6728_v3  ;;  %7028 = vmatpush1.msra.mxu0 %v6792_v28  ;;  %v6839_v26 = vld [vmem:[#allocation2 + $0x378] sm:$0xff]  ;;  %v6838_v52 = vld [vmem:[#allocation2 + $0x370] sm:$0xff]  ;;  %v6773_v48 = vld [vmem:[#allocation2 + $0x168] sm:$0xff] }
0x1b8e   :  { %6952 = vmatprep.subr.mxu1 %v6791_v19  ;;  %7029 = vmatprep.subr.mxu0 %v6855_v50  ;;  %v6837_v59 = vld [vmem:[#allocation2 + $0x368] sm:$0xff]  ;;  %v6772_v60 = vld [vmem:[#allocation2 + $0x160] sm:$0xff]  ;;  %v6771_v43 = vld [vmem:[#allocation2 + $0x158] sm:$0xff] }
0x1b8f   :  { %6953 = vmatpush2.msra.mxu1 %v6790_v8  ;;  %7030 = vmatpush2.msra.mxu0 %v6854_v5  ;;  %v6836_v30 = vld [vmem:[#allocation2 + $0x360] sm:$0xff]  ;;  %v6835_v6 = vld [vmem:[#allocation2 + $0x358] sm:$0xff]  ;;  %v6770_v55 = vld [vmem:[#allocation2 + $0x150] sm:$0xff] }
0x1b90   :  { %6954 = vmatprep.subr.mxu1 %v6789_v10  ;;  %7031 = vmatprep.subr.mxu0 %v6853_v24  ;;  %v6834_v3 = vld [vmem:[#allocation2 + $0x350] sm:$0xff]  ;;  %v6769_v28 = vld [vmem:[#allocation2 + $0x148] sm:$0xff]  ;;  %v6768_v50 = vld [vmem:[#allocation2 + $0x140] sm:$0xff] }
0x1b91   :  { %6955 = vmatpush2.msra.mxu1 %v6788_v7  ;;  %7032 = vmatpush2.msra.mxu0 %v6852_v61  ;;  %v6833_v19 = vld [vmem:[#allocation2 + $0x348] sm:$0xff]  ;;  %v6832_v8 = vld [vmem:[#allocation2 + $0x340] sm:$0xff]  ;;  %v6767_v5 = vld [vmem:[#allocation2 + $0x138] sm:$0xff] }
0x1b92   :  { %6956 = vmatprep.subr.mxu1 %v6787_v13  ;;  %7033 = vmatprep.subr.mxu0 %v6851_v15  ;;  %v6831_v10 = vld [vmem:[#allocation2 + $0x338] sm:$0xff]  ;;  %v6766_v24 = vld [vmem:[#allocation2 + $0x130] sm:$0xff]  ;;  %v6765_v61 = vld [vmem:[#allocation2 + $0x128] sm:$0xff] }
0x1b93   :  { %6957 = vmatpush2.msra.mxu1 %v6786_v12  ;;  %7034 = vmatpush2.msra.mxu0 %v6850_v57  ;;  %v6830_v7 = vld [vmem:[#allocation2 + $0x330] sm:$0xff]  ;;  %v6829_v13 = vld [vmem:[#allocation2 + $0x328] sm:$0xff]  ;;  %v6764_v15 = vld [vmem:[#allocation2 + $0x120] sm:$0xff] }
0x1b94   :  { %6958 = vmatprep.subr.mxu1 %v6785_v32  ;;  %7035 = vmatprep.subr.mxu0 %v6849_v14  ;;  %v6828_v12 = vld [vmem:[#allocation2 + $0x320] sm:$0xff]  ;;  %v6763_v57 = vld [vmem:[#allocation2 + $0x118] sm:$0xff]  ;;  %v6762_v14 = vld [vmem:[#allocation2 + $0x110] sm:$0xff] }
0x1b95   :  { %6959 = vmatpush2.msra.mxu1 %v6784_v16  ;;  %7036 = vmatpush2.msra.mxu0 %v6848_v20  ;;  %v6827_v32 = vld [vmem:[#allocation2 + $0x318] sm:$0xff]  ;;  %v6826_v16 = vld [vmem:[#allocation2 + $0x310] sm:$0xff]  ;;  %v6761_v20 = vld [vmem:[#allocation2 + $0x108] sm:$0xff] }
0x1b96   :  { %6960 = vmatprep.subr.mxu1 %v6783_v38  ;;  %7037 = vmatprep.subr.mxu0 %v6847_v40  ;;  %v6825_v38 = vld [vmem:[#allocation2 + $0x308] sm:$0xff]  ;;  %v6760_v40 = vld [vmem:[#allocation2 + $0x100] sm:$0xff] }
0x1b97   :  { %6961 = vmatpush2.msra.mxu1 %v6782_v42  ;;  %7038 = vmatpush2.msra.mxu0 %v6846_v29  ;;  %v6824_v42 = vld [vmem:[#allocation2 + $0x300] sm:$0xff]  ;;  %v6887_v29 = vld [vmem:[#allocation2 + $0x4f8] sm:$0xff] }
0x1b98   :  { %6962 = vmatprep.subr.mxu1 %v6781_v45  ;;  %7039 = vmatprep.subr.mxu0 %v6845_v4  ;;  %v6886_v45 = vld [vmem:[#allocation2 + $0x4f0] sm:$0xff]  ;;  %v6885_v4 = vld [vmem:[#allocation2 + $0x4e8] sm:$0xff] }
0x1b99   :  { %6963 = vmatpush2.msra.mxu1 %v6780_v46  ;;  %7040 = vmatpush2.msra.mxu0 %v6844_v9  ;;  %v6884_v46 = vld [vmem:[#allocation2 + $0x4e0] sm:$0xff]  ;;  %v6883_v9 = vld [vmem:[#allocation2 + $0x4d8] sm:$0xff] }
0x1b9a   :  { %6964 = vmatprep.subr.mxu1 %v6779_v47  ;;  %7041 = vmatprep.subr.mxu0 %v6843_v0  ;;  %v6882_v47 = vld [vmem:[#allocation2 + $0x4d0] sm:$0xff]  ;;  %v6881_v0 = vld [vmem:[#allocation2 + $0x4c8] sm:$0xff] }
0x1b9b   :  { %6965 = vmatpush2.msra.mxu1 %v6778_v27  ;;  %7042 = vmatpush2.msra.mxu0 %v6842_v31  ;;  %v6880_v27 = vld [vmem:[#allocation2 + $0x4c0] sm:$0xff]  ;;  %v6875_v31 = vld [vmem:[#allocation2 + $0x498] sm:$0xff] }
0x1b9c   :  { %6966 = vmatprep.subr.mxu1 %v6777_v37  ;;  %7043 = vmatprep.subr.mxu0 %v6841_v18  ;;  %v6873_v37 = vld [vmem:[#allocation2 + $0x488] sm:$0xff]  ;;  %v6871_v18 = vld [vmem:[#allocation2 + $0x478] sm:$0xff] }
0x1b9d   :  { %6967 = vmatpush2.msra.mxu1 %v6776_v2  ;;  %7044 = vmatpush2.msra.mxu0 %v6840_v17  ;;  %v6869_v2 = vld [vmem:[#allocation2 + $0x468] sm:$0xff]  ;;  %v6868_v17 = vld [vmem:[#allocation2 + $0x460] sm:$0xff] }
0x1b9e   :  { %6968 = vmatprep.subr.mxu1 %v6775_v44  ;;  %7045 = vmatprep.subr.mxu0 %v6839_v26  ;;  %v6867_v44 = vld [vmem:[#allocation2 + $0x458] sm:$0xff]  ;;  %v6866_v26 = vld [vmem:[#allocation2 + $0x450] sm:$0xff] }
0x1b9f   :  { %6969 = vmatpush2.msra.mxu1 %v6774_v22  ;;  %7046 = vmatpush2.msra.mxu0 %v6838_v52  ;;  %v6865_v22 = vld [vmem:[#allocation2 + $0x448] sm:$0xff]  ;;  %v6864_v52 = vld [vmem:[#allocation2 + $0x440] sm:$0xff] }
0x1ba0   :  { %6970 = vmatprep.subr.mxu1 %v6773_v48  ;;  %7047 = vmatprep.subr.mxu0 %v6837_v59  ;;  %v6863_v48 = vld [vmem:[#allocation2 + $0x438] sm:$0xff]  ;;  %v6862_v59 = vld [vmem:[#allocation2 + $0x430] sm:$0xff] }
0x1ba1   :  { %6971 = vmatpush2.msra.mxu1 %v6772_v60  ;;  %7048 = vmatpush2.msra.mxu0 %v6836_v30  ;;  %v6861_v60 = vld [vmem:[#allocation2 + $0x428] sm:$0xff]  ;;  %v6860_v30 = vld [vmem:[#allocation2 + $0x420] sm:$0xff] }
0x1ba2   :  { %6972 = vmatprep.subr.mxu1 %v6771_v43  ;;  %7049 = vmatprep.subr.mxu0 %v6835_v6  ;;  %v6859_v43 = vld [vmem:[#allocation2 + $0x418] sm:$0xff]  ;;  %v6858_v6 = vld [vmem:[#allocation2 + $0x410] sm:$0xff] }
0x1ba3   :  { %6973 = vmatpush2.msra.mxu1 %v6770_v55  ;;  %7050 = vmatpush2.msra.mxu0 %v6834_v3  ;;  %v6857_v55 = vld [vmem:[#allocation2 + $0x408] sm:$0xff]  ;;  %v6856_v3 = vld [vmem:[#allocation2 + $0x400] sm:$0xff] }
0x1ba4   :  { %6974 = vmatprep.subr.mxu1 %v6769_v28  ;;  %7051 = vmatprep.subr.mxu0 %v6833_v19  ;;  %v6919_v28 = vld [vmem:[#allocation2 + $0x5f8] sm:$0xff]  ;;  %v6918_v19 = vld [vmem:[#allocation2 + $0x5f0] sm:$0xff] }
0x1ba5   :  { %6975 = vmatpush2.msra.mxu1 %v6768_v50  ;;  %7052 = vmatpush2.msra.mxu0 %v6832_v8  ;;  %v6917_v50 = vld [vmem:[#allocation2 + $0x5e8] sm:$0xff]  ;;  %v6916_v8 = vld [vmem:[#allocation2 + $0x5e0] sm:$0xff] }
0x1ba6   :  { %6976 = vmatprep.subr.mxu1 %v6767_v5  ;;  %7053 = vmatprep.subr.mxu0 %v6831_v10  ;;  %v6915_v5 = vld [vmem:[#allocation2 + $0x5d8] sm:$0xff]  ;;  %v6914_v10 = vld [vmem:[#allocation2 + $0x5d0] sm:$0xff] }
0x1ba7   :  { %6977 = vmatpush2.msra.mxu1 %v6766_v24  ;;  %7054 = vmatpush2.msra.mxu0 %v6830_v7  ;;  %v6913_v24 = vld [vmem:[#allocation2 + $0x5c8] sm:$0xff]  ;;  %v6912_v7 = vld [vmem:[#allocation2 + $0x5c0] sm:$0xff] }
0x1ba8   :  { %6978 = vmatprep.subr.mxu1 %v6765_v61  ;;  %7055 = vmatprep.subr.mxu0 %v6829_v13  ;;  %v6911_v61 = vld [vmem:[#allocation2 + $0x5b8] sm:$0xff]  ;;  %v6910_v13 = vld [vmem:[#allocation2 + $0x5b0] sm:$0xff] }
0x1ba9   :  { %6979 = vmatpush2.msra.mxu1 %v6764_v15  ;;  %7056 = vmatpush2.msra.mxu0 %v6828_v12  ;;  %v6909_v15 = vld [vmem:[#allocation2 + $0x5a8] sm:$0xff]  ;;  %v6908_v12 = vld [vmem:[#allocation2 + $0x5a0] sm:$0xff] }
0x1baa   :  { %6980 = vmatprep.subr.mxu1 %v6763_v57  ;;  %7057 = vmatprep.subr.mxu0 %v6827_v32  ;;  %v6907_v57 = vld [vmem:[#allocation2 + $0x598] sm:$0xff]  ;;  %v6906_v32 = vld [vmem:[#allocation2 + $0x590] sm:$0xff] }
0x1bab   :  { %6981 = vmatpush2.msra.mxu1 %v6762_v14  ;;  %7058 = vmatpush2.msra.mxu0 %v6826_v16  ;;  %v6905_v14 = vld [vmem:[#allocation2 + $0x588] sm:$0xff]  ;;  %v6904_v16 = vld [vmem:[#allocation2 + $0x580] sm:$0xff] }
0x1bac   :  { %6982 = vmatprep.subr.mxu1 %v6761_v20  ;;  %7059 = vmatprep.subr.mxu0 %v6825_v38  ;;  %v6903_v20 = vld [vmem:[#allocation2 + $0x578] sm:$0xff]  ;;  %v6902_v38 = vld [vmem:[#allocation2 + $0x570] sm:$0xff] }
0x1bad   :  { %6983 = vmatpush2.msra.mxu1 %v6760_v40  ;;  %7060 = vmatpush2.msra.mxu0 %v6824_v42  ;;  %v6901_v40 = vld [vmem:[#allocation2 + $0x568] sm:$0xff]  ;;  %v6900_v42 = vld [vmem:[#allocation2 + $0x560] sm:$0xff] }
0x1bae   :  { %6985 = vmatmul.mubr.f32.vlgmr.msra.gmra.mxu1 %v9834_v39  ;;  %7062 = vmatmul.mubr.f32.vlgmr.msra.gmra.mxu0 %v9835_v35  ;;  %v6879_v39 = vld [vmem:[#allocation2 + $0x4b8] sm:$0xff]  ;;  %v6878_v35 = vld [vmem:[#allocation2 + $0x4b0] sm:$0xff] }
0x1baf   :  { %7074 = vmatprep.subr.mxu1 %v6887_v29  ;;  %6990 = vmatprep.mubr.f32.mxu1 %v9836_v56  ;;  %v6877_v56 = vld [vmem:[#allocation2 + $0x4a8] sm:$0xff]  ;;  %v6899_v29 = vld [vmem:[#allocation2 + $0x558] sm:$0xff] }
0x1bb0   :  { %7075 = vmatpush1.msra.mxu1 %v6886_v45  ;;  %7067 = vmatprep.mubr.f32.mxu0 %v9837_v34  ;;  %v6876_v34 = vld [vmem:[#allocation2 + $0x4a0] sm:$0xff]  ;;  %v6898_v45 = vld [vmem:[#allocation2 + $0x550] sm:$0xff] }
0x1bb1   :  { %7076 = vmatprep.subr.mxu1 %v6885_v4  ;;  %v6897_v4 = vld [vmem:[#allocation2 + $0x548] sm:$0xff] }
0x1bb2   :  { %7077 = vmatpush1.msra.mxu1 %v6884_v46  ;;  %7068 = vmatmul.mubr.f32.gmra.mxu0 %v9838_v33  ;;  %v6874_v33 = vld [vmem:[#allocation2 + $0x490] sm:$0xff]  ;;  %v6896_v46 = vld [vmem:[#allocation2 + $0x540] sm:$0xff] }
0x1bb3   :  { %7078 = vmatprep.subr.mxu1 %v6883_v9  ;;  %6991 = vmatmul.mubr.f32.gmra.mxu1 %v9839_v1  ;;  %v6872_v1 = vld [vmem:[#allocation2 + $0x480] sm:$0xff]  ;;  %v6895_v9 = vld [vmem:[#allocation2 + $0x538] sm:$0xff] }
0x1bb4   :  { %7079 = vmatpush1.msra.mxu1 %v6882_v47  ;;  %7138 = vmatprep.mubr.f32.mxu1 %v9263_v23  ;;  %v6870_v23 = vld [vmem:[#allocation2 + $0x470] sm:$0xff] }
0x1bb5   :  { %7080 = vmatprep.subr.mxu1 %v6881_v0  ;;  %7239 = vmatprep.mubr.f32.mxu0 %v9701_v49  ;;  %v6894_v47 = vld [vmem:[#allocation2 + $0x530] sm:$0xff]  ;;  %v6893_v0 = vld [vmem:[#allocation2 + $0x528] sm:$0xff] }
0x1bb6   :  { %7081 = vmatpush1.msra.mxu1 %v6880_v27  ;;  %v6892_v27 = vld [vmem:[#allocation2 + $0x520] sm:$0xff] }
0x1bb7   :  { %7082 = vmatprep.subr.mxu1 %v6879_v39  ;;  %v6891_v39 = vld [vmem:[#allocation2 + $0x518] sm:$0xff] }
0x1bb8   :  { %7083 = vmatpush1.msra.mxu1 %v6878_v35  ;;  %v6890_v35 = vld [vmem:[#allocation2 + $0x510] sm:$0xff] }
0x1bb9   :  { %7084 = vmatprep.subr.mxu1 %v6877_v56  ;;  %v6889_v56 = vld [vmem:[#allocation2 + $0x508] sm:$0xff] }
0x1bba   :  { %7085 = vmatpush1.msra.mxu1 %v6876_v34  ;;  %v6888_v34 = vld [vmem:[#allocation2 + $0x500] sm:$0xff] }
0x1bbb   :  { %7086 = vmatprep.subr.mxu1 %v6875_v31 }
0x1bbc   :  { %7087 = vmatpush1.msra.mxu1 %v6874_v33 }
0x1bbd   :  { %7088 = vmatprep.subr.mxu1 %v6873_v37 }
0x1bbe   :  { %7089 = vmatpush1.msra.mxu1 %v6872_v1 }
0x1bbf   :  { %7090 = vmatprep.subr.mxu1 %v6871_v18 }
0x1bc0   :  { %7091 = vmatpush1.msra.mxu1 %v6870_v23 }
0x1bc1   :  { %7092 = vmatprep.subr.mxu1 %v6869_v2 }
0x1bc2   :  { %7093 = vmatpush1.msra.mxu1 %v6868_v17 }
0x1bc3   :  { %7094 = vmatprep.subr.mxu1 %v6867_v44 }
0x1bc4   :  { %7095 = vmatpush1.msra.mxu1 %v6866_v26 }
0x1bc5   :  { %7096 = vmatprep.subr.mxu1 %v6865_v22 }
0x1bc6   :  { %7097 = vmatpush1.msra.mxu1 %v6864_v52 }
0x1bc7   :  { %7098 = vmatprep.subr.mxu1 %v6863_v48 }
0x1bc8   :  { %7099 = vmatpush1.msra.mxu1 %v6862_v59 }
0x1bc9   :  { %7100 = vmatprep.subr.mxu1 %v6861_v60 }
0x1bca   :  { %7101 = vmatpush1.msra.mxu1 %v6860_v30 }
0x1bcb   :  { %7102 = vmatprep.subr.mxu1 %v6859_v43 }
0x1bcc   :  { %7103 = vmatpush1.msra.mxu1 %v6858_v6 }
0x1bcd   :  { %7104 = vmatprep.subr.mxu1 %v6857_v55 }
0x1bce   :  { %7105 = vmatpush1.msra.mxu1 %v6856_v3 }
0x1bcf   :  { %7106 = vmatprep.subr.mxu1 %v6919_v28 }
0x1bd0   :  { %7107 = vmatpush2.msra.mxu1 %v6918_v19 }
0x1bd1   :  { %7108 = vmatprep.subr.mxu1 %v6917_v50 }
0x1bd2   :  { %7109 = vmatpush2.msra.mxu1 %v6916_v8 }
0x1bd3   :  { %7110 = vmatprep.subr.mxu1 %v6915_v5 }
0x1bd4   :  { %7111 = vmatpush2.msra.mxu1 %v6914_v10  ;;  %v9391_v10 = vld [vmem:[#allocation10 + $0x40] sm:$0xff] }
0x1bd5   :  { %7112 = vmatprep.subr.mxu1 %v6913_v24  ;;  %v9395_v24 = vld [vmem:[#allocation10 + $0x60] sm:$0xff] }
0x1bd6   :  { %7113 = vmatpush2.msra.mxu1 %v6912_v7  ;;  %v9397_v7 = vld [vmem:[#allocation10 + $0x68] sm:$0xff] }
0x1bd7   :  { %7114 = vmatprep.subr.mxu1 %v6911_v61  ;;  %v7167_v61 = vld [vmem:[#allocation10 + $0x20] sm:$0xff] }
0x1bd8   :  { %7115 = vmatpush2.msra.mxu1 %v6910_v13 }
0x1bd9   :  { %7116 = vmatprep.subr.mxu1 %v6909_v15  ;;  %v7168_v15 = vld [vmem:[#allocation10 + $0x28] sm:$0xff] }
0x1bda   :  { %7117 = vmatpush2.msra.mxu1 %v6908_v12 }
0x1bdb   :  { %7118 = vmatprep.subr.mxu1 %v6907_v57  ;;  %v9401_v57 = vld [vmem:[#allocation10 + $0x48] sm:$0xff] }
0x1bdc   :  { %7119 = vmatpush2.msra.mxu1 %v6906_v32  ;;  %v7318_v32 = vadd.f32 %v9397_v7, %v9395_v24 }
0x1bdd   :  { %7120 = vmatprep.subr.mxu1 %v6905_v14 }
0x1bde   :  { %7121 = vmatpush2.msra.mxu1 %v6904_v16  ;;  %v9405_v16 = vld [vmem:[#allocation10 + $0x70] sm:$0xff] }
0x1bdf   :  { %7122 = vmatprep.subr.mxu1 %v6903_v20  ;;  %v9407_v20 = vld [vmem:[#allocation10 + $0x90] sm:$0xff] }
0x1be0   :  { %7123 = vmatpush2.msra.mxu1 %v6902_v38  ;;  %v9409_v38 = vld [vmem:[#allocation10 + $0x98] sm:$0xff] }
0x1be1   :  { %7124 = vmatprep.subr.mxu1 %v6901_v40 }
0x1be2   :  { %7125 = vmatpush2.msra.mxu1 %v6900_v42 }
0x1be3   :  { %7126 = vmatprep.subr.mxu1 %v6899_v29  ;;  %v7169_v29 = vld [vmem:[#allocation10 + $0x50] sm:$0xff] }
0x1be4   :  { %7127 = vmatpush2.msra.mxu1 %v6898_v45 }
0x1be5   :  { %7128 = vmatprep.subr.mxu1 %v6897_v4 }
0x1be6   :  { %7129 = vmatpush2.msra.mxu1 %v6896_v46 }
0x1be7   :  { %7130 = vmatprep.subr.mxu1 %v6895_v9  ;;  %v7319_v9 = vadd.f32 %v7318_v32, %v9405_v16 }
0x1be8   :  { %7131 = vmatpush2.msra.mxu1 %v6894_v47  ;;  %v7325_v47 = vadd.f32 %v9409_v38, %v9407_v20 }
0x1be9   :  { %7132 = vmatprep.subr.mxu1 %v6893_v0 }
0x1bea   :  { %7133 = vmatpush2.msra.mxu1 %v6892_v27  ;;  %v7170_v27 = vld [vmem:[#allocation10 + $0x58] sm:$0xff] }
0x1beb   :  { %7134 = vmatprep.subr.mxu1 %v6891_v39  ;;  %v7295_v39 = vld [vmem:[#allocation10 + $0x78] sm:$0xff] }
0x1bec   :  { %7135 = vmatpush2.msra.mxu1 %v6890_v35  ;;  %v9415_v35 = vld [vmem:[#allocation10 + $0xa0] sm:$0xff] }
0x1bed   :  { %7136 = vmatprep.subr.mxu1 %v6889_v56 }
0x1bee   :  { %7137 = vmatpush2.msra.mxu1 %v6888_v34 }
0x1bef   :  { %7139 = vmatmul.mubr.f32.vlgmr.msra.gmra.mxu1 %v9266_v54 }
0x1bf0   :  { %7144 = vmatprep.mubr.f32.mxu1 %v9259_v21 }
0x1bf3   :  { %7145 = vmatmul.mubr.f32.gmra.mxu1 %v9261_v25 }
0x1c6e   :  { %v6986_v31 = vpop.f32.mrf.mxu1  ;;  %v7063_v33 = vpop.f32.mrf.mxu0 }
0x1c6f   :  { %v7064_v48 = vadd.f32 %v7063_v33, %v6986_v31  ;;  %v7171_v33 = vld [vmem:[#allocation10 + $0x80] sm:$0xff] }
0x1c70   :  { %v6988_v37 = vpop.f32.mrf.mxu1  ;;  %v7065_v18 = vpop.f32.mrf.mxu0 }
0x1c71   :  { %v7066_v22 = vadd.f32 %v7065_v18, %v6988_v37  ;;  %v7320_v18 = vadd.f32 %v7319_v9, %v7295_v39 }
0x1c72   :  { %v7069_v23 = vpop.f32.mrf.mxu0 }
0x1c73   :  { %v6992_v1 = vpop.f32.mrf.mxu1 }
0x1c74   :  { %v7071_v44 = vpop.f32.mrf.mxu0  ;;  %v7070_v52 = vadd.f32 %v7069_v23, %v6992_v1  ;;  %v7326_v23 = vadd.f32 %v7325_v47, %v9415_v35 }
0x1c75   :  { %v6994_v2 = vpop.f32.mrf.mxu1 }
0x1c76   :  { %v7072_v60 = vadd.f32 %v7071_v44, %v6994_v2  ;;  %v9423_v44 = vld [vmem:[#allocation10 + $0xa8] sm:$0xff] }
0x1caf   :  { %v7140_v17 = vpop.f32.mrf.mxu1 }
0x1cb0   :  { %v7141_v21 = vadd.f32 %v7140_v17, %v7064_v48  ;;  %v7172_v17 = vld [vmem:[#allocation10 + $0x88] sm:$0xff]  ;;  %v7173_v48 = vld [vmem:[#allocation10 + $0xb0] sm:$0xff] }
0x1cb1   :  { %v7142_v26 = vpop.f32.mrf.mxu1 }
0x1cb2   :  { %v7143_v54 = vadd.f32 %v7142_v26, %v7066_v22  ;;  %v7151_v28 = vmul.f32 2.0, %v7141_v21  ;;  %v7174_v21 = vld [vmem:[#allocation10 + $0xb8] sm:$0xff] }
0x1cb3   :  { %v7146_v59 = vpop.f32.mrf.mxu1 }
0x1cb4   :  { %v7147_v30 = vadd.f32 %v7146_v59, %v7070_v52  ;;  %v7152_v55 = vmul.f32 2.0, %v7143_v54  ;;  %v7159_v5 = vsub.f32 %v7151_v28, %v9825_v51  ;;  %v9378_v51 = vld [vmem:[#allocation10 + $0x8] sm:$0xff]  ;;  %v7327_v54 = vadd.f32 %v7326_v23, %v9423_v44 }
0x1cb5   :  { %v7148_v43 = vpop.f32.mrf.mxu1 }
0x1cb6   :  { %v7149_v25 = vadd.f32 %v7148_v43, %v7072_v60  ;;  %v7153_v6 = vmul.f32 2.0, %v7147_v30  ;;  %v7160_v8 = vsub.f32 %v7152_v55, %v8891_v58  ;;  %v9376_v58 = vld [vmem:[#allocation10] sm:$0xff] }
0x1cb8   :  { %v7154_v3 = vmul.f32 2.0, %v7149_v25  ;;  %v7161_v50 = vsub.f32 %v7153_v6, %v9827_v63  ;;  %v9382_v63 = vld [vmem:[#allocation10 + $0x30] sm:$0xff] }
0x1cba   :  { %v7162_v19 = vsub.f32 %v7154_v3, %v9826_v62  ;;  %v7304_v62 = vadd.f32 %v9378_v51, %v9376_v58 }
0x1cbc   :  { %7203 = vmatprep.subr.mxu0 %v7162_v19 }
0x1cbd   :  { %7204 = vmatpush1.msra.mxu0 %v7161_v50 }
0x1cbe   :  { %7205 = vmatprep.subr.mxu0 %v7160_v8 }
0x1cbf   :  { %7206 = vmatpush1.msra.mxu0 %v7159_v5 }
0x1cc0   :  { %7644 = vmatmul.mubr.msk.f32.vlgmr.msra.gmra.mxu0 %vm3576_vm1, %v9841_v11  ;;  %v9384_v11 = vld [vmem:[#allocation10 + $0x38] sm:$0xff] }
0x1cc1   :  { %7245 = vmatprep.mubr.f32.mxu0 %v9701_v49 }
0x1cc4   :  { %7645 = vmatmul.mubr.msk.f32.gmra.mxu0 %vm3576_vm1, %v9842_v36  ;;  %v9386_v36 = vld [vmem:[#allocation10 + $0x10] sm:$0xff] }
0x1cc5   :  { %7251 = vmatprep.mubr.f32.mxu0 %v9701_v49 }
0x1cc8   :  { %7646 = vmatmul.mubr.msk.f32.gmra.mxu0 %vm3576_vm1, %v9843_v53  ;;  %v7311_v53 = vadd.f32 %v9384_v11, %v9382_v63 }
0x1cc9   :  { %7257 = vmatprep.mubr.f32.mxu0 %v9701_v49  ;;  %v7305_v49 = vadd.f32 %v7304_v62, %v9386_v36 }
0x1cca   :  { %v7312_v13 = vadd.f32 %v7311_v53, %v9391_v10 }
0x1ccc   :  { %7647 = vmatmul.mubr.msk.f32.gmra.mxu0 %vm3576_vm1, %v9844_v41  ;;  %v9393_v41 = vld [vmem:[#allocation10 + $0x18] sm:$0xff]  ;;  %v7313_v45 = vadd.f32 %v7312_v13, %v9401_v57 }
0x1ccd   :  { %v7306_v12 = vadd.f32 %v7305_v49, %v9393_v41 }
0x1d80   :  { %v7241_v14 = vpop.f32.mrf.mxu0 }
0x1d81   :  { %v7264_v40 = vadd.f32 %v7241_v14, %v7167_v61 }
0x1d82   :  { %v7243_v42 = vpop.f32.mrf.mxu0 }
0x1d83   :  { %v7265_v4 = vadd.f32 %v7243_v42, %v7168_v15  ;;  %v7307_v46 = vadd.f32 %v7306_v12, %v7264_v40 }
0x1d84   :  { %v7247_v0 = vpop.f32.mrf.mxu0 }
0x1d85   :  { %v9417_v56 = vadd.f32 %v7247_v0, %v7169_v29  ;;  %v7308_v34 = vadd.f32 %v7307_v46, %v7265_v4 }
0x1d86   :  { %v7249_v31 = vpop.f32.mrf.mxu0 }
0x1d87   :  { %v9419_v37 = vadd.f32 %v7249_v31, %v7170_v27  ;;  %7309 = vadd.xlane.f32.xlu0 %v7308_v34  ;;  %v7314_v1 = vadd.f32 %v7313_v45, %v9417_v56 }
0x1d88   :  { %v7253_v2 = vpop.f32.mrf.mxu0 }
0x1d89   :  { %v7268_v26 = vadd.f32 %v7253_v2, %v7171_v33  ;;  %v7315_v22 = vadd.f32 %v7314_v1, %v9419_v37 }
0x1d8a   :  { %v7255_v52 = vpop.f32.mrf.mxu0 }
0x1d8b   :  { %v7269_v59 = vadd.f32 %v7255_v52, %v7172_v17  ;;  %7316 = vadd.xlane.f32.xlu0 %v7315_v22  ;;  %v7321_v60 = vadd.f32 %v7320_v18, %v7268_v26 }
0x1d8c   :  { %v7259_v30 = vpop.f32.mrf.mxu0 }
0x1d8d   :  { %v9427_v43 = vadd.f32 %v7259_v30, %v7173_v48  ;;  %v7322_v25 = vadd.f32 %v7321_v60, %v7269_v59 }
0x1d8e   :  { %v7261_v6 = vpop.f32.mrf.mxu0 }
0x1d8f   :  { %v9429_v55 = vadd.f32 %v7261_v6, %v7174_v21  ;;  %7323 = vadd.xlane.f32.xlu1 %v7322_v25  ;;  %v7328_v3 = vadd.f32 %v7327_v54, %v9427_v43 }
0x1d91   :  { %v7329_v28 = vadd.f32 %v7328_v3, %v9429_v55 }
0x1d93   :  { %7330 = vadd.xlane.f32.xlu1 %v7329_v28 }
0x1e10   :  { %v7310_v19 = vpop.xlane.xlu0 %7309 }
0x1e14   :  { %v7317_v62 = vpop.xlane.xlu0 %7316 }
0x1e18   :  { %v7324_v50 = vpop.xlane.xlu1 %7323 }
0x1e19   :  { %v7332_v8 = vadd.f32 %v7324_v50, %v7310_v19 }
0x1e1b   :  { %v7334_v5 = vmul.f32 0.0006510417, %v7332_v8 }
0x1e1c   :  { %v7331_v53 = vpop.xlane.xlu1 %7330 }
0x1e1d   :  { %v7333_v49 = vadd.f32 %v7331_v53, %v7317_v62  ;;  %7338 = vperm.xlu0 %7663, %v7334_v5  }
0x1e1f   :  { %v7335_v61 = vmul.f32 0.0006510417, %v7333_v49 }
0x1e21   :  { %7343 = vperm.xlu1 %7664, %v7335_v61  }
0x1e98   :  { %v7339_v13 = vpop.permute.xlu0 %7338 }
0x1e99   :  { %v9434_v15 = vsub.f32 %v9376_v58, %v7339_v13  ;;  %v9437_v12 = vsub.f32 %v9378_v51, %v7339_v13  ;;  %v9440_v32 = vsub.f32 %v9386_v36, %v7339_v13  ;;  %v9443_v14 = vsub.f32 %v9393_v41, %v7339_v13 }
0x1e9a   :  { %v9446_v42 = vsub.f32 %v9395_v24, %v7339_v13  ;;  %v9449_v29 = vsub.f32 %v9397_v7, %v7339_v13  ;;  %v9451_v45 = vsub.f32 %v7264_v40, %v7339_v13  ;;  %v9453_v46 = vsub.f32 %v7265_v4, %v7339_v13 }
0x1e9b   :  { %v7370_v58 = vmul.f32 %v9434_v15, %v9434_v15  ;;  %v7371_v51 = vmul.f32 %v9437_v12, %v9437_v12  ;;  %v9460_v41 = vsub.f32 %v9405_v16, %v7339_v13  ;;  %v7372_v24 = vmul.f32 %v9440_v32, %v9440_v32 }
0x1e9c   :  { %v7344_v36 = vpop.permute.xlu1 %7343  ;;  %v7382_v7 = vmul.f32 %v9446_v42, %v9446_v42  ;;  %v7373_v40 = vmul.f32 %v9443_v14, %v9443_v14  ;;  %v9468_v4 = vsub.f32 %v7295_v39, %v7339_v13  ;;  %v7383_v47 = vmul.f32 %v9449_v29, %v9449_v29 }
0x1e9d   :  { %v7394_v9 = vadd.f32 %v7371_v51, %v7370_v58  ;;  %v9473_v0 = vsub.f32 %v9382_v63, %v7344_v36  ;;  %v7374_v16 = vmul.f32 %v9451_v45, %v9451_v45  ;;  %v7375_v27 = vmul.f32 %v9453_v46, %v9453_v46 }
0x1e9e   :  { %v9480_v31 = vsub.f32 %v9384_v11, %v7344_v36  ;;  %v9482_v33 = vsub.f32 %v7268_v26, %v7339_v13  ;;  %v7384_v39 = vmul.f32 %v9460_v41, %v9460_v41  ;;  %v7408_v1 = vadd.f32 %v7383_v47, %v7382_v7 }
0x1e9f   :  { %v7395_v34 = vadd.f32 %v7394_v9, %v7372_v24  ;;  %v9487_v18 = vsub.f32 %v9391_v10, %v7344_v36  ;;  %v9490_v23 = vsub.f32 %v9401_v57, %v7344_v36  ;;  %v7376_v2 = vmul.f32 %v9473_v0, %v9473_v0 }
0x1ea0   :  { %v7377_v11 = vmul.f32 %v9480_v31, %v9480_v31  ;;  %v9496_v17 = vsub.f32 %v7269_v59, %v7339_v13  ;;  %v7385_v26 = vmul.f32 %v9468_v4, %v9468_v4  ;;  %v7409_v22 = vadd.f32 %v7408_v1, %v7384_v39 }
0x1ea1   :  { %v7396_v63 = vadd.f32 %v7395_v34, %v7373_v40  ;;  %v9501_v52 = vsub.f32 %v9417_v56, %v7344_v36  ;;  %v7378_v57 = vmul.f32 %v9487_v18, %v9487_v18  ;;  %v9506_v60 = vsub.f32 %v9407_v20, %v7344_v36 }
0x1ea2   :  { %v7401_v48 = vadd.f32 %v7377_v11, %v7376_v2  ;;  %v7386_v54 = vmul.f32 %v9482_v33, %v9482_v33  ;;  %v7410_v59 = vadd.f32 %v7409_v22, %v7385_v26  ;;  %v9511_v30 = vsub.f32 %v9409_v38, %v7344_v36  ;;  %v7426_v11 = vld [vmem:[%s9602_s8] sm:$0xff] }
0x1ea3   :  { %v7397_v10 = vadd.f32 %v7396_v63, %v7374_v16  ;;  %v9514_v21 = vsub.f32 %v9415_v35, %v7344_v36  ;;  %v9517_v25 = vsub.f32 %v9419_v37, %v7344_v36  ;;  %v7379_v6 = vmul.f32 %v9490_v23, %v9490_v23 }
0x1ea4   :  { %v7402_v3 = vadd.f32 %v7401_v48, %v7378_v57  ;;  %v7411_v20 = vadd.f32 %v7410_v59, %v7386_v54  ;;  %v9522_v28 = vsub.f32 %v9423_v44, %v7344_v36  ;;  %v7388_v19 = vmul.f32 %v9506_v60, %v9506_v60  ;;  %v7427_v57 = vld [vmem:[%s9602_s8 + $0x8] sm:$0xff]  ;;  %s8006_s8 = smov [#allocation10]  }
0x1ea5   :  { %v7398_v56 = vadd.f32 %v7397_v10, %v7375_v27  ;;  %v7389_v38 = vmul.f32 %v9511_v30, %v9511_v30  ;;  %v7387_v35 = vmul.f32 %v9496_v17, %v9496_v17  ;;  %v7380_v37 = vmul.f32 %v9501_v52, %v9501_v52  ;;  %v7434_v10 = vld [vmem:[%s9603_s9] sm:$0xff]  ;;  %v7435_v59 = vld [vmem:[%s9603_s9 + $0x8] sm:$0xff]  ;;  %s7557_s9 = sshll.u32 %s8006_s8, 4  ;;  %s9584_s9 = int_to_ptr.vmem [resolvable:$true] %s7557_s9 }
0x1ea6   :  { %v7403_v50 = vadd.f32 %v7402_v3, %v7379_v6  ;;  %v9533_v8 = vsub.f32 %v9427_v43, %v7344_v36  ;;  %v7390_v44 = vmul.f32 %v9514_v21, %v9514_v21  ;;  %v7381_v53 = vmul.f32 %v9517_v25, %v9517_v25  ;;  %s7953_s5 = scalar_lea.vmem %s9584_s9, 3072  ;;  %p7958_p2 = scmp.lt.s32.totalorder %s9584_s9, %s9584_s9 }
0x1ea7   :  { %7399 = vadd.xlane.f32.xlu1 %v7398_v56  ;;  %v7415_v5 = vadd.f32 %v7389_v38, %v7388_v19  ;;  %v7412_v62 = vadd.f32 %v7411_v20, %v7387_v35  ;;  %v9540_v61 = vsub.f32 %v9429_v55, %v7344_v36  ;;  %v7391_v13 = vmul.f32 %v9522_v28, %v9522_v28  ;;  %p7954_p1 = scmp.ne.s32.totalorder %s9584_s9, %s7953_s5  ;;  %p7959_p3 = scmp.lt.s32.totalorder %s7953_s5, %s7953_s5 }
0x1ea8   :  { %v7404_v49 = vadd.f32 %v7403_v50, %v7380_v37  ;;  %v7392_v43 = vmul.f32 %v9533_v8, %v9533_v8 }
0x1ea9   :  { %v7416_v58 = vadd.f32 %v7415_v5, %v7390_v44  ;;  %v7393_v9 = vmul.f32 %v9540_v61, %v9540_v61  ;;  %p7960_p4 = por %p7959_p3, %p7958_p2 }
0x1eaa   :  { %v7405_v51 = vadd.f32 %v7404_v49, %v7381_v53 }
0x1eab   :  { %7413 = vadd.xlane.f32.xlu1 %v7412_v62  ;;  %v7417_v24 = vadd.f32 %v7416_v58, %v7391_v13  ;;  %p7961_p5 = pnand %p7960_p4, %p7954_p1 }
0x1eac   :  { %7406 = vadd.xlane.f32.xlu0 %v7405_v51 }
0x1ead   :  { %v7418_v7 = vadd.f32 %v7417_v24, %v7392_v43 }
0x1eaf   :  { %v7419_v40 = vadd.f32 %v7418_v7, %v7393_v9 }
0x1eb1   :  { %7420 = vadd.xlane.f32.xlu1 %v7419_v40 }
0x1f30   :  { %v7400_v47 = vpop.xlane.xlu1 %7399 }
0x1f34   :  { %v7414_v55 = vpop.xlane.xlu1 %7413 }
0x1f35   :  { %v7422_v36 = vadd.f32 %v7414_v55, %v7400_v47  ;;  %v7407_v34 = vpop.xlane.xlu0 %7406 }
0x1f37   :  { %v7424_v16 = vmul.f32 0.0006510417, %v7422_v36 }
0x1f39   :  { %v7428_v27 = vadd.f32 1e-05, %v7424_v16 }
0x1f3a   :  { %v7421_v39 = vpop.xlane.xlu1 %7420 }
0x1f3b   :  { %7665 = vrsqrt.f32 %v7428_v27  ;;  %v7423_v1 = vadd.f32 %v7421_v39, %v7407_v34 }
0x1f3d   :  { %v7425_v63 = vmul.f32 0.0006510417, %v7423_v1 }
0x1f3f   :  { %v7429_v2 = vadd.f32 1e-05, %v7425_v63 }
0x1f41   :  { %7667 = vrsqrt.f32 %v7429_v2 }
0x1f48   :  { %v7666_v26 = vpop.eup %7665 }
0x1f49   :  { %v7432_v22 = vmul.f32 %v7666_v26, %v7426_v11 }
0x1f4b   :  { %7438 = vperm.xlu1 %7664, %v7432_v22  }
0x1f4e   :  { %v7668_v48 = vpop.eup %7667 }
0x1f4f   :  { %7472 = vperm.xlu1 %7664, %v7434_v10   ;;  %v7433_v54 = vmul.f32 %v7668_v48, %v7427_v57 }
0x1f51   :  { %7443 = vperm.xlu0 %7663, %v7433_v54  }
0x1f53   :  { %7477 = vperm.xlu1 %7664, %v7435_v59  }
0x1fc6   :  { %v7439_v56 = vpop.permute.xlu1 %7438 }
0x1fc7   :  { %v7446_v6 = vmul.f32 %v7439_v56, %v9434_v15  ;;  %v7447_v3 = vmul.f32 %v7439_v56, %v9437_v12  ;;  %v7448_v20 = vmul.f32 %v7439_v56, %v9440_v32  ;;  %v7449_v19 = vmul.f32 %v7439_v56, %v9443_v14 }
0x1fc8   :  { %v7450_v38 = vmul.f32 %v7439_v56, %v9451_v45  ;;  %v7451_v35 = vmul.f32 %v7439_v56, %v9453_v46  ;;  %v7458_v37 = vmul.f32 %v7439_v56, %v9446_v42  ;;  %v7459_v50 = vmul.f32 %v7439_v56, %v9449_v29 }
0x1fc9   :  { %v7460_v44 = vmul.f32 %v7439_v56, %v9460_v41  ;;  %v7461_v5 = vmul.f32 %v7439_v56, %v9468_v4  ;;  %v7462_v15 = vmul.f32 %v7439_v56, %v9482_v33  ;;  %v7463_v12 = vmul.f32 %v7439_v56, %v9496_v17 }
0x1fca   :  { %v7473_v62 = vpop.permute.xlu1 %7472 }
0x1fcb   :  { %v7480_v32 = vadd.f32 %v7473_v62, %v7446_v6  ;;  %v7481_v53 = vadd.f32 %v7473_v62, %v7447_v3  ;;  %v7482_v14 = vadd.f32 %v7473_v62, %v7448_v20  ;;  %v7483_v49 = vadd.f32 %v7473_v62, %v7449_v19 }
0x1fcc   :  { %v7484_v45 = vadd.f32 %v7473_v62, %v7450_v38  ;;  %v7485_v13 = vadd.f32 %v7473_v62, %v7451_v35  ;;  %v7492_v46 = vadd.f32 %v7473_v62, %v7458_v37  ;;  %v7493_v58 = vadd.f32 %v7473_v62, %v7459_v50  ;;  %v7444_v42 = vpop.permute.xlu0 %7443 }
0x1fcd   :  { %v7494_v51 = vadd.f32 %v7473_v62, %v7460_v44  ;;  %v7495_v29 = vadd.f32 %v7473_v62, %v7461_v5  ;;  %v7496_v43 = vadd.f32 %v7473_v62, %v7462_v15  ;;  %v7497_v41 = vadd.f32 %v7473_v62, %v7463_v12 }
0x1fce   :  { %v7452_v4 = vmul.f32 %v7444_v42, %v9473_v0  ;;  %v7453_v33 = vmul.f32 %v7444_v42, %v9480_v31  ;;  %v7454_v17 = vmul.f32 %v7444_v42, %v9487_v18  ;;  %v7455_v24 = vmul.f32 %v7444_v42, %v9490_v23  ;;  %v7478_v34 = vpop.permute.xlu1 %7477 }
0x1fcf   :  { %v7456_v9 = vmul.f32 %v7444_v42, %v9501_v52  ;;  %v7457_v7 = vmul.f32 %v7444_v42, %v9517_v25  ;;  %v7464_v40 = vmul.f32 %v7444_v42, %v9506_v60  ;;  %v7465_v47 = vmul.f32 %v7444_v42, %v9511_v30 }
0x1fd0   :  { %v7466_v55 = vmul.f32 %v7444_v42, %v9514_v21  ;;  %v7467_v36 = vmul.f32 %v7444_v42, %v9522_v28  ;;  %v7468_v0 = vmul.f32 %v7444_v42, %v9533_v8  ;;  %v7469_v31 = vmul.f32 %v7444_v42, %v9540_v61 }
0x1fd1   :  { %v7504_v16 = vmax.f32 %v7480_v32, 0.0  ;;  %v7505_v18 = vmax.f32 %v7481_v53, 0.0  ;;  %v7506_v27 = vmax.f32 %v7482_v14, 0.0  ;;  %v7507_v23 = vmax.f32 %v7483_v49, 0.0 }
0x1fd2   :  { %v7508_v52 = vmax.f32 %v7484_v45, 0.0  ;;  %v7509_v39 = vmax.f32 %v7485_v13, 0.0  ;;  %v7516_v25 = vmax.f32 %v7492_v46, 0.0  ;;  %v7517_v1 = vmax.f32 %v7493_v58, 0.0 }
0x1fd3   :  { %v7518_v60 = vmax.f32 %v7494_v51, 0.0  ;;  %v7519_v63 = vmax.f32 %v7495_v29, 0.0  ;;  %v7520_v30 = vmax.f32 %v7496_v43, 0.0  ;;  %v7521_v2 = vmax.f32 %v7497_v41, 0.0  ;;  %7528 = vst [vmem:[#allocation10] sm:$0xff] %v7504_v16  ;;  %7529 = vst [vmem:[#allocation10 + $0x8] sm:$0xff] %v7505_v18 }
0x1fd4   :  { %7530 = vst [vmem:[#allocation10 + $0x10] sm:$0xff] %v7506_v27  ;;  %7531 = vst [vmem:[#allocation10 + $0x18] sm:$0xff] %v7507_v23  ;;  %v7486_v21 = vadd.f32 %v7478_v34, %v7452_v4  ;;  %v7487_v28 = vadd.f32 %v7478_v34, %v7453_v33  ;;  %v7488_v8 = vadd.f32 %v7478_v34, %v7454_v17 }
0x1fd5   :  { %7532 = vst [vmem:[#allocation10 + $0x20] sm:$0xff] %v7508_v52  ;;  %7533 = vst [vmem:[#allocation10 + $0x28] sm:$0xff] %v7509_v39  ;;  %v7489_v61 = vadd.f32 %v7478_v34, %v7455_v24  ;;  %v7490_v11 = vadd.f32 %v7478_v34, %v7456_v9  ;;  %v7491_v26 = vadd.f32 %v7478_v34, %v7457_v7 }
0x1fd6   :  { %7540 = vst [vmem:[#allocation10 + $0x60] sm:$0xff] %v7516_v25  ;;  %7541 = vst [vmem:[#allocation10 + $0x68] sm:$0xff] %v7517_v1  ;;  %v7498_v22 = vadd.f32 %v7478_v34, %v7464_v40  ;;  %v7499_v10 = vadd.f32 %v7478_v34, %v7465_v47  ;;  %v7500_v57 = vadd.f32 %v7478_v34, %v7466_v55  ;;  %v7510_v56 = vmax.f32 %v7486_v21, 0.0 }
0x1fd7   :  { %7542 = vst [vmem:[#allocation10 + $0x70] sm:$0xff] %v7518_v60  ;;  %7543 = vst [vmem:[#allocation10 + $0x78] sm:$0xff] %v7519_v63  ;;  %v7501_v48 = vadd.f32 %v7478_v34, %v7467_v36  ;;  %v7502_v54 = vadd.f32 %v7478_v34, %v7468_v0  ;;  %v7503_v59 = vadd.f32 %v7478_v34, %v7469_v31  ;;  %v7511_v6 = vmax.f32 %v7487_v28, 0.0 }
0x1fd8   :  { %7544 = vst [vmem:[#allocation10 + $0x80] sm:$0xff] %v7520_v30  ;;  %7545 = vst [vmem:[#allocation10 + $0x88] sm:$0xff] %v7521_v2  ;;  %v7512_v3 = vmax.f32 %v7488_v8, 0.0  ;;  %v7513_v20 = vmax.f32 %v7489_v61, 0.0  ;;  %v7514_v19 = vmax.f32 %v7490_v11, 0.0  ;;  %v7515_v38 = vmax.f32 %v7491_v26, 0.0 }
0x1fd9   :  { %v7522_v35 = vmax.f32 %v7498_v22, 0.0  ;;  %v7523_v37 = vmax.f32 %v7499_v10, 0.0  ;;  %v7524_v50 = vmax.f32 %v7500_v57, 0.0  ;;  %v7525_v44 = vmax.f32 %v7501_v48, 0.0  ;;  %7534 = vst [vmem:[#allocation10 + $0x30] sm:$0xff] %v7510_v56  ;;  %7535 = vst [vmem:[#allocation10 + $0x38] sm:$0xff] %v7511_v6 }
0x1fda   :  { %v7526_v5 = vmax.f32 %v7502_v54, 0.0  ;;  %v7527_v15 = vmax.f32 %v7503_v59, 0.0  ;;  %7536 = vst [vmem:[#allocation10 + $0x40] sm:$0xff] %v7512_v3  ;;  %7537 = vst [vmem:[#allocation10 + $0x48] sm:$0xff] %v7513_v20 }
0x1fdb   :  { %7538 = vst [vmem:[#allocation10 + $0x50] sm:$0xff] %v7514_v19  ;;  %7539 = vst [vmem:[#allocation10 + $0x58] sm:$0xff] %v7515_v38 }
0x1fdc   :  { %7546 = vst [vmem:[#allocation10 + $0x90] sm:$0xff] %v7522_v35  ;;  %7547 = vst [vmem:[#allocation10 + $0x98] sm:$0xff] %v7523_v37 }
0x1fdd   :  { %7548 = vst [vmem:[#allocation10 + $0xa0] sm:$0xff] %v7524_v50  ;;  %7549 = vst [vmem:[#allocation10 + $0xa8] sm:$0xff] %v7525_v44 }
0x1fde   :  { %7550 = vst [vmem:[#allocation10 + $0xb0] sm:$0xff] %v7526_v5  ;;  %7551 = vst [vmem:[#allocation10 + $0xb8] sm:$0xff] %v7527_v15 }
0x1fdf   :  { %7964 = shalt.err (!%p7961_p5)
}
0x1fe0   :  { %s8007_s26 = smov 768   ;;  %s8008_s4 = smov 48  }
0x1fe1   :  { %7563 = dma.vmem_to_hbm [thread:$0]  %s9584_s9, 3072, %s9604_s10, [#allocation9], %s8007_s26, %s8007_s26, %s8008_s4  }
0x1fe2   :  { %7999 = dma.done.wait [#allocation9], 3072  }
0x1fe3   :  { %8000 = vsyncadd [#allocation9], 4294964224 }
0x1fe4   :  { %7567 = vsyncpa [#allocation8], 1 }
0x1fe5   :  { %7568 = vsyncpa [#allocation9], 1 }
0x1fe6   :  { %7569 = vsyncmov [#allocation3] }
0x1fe9   :  { %s7570_s28 = vpop.sfrf %7569 }
0x1fea   :  { %p7648_p6 = scmp.ne.s32.totalorder %s7570_s28, 0 }
0x1fec   :  { %7574 = shalt.err (%p7648_p6)  }
0x1fed   :  { %7576 = vsyncmov [#allocation3 + $0x1] }
0x1ff0   :  { %s7577_s29 = vpop.sfrf %7576 }
0x1ff1   :  { %p7649_p7 = scmp.ne.s32.totalorder %s7577_s29, 0 }
0x1ff3   :  { %7581 = shalt.err (%p7649_p7)  }

</bundles_post_ra>
